<compile_context>
chip_gen: v7x
topology: tpu7x:2x2x1
jax: 0.10.0
libtpu: 0.0.40
codegen_flags: <defaults>
</compile_context>

<pallas_src>
import functools

import jax
import jax.numpy as jnp
from jax.experimental import pallas as pl
from jax.experimental.pallas import tpu as pltpu


# --------------- fully fused convs + Gram + FC (one image / grid step) -------

def _cnn_kernel(x_ref, w1_ref, b1_ref, w2_ref, b2_ref, w3_ref, b3_ref,
                wt3_ref, fcb_ref, o_ref, pad2_ref, pad3_ref, *, H, W):
    HW = H * W
    inv_hw = 1.0 / float(HW)

    def conv3x3(read_tap, w_ref, b_ref, relu):
        # 3x3 / stride 1 / pad 1 conv as 9 shifted matmuls accumulated in f32.
        # All taps are read from VMEM (input block / padded scratch).
        Cout = w_ref.shape[-1]
        acc = jnp.zeros((HW, Cout), jnp.float32) + b_ref[...]
        for dy in range(3):
            for dx in range(3):
                patch = read_tap(dy, dx)                      # (H, W, Cin)
                Cin = patch.shape[-1]
                acc = acc + jnp.dot(patch.reshape(HW, Cin),
                                    w_ref[dy * 3 + dx],
                                    preferred_element_type=jnp.float32)
        return jnp.maximum(acc, 0.0) if relu else acc

    # conv1: taps read straight from the pre-padded NHWC input block.
    h1 = conv3x3(lambda dy, dx: x_ref[0, dy:dy + H, dx:dx + W, :],
                 w1_ref, b1_ref, True)                         # (HW, 128)

    # conv2: stage h1 into a zero-padded VMEM scratch (never touches HBM).
    C2 = h1.shape[-1]
    pad2_ref[...] = jnp.zeros_like(pad2_ref)
    pad2_ref[1:H + 1, 1:W + 1, :] = h1.reshape(H, W, C2)
    h2 = conv3x3(lambda dy, dx: pad2_ref[dy:dy + H, dx:dx + W, :],
                 w2_ref, b2_ref, True)                         # (HW, 64)

    # conv3
    C3 = h2.shape[-1]
    pad3_ref[...] = jnp.zeros_like(pad3_ref)
    pad3_ref[1:H + 1, 1:W + 1, :] = h2.reshape(H, W, C3)
    f = conv3x3(lambda dy, dx: pad3_ref[dy:dy + H, dx:dx + W, :],
                w3_ref, b3_ref, False)                         # (HW, C)

    # Gram with NCHW semantics, computed directly from the NHWC features:
    # G = f^T f / (H*W)   (f rows = pixels, cols = channels)
    C = f.shape[-1]
    g = jnp.dot(f.T, f, preferred_element_type=jnp.float32) * inv_hw  # (C, C)

    # Fused FC:  out = vec(G) @ fc_w.T + fc_b
    # wt3_ref is fc_w.T pre-reshaped to (C, C, N), so vec(G)@Wt is the sum of
    # per-row matmuls — no lane-changing reshape of g inside the kernel.
    out = fcb_ref[...].astype(jnp.float32)                     # (1, N)
    for i in range(C):
        out = out + jnp.dot(g[i:i + 1, :], wt3_ref[i],
                            preferred_element_type=jnp.float32)
    o_ref[0] = out.astype(o_ref.dtype)


def cnn_fused_pallas(x_padded_nhwc, prep):
    B, Hp2, Wp2, C1 = x_padded_nhwc.shape
    H, W = Hp2 - 2, Wp2 - 2
    C2 = prep["w1"].shape[-1]          # 128
    C3 = prep["w2"].shape[-1]          # 64
    C = prep["w3"].shape[-1]           # matrixSize
    N = C * C
    kernel = functools.partial(_cnn_kernel, H=H, W=W)
    return pl.pallas_call(
        kernel,
        out_shape=jax.ShapeDtypeStruct((B, 1, N), jnp.float32),
        grid=(B,),
        in_specs=[
            pl.BlockSpec((1, Hp2, Wp2, C1), lambda b: (b, 0, 0, 0)),
            pl.BlockSpec((9, C1, C2), lambda b: (0, 0, 0)),
            pl.BlockSpec((1, C2), lambda b: (0, 0)),
            pl.BlockSpec((9, C2, C3), lambda b: (0, 0, 0)),
            pl.BlockSpec((1, C3), lambda b: (0, 0)),
            pl.BlockSpec((9, C3, C), lambda b: (0, 0, 0)),
            pl.BlockSpec((1, C), lambda b: (0, 0)),
            pl.BlockSpec((C, C, N), lambda b: (0, 0, 0)),      # fc_w.T as (C,C,N)
            pl.BlockSpec((1, N), lambda b: (0, 0)),
        ],
        out_specs=pl.BlockSpec((1, 1, N), lambda b: (b, 0, 0)),
        scratch_shapes=[
            pltpu.VMEM((Hp2, Wp2, C2), jnp.float32),   # padded h1
            pltpu.VMEM((Hp2, Wp2, C3), jnp.float32),   # padded h2
        ],
        compiler_params=pltpu.CompilerParams(
            dimension_semantics=("parallel",),          # batch across TCs (v7x)
            vmem_limit_bytes=48 * 1024 * 1024),
    )(x_padded_nhwc, prep["w1"], prep["b1"], prep["w2"], prep["b2"],
      prep["w3"], prep["b3"], prep["fc_wt3"], prep["fc_b"])


# ------------------------------ Glue (JAX) ------------------------------------

def prepare_params(params):
    """One-time transform of PyTorch-layout params into kernel layout."""
    def conv_w(w_oihw):  # (O, I, 3, 3) -> (9, I, O) with (ky, kx) tap order
        o, i, kh, kw = w_oihw.shape
        return jnp.transpose(w_oihw, (2, 3, 1, 0)).reshape(kh * kw, i, o)
    C = params["w3"].shape[0]                           # matrixSize
    N = C * C
    return {
        "w1": conv_w(params["w1"]), "b1": params["b1"].reshape(1, -1),
        "w2": conv_w(params["w2"]), "b2": params["b2"].reshape(1, -1),
        "w3": conv_w(params["w3"]), "b3": params["b3"].reshape(1, -1),
        # fc_w.T done ONCE and reshaped so row i of the Gram hits slab [i].
        "fc_wt3": params["fc_w"].T.reshape(C, C, N),
        "fc_b": params["fc_b"].reshape(1, -1),
    }


@jax.jit
def cnn_forward(x_nchw, prep):
    B = x_nchw.shape[0]
    x = jnp.transpose(x_nchw, (0, 2, 3, 1))              # NCHW -> NHWC
    xp = jnp.pad(x, ((0, 0), (1, 1), (1, 1), (0, 0)))    # pad=1 for conv1
    out = cnn_fused_pallas(xp, prep)                     # (B, 1, C*C)
    return out.reshape(B, -1)                            # (B, C*C)


# -------------------------- Pure-JAX reference --------------------------------

def cnn_forward_ref(x_nchw, params):
    def conv(x, w, b):
        y = jax.lax.conv_general_dilated(
            x, w, window_strides=(1, 1), padding=((1, 1), (1, 1)),
            dimension_numbers=("NCHW", "OIHW", "NCHW"))
        return y + b.reshape(1, -1, 1, 1)

    h = jax.nn.relu(conv(x_nchw, params["w1"], params["b1"]))
    h = jax.nn.relu(conv(h, params["w2"], params["b2"]))
    h = conv(h, params["w3"], params["b3"])
    B, C, H, W = h.shape
    f = h.reshape(B, C, H * W)
    g = jnp.einsum("bck,bdk->bcd", f, f) / (H * W)
    return g.reshape(B, -1) @ params["fc_w"].T + params["fc_b"]


# --------------------------------- Main ----------------------------------------

def init_params(key, matrix_size=32):
    ks = jax.random.split(key, 8)
    def w(k, shape, fan_in):
        return jax.random.normal(k, shape, jnp.float32) / jnp.sqrt(fan_in)
    return {
        "w1": w(ks[0], (128, 256, 3, 3), 256 * 9),
        "b1": 0.01 * jax.random.normal(ks[1], (128,), jnp.float32),
        "w2": w(ks[2], (64, 128, 3, 3), 128 * 9),
        "b2": 0.01 * jax.random.normal(ks[3], (64,), jnp.float32),
        "w3": w(ks[4], (matrix_size, 64, 3, 3), 64 * 9),
        "b3": 0.01 * jax.random.normal(ks[5], (matrix_size,), jnp.float32),
        "fc_w": w(ks[6], (matrix_size * matrix_size, matrix_size * matrix_size),
                  matrix_size * matrix_size),
        "fc_b": 0.01 * jax.random.normal(ks[7], (matrix_size * matrix_size,),
                                         jnp.float32),
    }


if __name__ == "__main__":
    key = jax.random.PRNGKey(0)
    pkey, xkey = jax.random.split(key)
    params = init_params(pkey, matrix_size=32)
    prep = prepare_params(params)                  # done once, outside jit

    # Small input consistent with the module: NCHW, Cin must be 256.
    x = jax.random.normal(xkey, (2, 256, 8, 8), jnp.float32)

    out = jax.block_until_ready(cnn_forward(x, prep))
    ref = jax.block_until_ready(cnn_forward_ref(x, params))

    assert out.shape == (2, 32 * 32), out.shape
    assert jnp.allclose(out, ref, rtol=1e-3, atol=1e-3), (
        float(jnp.max(jnp.abs(out - ref))))
    print("KERNEL_OK")
</pallas_src>

<mosaic_0001>
module attributes {stable_mosaic.version = 11 : i64} {
  func.func @_cnn_kernel(%arg0: i32, %arg1: memref<1x10x10x256xf32, #tpu.memory_space<vmem>>, %arg2: memref<9x256x128xf32, #tpu.memory_space<vmem>>, %arg3: memref<1x128xf32, #tpu.memory_space<vmem>>, %arg4: memref<9x128x64xf32, #tpu.memory_space<vmem>>, %arg5: memref<1x64xf32, #tpu.memory_space<vmem>>, %arg6: memref<9x64x32xf32, #tpu.memory_space<vmem>>, %arg7: memref<1x32xf32, #tpu.memory_space<vmem>>, %arg8: memref<32x32x1024xf32, #tpu.memory_space<vmem>>, %arg9: memref<1x1024xf32, #tpu.memory_space<vmem>>, %arg10: memref<1x1x1024xf32, #tpu.memory_space<vmem>>, %arg11: memref<10x10x128xf32, #tpu.memory_space<vmem>>, %arg12: memref<10x10x64xf32, #tpu.memory_space<vmem>>) attributes {dimension_semantics = [#tpu.dimension_semantics<parallel>], iteration_bounds = array<i64: 2>, scalar_prefetch = 0 : i64, scratch_operands = 2 : i64, tpu.core_type = #tpu.core_type<tc>, window_params = [{transform_indices = @transform_0, window_bounds = array<i64: 1, 10, 10, 256>}, {pipeline_mode = #tpu.pipeline_mode<synchronous>, transform_indices = @transform_1, window_bounds = array<i64: 9, 256, 128>}, {pipeline_mode = #tpu.pipeline_mode<synchronous>, transform_indices = @transform_2, window_bounds = array<i64: 1, 128>}, {pipeline_mode = #tpu.pipeline_mode<synchronous>, transform_indices = @transform_3, window_bounds = array<i64: 9, 128, 64>}, {pipeline_mode = #tpu.pipeline_mode<synchronous>, transform_indices = @transform_4, window_bounds = array<i64: 1, 64>}, {pipeline_mode = #tpu.pipeline_mode<synchronous>, transform_indices = @transform_5, window_bounds = array<i64: 9, 64, 32>}, {pipeline_mode = #tpu.pipeline_mode<synchronous>, transform_indices = @transform_6, window_bounds = array<i64: 1, 32>}, {pipeline_mode = #tpu.pipeline_mode<synchronous>, transform_indices = @transform_7, window_bounds = array<i64: 32, 32, 1024>}, {pipeline_mode = #tpu.pipeline_mode<synchronous>, transform_indices = @transform_8, window_bounds = array<i64: 1, 1024>}, {transform_indices = @transform_9, window_bounds = array<i64: 1, 1, 1024>}]} {
    %cst = arith.constant 0.000000e+00 : f32
    %0 = vector.broadcast %cst : f32 to vector<64x128xf32>
    %c0 = arith.constant 0 : index
    %c0_0 = arith.constant 0 : index
    %1 = vector.load %arg3[%c0, %c0_0] : memref<1x128xf32, #tpu.memory_space<vmem>>, vector<1x128xf32>
    %2 = vector.broadcast %1 : vector<1x128xf32> to vector<64x128xf32>
    %3 = arith.addf %0, %2 : vector<64x128xf32>
    %c0_1 = arith.constant 0 : index
    %c0_2 = arith.constant 0 : index
    %c0_3 = arith.constant 0 : index
    %c0_4 = arith.constant 0 : index
    %4 = vector.load %arg1[%c0_1, %c0_2, %c0_3, %c0_4] : memref<1x10x10x256xf32, #tpu.memory_space<vmem>>, vector<1x8x8x256xf32>
    %5 = vector.shape_cast %4 : vector<1x8x8x256xf32> to vector<8x8x256xf32>
    %6 = vector.shape_cast %5 : vector<8x8x256xf32> to vector<64x256xf32>
    %c0_5 = arith.constant 0 : index
    %c0_6 = arith.constant 0 : index
    %c0_7 = arith.constant 0 : index
    %7 = vector.load %arg2[%c0_5, %c0_6, %c0_7] : memref<9x256x128xf32, #tpu.memory_space<vmem>>, vector<1x256x128xf32>
    %8 = vector.shape_cast %7 : vector<1x256x128xf32> to vector<256x128xf32>
    %cst_8 = arith.constant dense<0.000000e+00> : vector<64x128xf32>
    %9 = tpu.matmul %6, %8, %cst_8 {dimension_numbers = #tpu.dot_dimension_numbers<[1], [0], [0], [1], [0, 0, 1, 1], [], []>} : vector<64x256xf32>, vector<256x128xf32>, vector<64x128xf32> -> vector<64x128xf32>
    %10 = arith.addf %3, %9 : vector<64x128xf32>
    %c0_9 = arith.constant 0 : index
    %c0_10 = arith.constant 0 : index
    %c1 = arith.constant 1 : index
    %c0_11 = arith.constant 0 : index
    %11 = vector.load %arg1[%c0_9, %c0_10, %c1, %c0_11] : memref<1x10x10x256xf32, #tpu.memory_space<vmem>>, vector<1x8x8x256xf32>
    %12 = vector.shape_cast %11 : vector<1x8x8x256xf32> to vector<8x8x256xf32>
    %13 = vector.shape_cast %12 : vector<8x8x256xf32> to vector<64x256xf32>
    %c1_12 = arith.constant 1 : index
    %c0_13 = arith.constant 0 : index
    %c0_14 = arith.constant 0 : index
    %14 = vector.load %arg2[%c1_12, %c0_13, %c0_14] : memref<9x256x128xf32, #tpu.memory_space<vmem>>, vector<1x256x128xf32>
    %15 = vector.shape_cast %14 : vector<1x256x128xf32> to vector<256x128xf32>
    %cst_15 = arith.constant dense<0.000000e+00> : vector<64x128xf32>
    %16 = tpu.matmul %13, %15, %cst_15 {dimension_numbers = #tpu.dot_dimension_numbers<[1], [0], [0], [1], [0, 0, 1, 1], [], []>} : vector<64x256xf32>, vector<256x128xf32>, vector<64x128xf32> -> vector<64x128xf32>
    %17 = arith.addf %10, %16 : vector<64x128xf32>
    %c0_16 = arith.constant 0 : index
    %c0_17 = arith.constant 0 : index
    %c2 = arith.constant 2 : index
    %c0_18 = arith.constant 0 : index
    %18 = vector.load %arg1[%c0_16, %c0_17, %c2, %c0_18] : memref<1x10x10x256xf32, #tpu.memory_space<vmem>>, vector<1x8x8x256xf32>
    %19 = vector.shape_cast %18 : vector<1x8x8x256xf32> to vector<8x8x256xf32>
    %20 = vector.shape_cast %19 : vector<8x8x256xf32> to vector<64x256xf32>
    %c2_19 = arith.constant 2 : index
    %c0_20 = arith.constant 0 : index
    %c0_21 = arith.constant 0 : index
    %21 = vector.load %arg2[%c2_19, %c0_20, %c0_21] : memref<9x256x128xf32, #tpu.memory_space<vmem>>, vector<1x256x128xf32>
    %22 = vector.shape_cast %21 : vector<1x256x128xf32> to vector<256x128xf32>
    %cst_22 = arith.constant dense<0.000000e+00> : vector<64x128xf32>
    %23 = tpu.matmul %20, %22, %cst_22 {dimension_numbers = #tpu.dot_dimension_numbers<[1], [0], [0], [1], [0, 0, 1, 1], [], []>} : vector<64x256xf32>, vector<256x128xf32>, vector<64x128xf32> -> vector<64x128xf32>
    %24 = arith.addf %17, %23 : vector<64x128xf32>
    %c0_23 = arith.constant 0 : index
    %c1_24 = arith.constant 1 : index
    %c0_25 = arith.constant 0 : index
    %c0_26 = arith.constant 0 : index
    %25 = vector.load %arg1[%c0_23, %c1_24, %c0_25, %c0_26] : memref<1x10x10x256xf32, #tpu.memory_space<vmem>>, vector<1x8x8x256xf32>
    %26 = vector.shape_cast %25 : vector<1x8x8x256xf32> to vector<8x8x256xf32>
    %27 = vector.shape_cast %26 : vector<8x8x256xf32> to vector<64x256xf32>
    %c3 = arith.constant 3 : index
    %c0_27 = arith.constant 0 : index
    %c0_28 = arith.constant 0 : index
    %28 = vector.load %arg2[%c3, %c0_27, %c0_28] : memref<9x256x128xf32, #tpu.memory_space<vmem>>, vector<1x256x128xf32>
    %29 = vector.shape_cast %28 : vector<1x256x128xf32> to vector<256x128xf32>
    %cst_29 = arith.constant dense<0.000000e+00> : vector<64x128xf32>
    %30 = tpu.matmul %27, %29, %cst_29 {dimension_numbers = #tpu.dot_dimension_numbers<[1], [0], [0], [1], [0, 0, 1, 1], [], []>} : vector<64x256xf32>, vector<256x128xf32>, vector<64x128xf32> -> vector<64x128xf32>
    %31 = arith.addf %24, %30 : vector<64x128xf32>
    %c0_30 = arith.constant 0 : index
    %c1_31 = arith.constant 1 : index
    %c1_32 = arith.constant 1 : index
    %c0_33 = arith.constant 0 : index
    %32 = vector.load %arg1[%c0_30, %c1_31, %c1_32, %c0_33] : memref<1x10x10x256xf32, #tpu.memory_space<vmem>>, vector<1x8x8x256xf32>
    %33 = vector.shape_cast %32 : vector<1x8x8x256xf32> to vector<8x8x256xf32>
    %34 = vector.shape_cast %33 : vector<8x8x256xf32> to vector<64x256xf32>
    %c4 = arith.constant 4 : index
    %c0_34 = arith.constant 0 : index
    %c0_35 = arith.constant 0 : index
    %35 = vector.load %arg2[%c4, %c0_34, %c0_35] : memref<9x256x128xf32, #tpu.memory_space<vmem>>, vector<1x256x128xf32>
    %36 = vector.shape_cast %35 : vector<1x256x128xf32> to vector<256x128xf32>
    %cst_36 = arith.constant dense<0.000000e+00> : vector<64x128xf32>
    %37 = tpu.matmul %34, %36, %cst_36 {dimension_numbers = #tpu.dot_dimension_numbers<[1], [0], [0], [1], [0, 0, 1, 1], [], []>} : vector<64x256xf32>, vector<256x128xf32>, vector<64x128xf32> -> vector<64x128xf32>
    %38 = arith.addf %31, %37 : vector<64x128xf32>
    %c0_37 = arith.constant 0 : index
    %c1_38 = arith.constant 1 : index
    %c2_39 = arith.constant 2 : index
    %c0_40 = arith.constant 0 : index
    %39 = vector.load %arg1[%c0_37, %c1_38, %c2_39, %c0_40] : memref<1x10x10x256xf32, #tpu.memory_space<vmem>>, vector<1x8x8x256xf32>
    %40 = vector.shape_cast %39 : vector<1x8x8x256xf32> to vector<8x8x256xf32>
    %41 = vector.shape_cast %40 : vector<8x8x256xf32> to vector<64x256xf32>
    %c5 = arith.constant 5 : index
    %c0_41 = arith.constant 0 : index
    %c0_42 = arith.constant 0 : index
    %42 = vector.load %arg2[%c5, %c0_41, %c0_42] : memref<9x256x128xf32, #tpu.memory_space<vmem>>, vector<1x256x128xf32>
    %43 = vector.shape_cast %42 : vector<1x256x128xf32> to vector<256x128xf32>
    %cst_43 = arith.constant dense<0.000000e+00> : vector<64x128xf32>
    %44 = tpu.matmul %41, %43, %cst_43 {dimension_numbers = #tpu.dot_dimension_numbers<[1], [0], [0], [1], [0, 0, 1, 1], [], []>} : vector<64x256xf32>, vector<256x128xf32>, vector<64x128xf32> -> vector<64x128xf32>
    %45 = arith.addf %38, %44 : vector<64x128xf32>
    %c0_44 = arith.constant 0 : index
    %c2_45 = arith.constant 2 : index
    %c0_46 = arith.constant 0 : index
    %c0_47 = arith.constant 0 : index
    %46 = vector.load %arg1[%c0_44, %c2_45, %c0_46, %c0_47] : memref<1x10x10x256xf32, #tpu.memory_space<vmem>>, vector<1x8x8x256xf32>
    %47 = vector.shape_cast %46 : vector<1x8x8x256xf32> to vector<8x8x256xf32>
    %48 = vector.shape_cast %47 : vector<8x8x256xf32> to vector<64x256xf32>
    %c6 = arith.constant 6 : index
    %c0_48 = arith.constant 0 : index
    %c0_49 = arith.constant 0 : index
    %49 = vector.load %arg2[%c6, %c0_48, %c0_49] : memref<9x256x128xf32, #tpu.memory_space<vmem>>, vector<1x256x128xf32>
    %50 = vector.shape_cast %49 : vector<1x256x128xf32> to vector<256x128xf32>
    %cst_50 = arith.constant dense<0.000000e+00> : vector<64x128xf32>
    %51 = tpu.matmul %48, %50, %cst_50 {dimension_numbers = #tpu.dot_dimension_numbers<[1], [0], [0], [1], [0, 0, 1, 1], [], []>} : vector<64x256xf32>, vector<256x128xf32>, vector<64x128xf32> -> vector<64x128xf32>
    %52 = arith.addf %45, %51 : vector<64x128xf32>
    %c0_51 = arith.constant 0 : index
    %c2_52 = arith.constant 2 : index
    %c1_53 = arith.constant 1 : index
    %c0_54 = arith.constant 0 : index
    %53 = vector.load %arg1[%c0_51, %c2_52, %c1_53, %c0_54] : memref<1x10x10x256xf32, #tpu.memory_space<vmem>>, vector<1x8x8x256xf32>
    %54 = vector.shape_cast %53 : vector<1x8x8x256xf32> to vector<8x8x256xf32>
    %55 = vector.shape_cast %54 : vector<8x8x256xf32> to vector<64x256xf32>
    %c7 = arith.constant 7 : index
    %c0_55 = arith.constant 0 : index
    %c0_56 = arith.constant 0 : index
    %56 = vector.load %arg2[%c7, %c0_55, %c0_56] : memref<9x256x128xf32, #tpu.memory_space<vmem>>, vector<1x256x128xf32>
    %57 = vector.shape_cast %56 : vector<1x256x128xf32> to vector<256x128xf32>
    %cst_57 = arith.constant dense<0.000000e+00> : vector<64x128xf32>
    %58 = tpu.matmul %55, %57, %cst_57 {dimension_numbers = #tpu.dot_dimension_numbers<[1], [0], [0], [1], [0, 0, 1, 1], [], []>} : vector<64x256xf32>, vector<256x128xf32>, vector<64x128xf32> -> vector<64x128xf32>
    %59 = arith.addf %52, %58 : vector<64x128xf32>
    %c0_58 = arith.constant 0 : index
    %c2_59 = arith.constant 2 : index
    %c2_60 = arith.constant 2 : index
    %c0_61 = arith.constant 0 : index
    %60 = vector.load %arg1[%c0_58, %c2_59, %c2_60, %c0_61] : memref<1x10x10x256xf32, #tpu.memory_space<vmem>>, vector<1x8x8x256xf32>
    %61 = vector.shape_cast %60 : vector<1x8x8x256xf32> to vector<8x8x256xf32>
    %62 = vector.shape_cast %61 : vector<8x8x256xf32> to vector<64x256xf32>
    %c8 = arith.constant 8 : index
    %c0_62 = arith.constant 0 : index
    %c0_63 = arith.constant 0 : index
    %63 = vector.load %arg2[%c8, %c0_62, %c0_63] : memref<9x256x128xf32, #tpu.memory_space<vmem>>, vector<1x256x128xf32>
    %64 = vector.shape_cast %63 : vector<1x256x128xf32> to vector<256x128xf32>
    %cst_64 = arith.constant dense<0.000000e+00> : vector<64x128xf32>
    %65 = tpu.matmul %62, %64, %cst_64 {dimension_numbers = #tpu.dot_dimension_numbers<[1], [0], [0], [1], [0, 0, 1, 1], [], []>} : vector<64x256xf32>, vector<256x128xf32>, vector<64x128xf32> -> vector<64x128xf32>
    %66 = arith.addf %59, %65 : vector<64x128xf32>
    %cst_65 = arith.constant 0.000000e+00 : f32
    %67 = vector.broadcast %cst_65 : f32 to vector<64x128xf32>
    %68 = arith.maximumf %66, %67 : vector<64x128xf32>
    %cst_66 = arith.constant 0.000000e+00 : f32
    %69 = vector.broadcast %cst_66 : f32 to vector<10x10x128xf32>
    %c0_67 = arith.constant 0 : index
    %c0_68 = arith.constant 0 : index
    %c0_69 = arith.constant 0 : index
    %70 = vector.load %arg11[%c0_67, %c0_68, %c0_69] : memref<10x10x128xf32, #tpu.memory_space<vmem>>, vector<10x10x128xf32>
    tpu.vector_store %arg11[%c0_67, %c0_68, %c0_69], %69 {strides = array<i32>} : memref<10x10x128xf32, #tpu.memory_space<vmem>>, vector<10x10x128xf32>,
    %71 = vector.shape_cast %68 : vector<64x128xf32> to vector<8x8x128xf32>
    %c1_70 = arith.constant 1 : index
    %c1_71 = arith.constant 1 : index
    %c0_72 = arith.constant 0 : index
    %72 = vector.load %arg11[%c1_70, %c1_71, %c0_72] : memref<10x10x128xf32, #tpu.memory_space<vmem>>, vector<8x8x128xf32>
    tpu.vector_store %arg11[%c1_70, %c1_71, %c0_72], %71 {strides = array<i32>} : memref<10x10x128xf32, #tpu.memory_space<vmem>>, vector<8x8x128xf32>,
    %cst_73 = arith.constant 0.000000e+00 : f32
    %73 = vector.broadcast %cst_73 : f32 to vector<64x64xf32>
    %c0_74 = arith.constant 0 : index
    %c0_75 = arith.constant 0 : index
    %74 = vector.load %arg5[%c0_74, %c0_75] : memref<1x64xf32, #tpu.memory_space<vmem>>, vector<1x64xf32>
    %75 = vector.broadcast %74 : vector<1x64xf32> to vector<64x64xf32>
    %76 = arith.addf %73, %75 : vector<64x64xf32>
    %c0_76 = arith.constant 0 : index
    %c0_77 = arith.constant 0 : index
    %c0_78 = arith.constant 0 : index
    %77 = vector.load %arg11[%c0_76, %c0_77, %c0_78] : memref<10x10x128xf32, #tpu.memory_space<vmem>>, vector<8x8x128xf32>
    %78 = vector.shape_cast %77 : vector<8x8x128xf32> to vector<64x128xf32>
    %c0_79 = arith.constant 0 : index
    %c0_80 = arith.constant 0 : index
    %c0_81 = arith.constant 0 : index
    %79 = vector.load %arg4[%c0_79, %c0_80, %c0_81] : memref<9x128x64xf32, #tpu.memory_space<vmem>>, vector<1x128x64xf32>
    %80 = vector.shape_cast %79 : vector<1x128x64xf32> to vector<128x64xf32>
    %cst_82 = arith.constant dense<0.000000e+00> : vector<64x64xf32>
    %81 = tpu.matmul %78, %80, %cst_82 {dimension_numbers = #tpu.dot_dimension_numbers<[1], [0], [0], [1], [0, 0, 1, 1], [], []>} : vector<64x128xf32>, vector<128x64xf32>, vector<64x64xf32> -> vector<64x64xf32>
    %82 = arith.addf %76, %81 : vector<64x64xf32>
    %c0_83 = arith.constant 0 : index
    %c1_84 = arith.constant 1 : index
    %c0_85 = arith.constant 0 : index
    %83 = vector.load %arg11[%c0_83, %c1_84, %c0_85] : memref<10x10x128xf32, #tpu.memory_space<vmem>>, vector<8x8x128xf32>
    %84 = vector.shape_cast %83 : vector<8x8x128xf32> to vector<64x128xf32>
    %c1_86 = arith.constant 1 : index
    %c0_87 = arith.constant 0 : index
    %c0_88 = arith.constant 0 : index
    %85 = vector.load %arg4[%c1_86, %c0_87, %c0_88] : memref<9x128x64xf32, #tpu.memory_space<vmem>>, vector<1x128x64xf32>
    %86 = vector.shape_cast %85 : vector<1x128x64xf32> to vector<128x64xf32>
    %cst_89 = arith.constant dense<0.000000e+00> : vector<64x64xf32>
    %87 = tpu.matmul %84, %86, %cst_89 {dimension_numbers = #tpu.dot_dimension_numbers<[1], [0], [0], [1], [0, 0, 1, 1], [], []>} : vector<64x128xf32>, vector<128x64xf32>, vector<64x64xf32> -> vector<64x64xf32>
    %88 = arith.addf %82, %87 : vector<64x64xf32>
    %c0_90 = arith.constant 0 : index
    %c2_91 = arith.constant 2 : index
    %c0_92 = arith.constant 0 : index
    %89 = vector.load %arg11[%c0_90, %c2_91, %c0_92] : memref<10x10x128xf32, #tpu.memory_space<vmem>>, vector<8x8x128xf32>
    %90 = vector.shape_cast %89 : vector<8x8x128xf32> to vector<64x128xf32>
    %c2_93 = arith.constant 2 : index
    %c0_94 = arith.constant 0 : index
    %c0_95 = arith.constant 0 : index
    %91 = vector.load %arg4[%c2_93, %c0_94, %c0_95] : memref<9x128x64xf32, #tpu.memory_space<vmem>>, vector<1x128x64xf32>
    %92 = vector.shape_cast %91 : vector<1x128x64xf32> to vector<128x64xf32>
    %cst_96 = arith.constant dense<0.000000e+00> : vector<64x64xf32>
    %93 = tpu.matmul %90, %92, %cst_96 {dimension_numbers = #tpu.dot_dimension_numbers<[1], [0], [0], [1], [0, 0, 1, 1], [], []>} : vector<64x128xf32>, vector<128x64xf32>, vector<64x64xf32> -> vector<64x64xf32>
    %94 = arith.addf %88, %93 : vector<64x64xf32>
    %c1_97 = arith.constant 1 : index
    %c0_98 = arith.constant 0 : index
    %c0_99 = arith.constant 0 : index
    %95 = vector.load %arg11[%c1_97, %c0_98, %c0_99] : memref<10x10x128xf32, #tpu.memory_space<vmem>>, vector<8x8x128xf32>
    %96 = vector.shape_cast %95 : vector<8x8x128xf32> to vector<64x128xf32>
    %c3_100 = arith.constant 3 : index
    %c0_101 = arith.constant 0 : index
    %c0_102 = arith.constant 0 : index
    %97 = vector.load %arg4[%c3_100, %c0_101, %c0_102] : memref<9x128x64xf32, #tpu.memory_space<vmem>>, vector<1x128x64xf32>
    %98 = vector.shape_cast %97 : vector<1x128x64xf32> to vector<128x64xf32>
    %cst_103 = arith.constant dense<0.000000e+00> : vector<64x64xf32>
    %99 = tpu.matmul %96, %98, %cst_103 {dimension_numbers = #tpu.dot_dimension_numbers<[1], [0], [0], [1], [0, 0, 1, 1], [], []>} : vector<64x128xf32>, vector<128x64xf32>, vector<64x64xf32> -> vector<64x64xf32>
    %100 = arith.addf %94, %99 : vector<64x64xf32>
    %c1_104 = arith.constant 1 : index
    %c1_105 = arith.constant 1 : index
    %c0_106 = arith.constant 0 : index
    %101 = vector.load %arg11[%c1_104, %c1_105, %c0_106] : memref<10x10x128xf32, #tpu.memory_space<vmem>>, vector<8x8x128xf32>
    %102 = vector.shape_cast %101 : vector<8x8x128xf32> to vector<64x128xf32>
    %c4_107 = arith.constant 4 : index
    %c0_108 = arith.constant 0 : index
    %c0_109 = arith.constant 0 : index
    %103 = vector.load %arg4[%c4_107, %c0_108, %c0_109] : memref<9x128x64xf32, #tpu.memory_space<vmem>>, vector<1x128x64xf32>
    %104 = vector.shape_cast %103 : vector<1x128x64xf32> to vector<128x64xf32>
    %cst_110 = arith.constant dense<0.000000e+00> : vector<64x64xf32>
    %105 = tpu.matmul %102, %104, %cst_110 {dimension_numbers = #tpu.dot_dimension_numbers<[1], [0], [0], [1], [0, 0, 1, 1], [], []>} : vector<64x128xf32>, vector<128x64xf32>, vector<64x64xf32> -> vector<64x64xf32>
    %106 = arith.addf %100, %105 : vector<64x64xf32>
    %c1_111 = arith.constant 1 : index
    %c2_112 = arith.constant 2 : index
    %c0_113 = arith.constant 0 : index
    %107 = vector.load %arg11[%c1_111, %c2_112, %c0_113] : memref<10x10x128xf32, #tpu.memory_space<vmem>>, vector<8x8x128xf32>
    %108 = vector.shape_cast %107 : vector<8x8x128xf32> to vector<64x128xf32>
    %c5_114 = arith.constant 5 : index
    %c0_115 = arith.constant 0 : index
    %c0_116 = arith.constant 0 : index
    %109 = vector.load %arg4[%c5_114, %c0_115, %c0_116] : memref<9x128x64xf32, #tpu.memory_space<vmem>>, vector<1x128x64xf32>
    %110 = vector.shape_cast %109 : vector<1x128x64xf32> to vector<128x64xf32>
    %cst_117 = arith.constant dense<0.000000e+00> : vector<64x64xf32>
    %111 = tpu.matmul %108, %110, %cst_117 {dimension_numbers = #tpu.dot_dimension_numbers<[1], [0], [0], [1], [0, 0, 1, 1], [], []>} : vector<64x128xf32>, vector<128x64xf32>, vector<64x64xf32> -> vector<64x64xf32>
    %112 = arith.addf %106, %111 : vector<64x64xf32>
    %c2_118 = arith.constant 2 : index
    %c0_119 = arith.constant 0 : index
    %c0_120 = arith.constant 0 : index
    %113 = vector.load %arg11[%c2_118, %c0_119, %c0_120] : memref<10x10x128xf32, #tpu.memory_space<vmem>>, vector<8x8x128xf32>
    %114 = vector.shape_cast %113 : vector<8x8x128xf32> to vector<64x128xf32>
    %c6_121 = arith.constant 6 : index
    %c0_122 = arith.constant 0 : index
    %c0_123 = arith.constant 0 : index
    %115 = vector.load %arg4[%c6_121, %c0_122, %c0_123] : memref<9x128x64xf32, #tpu.memory_space<vmem>>, vector<1x128x64xf32>
    %116 = vector.shape_cast %115 : vector<1x128x64xf32> to vector<128x64xf32>
    %cst_124 = arith.constant dense<0.000000e+00> : vector<64x64xf32>
    %117 = tpu.matmul %114, %116, %cst_124 {dimension_numbers = #tpu.dot_dimension_numbers<[1], [0], [0], [1], [0, 0, 1, 1], [], []>} : vector<64x128xf32>, vector<128x64xf32>, vector<64x64xf32> -> vector<64x64xf32>
    %118 = arith.addf %112, %117 : vector<64x64xf32>
    %c2_125 = arith.constant 2 : index
    %c1_126 = arith.constant 1 : index
    %c0_127 = arith.constant 0 : index
    %119 = vector.load %arg11[%c2_125, %c1_126, %c0_127] : memref<10x10x128xf32, #tpu.memory_space<vmem>>, vector<8x8x128xf32>
    %120 = vector.shape_cast %119 : vector<8x8x128xf32> to vector<64x128xf32>
    %c7_128 = arith.constant 7 : index
    %c0_129 = arith.constant 0 : index
    %c0_130 = arith.constant 0 : index
    %121 = vector.load %arg4[%c7_128, %c0_129, %c0_130] : memref<9x128x64xf32, #tpu.memory_space<vmem>>, vector<1x128x64xf32>
    %122 = vector.shape_cast %121 : vector<1x128x64xf32> to vector<128x64xf32>
    %cst_131 = arith.constant dense<0.000000e+00> : vector<64x64xf32>
    %123 = tpu.matmul %120, %122, %cst_131 {dimension_numbers = #tpu.dot_dimension_numbers<[1], [0], [0], [1], [0, 0, 1, 1], [], []>} : vector<64x128xf32>, vector<128x64xf32>, vector<64x64xf32> -> vector<64x64xf32>
    %124 = arith.addf %118, %123 : vector<64x64xf32>
    %c2_132 = arith.constant 2 : index
    %c2_133 = arith.constant 2 : index
    %c0_134 = arith.constant 0 : index
    %125 = vector.load %arg11[%c2_132, %c2_133, %c0_134] : memref<10x10x128xf32, #tpu.memory_space<vmem>>, vector<8x8x128xf32>
    %126 = vector.shape_cast %125 : vector<8x8x128xf32> to vector<64x128xf32>
    %c8_135 = arith.constant 8 : index
    %c0_136 = arith.constant 0 : index
    %c0_137 = arith.constant 0 : index
    %127 = vector.load %arg4[%c8_135, %c0_136, %c0_137] : memref<9x128x64xf32, #tpu.memory_space<vmem>>, vector<1x128x64xf32>
    %128 = vector.shape_cast %127 : vector<1x128x64xf32> to vector<128x64xf32>
    %cst_138 = arith.constant dense<0.000000e+00> : vector<64x64xf32>
    %129 = tpu.matmul %126, %128, %cst_138 {dimension_numbers = #tpu.dot_dimension_numbers<[1], [0], [0], [1], [0, 0, 1, 1], [], []>} : vector<64x128xf32>, vector<128x64xf32>, vector<64x64xf32> -> vector<64x64xf32>
    %130 = arith.addf %124, %129 : vector<64x64xf32>
    %cst_139 = arith.constant 0.000000e+00 : f32
    %131 = vector.broadcast %cst_139 : f32 to vector<64x64xf32>
    %132 = arith.maximumf %130, %131 : vector<64x64xf32>
    %cst_140 = arith.constant 0.000000e+00 : f32
    %133 = vector.broadcast %cst_140 : f32 to vector<10x10x64xf32>
    %c0_141 = arith.constant 0 : index
    %c0_142 = arith.constant 0 : index
    %c0_143 = arith.constant 0 : index
    %134 = vector.load %arg12[%c0_141, %c0_142, %c0_143] : memref<10x10x64xf32, #tpu.memory_space<vmem>>, vector<10x10x64xf32>
    tpu.vector_store %arg12[%c0_141, %c0_142, %c0_143], %133 {strides = array<i32>} : memref<10x10x64xf32, #tpu.memory_space<vmem>>, vector<10x10x64xf32>,
    %135 = vector.shape_cast %132 : vector<64x64xf32> to vector<8x8x64xf32>
    %c1_144 = arith.constant 1 : index
    %c1_145 = arith.constant 1 : index
    %c0_146 = arith.constant 0 : index
    %136 = vector.load %arg12[%c1_144, %c1_145, %c0_146] : memref<10x10x64xf32, #tpu.memory_space<vmem>>, vector<8x8x64xf32>
    tpu.vector_store %arg12[%c1_144, %c1_145, %c0_146], %135 {strides = array<i32>} : memref<10x10x64xf32, #tpu.memory_space<vmem>>, vector<8x8x64xf32>,
    %cst_147 = arith.constant 0.000000e+00 : f32
    %137 = vector.broadcast %cst_147 : f32 to vector<64x32xf32>
    %c0_148 = arith.constant 0 : index
    %c0_149 = arith.constant 0 : index
    %138 = vector.load %arg7[%c0_148, %c0_149] : memref<1x32xf32, #tpu.memory_space<vmem>>, vector<1x32xf32>
    %139 = vector.broadcast %138 : vector<1x32xf32> to vector<64x32xf32>
    %140 = arith.addf %137, %139 : vector<64x32xf32>
    %c0_150 = arith.constant 0 : index
    %c0_151 = arith.constant 0 : index
    %c0_152 = arith.constant 0 : index
    %141 = vector.load %arg12[%c0_150, %c0_151, %c0_152] : memref<10x10x64xf32, #tpu.memory_space<vmem>>, vector<8x8x64xf32>
    %142 = vector.shape_cast %141 : vector<8x8x64xf32> to vector<64x64xf32>
    %c0_153 = arith.constant 0 : index
    %c0_154 = arith.constant 0 : index
    %c0_155 = arith.constant 0 : index
    %143 = vector.load %arg6[%c0_153, %c0_154, %c0_155] : memref<9x64x32xf32, #tpu.memory_space<vmem>>, vector<1x64x32xf32>
    %144 = vector.shape_cast %143 : vector<1x64x32xf32> to vector<64x32xf32>
    %cst_156 = arith.constant dense<0.000000e+00> : vector<64x32xf32>
    %145 = tpu.matmul %142, %144, %cst_156 {dimension_numbers = #tpu.dot_dimension_numbers<[1], [0], [0], [1], [0, 0, 1, 1], [], []>} : vector<64x64xf32>, vector<64x32xf32>, vector<64x32xf32> -> vector<64x32xf32>
    %146 = arith.addf %140, %145 : vector<64x32xf32>
    %c0_157 = arith.constant 0 : index
    %c1_158 = arith.constant 1 : index
    %c0_159 = arith.constant 0 : index
    %147 = vector.load %arg12[%c0_157, %c1_158, %c0_159] : memref<10x10x64xf32, #tpu.memory_space<vmem>>, vector<8x8x64xf32>
    %148 = vector.shape_cast %147 : vector<8x8x64xf32> to vector<64x64xf32>
    %c1_160 = arith.constant 1 : index
    %c0_161 = arith.constant 0 : index
    %c0_162 = arith.constant 0 : index
    %149 = vector.load %arg6[%c1_160, %c0_161, %c0_162] : memref<9x64x32xf32, #tpu.memory_space<vmem>>, vector<1x64x32xf32>
    %150 = vector.shape_cast %149 : vector<1x64x32xf32> to vector<64x32xf32>
    %cst_163 = arith.constant dense<0.000000e+00> : vector<64x32xf32>
    %151 = tpu.matmul %148, %150, %cst_163 {dimension_numbers = #tpu.dot_dimension_numbers<[1], [0], [0], [1], [0, 0, 1, 1], [], []>} : vector<64x64xf32>, vector<64x32xf32>, vector<64x32xf32> -> vector<64x32xf32>
    %152 = arith.addf %146, %151 : vector<64x32xf32>
    %c0_164 = arith.constant 0 : index
    %c2_165 = arith.constant 2 : index
    %c0_166 = arith.constant 0 : index
    %153 = vector.load %arg12[%c0_164, %c2_165, %c0_166] : memref<10x10x64xf32, #tpu.memory_space<vmem>>, vector<8x8x64xf32>
    %154 = vector.shape_cast %153 : vector<8x8x64xf32> to vector<64x64xf32>
    %c2_167 = arith.constant 2 : index
    %c0_168 = arith.constant 0 : index
    %c0_169 = arith.constant 0 : index
    %155 = vector.load %arg6[%c2_167, %c0_168, %c0_169] : memref<9x64x32xf32, #tpu.memory_space<vmem>>, vector<1x64x32xf32>
    %156 = vector.shape_cast %155 : vector<1x64x32xf32> to vector<64x32xf32>
    %cst_170 = arith.constant dense<0.000000e+00> : vector<64x32xf32>
    %157 = tpu.matmul %154, %156, %cst_170 {dimension_numbers = #tpu.dot_dimension_numbers<[1], [0], [0], [1], [0, 0, 1, 1], [], []>} : vector<64x64xf32>, vector<64x32xf32>, vector<64x32xf32> -> vector<64x32xf32>
    %158 = arith.addf %152, %157 : vector<64x32xf32>
    %c1_171 = arith.constant 1 : index
    %c0_172 = arith.constant 0 : index
    %c0_173 = arith.constant 0 : index
    %159 = vector.load %arg12[%c1_171, %c0_172, %c0_173] : memref<10x10x64xf32, #tpu.memory_space<vmem>>, vector<8x8x64xf32>
    %160 = vector.shape_cast %159 : vector<8x8x64xf32> to vector<64x64xf32>
    %c3_174 = arith.constant 3 : index
    %c0_175 = arith.constant 0 : index
    %c0_176 = arith.constant 0 : index
    %161 = vector.load %arg6[%c3_174, %c0_175, %c0_176] : memref<9x64x32xf32, #tpu.memory_space<vmem>>, vector<1x64x32xf32>
    %162 = vector.shape_cast %161 : vector<1x64x32xf32> to vector<64x32xf32>
    %cst_177 = arith.constant dense<0.000000e+00> : vector<64x32xf32>
    %163 = tpu.matmul %160, %162, %cst_177 {dimension_numbers = #tpu.dot_dimension_numbers<[1], [0], [0], [1], [0, 0, 1, 1], [], []>} : vector<64x64xf32>, vector<64x32xf32>, vector<64x32xf32> -> vector<64x32xf32>
    %164 = arith.addf %158, %163 : vector<64x32xf32>
    %c1_178 = arith.constant 1 : index
    %c1_179 = arith.constant 1 : index
    %c0_180 = arith.constant 0 : index
    %165 = vector.load %arg12[%c1_178, %c1_179, %c0_180] : memref<10x10x64xf32, #tpu.memory_space<vmem>>, vector<8x8x64xf32>
    %166 = vector.shape_cast %165 : vector<8x8x64xf32> to vector<64x64xf32>
    %c4_181 = arith.constant 4 : index
    %c0_182 = arith.constant 0 : index
    %c0_183 = arith.constant 0 : index
    %167 = vector.load %arg6[%c4_181, %c0_182, %c0_183] : memref<9x64x32xf32, #tpu.memory_space<vmem>>, vector<1x64x32xf32>
    %168 = vector.shape_cast %167 : vector<1x64x32xf32> to vector<64x32xf32>
    %cst_184 = arith.constant dense<0.000000e+00> : vector<64x32xf32>
    %169 = tpu.matmul %166, %168, %cst_184 {dimension_numbers = #tpu.dot_dimension_numbers<[1], [0], [0], [1], [0, 0, 1, 1], [], []>} : vector<64x64xf32>, vector<64x32xf32>, vector<64x32xf32> -> vector<64x32xf32>
    %170 = arith.addf %164, %169 : vector<64x32xf32>
    %c1_185 = arith.constant 1 : index
    %c2_186 = arith.constant 2 : index
    %c0_187 = arith.constant 0 : index
    %171 = vector.load %arg12[%c1_185, %c2_186, %c0_187] : memref<10x10x64xf32, #tpu.memory_space<vmem>>, vector<8x8x64xf32>
    %172 = vector.shape_cast %171 : vector<8x8x64xf32> to vector<64x64xf32>
    %c5_188 = arith.constant 5 : index
    %c0_189 = arith.constant 0 : index
    %c0_190 = arith.constant 0 : index
    %173 = vector.load %arg6[%c5_188, %c0_189, %c0_190] : memref<9x64x32xf32, #tpu.memory_space<vmem>>, vector<1x64x32xf32>
    %174 = vector.shape_cast %173 : vector<1x64x32xf32> to vector<64x32xf32>
    %cst_191 = arith.constant dense<0.000000e+00> : vector<64x32xf32>
    %175 = tpu.matmul %172, %174, %cst_191 {dimension_numbers = #tpu.dot_dimension_numbers<[1], [0], [0], [1], [0, 0, 1, 1], [], []>} : vector<64x64xf32>, vector<64x32xf32>, vector<64x32xf32> -> vector<64x32xf32>
    %176 = arith.addf %170, %175 : vector<64x32xf32>
    %c2_192 = arith.constant 2 : index
    %c0_193 = arith.constant 0 : index
    %c0_194 = arith.constant 0 : index
    %177 = vector.load %arg12[%c2_192, %c0_193, %c0_194] : memref<10x10x64xf32, #tpu.memory_space<vmem>>, vector<8x8x64xf32>
    %178 = vector.shape_cast %177 : vector<8x8x64xf32> to vector<64x64xf32>
    %c6_195 = arith.constant 6 : index
    %c0_196 = arith.constant 0 : index
    %c0_197 = arith.constant 0 : index
    %179 = vector.load %arg6[%c6_195, %c0_196, %c0_197] : memref<9x64x32xf32, #tpu.memory_space<vmem>>, vector<1x64x32xf32>
    %180 = vector.shape_cast %179 : vector<1x64x32xf32> to vector<64x32xf32>
    %cst_198 = arith.constant dense<0.000000e+00> : vector<64x32xf32>
    %181 = tpu.matmul %178, %180, %cst_198 {dimension_numbers = #tpu.dot_dimension_numbers<[1], [0], [0], [1], [0, 0, 1, 1], [], []>} : vector<64x64xf32>, vector<64x32xf32>, vector<64x32xf32> -> vector<64x32xf32>
    %182 = arith.addf %176, %181 : vector<64x32xf32>
    %c2_199 = arith.constant 2 : index
    %c1_200 = arith.constant 1 : index
    %c0_201 = arith.constant 0 : index
    %183 = vector.load %arg12[%c2_199, %c1_200, %c0_201] : memref<10x10x64xf32, #tpu.memory_space<vmem>>, vector<8x8x64xf32>
    %184 = vector.shape_cast %183 : vector<8x8x64xf32> to vector<64x64xf32>
    %c7_202 = arith.constant 7 : index
    %c0_203 = arith.constant 0 : index
    %c0_204 = arith.constant 0 : index
    %185 = vector.load %arg6[%c7_202, %c0_203, %c0_204] : memref<9x64x32xf32, #tpu.memory_space<vmem>>, vector<1x64x32xf32>
    %186 = vector.shape_cast %185 : vector<1x64x32xf32> to vector<64x32xf32>
    %cst_205 = arith.constant dense<0.000000e+00> : vector<64x32xf32>
    %187 = tpu.matmul %184, %186, %cst_205 {dimension_numbers = #tpu.dot_dimension_numbers<[1], [0], [0], [1], [0, 0, 1, 1], [], []>} : vector<64x64xf32>, vector<64x32xf32>, vector<64x32xf32> -> vector<64x32xf32>
    %188 = arith.addf %182, %187 : vector<64x32xf32>
    %c2_206 = arith.constant 2 : index
    %c2_207 = arith.constant 2 : index
    %c0_208 = arith.constant 0 : index
    %189 = vector.load %arg12[%c2_206, %c2_207, %c0_208] : memref<10x10x64xf32, #tpu.memory_space<vmem>>, vector<8x8x64xf32>
    %190 = vector.shape_cast %189 : vector<8x8x64xf32> to vector<64x64xf32>
    %c8_209 = arith.constant 8 : index
    %c0_210 = arith.constant 0 : index
    %c0_211 = arith.constant 0 : index
    %191 = vector.load %arg6[%c8_209, %c0_210, %c0_211] : memref<9x64x32xf32, #tpu.memory_space<vmem>>, vector<1x64x32xf32>
    %192 = vector.shape_cast %191 : vector<1x64x32xf32> to vector<64x32xf32>
    %cst_212 = arith.constant dense<0.000000e+00> : vector<64x32xf32>
    %193 = tpu.matmul %190, %192, %cst_212 {dimension_numbers = #tpu.dot_dimension_numbers<[1], [0], [0], [1], [0, 0, 1, 1], [], []>} : vector<64x64xf32>, vector<64x32xf32>, vector<64x32xf32> -> vector<64x32xf32>
    %194 = arith.addf %188, %193 : vector<64x32xf32>
    %195 = tpu.transpose %194, [1, 0] : vector<64x32xf32> -> vector<32x64xf32>
    %cst_213 = arith.constant dense<0.000000e+00> : vector<32x32xf32>
    %196 = tpu.matmul %195, %194, %cst_213 {dimension_numbers = #tpu.dot_dimension_numbers<[1], [0], [0], [1], [0, 0, 1, 1], [], []>} : vector<32x64xf32>, vector<64x32xf32>, vector<32x32xf32> -> vector<32x32xf32>
    %cst_214 = arith.constant 1.562500e-02 : f32
    %197 = vector.broadcast %cst_214 : f32 to vector<32x32xf32>
    %198 = arith.mulf %196, %197 : vector<32x32xf32>
    %c0_215 = arith.constant 0 : index
    %c0_216 = arith.constant 0 : index
    %199 = vector.load %arg9[%c0_215, %c0_216] : memref<1x1024xf32, #tpu.memory_space<vmem>>, vector<1x1024xf32>
    %200 = vector.extract_strided_slice %198 {offsets = [0, 0], sizes = [1, 32], strides = [1, 1]} : vector<32x32xf32> to vector<1x32xf32>
    %c0_217 = arith.constant 0 : index
    %c0_218 = arith.constant 0 : index
    %c0_219 = arith.constant 0 : index
    %201 = vector.load %arg8[%c0_217, %c0_218, %c0_219] : memref<32x32x1024xf32, #tpu.memory_space<vmem>>, vector<1x32x1024xf32>
    %202 = vector.shape_cast %201 : vector<1x32x1024xf32> to vector<32x1024xf32>
    %cst_220 = arith.constant dense<0.000000e+00> : vector<1x1024xf32>
    %203 = tpu.matmul %200, %202, %cst_220 {dimension_numbers = #tpu.dot_dimension_numbers<[1], [0], [0], [1], [0, 0, 1, 1], [], []>} : vector<1x32xf32>, vector<32x1024xf32>, vector<1x1024xf32> -> vector<1x1024xf32>
    %204 = arith.addf %199, %203 : vector<1x1024xf32>
    %205 = vector.extract_strided_slice %198 {offsets = [1, 0], sizes = [1, 32], strides = [1, 1]} : vector<32x32xf32> to vector<1x32xf32>
    %c1_221 = arith.constant 1 : index
    %c0_222 = arith.constant 0 : index
    %c0_223 = arith.constant 0 : index
    %206 = vector.load %arg8[%c1_221, %c0_222, %c0_223] : memref<32x32x1024xf32, #tpu.memory_space<vmem>>, vector<1x32x1024xf32>
    %207 = vector.shape_cast %206 : vector<1x32x1024xf32> to vector<32x1024xf32>
    %cst_224 = arith.constant dense<0.000000e+00> : vector<1x1024xf32>
    %208 = tpu.matmul %205, %207, %cst_224 {dimension_numbers = #tpu.dot_dimension_numbers<[1], [0], [0], [1], [0, 0, 1, 1], [], []>} : vector<1x32xf32>, vector<32x1024xf32>, vector<1x1024xf32> -> vector<1x1024xf32>
    %209 = arith.addf %204, %208 : vector<1x1024xf32>
    %210 = vector.extract_strided_slice %198 {offsets = [2, 0], sizes = [1, 32], strides = [1, 1]} : vector<32x32xf32> to vector<1x32xf32>
    %c2_225 = arith.constant 2 : index
    %c0_226 = arith.constant 0 : index
    %c0_227 = arith.constant 0 : index
    %211 = vector.load %arg8[%c2_225, %c0_226, %c0_227] : memref<32x32x1024xf32, #tpu.memory_space<vmem>>, vector<1x32x1024xf32>
    %212 = vector.shape_cast %211 : vector<1x32x1024xf32> to vector<32x1024xf32>
    %cst_228 = arith.constant dense<0.000000e+00> : vector<1x1024xf32>
    %213 = tpu.matmul %210, %212, %cst_228 {dimension_numbers = #tpu.dot_dimension_numbers<[1], [0], [0], [1], [0, 0, 1, 1], [], []>} : vector<1x32xf32>, vector<32x1024xf32>, vector<1x1024xf32> -> vector<1x1024xf32>
    %214 = arith.addf %209, %213 : vector<1x1024xf32>
    %215 = vector.extract_strided_slice %198 {offsets = [3, 0], sizes = [1, 32], strides = [1, 1]} : vector<32x32xf32> to vector<1x32xf32>
    %c3_229 = arith.constant 3 : index
    %c0_230 = arith.constant 0 : index
    %c0_231 = arith.constant 0 : index
    %216 = vector.load %arg8[%c3_229, %c0_230, %c0_231] : memref<32x32x1024xf32, #tpu.memory_space<vmem>>, vector<1x32x1024xf32>
    %217 = vector.shape_cast %216 : vector<1x32x1024xf32> to vector<32x1024xf32>
    %cst_232 = arith.constant dense<0.000000e+00> : vector<1x1024xf32>
    %218 = tpu.matmul %215, %217, %cst_232 {dimension_numbers = #tpu.dot_dimension_numbers<[1], [0], [0], [1], [0, 0, 1, 1], [], []>} : vector<1x32xf32>, vector<32x1024xf32>, vector<1x1024xf32> -> vector<1x1024xf32>
    %219 = arith.addf %214, %218 : vector<1x1024xf32>
    %220 = vector.extract_strided_slice %198 {offsets = [4, 0], sizes = [1, 32], strides = [1, 1]} : vector<32x32xf32> to vector<1x32xf32>
    %c4_233 = arith.constant 4 : index
    %c0_234 = arith.constant 0 : index
    %c0_235 = arith.constant 0 : index
    %221 = vector.load %arg8[%c4_233, %c0_234, %c0_235] : memref<32x32x1024xf32, #tpu.memory_space<vmem>>, vector<1x32x1024xf32>
    %222 = vector.shape_cast %221 : vector<1x32x1024xf32> to vector<32x1024xf32>
    %cst_236 = arith.constant dense<0.000000e+00> : vector<1x1024xf32>
    %223 = tpu.matmul %220, %222, %cst_236 {dimension_numbers = #tpu.dot_dimension_numbers<[1], [0], [0], [1], [0, 0, 1, 1], [], []>} : vector<1x32xf32>, vector<32x1024xf32>, vector<1x1024xf32> -> vector<1x1024xf32>
    %224 = arith.addf %219, %223 : vector<1x1024xf32>
    %225 = vector.extract_strided_slice %198 {offsets = [5, 0], sizes = [1, 32], strides = [1, 1]} : vector<32x32xf32> to vector<1x32xf32>
    %c5_237 = arith.constant 5 : index
    %c0_238 = arith.constant 0 : index
    %c0_239 = arith.constant 0 : index
    %226 = vector.load %arg8[%c5_237, %c0_238, %c0_239] : memref<32x32x1024xf32, #tpu.memory_space<vmem>>, vector<1x32x1024xf32>
    %227 = vector.shape_cast %226 : vector<1x32x1024xf32> to vector<32x1024xf32>
    %cst_240 = arith.constant dense<0.000000e+00> : vector<1x1024xf32>
    %228 = tpu.matmul %225, %227, %cst_240 {dimension_numbers = #tpu.dot_dimension_numbers<[1], [0], [0], [1], [0, 0, 1, 1], [], []>} : vector<1x32xf32>, vector<32x1024xf32>, vector<1x1024xf32> -> vector<1x1024xf32>
    %229 = arith.addf %224, %228 : vector<1x1024xf32>
    %230 = vector.extract_strided_slice %198 {offsets = [6, 0], sizes = [1, 32], strides = [1, 1]} : vector<32x32xf32> to vector<1x32xf32>
    %c6_241 = arith.constant 6 : index
    %c0_242 = arith.constant 0 : index
    %c0_243 = arith.constant 0 : index
    %231 = vector.load %arg8[%c6_241, %c0_242, %c0_243] : memref<32x32x1024xf32, #tpu.memory_space<vmem>>, vector<1x32x1024xf32>
    %232 = vector.shape_cast %231 : vector<1x32x1024xf32> to vector<32x1024xf32>
    %cst_244 = arith.constant dense<0.000000e+00> : vector<1x1024xf32>
    %233 = tpu.matmul %230, %232, %cst_244 {dimension_numbers = #tpu.dot_dimension_numbers<[1], [0], [0], [1], [0, 0, 1, 1], [], []>} : vector<1x32xf32>, vector<32x1024xf32>, vector<1x1024xf32> -> vector<1x1024xf32>
    %234 = arith.addf %229, %233 : vector<1x1024xf32>
    %235 = vector.extract_strided_slice %198 {offsets = [7, 0], sizes = [1, 32], strides = [1, 1]} : vector<32x32xf32> to vector<1x32xf32>
    %c7_245 = arith.constant 7 : index
    %c0_246 = arith.constant 0 : index
    %c0_247 = arith.constant 0 : index
    %236 = vector.load %arg8[%c7_245, %c0_246, %c0_247] : memref<32x32x1024xf32, #tpu.memory_space<vmem>>, vector<1x32x1024xf32>
    %237 = vector.shape_cast %236 : vector<1x32x1024xf32> to vector<32x1024xf32>
    %cst_248 = arith.constant dense<0.000000e+00> : vector<1x1024xf32>
    %238 = tpu.matmul %235, %237, %cst_248 {dimension_numbers = #tpu.dot_dimension_numbers<[1], [0], [0], [1], [0, 0, 1, 1], [], []>} : vector<1x32xf32>, vector<32x1024xf32>, vector<1x1024xf32> -> vector<1x1024xf32>
    %239 = arith.addf %234, %238 : vector<1x1024xf32>
    %240 = vector.extract_strided_slice %198 {offsets = [8, 0], sizes = [1, 32], strides = [1, 1]} : vector<32x32xf32> to vector<1x32xf32>
    %c8_249 = arith.constant 8 : index
    %c0_250 = arith.constant 0 : index
    %c0_251 = arith.constant 0 : index
    %241 = vector.load %arg8[%c8_249, %c0_250, %c0_251] : memref<32x32x1024xf32, #tpu.memory_space<vmem>>, vector<1x32x1024xf32>
    %242 = vector.shape_cast %241 : vector<1x32x1024xf32> to vector<32x1024xf32>
    %cst_252 = arith.constant dense<0.000000e+00> : vector<1x1024xf32>
    %243 = tpu.matmul %240, %242, %cst_252 {dimension_numbers = #tpu.dot_dimension_numbers<[1], [0], [0], [1], [0, 0, 1, 1], [], []>} : vector<1x32xf32>, vector<32x1024xf32>, vector<1x1024xf32> -> vector<1x1024xf32>
    %244 = arith.addf %239, %243 : vector<1x1024xf32>
    %245 = vector.extract_strided_slice %198 {offsets = [9, 0], sizes = [1, 32], strides = [1, 1]} : vector<32x32xf32> to vector<1x32xf32>
    %c9 = arith.constant 9 : index
    %c0_253 = arith.constant 0 : index
    %c0_254 = arith.constant 0 : index
    %246 = vector.load %arg8[%c9, %c0_253, %c0_254] : memref<32x32x1024xf32, #tpu.memory_space<vmem>>, vector<1x32x1024xf32>
    %247 = vector.shape_cast %246 : vector<1x32x1024xf32> to vector<32x1024xf32>
    %cst_255 = arith.constant dense<0.000000e+00> : vector<1x1024xf32>
    %248 = tpu.matmul %245, %247, %cst_255 {dimension_numbers = #tpu.dot_dimension_numbers<[1], [0], [0], [1], [0, 0, 1, 1], [], []>} : vector<1x32xf32>, vector<32x1024xf32>, vector<1x1024xf32> -> vector<1x1024xf32>
    %249 = arith.addf %244, %248 : vector<1x1024xf32>
    %250 = vector.extract_strided_slice %198 {offsets = [10, 0], sizes = [1, 32], strides = [1, 1]} : vector<32x32xf32> to vector<1x32xf32>
    %c10 = arith.constant 10 : index
    %c0_256 = arith.constant 0 : index
    %c0_257 = arith.constant 0 : index
    %251 = vector.load %arg8[%c10, %c0_256, %c0_257] : memref<32x32x1024xf32, #tpu.memory_space<vmem>>, vector<1x32x1024xf32>
    %252 = vector.shape_cast %251 : vector<1x32x1024xf32> to vector<32x1024xf32>
    %cst_258 = arith.constant dense<0.000000e+00> : vector<1x1024xf32>
    %253 = tpu.matmul %250, %252, %cst_258 {dimension_numbers = #tpu.dot_dimension_numbers<[1], [0], [0], [1], [0, 0, 1, 1], [], []>} : vector<1x32xf32>, vector<32x1024xf32>, vector<1x1024xf32> -> vector<1x1024xf32>
    %254 = arith.addf %249, %253 : vector<1x1024xf32>
    %255 = vector.extract_strided_slice %198 {offsets = [11, 0], sizes = [1, 32], strides = [1, 1]} : vector<32x32xf32> to vector<1x32xf32>
    %c11 = arith.constant 11 : index
    %c0_259 = arith.constant 0 : index
    %c0_260 = arith.constant 0 : index
    %256 = vector.load %arg8[%c11, %c0_259, %c0_260] : memref<32x32x1024xf32, #tpu.memory_space<vmem>>, vector<1x32x1024xf32>
    %257 = vector.shape_cast %256 : vector<1x32x1024xf32> to vector<32x1024xf32>
    %cst_261 = arith.constant dense<0.000000e+00> : vector<1x1024xf32>
    %258 = tpu.matmul %255, %257, %cst_261 {dimension_numbers = #tpu.dot_dimension_numbers<[1], [0], [0], [1], [0, 0, 1, 1], [], []>} : vector<1x32xf32>, vector<32x1024xf32>, vector<1x1024xf32> -> vector<1x1024xf32>
    %259 = arith.addf %254, %258 : vector<1x1024xf32>
    %260 = vector.extract_strided_slice %198 {offsets = [12, 0], sizes = [1, 32], strides = [1, 1]} : vector<32x32xf32> to vector<1x32xf32>
    %c12 = arith.constant 12 : index
    %c0_262 = arith.constant 0 : index
    %c0_263 = arith.constant 0 : index
    %261 = vector.load %arg8[%c12, %c0_262, %c0_263] : memref<32x32x1024xf32, #tpu.memory_space<vmem>>, vector<1x32x1024xf32>
    %262 = vector.shape_cast %261 : vector<1x32x1024xf32> to vector<32x1024xf32>
    %cst_264 = arith.constant dense<0.000000e+00> : vector<1x1024xf32>
    %263 = tpu.matmul %260, %262, %cst_264 {dimension_numbers = #tpu.dot_dimension_numbers<[1], [0], [0], [1], [0, 0, 1, 1], [], []>} : vector<1x32xf32>, vector<32x1024xf32>, vector<1x1024xf32> -> vector<1x1024xf32>
    %264 = arith.addf %259, %263 : vector<1x1024xf32>
    %265 = vector.extract_strided_slice %198 {offsets = [13, 0], sizes = [1, 32], strides = [1, 1]} : vector<32x32xf32> to vector<1x32xf32>
    %c13 = arith.constant 13 : index
    %c0_265 = arith.constant 0 : index
    %c0_266 = arith.constant 0 : index
    %266 = vector.load %arg8[%c13, %c0_265, %c0_266] : memref<32x32x1024xf32, #tpu.memory_space<vmem>>, vector<1x32x1024xf32>
    %267 = vector.shape_cast %266 : vector<1x32x1024xf32> to vector<32x1024xf32>
    %cst_267 = arith.constant dense<0.000000e+00> : vector<1x1024xf32>
    %268 = tpu.matmul %265, %267, %cst_267 {dimension_numbers = #tpu.dot_dimension_numbers<[1], [0], [0], [1], [0, 0, 1, 1], [], []>} : vector<1x32xf32>, vector<32x1024xf32>, vector<1x1024xf32> -> vector<1x1024xf32>
    %269 = arith.addf %264, %268 : vector<1x1024xf32>
    %270 = vector.extract_strided_slice %198 {offsets = [14, 0], sizes = [1, 32], strides = [1, 1]} : vector<32x32xf32> to vector<1x32xf32>
    %c14 = arith.constant 14 : index
    %c0_268 = arith.constant 0 : index
    %c0_269 = arith.constant 0 : index
    %271 = vector.load %arg8[%c14, %c0_268, %c0_269] : memref<32x32x1024xf32, #tpu.memory_space<vmem>>, vector<1x32x1024xf32>
    %272 = vector.shape_cast %271 : vector<1x32x1024xf32> to vector<32x1024xf32>
    %cst_270 = arith.constant dense<0.000000e+00> : vector<1x1024xf32>
    %273 = tpu.matmul %270, %272, %cst_270 {dimension_numbers = #tpu.dot_dimension_numbers<[1], [0], [0], [1], [0, 0, 1, 1], [], []>} : vector<1x32xf32>, vector<32x1024xf32>, vector<1x1024xf32> -> vector<1x1024xf32>
    %274 = arith.addf %269, %273 : vector<1x1024xf32>
    %275 = vector.extract_strided_slice %198 {offsets = [15, 0], sizes = [1, 32], strides = [1, 1]} : vector<32x32xf32> to vector<1x32xf32>
    %c15 = arith.constant 15 : index
    %c0_271 = arith.constant 0 : index
    %c0_272 = arith.constant 0 : index
    %276 = vector.load %arg8[%c15, %c0_271, %c0_272] : memref<32x32x1024xf32, #tpu.memory_space<vmem>>, vector<1x32x1024xf32>
    %277 = vector.shape_cast %276 : vector<1x32x1024xf32> to vector<32x1024xf32>
    %cst_273 = arith.constant dense<0.000000e+00> : vector<1x1024xf32>
    %278 = tpu.matmul %275, %277, %cst_273 {dimension_numbers = #tpu.dot_dimension_numbers<[1], [0], [0], [1], [0, 0, 1, 1], [], []>} : vector<1x32xf32>, vector<32x1024xf32>, vector<1x1024xf32> -> vector<1x1024xf32>
    %279 = arith.addf %274, %278 : vector<1x1024xf32>
    %280 = vector.extract_strided_slice %198 {offsets = [16, 0], sizes = [1, 32], strides = [1, 1]} : vector<32x32xf32> to vector<1x32xf32>
    %c16 = arith.constant 16 : index
    %c0_274 = arith.constant 0 : index
    %c0_275 = arith.constant 0 : index
    %281 = vector.load %arg8[%c16, %c0_274, %c0_275] : memref<32x32x1024xf32, #tpu.memory_space<vmem>>, vector<1x32x1024xf32>
    %282 = vector.shape_cast %281 : vector<1x32x1024xf32> to vector<32x1024xf32>
    %cst_276 = arith.constant dense<0.000000e+00> : vector<1x1024xf32>
    %283 = tpu.matmul %280, %282, %cst_276 {dimension_numbers = #tpu.dot_dimension_numbers<[1], [0], [0], [1], [0, 0, 1, 1], [], []>} : vector<1x32xf32>, vector<32x1024xf32>, vector<1x1024xf32> -> vector<1x1024xf32>
    %284 = arith.addf %279, %283 : vector<1x1024xf32>
    %285 = vector.extract_strided_slice %198 {offsets = [17, 0], sizes = [1, 32], strides = [1, 1]} : vector<32x32xf32> to vector<1x32xf32>
    %c17 = arith.constant 17 : index
    %c0_277 = arith.constant 0 : index
    %c0_278 = arith.constant 0 : index
    %286 = vector.load %arg8[%c17, %c0_277, %c0_278] : memref<32x32x1024xf32, #tpu.memory_space<vmem>>, vector<1x32x1024xf32>
    %287 = vector.shape_cast %286 : vector<1x32x1024xf32> to vector<32x1024xf32>
    %cst_279 = arith.constant dense<0.000000e+00> : vector<1x1024xf32>
    %288 = tpu.matmul %285, %287, %cst_279 {dimension_numbers = #tpu.dot_dimension_numbers<[1], [0], [0], [1], [0, 0, 1, 1], [], []>} : vector<1x32xf32>, vector<32x1024xf32>, vector<1x1024xf32> -> vector<1x1024xf32>
    %289 = arith.addf %284, %288 : vector<1x1024xf32>
    %290 = vector.extract_strided_slice %198 {offsets = [18, 0], sizes = [1, 32], strides = [1, 1]} : vector<32x32xf32> to vector<1x32xf32>
    %c18 = arith.constant 18 : index
    %c0_280 = arith.constant 0 : index
    %c0_281 = arith.constant 0 : index
    %291 = vector.load %arg8[%c18, %c0_280, %c0_281] : memref<32x32x1024xf32, #tpu.memory_space<vmem>>, vector<1x32x1024xf32>
    %292 = vector.shape_cast %291 : vector<1x32x1024xf32> to vector<32x1024xf32>
    %cst_282 = arith.constant dense<0.000000e+00> : vector<1x1024xf32>
    %293 = tpu.matmul %290, %292, %cst_282 {dimension_numbers = #tpu.dot_dimension_numbers<[1], [0], [0], [1], [0, 0, 1, 1], [], []>} : vector<1x32xf32>, vector<32x1024xf32>, vector<1x1024xf32> -> vector<1x1024xf32>
    %294 = arith.addf %289, %293 : vector<1x1024xf32>
    %295 = vector.extract_strided_slice %198 {offsets = [19, 0], sizes = [1, 32], strides = [1, 1]} : vector<32x32xf32> to vector<1x32xf32>
    %c19 = arith.constant 19 : index
    %c0_283 = arith.constant 0 : index
    %c0_284 = arith.constant 0 : index
    %296 = vector.load %arg8[%c19, %c0_283, %c0_284] : memref<32x32x1024xf32, #tpu.memory_space<vmem>>, vector<1x32x1024xf32>
    %297 = vector.shape_cast %296 : vector<1x32x1024xf32> to vector<32x1024xf32>
    %cst_285 = arith.constant dense<0.000000e+00> : vector<1x1024xf32>
    %298 = tpu.matmul %295, %297, %cst_285 {dimension_numbers = #tpu.dot_dimension_numbers<[1], [0], [0], [1], [0, 0, 1, 1], [], []>} : vector<1x32xf32>, vector<32x1024xf32>, vector<1x1024xf32> -> vector<1x1024xf32>
    %299 = arith.addf %294, %298 : vector<1x1024xf32>
    %300 = vector.extract_strided_slice %198 {offsets = [20, 0], sizes = [1, 32], strides = [1, 1]} : vector<32x32xf32> to vector<1x32xf32>
    %c20 = arith.constant 20 : index
    %c0_286 = arith.constant 0 : index
    %c0_287 = arith.constant 0 : index
    %301 = vector.load %arg8[%c20, %c0_286, %c0_287] : memref<32x32x1024xf32, #tpu.memory_space<vmem>>, vector<1x32x1024xf32>
    %302 = vector.shape_cast %301 : vector<1x32x1024xf32> to vector<32x1024xf32>
    %cst_288 = arith.constant dense<0.000000e+00> : vector<1x1024xf32>
    %303 = tpu.matmul %300, %302, %cst_288 {dimension_numbers = #tpu.dot_dimension_numbers<[1], [0], [0], [1], [0, 0, 1, 1], [], []>} : vector<1x32xf32>, vector<32x1024xf32>, vector<1x1024xf32> -> vector<1x1024xf32>
    %304 = arith.addf %299, %303 : vector<1x1024xf32>
    %305 = vector.extract_strided_slice %198 {offsets = [21, 0], sizes = [1, 32], strides = [1, 1]} : vector<32x32xf32> to vector<1x32xf32>
    %c21 = arith.constant 21 : index
    %c0_289 = arith.constant 0 : index
    %c0_290 = arith.constant 0 : index
    %306 = vector.load %arg8[%c21, %c0_289, %c0_290] : memref<32x32x1024xf32, #tpu.memory_space<vmem>>, vector<1x32x1024xf32>
    %307 = vector.shape_cast %306 : vector<1x32x1024xf32> to vector<32x1024xf32>
    %cst_291 = arith.constant dense<0.000000e+00> : vector<1x1024xf32>
    %308 = tpu.matmul %305, %307, %cst_291 {dimension_numbers = #tpu.dot_dimension_numbers<[1], [0], [0], [1], [0, 0, 1, 1], [], []>} : vector<1x32xf32>, vector<32x1024xf32>, vector<1x1024xf32> -> vector<1x1024xf32>
    %309 = arith.addf %304, %308 : vector<1x1024xf32>
    %310 = vector.extract_strided_slice %198 {offsets = [22, 0], sizes = [1, 32], strides = [1, 1]} : vector<32x32xf32> to vector<1x32xf32>
    %c22 = arith.constant 22 : index
    %c0_292 = arith.constant 0 : index
    %c0_293 = arith.constant 0 : index
    %311 = vector.load %arg8[%c22, %c0_292, %c0_293] : memref<32x32x1024xf32, #tpu.memory_space<vmem>>, vector<1x32x1024xf32>
    %312 = vector.shape_cast %311 : vector<1x32x1024xf32> to vector<32x1024xf32>
    %cst_294 = arith.constant dense<0.000000e+00> : vector<1x1024xf32>
    %313 = tpu.matmul %310, %312, %cst_294 {dimension_numbers = #tpu.dot_dimension_numbers<[1], [0], [0], [1], [0, 0, 1, 1], [], []>} : vector<1x32xf32>, vector<32x1024xf32>, vector<1x1024xf32> -> vector<1x1024xf32>
    %314 = arith.addf %309, %313 : vector<1x1024xf32>
    %315 = vector.extract_strided_slice %198 {offsets = [23, 0], sizes = [1, 32], strides = [1, 1]} : vector<32x32xf32> to vector<1x32xf32>
    %c23 = arith.constant 23 : index
    %c0_295 = arith.constant 0 : index
    %c0_296 = arith.constant 0 : index
    %316 = vector.load %arg8[%c23, %c0_295, %c0_296] : memref<32x32x1024xf32, #tpu.memory_space<vmem>>, vector<1x32x1024xf32>
    %317 = vector.shape_cast %316 : vector<1x32x1024xf32> to vector<32x1024xf32>
    %cst_297 = arith.constant dense<0.000000e+00> : vector<1x1024xf32>
    %318 = tpu.matmul %315, %317, %cst_297 {dimension_numbers = #tpu.dot_dimension_numbers<[1], [0], [0], [1], [0, 0, 1, 1], [], []>} : vector<1x32xf32>, vector<32x1024xf32>, vector<1x1024xf32> -> vector<1x1024xf32>
    %319 = arith.addf %314, %318 : vector<1x1024xf32>
    %320 = vector.extract_strided_slice %198 {offsets = [24, 0], sizes = [1, 32], strides = [1, 1]} : vector<32x32xf32> to vector<1x32xf32>
    %c24 = arith.constant 24 : index
    %c0_298 = arith.constant 0 : index
    %c0_299 = arith.constant 0 : index
    %321 = vector.load %arg8[%c24, %c0_298, %c0_299] : memref<32x32x1024xf32, #tpu.memory_space<vmem>>, vector<1x32x1024xf32>
    %322 = vector.shape_cast %321 : vector<1x32x1024xf32> to vector<32x1024xf32>
    %cst_300 = arith.constant dense<0.000000e+00> : vector<1x1024xf32>
    %323 = tpu.matmul %320, %322, %cst_300 {dimension_numbers = #tpu.dot_dimension_numbers<[1], [0], [0], [1], [0, 0, 1, 1], [], []>} : vector<1x32xf32>, vector<32x1024xf32>, vector<1x1024xf32> -> vector<1x1024xf32>
    %324 = arith.addf %319, %323 : vector<1x1024xf32>
    %325 = vector.extract_strided_slice %198 {offsets = [25, 0], sizes = [1, 32], strides = [1, 1]} : vector<32x32xf32> to vector<1x32xf32>
    %c25 = arith.constant 25 : index
    %c0_301 = arith.constant 0 : index
    %c0_302 = arith.constant 0 : index
    %326 = vector.load %arg8[%c25, %c0_301, %c0_302] : memref<32x32x1024xf32, #tpu.memory_space<vmem>>, vector<1x32x1024xf32>
    %327 = vector.shape_cast %326 : vector<1x32x1024xf32> to vector<32x1024xf32>
    %cst_303 = arith.constant dense<0.000000e+00> : vector<1x1024xf32>
    %328 = tpu.matmul %325, %327, %cst_303 {dimension_numbers = #tpu.dot_dimension_numbers<[1], [0], [0], [1], [0, 0, 1, 1], [], []>} : vector<1x32xf32>, vector<32x1024xf32>, vector<1x1024xf32> -> vector<1x1024xf32>
    %329 = arith.addf %324, %328 : vector<1x1024xf32>
    %330 = vector.extract_strided_slice %198 {offsets = [26, 0], sizes = [1, 32], strides = [1, 1]} : vector<32x32xf32> to vector<1x32xf32>
    %c26 = arith.constant 26 : index
    %c0_304 = arith.constant 0 : index
    %c0_305 = arith.constant 0 : index
    %331 = vector.load %arg8[%c26, %c0_304, %c0_305] : memref<32x32x1024xf32, #tpu.memory_space<vmem>>, vector<1x32x1024xf32>
    %332 = vector.shape_cast %331 : vector<1x32x1024xf32> to vector<32x1024xf32>
    %cst_306 = arith.constant dense<0.000000e+00> : vector<1x1024xf32>
    %333 = tpu.matmul %330, %332, %cst_306 {dimension_numbers = #tpu.dot_dimension_numbers<[1], [0], [0], [1], [0, 0, 1, 1], [], []>} : vector<1x32xf32>, vector<32x1024xf32>, vector<1x1024xf32> -> vector<1x1024xf32>
    %334 = arith.addf %329, %333 : vector<1x1024xf32>
    %335 = vector.extract_strided_slice %198 {offsets = [27, 0], sizes = [1, 32], strides = [1, 1]} : vector<32x32xf32> to vector<1x32xf32>
    %c27 = arith.constant 27 : index
    %c0_307 = arith.constant 0 : index
    %c0_308 = arith.constant 0 : index
    %336 = vector.load %arg8[%c27, %c0_307, %c0_308] : memref<32x32x1024xf32, #tpu.memory_space<vmem>>, vector<1x32x1024xf32>
    %337 = vector.shape_cast %336 : vector<1x32x1024xf32> to vector<32x1024xf32>
    %cst_309 = arith.constant dense<0.000000e+00> : vector<1x1024xf32>
    %338 = tpu.matmul %335, %337, %cst_309 {dimension_numbers = #tpu.dot_dimension_numbers<[1], [0], [0], [1], [0, 0, 1, 1], [], []>} : vector<1x32xf32>, vector<32x1024xf32>, vector<1x1024xf32> -> vector<1x1024xf32>
    %339 = arith.addf %334, %338 : vector<1x1024xf32>
    %340 = vector.extract_strided_slice %198 {offsets = [28, 0], sizes = [1, 32], strides = [1, 1]} : vector<32x32xf32> to vector<1x32xf32>
    %c28 = arith.constant 28 : index
    %c0_310 = arith.constant 0 : index
    %c0_311 = arith.constant 0 : index
    %341 = vector.load %arg8[%c28, %c0_310, %c0_311] : memref<32x32x1024xf32, #tpu.memory_space<vmem>>, vector<1x32x1024xf32>
    %342 = vector.shape_cast %341 : vector<1x32x1024xf32> to vector<32x1024xf32>
    %cst_312 = arith.constant dense<0.000000e+00> : vector<1x1024xf32>
    %343 = tpu.matmul %340, %342, %cst_312 {dimension_numbers = #tpu.dot_dimension_numbers<[1], [0], [0], [1], [0, 0, 1, 1], [], []>} : vector<1x32xf32>, vector<32x1024xf32>, vector<1x1024xf32> -> vector<1x1024xf32>
    %344 = arith.addf %339, %343 : vector<1x1024xf32>
    %345 = vector.extract_strided_slice %198 {offsets = [29, 0], sizes = [1, 32], strides = [1, 1]} : vector<32x32xf32> to vector<1x32xf32>
    %c29 = arith.constant 29 : index
    %c0_313 = arith.constant 0 : index
    %c0_314 = arith.constant 0 : index
    %346 = vector.load %arg8[%c29, %c0_313, %c0_314] : memref<32x32x1024xf32, #tpu.memory_space<vmem>>, vector<1x32x1024xf32>
    %347 = vector.shape_cast %346 : vector<1x32x1024xf32> to vector<32x1024xf32>
    %cst_315 = arith.constant dense<0.000000e+00> : vector<1x1024xf32>
    %348 = tpu.matmul %345, %347, %cst_315 {dimension_numbers = #tpu.dot_dimension_numbers<[1], [0], [0], [1], [0, 0, 1, 1], [], []>} : vector<1x32xf32>, vector<32x1024xf32>, vector<1x1024xf32> -> vector<1x1024xf32>
    %349 = arith.addf %344, %348 : vector<1x1024xf32>
    %350 = vector.extract_strided_slice %198 {offsets = [30, 0], sizes = [1, 32], strides = [1, 1]} : vector<32x32xf32> to vector<1x32xf32>
    %c30 = arith.constant 30 : index
    %c0_316 = arith.constant 0 : index
    %c0_317 = arith.constant 0 : index
    %351 = vector.load %arg8[%c30, %c0_316, %c0_317] : memref<32x32x1024xf32, #tpu.memory_space<vmem>>, vector<1x32x1024xf32>
    %352 = vector.shape_cast %351 : vector<1x32x1024xf32> to vector<32x1024xf32>
    %cst_318 = arith.constant dense<0.000000e+00> : vector<1x1024xf32>
    %353 = tpu.matmul %350, %352, %cst_318 {dimension_numbers = #tpu.dot_dimension_numbers<[1], [0], [0], [1], [0, 0, 1, 1], [], []>} : vector<1x32xf32>, vector<32x1024xf32>, vector<1x1024xf32> -> vector<1x1024xf32>
    %354 = arith.addf %349, %353 : vector<1x1024xf32>
    %355 = vector.extract_strided_slice %198 {offsets = [31, 0], sizes = [1, 32], strides = [1, 1]} : vector<32x32xf32> to vector<1x32xf32>
    %c31 = arith.constant 31 : index
    %c0_319 = arith.constant 0 : index
    %c0_320 = arith.constant 0 : index
    %356 = vector.load %arg8[%c31, %c0_319, %c0_320] : memref<32x32x1024xf32, #tpu.memory_space<vmem>>, vector<1x32x1024xf32>
    %357 = vector.shape_cast %356 : vector<1x32x1024xf32> to vector<32x1024xf32>
    %cst_321 = arith.constant dense<0.000000e+00> : vector<1x1024xf32>
    %358 = tpu.matmul %355, %357, %cst_321 {dimension_numbers = #tpu.dot_dimension_numbers<[1], [0], [0], [1], [0, 0, 1, 1], [], []>} : vector<1x32xf32>, vector<32x1024xf32>, vector<1x1024xf32> -> vector<1x1024xf32>
    %359 = arith.addf %354, %358 : vector<1x1024xf32>
    %c0_322 = arith.constant 0 : index
    %c0_323 = arith.constant 0 : index
    %c0_324 = arith.constant 0 : index
    %360 = vector.load %arg10[%c0_322, %c0_323, %c0_324] : memref<1x1x1024xf32, #tpu.memory_space<vmem>>, vector<1x1x1024xf32>
    %361 = vector.shape_cast %360 : vector<1x1x1024xf32> to vector<1x1024xf32>
    %362 = vector.shape_cast %359 : vector<1x1024xf32> to vector<1x1x1024xf32>
    tpu.vector_store %arg10[%c0_322, %c0_323, %c0_324], %362 {strides = array<i32>} : memref<1x1x1024xf32, #tpu.memory_space<vmem>>, vector<1x1x1024xf32>,
    return
  }
  func.func @transform_0(%arg0: i32) -> (i32, i32, i32, i32) {
    %c0_i32 = arith.constant 0 : i32
    %c0_i32_0 = arith.constant 0 : i32
    %c0_i32_1 = arith.constant 0 : i32
    %c0_i32_2 = arith.constant 0 : i32
    return %arg0, %c0_i32, %c0_i32_0, %c0_i32_1 : i32, i32, i32, i32
  }
  func.func @transform_1(%arg0: i32) -> (i32, i32, i32) {
    %c0_i32 = arith.constant 0 : i32
    %c0_i32_0 = arith.constant 0 : i32
    %c0_i32_1 = arith.constant 0 : i32
    %c0_i32_2 = arith.constant 0 : i32
    return %c0_i32, %c0_i32_0, %c0_i32_1 : i32, i32, i32
  }
  func.func @transform_2(%arg0: i32) -> (i32, i32) {
    %c0_i32 = arith.constant 0 : i32
    %c0_i32_0 = arith.constant 0 : i32
    %c0_i32_1 = arith.constant 0 : i32
    return %c0_i32, %c0_i32_0 : i32, i32
  }
  func.func @transform_3(%arg0: i32) -> (i32, i32, i32) {
    %c0_i32 = arith.constant 0 : i32
    %c0_i32_0 = arith.constant 0 : i32
    %c0_i32_1 = arith.constant 0 : i32
    %c0_i32_2 = arith.constant 0 : i32
    return %c0_i32, %c0_i32_0, %c0_i32_1 : i32, i32, i32
  }
  func.func @transform_4(%arg0: i32) -> (i32, i32) {
    %c0_i32 = arith.constant 0 : i32
    %c0_i32_0 = arith.constant 0 : i32
    %c0_i32_1 = arith.constant 0 : i32
    return %c0_i32, %c0_i32_0 : i32, i32
  }
  func.func @transform_5(%arg0: i32) -> (i32, i32, i32) {
    %c0_i32 = arith.constant 0 : i32
    %c0_i32_0 = arith.constant 0 : i32
    %c0_i32_1 = arith.constant 0 : i32
    %c0_i32_2 = arith.constant 0 : i32
    return %c0_i32, %c0_i32_0, %c0_i32_1 : i32, i32, i32
  }
  func.func @transform_6(%arg0: i32) -> (i32, i32) {
    %c0_i32 = arith.constant 0 : i32
    %c0_i32_0 = arith.constant 0 : i32
    %c0_i32_1 = arith.constant 0 : i32
    return %c0_i32, %c0_i32_0 : i32, i32
  }
  func.func @transform_7(%arg0: i32) -> (i32, i32, i32) {
    %c0_i32 = arith.constant 0 : i32
    %c0_i32_0 = arith.constant 0 : i32
    %c0_i32_1 = arith.constant 0 : i32
    %c0_i32_2 = arith.constant 0 : i32
    return %c0_i32, %c0_i32_0, %c0_i32_1 : i32, i32, i32
  }
  func.func @transform_8(%arg0: i32) -> (i32, i32) {
    %c0_i32 = arith.constant 0 : i32
    %c0_i32_0 = arith.constant 0 : i32
    %c0_i32_1 = arith.constant 0 : i32
    return %c0_i32, %c0_i32_0 : i32, i32
  }
  func.func @transform_9(%arg0: i32) -> (i32, i32, i32) {
    %c0_i32 = arith.constant 0 : i32
    %c0_i32_0 = arith.constant 0 : i32
    %c0_i32_1 = arith.constant 0 : i32
    return %arg0, %c0_i32, %c0_i32_0 : i32, i32, i32
  }
}

</mosaic_0001>

<bundles_post_ra>
// kernel: cnn_forward.1
= control target key start
LH: loop header
LB: loop body
LE: loop exit
PB: predicated region body
PF: predicated region fallthrough
CT: control target
= control target key end

     0   :  { %14 = vsyncpa [#allocation5], 0  ;;  %s24995_s0 = inlined_call_operand.vmem [shape: f32[2,10,10,256], index: 0, kind: input, shape index: {}]   ;;  %s24996_s1 = inlined_call_operand.hbm [shape: f32[9,256,128], index: 1, kind: input, shape index: {}]   ;;  %s24997_s2 = inlined_call_operand.hbm [shape: f32[1,128], index: 2, kind: input, shape index: {}]   ;;  %s24998_s3 = inlined_call_operand.vmem [shape: f32[9,128,64], index: 3, kind: input, shape index: {}]   ;;  %s24999_s4 = inlined_call_operand.hbm [shape: f32[1,64], index: 4, kind: input, shape index: {}]   ;;  %s25000_s5 = inlined_call_operand.vmem [shape: f32[9,64,32], index: 5, kind: input, shape index: {}]   ;;  %s25001_s6 = inlined_call_operand.hbm [shape: f32[1,32], index: 6, kind: input, shape index: {}]   ;;  %s25002_s7 = inlined_call_operand.hbm [shape: f32[32,32,1024], index: 7, kind: input, shape index: {}]   ;;  %s25003_s8 = inlined_call_operand.hbm [shape: f32[1,1024], index: 8, kind: input, shape index: {}]   ;;  %s25004_s9 = inlined_call_operand.vmem [shape: f32[2,1,1024], index: 9, kind: output, shape index: {}]  }
   0x1   :  { %15 = vsyncpa [#allocation7], 0 }
   0x2   :  { %16 = vsyncpa [#allocation10], 0 }
   0x3   :  { %17 = vsyncpa [#allocation13], 0  ;;  %s22016_s30 = smov 0  }
   0x4 LB: > { %s21954_s10 = smov [#allocation6]   ;;  %s22022_s12 = sadd.s32 4294967295, %s21952_s30   ;;  %s21952_s30 = sphi %s22016_s30, %s23_s30  }
   0x5   : > { %s274_s11 = sshll.u32 %s21954_s10, 4  ;;  %p17650_p0 = scmp.ge.s32.totalorder %s21952_s30, 1  ;;  %s22027_s11 = int_to_ptr.vmem [resolvable:$true] %s274_s11 }
   0x6   : > { %p248_p1 = scmp.lt.s32.totalorder %s21952_s30, 3  ;;  %p25005_p2 = scmp.eq.s32.totalorder %s22022_s12, 0 }
   0x7   : > { %s21955_s14 = smov [#allocation9]   ;;  %s21956_s16 = smov [#allocation4]  }
   0x8   : > { %p22029_p3 = pnand %p17650_p0, %p248_p1  ;;  %s302_s15 = sshll.u32 %s21955_s14, 4  ;;  %s22035_s15 = int_to_ptr.vmem [resolvable:$true] %s302_s15 }
   0x9   : > { %s260_s17 = sshll.u32 %s21956_s16, 4  ;;  %s21957_s19 = smov [#allocation8]   ;;  %s22043_s17 = int_to_ptr.vmem [resolvable:$true] %s260_s17 }
   0xa   : > { %s25007_s13 = scalar_select %p22029_p3, 1, 0 }
   0xb   : > { %p21703_p4 = pneg %p22029_p3  ;;  %s22045_s20 = sshll.u32 %s21957_s19, 4  ;;  %s289_s20 = int_to_ptr.vmem [resolvable:$true] %s22045_s20 }
   0xc   : > { %s21762_s23 = scalar_lea.hbm %s24997_s2, 16 }
   0xd   : > { %p22039_p5 = pnand %p25005_p2, %p21703_p4  ;;  %p21763_p6 = scmp.ne.s32.totalorder %s24997_s2, %s21762_s23 }
   0xe   : > { %p21769_p10 = scmp.lt.u32.totalorder %s21762_s23, %s24997_s2 }
   0xf   : > { %p22055_p7 = pneg %p22039_p5 }
  0x11   : > { %p21765_p8 = pnand %p22055_p7, %p21763_p6 }
  0x13   : > { %p21766_p9 = pneg %p21765_p8 }
  0x15   : > { %p21771_p11 = pnand %p21769_p10, %p21766_p9 }
  0x17   : > { %21774 = shalt.err (!%p21771_p11)
}
  0x18   : > { %s21775_s29 = scalar_lea.vmem %s22027_s11, 16  ;;  %s21782_s10 = scalar_lea.vmem %s22027_s11, 32 }
  0x19   : > { %p21776_p12 = scmp.ne.s32.totalorder %s22027_s11, %s21775_s29  ;;  %p21783_p1 = scmp.lt.s32.totalorder %s22027_s11, %s22027_s11 }
  0x1a   : > { %p21784_p4 = scmp.lt.s32.totalorder %s21782_s10, %s21775_s29 }
  0x1b   : > { %p21778_p13 = pnand %p21776_p12, %p22055_p7 }
  0x1c   : > { %p21785_p6 = por %p21784_p4, %p21783_p1 }
  0x1d   : > { %p21779_p0 = pneg %p21778_p13 }
  0x1f   : > { %p21786_p8 = pnand %p21785_p6, %p21779_p0 }
  0x21   : > { %21789 = shalt.err (!%p21786_p8)
}
  0x22   : > { %21709 = dma.hbm_to_vmem [thread:$0]  (!%p22039_p5), %s24997_s2, 16, %s22027_s11, [#allocation7]  }
  0x23   : > { %s21790_s22 = scalar_lea.hbm %s25001_s6, 16 }
  0x24   : > { %p21791_p9 = scmp.ne.s32.totalorder %s25001_s6, %s21790_s22  ;;  %p21797_p12 = scmp.lt.u32.totalorder %s21790_s22, %s25001_s6 }
  0x26   : > { %p21793_p10 = pnand %p21791_p9, %p22055_p7 }
  0x28   : > { %p21794_p11 = pneg %p21793_p10 }
  0x2a   : > { %p21799_p13 = pnand %p21797_p12, %p21794_p11 }
  0x2c   : > { %21802 = shalt.err (!%p21799_p13)
}
  0x2d   : > { %s21803_s11 = scalar_lea.vmem %s22035_s15, 16  ;;  %s21810_s28 = scalar_lea.vmem %s22035_s15, 32 }
  0x2e   : > { %p21804_p0 = scmp.ne.s32.totalorder %s22035_s15, %s21803_s11  ;;  %p21811_p6 = scmp.lt.s32.totalorder %s22035_s15, %s22035_s15 }
  0x2f   : > { %p21812_p8 = scmp.lt.s32.totalorder %s21810_s28, %s21803_s11 }
  0x30   : > { %p21806_p1 = pnand %p21804_p0, %p22055_p7 }
  0x31   : > { %p21813_p9 = por %p21812_p8, %p21811_p6 }
  0x32   : > { %p21807_p4 = pneg %p21806_p1 }
  0x34   : > { %p21814_p10 = pnand %p21813_p9, %p21807_p4 }
  0x36   : > { %21817 = shalt.err (!%p21814_p10)
}
  0x37   : > { %21715 = dma.hbm_to_vmem [thread:$0]  (!%p22039_p5), %s25001_s6, 16, %s22035_s15, [#allocation10]  }
  0x38   : > { %s21818_s19 = scalar_lea.hbm %s24996_s1, 36864 }
  0x39   : > { %p21819_p11 = scmp.ne.s32.totalorder %s24996_s1, %s21818_s19  ;;  %p21825_p0 = scmp.lt.u32.totalorder %s21818_s19, %s24996_s1 }
  0x3b   : > { %p21821_p12 = pnand %p21819_p11, %p22055_p7 }
  0x3d   : > { %p21822_p13 = pneg %p21821_p12 }
  0x3f   : > { %p21827_p1 = pnand %p21825_p0, %p21822_p13 }
  0x41   : > { %21830 = shalt.err (!%p21827_p1)
}
  0x42   : > { %s21831_s15 = scalar_lea.vmem %s22043_s17, 36864  ;;  %p21839_p9 = scmp.lt.s32.totalorder %s22043_s17, %s22043_s17 }
  0x43   : > { %p21832_p4 = scmp.ne.s32.totalorder %s22043_s17, %s21831_s15  ;;  %p21840_p10 = scmp.lt.s32.totalorder %s21831_s15, %s21831_s15 }
  0x45   : > { %p21834_p6 = pnand %p21832_p4, %p22055_p7  ;;  %p21841_p11 = por %p21840_p10, %p21839_p9 }
  0x47   : > { %p21835_p8 = pneg %p21834_p6 }
  0x49   : > { %p21842_p12 = pnand %p21841_p11, %p21835_p8 }
  0x4b   : > { %21845 = shalt.err (!%p21842_p12)
}
  0x4c   : > { %s21958_s25 = smov 128   ;;  %s21959_s27 = smov 8  }
  0x4d   : > { %21706 = dma.hbm_to_vmem [thread:$0]  (!%p22039_p5), %s24996_s1, 36864, %s22043_s17, [#allocation5], %s21958_s25, %s21958_s25, %s21959_s27  }
  0x4e   : > { %s21846_s14 = scalar_lea.hbm %s24999_s4, 16 }
  0x4f   : > { %p21847_p13 = scmp.ne.s32.totalorder %s24999_s4, %s21846_s14  ;;  %p21853_p4 = scmp.lt.u32.totalorder %s21846_s14, %s24999_s4 }
  0x51   : > { %p21849_p0 = pnand %p21847_p13, %p22055_p7 }
  0x53   : > { %p21850_p1 = pneg %p21849_p0 }
  0x55   : > { %p21855_p6 = pnand %p21853_p4, %p21850_p1 }
  0x57   : > { %21858 = shalt.err (!%p21855_p6)
}
  0x58   : > { %s21859_s23 = scalar_lea.vmem %s289_s20, 16  ;;  %s21866_s17 = scalar_lea.vmem %s289_s20, 32 }
  0x59   : > { %p21860_p8 = scmp.ne.s32.totalorder %s289_s20, %s21859_s23  ;;  %p21867_p11 = scmp.lt.s32.totalorder %s289_s20, %s289_s20 }
  0x5a   : > { %p21868_p12 = scmp.lt.s32.totalorder %s21866_s17, %s21859_s23 }
  0x5b   : > { %p21862_p9 = pnand %p21860_p8, %p22055_p7 }
  0x5c   : > { %p21869_p2 = por %p21868_p12, %p21867_p11 }
  0x5d   : > { %p21863_p10 = pneg %p21862_p9 }
  0x5f   : > { %p21870_p3 = pnand %p21869_p2, %p21863_p10 }
  0x61   : > { %21873 = shalt.err (!%p21870_p3)
}
  0x62   : > { %21712 = dma.hbm_to_vmem [thread:$0]  (!%p22039_p5), %s24999_s4, 16, %s289_s20, [#allocation7]  }
  0x63   : > { %s21960_s25 = smov [#allocation11]   ;;  %s21874_s29 = scalar_lea.hbm %s25002_s7, 131072 }
  0x64   : > { %s312_s27 = sshll.u32 %s21960_s25, 4  ;;  %p21875_p13 = scmp.ne.s32.totalorder %s25002_s7, %s21874_s29  ;;  %s313_s27 = int_to_ptr.vmem [resolvable:$true] %s312_s27 }
  0x65   : > { %p21881_p0 = scmp.lt.u32.totalorder %s21874_s29, %s25002_s7 }
  0x66   : > { %p21877_p2 = pnand %p21875_p13, %p22055_p7 }
  0x68   : > { %p21878_p3 = pneg %p21877_p2 }
  0x6a   : > { %p21883_p1 = pnand %p21881_p0, %p21878_p3 }
  0x6c   : > { %21886 = shalt.err (!%p21883_p1)
}
  0x6d   : > { %s21887_s20 = scalar_lea.vmem %s313_s27, 131072  ;;  %p21895_p9 = scmp.lt.s32.totalorder %s313_s27, %s313_s27 }
  0x6e   : > { %p21888_p4 = scmp.ne.s32.totalorder %s313_s27, %s21887_s20  ;;  %p21896_p10 = scmp.lt.s32.totalorder %s21887_s20, %s21887_s20 }
  0x70   : > { %p21890_p6 = pnand %p21888_p4, %p22055_p7  ;;  %p21897_p11 = por %p21896_p10, %p21895_p9 }
  0x72   : > { %p21891_p8 = pneg %p21890_p6 }
  0x74   : > { %p21898_p12 = pnand %p21897_p11, %p21891_p8 }
  0x76   : > { %21901 = shalt.err (!%p21898_p12)
}
  0x77   : > { %s21961_s21 = smov 1024   ;;  %s21962_s22 = smov 64  }
  0x78   : > { %21718 = dma.hbm_to_vmem [thread:$0]  (!%p22039_p5), %s25002_s7, 131072, %s313_s27, [#allocation10], %s21961_s21, %s21961_s21, %s21962_s22  }
  0x79   : > { %s21963_s24 = smov [#allocation12]   ;;  %s21902_s28 = scalar_lea.hbm %s25003_s8, 128 }
  0x7a   : > { %s326_s15 = sshll.u32 %s21963_s24, 4  ;;  %p21903_p13 = scmp.ne.s32.totalorder %s25003_s8, %s21902_s28  ;;  %s327_s15 = int_to_ptr.vmem [resolvable:$true] %s326_s15 }
  0x7b   : > { %p21909_p0 = scmp.lt.u32.totalorder %s21902_s28, %s25003_s8 }
  0x7c   : > { %p21905_p2 = pnand %p21903_p13, %p22055_p7 }
  0x7e   : > { %p21906_p3 = pneg %p21905_p2 }
  0x80   : > { %p21911_p1 = pnand %p21909_p0, %p21906_p3 }
  0x82   : > { %21914 = shalt.err (!%p21911_p1)
}
  0x83   : > { %s21915_s27 = scalar_lea.vmem %s327_s15, 128  ;;  %p21923_p9 = scmp.lt.s32.totalorder %s327_s15, %s327_s15 }
  0x84   : > { %p21916_p4 = scmp.ne.s32.totalorder %s327_s15, %s21915_s27  ;;  %p21924_p10 = scmp.lt.s32.totalorder %s21915_s27, %s21915_s27 }
  0x86   : > { %p21918_p6 = pnand %p21916_p4, %p22055_p7  ;;  %p21925_p11 = por %p21924_p10, %p21923_p9 }
  0x88   : > { %p21919_p8 = pneg %p21918_p6 }
  0x8a   : > { %p21926_p12 = pnand %p21925_p11, %p21919_p8 }
  0x8c   : > { %21929 = shalt.err (!%p21926_p12)
}
  0x8d   : > { %21721 = dma.hbm_to_vmem [thread:$0]  (!%p22039_p5), %s25003_s8, 128, %s327_s15, [#allocation13]  }
  0x8e   : > { %p25010_p13 = scmp.ne.s32.totalorder %s25007_s13, 0 }
  0x8f   : > { %p25011_p2 = scmp.eq.s32.totalorder (!%p25010_p13), %s22022_s12, 0 }
  0x90   : > { %347 = sbr.rel (%p25010_p13) target bundleno = 2510 (0x9ce), region = 56 }
  0x97   : > { %21935 = dma.done.wait (%p25011_p2), [#allocation5], 36864   ;;  %p25012_p7 = pmov %p25011_p2 }
  0x98   : > { %p25013_p3 = pmov %p25011_p2 }
  0x99   : > { %21937 = vsyncadd (%p25012_p7), [#allocation5], 4294930432 }
  0x9a   : > { %21939 = dma.done.wait (%p25013_p3), [#allocation7], 32   ;;  %p25014_p0 = pmov %p25011_p2 }
  0x9c   : > { %21941 = vsyncadd (%p25014_p0), [#allocation7], 4294967264  ;;  %p25015_p1 = pmov %p25014_p0 }
  0x9d   : > { %p25016_p5 = pmov %p25014_p0 }
  0x9e   : > { %21943 = dma.done.wait (%p25015_p1), [#allocation10], 131088  }
  0x9f   : > { %21945 = vsyncadd (%p25016_p5), [#allocation10], 4294836208  ;;  %p25017_p4 = pmov %p25014_p0 }
  0xa0   : > { %p25018_p6 = pmov %p25014_p0 }
  0xa1   : > { %21947 = dma.done.wait (%p25017_p4), [#allocation13], 128  }
  0xa2   : > { %21949 = vsyncadd (%p25018_p6), [#allocation13], 4294967168  ;;  %v451_v0 = vld [vmem:[#allocation4 + $0x80] sm:$0xff]  ;;  %v452_v1 = vld [vmem:[#allocation4 + $0x88] sm:$0xff]  ;;  %p402_p8 = scmp.lt.s32.totalorder %s22022_s12, 1  ;;  %vm644_vm0 = vcmask 1046528  }
  0xa3   : > { %v435_v2 = vld [vmem:[#allocation4] sm:$0xff]  ;;  %v19774_v3 = vpack.c.bf16 %v452_v1, %v451_v0  ;;  %v436_v4 = vld [vmem:[#allocation4 + $0x8] sm:$0xff]  ;;  %v453_v11 = vld [vmem:[#allocation4 + $0x90] sm:$0xff]  ;;  %vm919_vm1 = vcmask 1045504   ;;  %vm3847_vm2 = vcmask 523264   ;;  %vm3849_vm3 = vcmask 517120  }
  0xa4   : > { %v726_v5 = vld [vmem:[#allocation4 + $0x180] sm:$0xff]  ;;  %v727_v6 = vld [vmem:[#allocation4 + $0x188] sm:$0xff]  ;;  %v19776_v7 = vpack.c.bf16 %v436_v4, %v435_v2  ;;  %v454_v13 = vld [vmem:[#allocation4 + $0x98] sm:$0xff]  ;;  %s25043_s12 = smov (!%p402_p8, %s22022_s12), 1  ;;  %vm5438_vm4 = vcmask 261120  }
  0xa5   : > { %v19806_v8 = vpack.c.bf16 %v727_v6, %v726_v5  ;;  %v710_v9 = vld [vmem:[#allocation4 + $0x100] sm:$0xff]  ;;  %v711_v10 = vld [vmem:[#allocation4 + $0x108] sm:$0xff]  ;;  %19775 = vmatprep.subr.bf16.mxu0 %v19774_v3  ;;  %v437_v14 = vld [vmem:[#allocation4 + $0x10] sm:$0xff]  ;;  %v19778_v16 = vpack.c.bf16 %v454_v13, %v453_v11  ;;  %s21678_s13 = smul.u32 320, %s25043_s12  ;;  %s17666_s20 = sshll.u32 %s25043_s12, 3 }
  0xa6   : > { %v19808_v12 = vpack.c.bf16 %v711_v10, %v710_v9  ;;  %v438_v15 = vld [vmem:[#allocation4 + $0x18] sm:$0xff]  ;;  %19777 = vmatpush3.bf16.msra.mxu0 %v19776_v7  ;;  %v728_v18 = vld [vmem:[#allocation4 + $0x190] sm:$0xff]  ;;  %v455_v23 = vld [vmem:[#allocation4 + $0xa0] sm:$0xff]  ;;  %s410_s26 = scalar_lea.vmem %s25004_s9, %s17666_s20 }
  0xa7   : > { %19807 = vmatprep.subr.bf16.mxu1 %v19806_v8  ;;  %v19780_v17 = vpack.c.bf16 %v438_v15, %v437_v14  ;;  %v729_v19 = vld [vmem:[#allocation4 + $0x198] sm:$0xff]  ;;  %v712_v20 = vld [vmem:[#allocation4 + $0x110] sm:$0xff]  ;;  %v456_v24 = vld [vmem:[#allocation4 + $0xa8] sm:$0xff]  ;;  %19779 = vmatprep.subr.bf16.mxu0 %v19778_v16  ;;  %s22207_s21 = scalar_lea.vmem %s24995_s0, %s21678_s13 }
  0xa8   : > { %19809 = vmatpush3.bf16.msra.mxu1 %v19808_v12  ;;  %v19810_v21 = vpack.c.bf16 %v729_v19, %v728_v18  ;;  %v713_v22 = vld [vmem:[#allocation4 + $0x118] sm:$0xff]  ;;  %v19782_v26 = vpack.c.bf16 %v456_v24, %v455_v23  ;;  %v439_v27 = vld [vmem:[#allocation4 + $0x20] sm:$0xff]  ;;  %v440_v28 = vld [vmem:[#allocation4 + $0x28] sm:$0xff] }
  0xa9   : > { %v19812_v25 = vpack.c.bf16 %v713_v22, %v712_v20  ;;  %v730_v29 = vld [vmem:[#allocation4 + $0x1a0] sm:$0xff]  ;;  %v731_v30 = vld [vmem:[#allocation4 + $0x1a8] sm:$0xff]  ;;  %v19784_v33 = vpack.c.bf16 %v440_v28, %v439_v27  ;;  %v457_v35 = vld [vmem:[#allocation4 + $0xb0] sm:$0xff] }
  0xaa   : > { %19811 = vmatprep.subr.bf16.mxu1 %v19810_v21  ;;  %v714_v31 = vld [vmem:[#allocation4 + $0x120] sm:$0xff]  ;;  %v715_v32 = vld [vmem:[#allocation4 + $0x128] sm:$0xff]  ;;  %19781 = vmatpush3.bf16.msra.mxu0 %v19780_v17  ;;  %v19814_v34 = vpack.c.bf16 %v731_v30, %v730_v29  ;;  %v458_v36 = vld [vmem:[#allocation4 + $0xb8] sm:$0xff] }
  0xab   : > { %v441_v37 = vld [vmem:[#allocation4 + $0x30] sm:$0xff]  ;;  %19783 = vmatprep.subr.bf16.mxu0 %v19782_v26  ;;  %v19816_v38 = vpack.c.bf16 %v715_v32, %v714_v31  ;;  %v19786_v39 = vpack.c.bf16 %v458_v36, %v457_v35  ;;  %v442_v40 = vld [vmem:[#allocation4 + $0x38] sm:$0xff]  ;;  %v459_v46 = vld [vmem:[#allocation4 + $0xc0] sm:$0xff] }
  0xac   : > { %19813 = vmatpush3.bf16.msra.mxu1 %v19812_v25  ;;  %v732_v41 = vld [vmem:[#allocation4 + $0x1b0] sm:$0xff]  ;;  %v733_v42 = vld [vmem:[#allocation4 + $0x1b8] sm:$0xff]  ;;  %v460_v47 = vld [vmem:[#allocation4 + $0xc8] sm:$0xff]  ;;  %v19788_v48 = vpack.c.bf16 %v442_v40, %v441_v37 }
  0xad   : > { %19815 = vmatprep.subr.bf16.mxu1 %v19814_v34  ;;  %v19818_v43 = vpack.c.bf16 %v733_v42, %v732_v41  ;;  %v716_v44 = vld [vmem:[#allocation4 + $0x130] sm:$0xff]  ;;  %v717_v45 = vld [vmem:[#allocation4 + $0x138] sm:$0xff]  ;;  %v734_v49 = vld [vmem:[#allocation4 + $0x1c0] sm:$0xff]  ;;  %v19790_v52 = vpack.c.bf16 %v460_v47, %v459_v46 }
  0xae   : > { %19785 = vmatpush3.bf16.msra.mxu0 %v19784_v33  ;;  %v735_v50 = vld [vmem:[#allocation4 + $0x1c8] sm:$0xff]  ;;  %v19820_v51 = vpack.c.bf16 %v717_v45, %v716_v44  ;;  %v443_v53 = vld [vmem:[#allocation4 + $0x40] sm:$0xff]  ;;  %v461_v58 = vld [vmem:[#allocation4 + $0xd0] sm:$0xff] }
  0xaf   : > { %19787 = vmatprep.subr.bf16.mxu0 %v19786_v39  ;;  %v444_v54 = vld [vmem:[#allocation4 + $0x48] sm:$0xff]  ;;  %v718_v55 = vld [vmem:[#allocation4 + $0x140] sm:$0xff]  ;;  %v19822_v56 = vpack.c.bf16 %v735_v50, %v734_v49  ;;  %v462_v59 = vld [vmem:[#allocation4 + $0xd8] sm:$0xff] }
  0xb0   : > { %19817 = vmatpush3.bf16.msra.mxu1 %v19816_v38  ;;  %v719_v57 = vld [vmem:[#allocation4 + $0x148] sm:$0xff]  ;;  %v736_v60 = vld [vmem:[#allocation4 + $0x1d0] sm:$0xff]  ;;  %v737_v61 = vld [vmem:[#allocation4 + $0x1d8] sm:$0xff]  ;;  %v19792_v62 = vpack.c.bf16 %v444_v54, %v443_v53  ;;  %v19794_v0 = vpack.c.bf16 %v462_v59, %v461_v58 }
  0xb1   : > { %19819 = vmatprep.subr.bf16.mxu1 %v19818_v43  ;;  %v19824_v63 = vpack.c.bf16 %v719_v57, %v718_v55  ;;  %v445_v1 = vld [vmem:[#allocation4 + $0x50] sm:$0xff]  ;;  %v446_v2 = vld [vmem:[#allocation4 + $0x58] sm:$0xff]  ;;  %v19826_v4 = vpack.c.bf16 %v737_v61, %v736_v60  ;;  %v463_v6 = vld [vmem:[#allocation4 + $0xe0] sm:$0xff] }
  0xb2   : > { %19789 = vmatpush3.bf16.msra.mxu0 %v19788_v48  ;;  %v720_v3 = vld [vmem:[#allocation4 + $0x150] sm:$0xff]  ;;  %v721_v5 = vld [vmem:[#allocation4 + $0x158] sm:$0xff]  ;;  %v464_v7 = vld [vmem:[#allocation4 + $0xe8] sm:$0xff]  ;;  %v19796_v10 = vpack.c.bf16 %v446_v2, %v445_v1 }
  0xb3   : > { %19791 = vmatprep.subr.bf16.mxu0 %v19790_v52  ;;  %v738_v8 = vld [vmem:[#allocation4 + $0x1e0] sm:$0xff]  ;;  %v739_v9 = vld [vmem:[#allocation4 + $0x1e8] sm:$0xff]  ;;  %v19828_v13 = vpack.c.bf16 %v721_v5, %v720_v3  ;;  %v19798_v14 = vpack.c.bf16 %v464_v7, %v463_v6  ;;  %v465_v19 = vld [vmem:[#allocation4 + $0xf0] sm:$0xff] }
  0xb4   : > { %19821 = vmatpush3.bf16.msra.mxu1 %v19820_v51  ;;  %v447_v11 = vld [vmem:[#allocation4 + $0x60] sm:$0xff]  ;;  %v420_v12 = vld [vmem:[%s22207_s21 + $0x8] sm:$0xff]  ;;  %v19830_v18 = vpack.c.bf16 %v739_v9, %v738_v8  ;;  %v466_v20 = vld [vmem:[#allocation4 + $0xf8] sm:$0xff] }
  0xb5   : > { %19823 = vmatprep.subr.bf16.mxu1 %v19822_v56  ;;  %v448_v15 = vld [vmem:[#allocation4 + $0x68] sm:$0xff]  ;;  %v722_v16 = vld [vmem:[#allocation4 + $0x160] sm:$0xff]  ;;  %531 = vmatprep.mubr.f32.mxu0 %v420_v12  ;;  %v740_v22 = vld [vmem:[#allocation4 + $0x1f0] sm:$0xff]  ;;  %v19802_v31 = vpack.c.bf16 %v466_v20, %v465_v19 }
  0xb6   : > { %19793 = vmatpush3.bf16.msra.mxu0 %v19792_v62  ;;  %v723_v17 = vld [vmem:[#allocation4 + $0x168] sm:$0xff]  ;;  %v741_v23 = vld [vmem:[#allocation4 + $0x1f8] sm:$0xff]  ;;  %v19800_v26 = vpack.c.bf16 %v448_v15, %v447_v11  ;;  %v449_v27 = vld [vmem:[#allocation4 + $0x70] sm:$0xff] }
  0xb7   : > { %19795 = vmatprep.subr.bf16.mxu0 %v19794_v0  ;;  %v581_v21 = vld [vmem:[%s22207_s21 + $0x8] sm:$0xfe]  ;;  %v583_v24 = vld [vmem:[%s22207_s21 + $0x18] sm:$0x1]  ;;  %v19832_v30 = vpack.c.bf16 %v723_v17, %v722_v16  ;;  %v724_v32 = vld [vmem:[#allocation4 + $0x170] sm:$0xff]  ;;  %v19834_v35 = vpack.c.bf16 %v741_v23, %v740_v22 }
  0xb8   : > { %19825 = vmatpush3.bf16.msra.mxu1 %v19824_v63  ;;  %v648_v25 = vrot.slane %v581_v21, 1  ;;  %v450_v28 = vld [vmem:[#allocation4 + $0x78] sm:$0xff]  ;;  %v649_v29 = vrot.slane %v583_v24, 1  ;;  %v1001_v34 = vld [vmem:[#allocation4 + $0x280] sm:$0xff]  ;;  %v1002_v36 = vld [vmem:[#allocation4 + $0x288] sm:$0xff] }
  0xb9   : > { %19827 = vmatprep.subr.bf16.mxu1 %v19826_v4  ;;  %v725_v33 = vld [vmem:[#allocation4 + $0x178] sm:$0xff]  ;;  %v580_v38 = vld [vmem:[%s22207_s21] sm:$0xfe]  ;;  %v582_v39 = vld [vmem:[%s22207_s21 + $0x10] sm:$0x1]  ;;  %v19804_v42 = vpack.c.bf16 %v450_v28, %v449_v27  ;;  %v19838_v46 = vpack.c.bf16 %v1002_v36, %v1001_v34 }
  0xba   : > { %19797 = vmatpush3.bf16.msra.mxu0 %v19796_v10  ;;  %v650_v37 = vsel %vm644_vm0, %v648_v25, %v649_v29  ;;  %v1164_v40 = vld [vmem:[#allocation4 + $0x380] sm:$0xff]  ;;  %v1165_v41 = vld [vmem:[#allocation4 + $0x388] sm:$0xff]  ;;  %v587_v44 = vld [vmem:[%s22207_s21 + $0x38] sm:$0x1]  ;;  %v19836_v45 = vpack.c.bf16 %v725_v33, %v724_v32  ;;  %v645_v49 = vrot.slane %v580_v38, 1  ;;  %v646_v50 = vrot.slane %v582_v39, 1 }
  0xbb   : > { %19799 = vmatprep.subr.bf16.mxu0 %v19798_v14  ;;  %806 = vmatprep.mubr.f32.mxu1 %v650_v37  ;;  %v585_v43 = vld [vmem:[%s22207_s21 + $0x28] sm:$0xfe]  ;;  %v985_v47 = vld [vmem:[#allocation4 + $0x200] sm:$0xff]  ;;  %v19870_v53 = vpack.c.bf16 %v1165_v41, %v1164_v40  ;;  %v586_v56 = vld [vmem:[%s22207_s21 + $0x30] sm:$0x1]  ;;  %v655_v60 = vrot.slane %v587_v44, 1 }
  0xbc   : > { %19829 = vmatpush3.bf16.msra.mxu1 %v19828_v13  ;;  %v986_v48 = vld [vmem:[#allocation4 + $0x208] sm:$0xff]  ;;  %v1148_v51 = vld [vmem:[#allocation4 + $0x300] sm:$0xff]  ;;  %v1003_v57 = vld [vmem:[#allocation4 + $0x290] sm:$0xff]  ;;  %v654_v59 = vrot.slane %v585_v43, 1  ;;  %v647_v3 = vsel %vm644_vm0, %v645_v49, %v646_v50  ;;  %v652_v8 = vrot.slane %v586_v56, 1 }
  0xbd   : > { %19831 = vmatprep.subr.bf16.mxu1 %v19830_v18  ;;  %v419_v52 = vld [vmem:[%s22207_s21] sm:$0xff]  ;;  %v1149_v54 = vld [vmem:[#allocation4 + $0x308] sm:$0xff]  ;;  %v1004_v58 = vld [vmem:[#allocation4 + $0x298] sm:$0xff]  ;;  %v19840_v62 = vpack.c.bf16 %v986_v48, %v985_v47 }
  0xbe   : > { %19801 = vmatpush3.bf16.msra.mxu0 %v19800_v26  ;;  %v584_v55 = vld [vmem:[%s22207_s21 + $0x20] sm:$0xfe]  ;;  %v1166_v61 = vld [vmem:[#allocation4 + $0x390] sm:$0xff]  ;;  %v22221_v63 = vld [vmem:[%s22207_s21 + $0x28] sm:$0xff]  ;;  %v19872_v4 = vpack.c.bf16 %v1149_v54, %v1148_v51  ;;  %v19842_v11 = vpack.c.bf16 %v1004_v58, %v1003_v57  ;;  %v656_v15 = vsel %vm644_vm0, %v654_v59, %v655_v60 }
  0xbf   : > { %19803 = vmatprep.subr.bf16.mxu0 %v19802_v31  ;;  %v1167_v0 = vld [vmem:[#allocation4 + $0x398] sm:$0xff]  ;;  %v589_v1 = vld [vmem:[%s22207_s21 + $0x48] sm:$0xfe]  ;;  %v987_v5 = vld [vmem:[#allocation4 + $0x210] sm:$0xff]  ;;  %v651_v7 = vrot.slane %v584_v55, 1 }
  0xc0   : > { %19833 = vmatpush3.bf16.msra.mxu1 %v19832_v30  ;;  %v591_v2 = vld [vmem:[%s22207_s21 + $0x58] sm:$0x1]  ;;  %v1150_v9 = vld [vmem:[#allocation4 + $0x310] sm:$0xff]  ;;  %v22227_v10 = vld [vmem:[%s22207_s21 + $0x20] sm:$0xff]  ;;  %v19874_v16 = vpack.c.bf16 %v1167_v0, %v1166_v61  ;;  %v660_v19 = vrot.slane %v589_v1, 1 }
  0xc1   : > { %19835 = vmatprep.subr.bf16.mxu1 %v19834_v35  ;;  %v988_v6 = vld [vmem:[#allocation4 + $0x218] sm:$0xff]  ;;  %v588_v13 = vld [vmem:[%s22207_s21 + $0x40] sm:$0xfe]  ;;  %v590_v14 = vld [vmem:[%s22207_s21 + $0x50] sm:$0x1]  ;;  %v661_v20 = vrot.slane %v591_v2, 1  ;;  %v653_v27 = vsel %vm644_vm0, %v651_v7, %v652_v8 }
  0xc2   : > { %19805 = vmatpush3.bf16.msra.mxu0 %v19804_v42  ;;  %v1151_v12 = vld [vmem:[#allocation4 + $0x318] sm:$0xff]  ;;  %v1005_v17 = vld [vmem:[#allocation4 + $0x2a0] sm:$0xff]  ;;  %v1006_v18 = vld [vmem:[#allocation4 + $0x2a8] sm:$0xff]  ;;  %v19844_v22 = vpack.c.bf16 %v988_v6, %v987_v5  ;;  %v657_v30 = vrot.slane %v588_v13, 1  ;;  %v658_v31 = vrot.slane %v590_v14, 1 }
  0xc3   : > { %19839 = vmatprep.subr.bf16.mxu0 %v19838_v46  ;;  %v22232_v21 = vld [vmem:[#allocation4 + $0x220] sm:$0xff]  ;;  %v22235_v23 = vld [vmem:[%s22207_s21 + $0x48] sm:$0xff]  ;;  %v19876_v28 = vpack.c.bf16 %v1151_v12, %v1150_v9  ;;  %v595_v33 = vld [vmem:[%s22207_s21 + $0x78] sm:$0x1]  ;;  %v19846_v35 = vpack.c.bf16 %v1006_v18, %v1005_v17  ;;  %v662_v39 = vsel %vm644_vm0, %v660_v19, %v661_v20 }
  0xc4   : > { %19837 = vmatpush3.bf16.msra.mxu1 %v19836_v45  ;;  %v1168_v24 = vld [vmem:[#allocation4 + $0x3a0] sm:$0xff]  ;;  %v1169_v25 = vld [vmem:[#allocation4 + $0x3a8] sm:$0xff]  ;;  %v594_v38 = vld [vmem:[%s22207_s21 + $0x70] sm:$0x1]  ;;  %v667_v44 = vrot.slane %v595_v33, 1  ;;  %v659_v51 = vsel %vm644_vm0, %v657_v30, %v658_v31 }
  0xc5   : > { %19871 = vmatprep.subr.bf16.mxu1 %v19870_v53  ;;  %532 = vmatmul.mubr.f32.vlgmr.msra.gmra.mrb[0].mxu0 %v419_v52  ;;  %v593_v26 = vld [vmem:[%s22207_s21 + $0x68] sm:$0xfe]  ;;  %v1152_v32 = vld [vmem:[#allocation4 + $0x320] sm:$0xff]  ;;  %v19878_v40 = vpack.c.bf16 %v1169_v25, %v1168_v24  ;;  %v1007_v41 = vld [vmem:[#allocation4 + $0x2b0] sm:$0xff]  ;;  %v664_v54 = vrot.slane %v594_v38, 1 }
  0xc6   : > { %19841 = vmatpush3.bf16.msra.mxu0 %v19840_v62  ;;  %536 = vmatprep.mubr.f32.mxu0 %v22221_v63  ;;  %v990_v29 = vld [vmem:[#allocation4 + $0x228] sm:$0xff]  ;;  %v22242_v34 = vld [vmem:[%s22207_s21 + $0x40] sm:$0xff]  ;;  %v1008_v42 = vld [vmem:[#allocation4 + $0x2b8] sm:$0xff]  ;;  %v666_v43 = vrot.slane %v593_v26, 1 }
  0xc7   : > { %807 = vmatmul.mubr.f32.vlgmr.msra.gmra.mrb[0].mxu1 %v647_v3  ;;  %19843 = vmatprep.subr.bf16.mxu0 %v19842_v11  ;;  %v1153_v36 = vld [vmem:[#allocation4 + $0x328] sm:$0xff]  ;;  %v592_v37 = vld [vmem:[%s22207_s21 + $0x60] sm:$0xfe]  ;;  %v22248_v45 = vld [vmem:[#allocation4 + $0x230] sm:$0xff]  ;;  %v19848_v46 = vpack.c.bf16 %v990_v29, %v22232_v21  ;;  %v19850_v58 = vpack.c.bf16 %v1008_v42, %v1007_v41 }
  0xc8   : > { %19873 = vmatpush3.bf16.msra.mxu1 %v19872_v4  ;;  %811 = vmatprep.mubr.f32.mxu1 %v656_v15  ;;  %v22252_v47 = vld [vmem:[%s22207_s21 + $0x68] sm:$0xff]  ;;  %v992_v48 = vld [vmem:[#allocation4 + $0x238] sm:$0xff]  ;;  %v1170_v49 = vld [vmem:[#allocation4 + $0x3b0] sm:$0xff]  ;;  %v19880_v52 = vpack.c.bf16 %v1153_v36, %v1152_v32  ;;  %v663_v53 = vrot.slane %v592_v37, 1  ;;  %v668_v62 = vsel %vm644_vm0, %v666_v43, %v667_v44 }
  0xc9   : > { %537 = vmatmul.mubr.f32.gmra.mrb[2].mxu0 %v22227_v10  ;;  %19875 = vmatprep.subr.bf16.mxu1 %v19874_v16  ;;  %v1171_v50 = vld [vmem:[#allocation4 + $0x3b8] sm:$0xff]  ;;  %v597_v55 = vld [vmem:[%s22207_s21 + $0x88] sm:$0xfe]  ;;  %v22259_v57 = vld [vmem:[%s22207_s21 + $0x60] sm:$0xff]  ;;  %v19852_v6 = vpack.c.bf16 %v992_v48, %v22248_v45 }
  0xca   : > { %19845 = vmatpush3.bf16.msra.mxu0 %v19844_v22  ;;  %541 = vmatprep.mubr.f32.mxu0 %v22235_v23  ;;  %v599_v56 = vld [vmem:[%s22207_s21 + $0x98] sm:$0x1]  ;;  %v1154_v59 = vld [vmem:[#allocation4 + $0x330] sm:$0xff]  ;;  %v596_v61 = vld [vmem:[%s22207_s21 + $0x80] sm:$0xfe]  ;;  %v19882_v0 = vpack.c.bf16 %v1171_v50, %v1170_v49  ;;  %v672_v3 = vrot.slane %v597_v55, 1  ;;  %v665_v11 = vsel %vm644_vm0, %v663_v53, %v664_v54 }
  0xcb   : > { %812 = vmatmul.mubr.f32.gmra.mrb[2].mxu1 %v653_v27  ;;  %19847 = vmatprep.subr.bf16.mxu0 %v19846_v35  ;;  %v1155_v60 = vld [vmem:[#allocation4 + $0x338] sm:$0xff]  ;;  %v1009_v1 = vld [vmem:[#allocation4 + $0x2c0] sm:$0xff]  ;;  %v1010_v2 = vld [vmem:[#allocation4 + $0x2c8] sm:$0xff]  ;;  %v673_v4 = vrot.slane %v599_v56, 1  ;;  %v669_v15 = vrot.slane %v596_v61, 1 }
  0xcc   : > { %19877 = vmatpush3.bf16.msra.mxu1 %v19876_v28  ;;  %816 = vmatprep.mubr.f32.mxu1 %v662_v39  ;;  %v598_v5 = vld [vmem:[%s22207_s21 + $0x90] sm:$0x1]  ;;  %v22267_v7 = vld [vmem:[%s22207_s21 + $0x88] sm:$0xff]  ;;  %v1172_v8 = vld [vmem:[#allocation4 + $0x3c0] sm:$0xff]  ;;  %v19884_v12 = vpack.c.bf16 %v1155_v60, %v1154_v59  ;;  %v19854_v19 = vpack.c.bf16 %v1010_v2, %v1009_v1 }
  0xcd   : > { %542 = vmatmul.mubr.f32.gmra.mrb[4].mxu0 %v22242_v34  ;;  %19879 = vmatprep.subr.bf16.mxu1 %v19878_v40  ;;  %v1173_v9 = vld [vmem:[#allocation4 + $0x3c8] sm:$0xff]  ;;  %v993_v13 = vld [vmem:[#allocation4 + $0x240] sm:$0xff]  ;;  %v670_v16 = vrot.slane %v598_v5, 1  ;;  %v603_v22 = vld [vmem:[%s22207_s21 + $0xb8] sm:$0x1]  ;;  %v674_v24 = vsel %vm644_vm0, %v672_v3, %v673_v4 }
  0xce   : > { %19849 = vmatpush3.bf16.msra.mxu0 %v19848_v46  ;;  %546 = vmatprep.mubr.f32.mxu0 %v22252_v47  ;;  %v994_v14 = vld [vmem:[#allocation4 + $0x248] sm:$0xff]  ;;  %v1156_v17 = vld [vmem:[#allocation4 + $0x340] sm:$0xff]  ;;  %v19886_v25 = vpack.c.bf16 %v1173_v9, %v1172_v8  ;;  %v1011_v26 = vld [vmem:[#allocation4 + $0x2d0] sm:$0xff]  ;;  %v679_v29 = vrot.slane %v603_v22, 1 }
  0xcf   : > { %817 = vmatmul.mubr.f32.gmra.mrb[4].mxu1 %v659_v51  ;;  %19851 = vmatprep.subr.bf16.mxu0 %v19850_v58  ;;  %v22272_v18 = vld [vmem:[%s22207_s21 + $0x80] sm:$0xff]  ;;  %v1157_v20 = vld [vmem:[#allocation4 + $0x348] sm:$0xff]  ;;  %v1012_v27 = vld [vmem:[#allocation4 + $0x2d8] sm:$0xff]  ;;  %v19856_v31 = vpack.c.bf16 %v994_v14, %v993_v13  ;;  %v671_v36 = vsel %vm644_vm0, %v669_v15, %v670_v16 }
  0xd0   : > { %19881 = vmatpush3.bf16.msra.mxu1 %v19880_v52  ;;  %821 = vmatprep.mubr.f32.mxu1 %v668_v62  ;;  %v601_v21 = vld [vmem:[%s22207_s21 + $0xa8] sm:$0xfe]  ;;  %v600_v30 = vld [vmem:[%s22207_s21 + $0xa0] sm:$0xfe]  ;;  %v602_v32 = vld [vmem:[%s22207_s21 + $0xb0] sm:$0x1]  ;;  %v19888_v38 = vpack.c.bf16 %v1157_v20, %v1156_v17  ;;  %v19858_v44 = vpack.c.bf16 %v1012_v27, %v1011_v26 }
  0xd1   : > { %547 = vmatmul.mubr.f32.gmra.mrb[6].mxu0 %v22259_v57  ;;  %19883 = vmatprep.subr.bf16.mxu1 %v19882_v0  ;;  %v678_v28 = vrot.slane %v601_v21, 1  ;;  %v1174_v33 = vld [vmem:[#allocation4 + $0x3d0] sm:$0xff]  ;;  %v1175_v35 = vld [vmem:[#allocation4 + $0x3d8] sm:$0xff]  ;;  %v22283_v37 = vld [vmem:[%s22207_s21 + $0xa8] sm:$0xff]  ;;  %v675_v41 = vrot.slane %v600_v30, 1  ;;  %v676_v42 = vrot.slane %v602_v32, 1 }
  0xd2   : > { %19853 = vmatpush3.bf16.msra.mxu0 %v19852_v6  ;;  %551 = vmatprep.mubr.f32.mxu0 %v22267_v7  ;;  %v995_v39 = vld [vmem:[#allocation4 + $0x250] sm:$0xff]  ;;  %v996_v40 = vld [vmem:[#allocation4 + $0x258] sm:$0xff]  ;;  %v22286_v43 = vld [vmem:[%s22207_s21 + $0xa0] sm:$0xff]  ;;  %v19890_v50 = vpack.c.bf16 %v1175_v35, %v1174_v33 }
  0xd3   : > { %822 = vmatmul.mubr.f32.gmra.mrb[6].mxu1 %v665_v11  ;;  %19855 = vmatprep.subr.bf16.mxu0 %v19854_v19  ;;  %v1158_v45 = vld [vmem:[#allocation4 + $0x350] sm:$0xff]  ;;  %v1159_v46 = vld [vmem:[#allocation4 + $0x358] sm:$0xff]  ;;  %v605_v48 = vld [vmem:[%s22207_s21 + $0xc8] sm:$0xfe]  ;;  %v680_v49 = vsel %vm644_vm0, %v678_v28, %v679_v29  ;;  %v19860_v55 = vpack.c.bf16 %v996_v40, %v995_v39  ;;  %v677_v62 = vsel %vm644_vm0, %v675_v41, %v676_v42 }
  0xd4   : > { %19885 = vmatpush3.bf16.msra.mxu1 %v19884_v12  ;;  %826 = vmatprep.mubr.f32.mxu1 %v674_v24  ;;  %v1013_v51 = vld [vmem:[#allocation4 + $0x2e0] sm:$0xff]  ;;  %v1014_v52 = vld [vmem:[#allocation4 + $0x2e8] sm:$0xff]  ;;  %v607_v53 = vld [vmem:[%s22207_s21 + $0xd8] sm:$0x1]  ;;  %v684_v54 = vrot.slane %v605_v48, 1  ;;  %v19892_v0 = vpack.c.bf16 %v1159_v46, %v1158_v45 }
  0xd5   : > { %552 = vmatmul.mubr.f32.gmra.mrb[8].mxu0 %v22272_v18  ;;  %19887 = vmatprep.subr.bf16.mxu1 %v19886_v25  ;;  %v22293_v56 = vld [vmem:[%s22207_s21 + $0xc8] sm:$0xff]  ;;  %v685_v58 = vrot.slane %v607_v53, 1  ;;  %v604_v59 = vld [vmem:[%s22207_s21 + $0xc0] sm:$0xfe]  ;;  %v606_v60 = vld [vmem:[%s22207_s21 + $0xd0] sm:$0x1]  ;;  %v19862_v8 = vpack.c.bf16 %v1014_v52, %v1013_v51 }
  0xd6   : > { %19857 = vmatpush3.bf16.msra.mxu0 %v19856_v31  ;;  %v1176_v61 = vld [vmem:[#allocation4 + $0x3e0] sm:$0xff]  ;;  %556 = vmatprep.mubr.f32.mxu0 %v22283_v37  ;;  %v998_v2 = vld [vmem:[#allocation4 + $0x268] sm:$0xff]  ;;  %v681_v3 = vrot.slane %v604_v59, 1  ;;  %v682_v4 = vrot.slane %v606_v60, 1  ;;  %v1015_v12 = vld [vmem:[#allocation4 + $0x2f0] sm:$0xff] }
  0xd7   : > { %827 = vmatmul.mubr.f32.gmra.mrb[8].mxu1 %v671_v36  ;;  %v997_v1 = vld [vmem:[#allocation4 + $0x260] sm:$0xff]  ;;  %v1177_v5 = vld [vmem:[#allocation4 + $0x3e8] sm:$0xff]  ;;  %19859 = vmatprep.subr.bf16.mxu0 %v19858_v44  ;;  %v686_v13 = vsel %vm644_vm0, %v684_v54, %v685_v58  ;;  %v1016_v15 = vld [vmem:[#allocation4 + $0x2f8] sm:$0xff] }
  0xd8   : > { %19889 = vmatpush3.bf16.msra.mxu1 %v19888_v38  ;;  %831 = vmatprep.mubr.f32.mxu1 %v680_v49  ;;  %v22300_v6 = vld [vmem:[%s22207_s21 + $0xc0] sm:$0xff]  ;;  %v1161_v11 = vld [vmem:[#allocation4 + $0x368] sm:$0xff]  ;;  %v19894_v14 = vpack.c.bf16 %v1177_v5, %v1176_v61  ;;  %v611_v17 = vld [vmem:[%s22207_s21 + $0xf8] sm:$0x1]  ;;  %v19864_v19 = vpack.c.bf16 %v998_v2, %v997_v1  ;;  %v683_v27 = vsel %vm644_vm0, %v681_v3, %v682_v4 }
  0xd9   : > { %v1160_v9 = vld [vmem:[#allocation4 + $0x360] sm:$0xff]  ;;  %557 = vmatmul.mubr.f32.gmra.mrb[10].mxu0 %v22286_v43  ;;  %19891 = vmatprep.subr.bf16.mxu1 %v19890_v50  ;;  %v609_v16 = vld [vmem:[%s22207_s21 + $0xe8] sm:$0xfe]  ;;  %v691_v22 = vrot.slane %v611_v17, 1  ;;  %v999_v24 = vld [vmem:[#allocation4 + $0x270] sm:$0xff]  ;;  %v19866_v35 = vpack.c.bf16 %v1016_v15, %v1015_v12 }
  0xda   : > { %19861 = vmatpush3.bf16.msra.mxu0 %v19860_v55  ;;  %v22307_v20 = vld [vmem:[%s22207_s21 + $0xe8] sm:$0xff]  ;;  %v690_v21 = vrot.slane %v609_v16, 1  ;;  %v1000_v25 = vld [vmem:[#allocation4 + $0x278] sm:$0xff]  ;;  %v608_v26 = vld [vmem:[%s22207_s21 + $0xe0] sm:$0xfe]  ;;  %561 = vmatprep.mubr.f32.mxu0 %v22293_v56  ;;  %v19896_v28 = vpack.c.bf16 %v1161_v11, %v1160_v9 }
  0xdb   : > { %832 = vmatmul.mubr.f32.gmra.mrb[10].mxu1 %v677_v62  ;;  %v610_v29 = vld [vmem:[%s22207_s21 + $0xf0] sm:$0x1]  ;;  %v687_v30 = vrot.slane %v608_v26, 1  ;;  %v1179_v32 = vld [vmem:[#allocation4 + $0x3f8] sm:$0xff]  ;;  %19863 = vmatprep.subr.bf16.mxu0 %v19862_v8  ;;  %v22314_v33 = vld [vmem:[%s22207_s21 + $0xe0] sm:$0xff]  ;;  %v19868_v50 = vpack.c.bf16 %v1000_v25, %v999_v24 }
  0xdc   : > { %19893 = vmatpush3.bf16.msra.mxu1 %v19892_v0  ;;  %v1178_v31 = vld [vmem:[#allocation4 + $0x3f0] sm:$0xff]  ;;  %836 = vmatprep.mubr.f32.mxu1 %v686_v13  ;;  %v688_v36 = vrot.slane %v610_v29, 1  ;;  %v856_v38 = vld [vmem:[%s22207_s21 + $0x8] sm:$0xfc]  ;;  %v858_v39 = vld [vmem:[%s22207_s21 + $0x18] sm:$0x3]  ;;  %v692_v41 = vsel %vm644_vm0, %v690_v21, %v691_v22 }
  0xdd   : > { %v1162_v40 = vld [vmem:[#allocation4 + $0x370] sm:$0xff]  ;;  %562 = vmatmul.mubr.f32.gmra.mrb[12].mxu0 %v22300_v6  ;;  %19895 = vmatprep.subr.bf16.mxu1 %v19894_v14  ;;  %v19898_v42 = vpack.c.bf16 %v1179_v32, %v1178_v31  ;;  %v923_v44 = vrot.slane %v856_v38, 2  ;;  %v924_v45 = vrot.slane %v858_v39, 2  ;;  %v1163_v46 = vld [vmem:[#allocation4 + $0x378] sm:$0xff]  ;;  %v855_v48 = vld [vmem:[%s22207_s21] sm:$0xfc] }
  0xde   : > { %v1438_v49 = vld [vmem:[#allocation4 + $0x480] sm:$0xff]  ;;  %19865 = vmatpush3.bf16.msra.mxu0 %v19864_v19  ;;  %v857_v51 = vld [vmem:[%s22207_s21 + $0x10] sm:$0x3]  ;;  %v920_v52 = vrot.slane %v855_v48, 2  ;;  %v1439_v53 = vld [vmem:[#allocation4 + $0x488] sm:$0xff]  ;;  %566 = vmatprep.mubr.f32.mxu0 %v22307_v20  ;;  %v689_v55 = vsel %vm644_vm0, %v687_v30, %v688_v36  ;;  %v19900_v58 = vpack.c.bf16 %v1163_v46, %v1162_v40 }
  0xdf   : > { %837 = vmatmul.mubr.f32.gmra.mrb[12].mxu1 %v683_v27  ;;  %v1422_v54 = vld [vmem:[#allocation4 + $0x400] sm:$0xff]  ;;  %v921_v59 = vrot.slane %v857_v51, 2  ;;  %v1423_v60 = vld [vmem:[#allocation4 + $0x408] sm:$0xff]  ;;  %19867 = vmatprep.subr.bf16.mxu0 %v19866_v35  ;;  %v925_v0 = vsel %vm919_vm1, %v923_v44, %v924_v45  ;;  %v19902_v1 = vpack.c.bf16 %v1439_v53, %v1438_v49  ;;  %v862_v3 = vld [vmem:[%s22207_s21 + $0x38] sm:$0x3] }
  0xe0   : > { %19897 = vmatpush3.bf16.msra.mxu1 %v19896_v28  ;;  %v1712_v61 = vld [vmem:[#allocation4 + $0x580] sm:$0xff]  ;;  %v1713_v62 = vld [vmem:[#allocation4 + $0x588] sm:$0xff]  ;;  %841 = vmatprep.mubr.f32.mxu1 %v692_v41  ;;  %v930_v9 = vrot.slane %v862_v3, 2  ;;  %v1440_v13 = vld [vmem:[#allocation4 + $0x490] sm:$0xff]  ;;  %v19904_v15 = vpack.c.bf16 %v1423_v60, %v1422_v54 }
  0xe1   : > { %v860_v2 = vld [vmem:[%s22207_s21 + $0x28] sm:$0xfc]  ;;  %v1696_v4 = vld [vmem:[#allocation4 + $0x500] sm:$0xff]  ;;  %567 = vmatmul.mubr.f32.gmra.mrb[14].mxu0 %v22314_v33  ;;  %19899 = vmatprep.subr.bf16.mxu1 %v19898_v42  ;;  %v19934_v5 = vpack.c.bf16 %v1713_v62, %v1712_v61  ;;  %v922_v14 = vsel %vm919_vm1, %v920_v52, %v921_v59  ;;  %v861_v16 = vld [vmem:[%s22207_s21 + $0x30] sm:$0x3] }
  0xe2   : > { %v929_v8 = vrot.slane %v860_v2, 2  ;;  %v1697_v11 = vld [vmem:[#allocation4 + $0x508] sm:$0xff]  ;;  %v859_v12 = vld [vmem:[%s22207_s21 + $0x20] sm:$0xfc]  ;;  %19869 = vmatpush3.bf16.msra.mxu0 %v19868_v50  ;;  %v1441_v19 = vld [vmem:[#allocation4 + $0x498] sm:$0xff]  ;;  %1081 = vmatprep.mubr.f32.mxu0 %v925_v0  ;;  %v927_v24 = vrot.slane %v861_v16, 2 }
  0xe3   : > { %842 = vmatmul.mubr.f32.gmra.mrb[14].mxu1 %v689_v55  ;;  %v926_v17 = vrot.slane %v859_v12, 2  ;;  %v1424_v21 = vld [vmem:[#allocation4 + $0x410] sm:$0xff]  ;;  %v19936_v22 = vpack.c.bf16 %v1697_v11, %v1696_v4  ;;  %v1425_v25 = vld [vmem:[#allocation4 + $0x418] sm:$0xff]  ;;  %19903 = vmatprep.subr.bf16.mxu0 %v19902_v1  ;;  %v19906_v29 = vpack.c.bf16 %v1441_v19, %v1440_v13  ;;  %v864_v30 = vld [vmem:[%s22207_s21 + $0x48] sm:$0xfc] }
  0xe4   : > { %19901 = vmatpush3.bf16.msra.mxu1 %v19900_v58  ;;  %v1714_v26 = vld [vmem:[#allocation4 + $0x590] sm:$0xff]  ;;  %v1715_v27 = vld [vmem:[#allocation4 + $0x598] sm:$0xff]  ;;  %1244 = vmatprep.mubr.f32.mxu1 %v22221_v63  ;;  %v931_v28 = vsel %vm919_vm1, %v929_v8, %v930_v9  ;;  %v935_v36 = vrot.slane %v864_v30, 2  ;;  %v863_v40 = vld [vmem:[%s22207_s21 + $0x40] sm:$0xfc]  ;;  %v19908_v42 = vpack.c.bf16 %v1425_v25, %v1424_v21 }
  0xe5   : > { %v866_v31 = vld [vmem:[%s22207_s21 + $0x58] sm:$0x3]  ;;  %v1698_v32 = vld [vmem:[#allocation4 + $0x510] sm:$0xff]  ;;  %1082 = vmatmul.mubr.f32.vlgmr.msra.gmra.mrb[16].mxu0 %v922_v14  ;;  %19935 = vmatprep.subr.bf16.mxu1 %v19934_v5  ;;  %v19938_v35 = vpack.c.bf16 %v1715_v27, %v1714_v26  ;;  %v1442_v41 = vld [vmem:[#allocation4 + $0x4a0] sm:$0xff]  ;;  %v928_v63 = vsel %vm919_vm1, %v926_v17, %v927_v24  ;;  %v932_v45 = vrot.slane %v863_v40, 2 }
  0xe6   : > { %v936_v38 = vrot.slane %v866_v31, 2  ;;  %v1699_v39 = vld [vmem:[#allocation4 + $0x518] sm:$0xff]  ;;  %19905 = vmatpush3.bf16.msra.mxu0 %v19904_v15  ;;  %v865_v44 = vld [vmem:[%s22207_s21 + $0x50] sm:$0x3]  ;;  %v1443_v46 = vld [vmem:[#allocation4 + $0x4a8] sm:$0xff]  ;;  %1086 = vmatprep.mubr.f32.mxu0 %v931_v28 }
  0xe7   : > { %1245 = vmatmul.mubr.f32.vlgmr.msra.gmra.mrb[16].mxu1 %v22227_v10  ;;  %v1426_v48 = vld [vmem:[#allocation4 + $0x420] sm:$0xff]  ;;  %v19940_v49 = vpack.c.bf16 %v1699_v39, %v1698_v32  ;;  %v933_v50 = vrot.slane %v865_v44, 2  ;;  %v1427_v51 = vld [vmem:[#allocation4 + $0x428] sm:$0xff]  ;;  %19907 = vmatprep.subr.bf16.mxu0 %v19906_v29  ;;  %v19910_v54 = vpack.c.bf16 %v1443_v46, %v1442_v41  ;;  %v870_v58 = vld [vmem:[%s22207_s21 + $0x78] sm:$0x3] }
  0xe8   : > { %19937 = vmatpush3.bf16.msra.mxu1 %v19936_v22  ;;  %v1716_v52 = vld [vmem:[#allocation4 + $0x5a0] sm:$0xff]  ;;  %v1717_v53 = vld [vmem:[#allocation4 + $0x5a8] sm:$0xff]  ;;  %1249 = vmatprep.mubr.f32.mxu1 %v22235_v23  ;;  %v937_v10 = vsel %vm919_vm1, %v935_v36, %v936_v38  ;;  %v942_v62 = vrot.slane %v870_v58, 2  ;;  %v1444_v2 = vld [vmem:[#allocation4 + $0x4b0] sm:$0xff]  ;;  %v19912_v3 = vpack.c.bf16 %v1427_v51, %v1426_v48 }
  0xe9   : > { %v868_v55 = vld [vmem:[%s22207_s21 + $0x68] sm:$0xfc]  ;;  %v1700_v59 = vld [vmem:[#allocation4 + $0x520] sm:$0xff]  ;;  %1087 = vmatmul.mubr.f32.gmra.mrb[18].mxu0 %v928_v63  ;;  %19939 = vmatprep.subr.bf16.mxu1 %v19938_v35  ;;  %v19942_v60 = vpack.c.bf16 %v1717_v53, %v1716_v52  ;;  %v934_v23 = vsel %vm919_vm1, %v932_v45, %v933_v50  ;;  %v869_v4 = vld [vmem:[%s22207_s21 + $0x70] sm:$0x3] }
  0xea   : > { %v941_v61 = vrot.slane %v868_v55, 2  ;;  %v1701_v0 = vld [vmem:[#allocation4 + $0x528] sm:$0xff]  ;;  %v867_v1 = vld [vmem:[%s22207_s21 + $0x60] sm:$0xfc]  ;;  %19909 = vmatpush3.bf16.msra.mxu0 %v19908_v42  ;;  %v1445_v8 = vld [vmem:[#allocation4 + $0x4b8] sm:$0xff]  ;;  %1091 = vmatprep.mubr.f32.mxu0 %v937_v10  ;;  %v939_v12 = vrot.slane %v869_v4, 2 }
  0xeb   : > { %1250 = vmatmul.mubr.f32.gmra.mrb[18].mxu1 %v22242_v34  ;;  %v938_v5 = vrot.slane %v867_v1, 2  ;;  %v1428_v9 = vld [vmem:[#allocation4 + $0x430] sm:$0xff]  ;;  %v19944_v11 = vpack.c.bf16 %v1701_v0, %v1700_v59  ;;  %v1429_v13 = vld [vmem:[#allocation4 + $0x438] sm:$0xff]  ;;  %19911 = vmatprep.subr.bf16.mxu0 %v19910_v54  ;;  %v19914_v16 = vpack.c.bf16 %v1445_v8, %v1444_v2  ;;  %v872_v17 = vld [vmem:[%s22207_s21 + $0x88] sm:$0xfc] }
  0xec   : > { %19941 = vmatpush3.bf16.msra.mxu1 %v19940_v49  ;;  %v1718_v14 = vld [vmem:[#allocation4 + $0x5b0] sm:$0xff]  ;;  %v1719_v15 = vld [vmem:[#allocation4 + $0x5b8] sm:$0xff]  ;;  %1254 = vmatprep.mubr.f32.mxu1 %v22252_v47  ;;  %v943_v34 = vsel %vm919_vm1, %v941_v61, %v942_v62  ;;  %v947_v24 = vrot.slane %v872_v17, 2  ;;  %v871_v27 = vld [vmem:[%s22207_s21 + $0x80] sm:$0xfc]  ;;  %v19916_v29 = vpack.c.bf16 %v1429_v13, %v1428_v9 }
  0xed   : > { %v874_v19 = vld [vmem:[%s22207_s21 + $0x98] sm:$0x3]  ;;  %v1702_v21 = vld [vmem:[#allocation4 + $0x530] sm:$0xff]  ;;  %1092 = vmatmul.mubr.f32.gmra.mrb[20].mxu0 %v934_v23  ;;  %19943 = vmatprep.subr.bf16.mxu1 %v19942_v60  ;;  %v19946_v22 = vpack.c.bf16 %v1719_v15, %v1718_v14  ;;  %v1446_v28 = vld [vmem:[#allocation4 + $0x4c0] sm:$0xff]  ;;  %v940_v47 = vsel %vm919_vm1, %v938_v5, %v939_v12  ;;  %v944_v31 = vrot.slane %v871_v27, 2 }
  0xee   : > { %v948_v25 = vrot.slane %v874_v19, 2  ;;  %v1703_v26 = vld [vmem:[#allocation4 + $0x538] sm:$0xff]  ;;  %19913 = vmatpush3.bf16.msra.mxu0 %v19912_v3  ;;  %v873_v30 = vld [vmem:[%s22207_s21 + $0x90] sm:$0x3]  ;;  %v1447_v32 = vld [vmem:[#allocation4 + $0x4c8] sm:$0xff]  ;;  %1096 = vmatprep.mubr.f32.mxu0 %v943_v34 }
  0xef   : > { %1255 = vmatmul.mubr.f32.gmra.mrb[20].mxu1 %v22259_v57  ;;  %v1430_v35 = vld [vmem:[#allocation4 + $0x440] sm:$0xff]  ;;  %v19948_v36 = vpack.c.bf16 %v1703_v26, %v1702_v21  ;;  %v945_v38 = vrot.slane %v873_v30, 2  ;;  %v1431_v39 = vld [vmem:[#allocation4 + $0x448] sm:$0xff]  ;;  %19915 = vmatprep.subr.bf16.mxu0 %v19914_v16  ;;  %v19918_v63 = vpack.c.bf16 %v1447_v32, %v1446_v28  ;;  %v878_v44 = vld [vmem:[%s22207_s21 + $0xb8] sm:$0x3] }
  0xf0   : > { %19945 = vmatpush3.bf16.msra.mxu1 %v19944_v11  ;;  %v1720_v40 = vld [vmem:[#allocation4 + $0x5c0] sm:$0xff]  ;;  %v1721_v41 = vld [vmem:[#allocation4 + $0x5c8] sm:$0xff]  ;;  %1259 = vmatprep.mubr.f32.mxu1 %v22267_v7  ;;  %v949_v57 = vsel %vm919_vm1, %v947_v24, %v948_v25  ;;  %v954_v49 = vrot.slane %v878_v44, 2  ;;  %v1448_v52 = vld [vmem:[#allocation4 + $0x4d0] sm:$0xff]  ;;  %v19920_v53 = vpack.c.bf16 %v1431_v39, %v1430_v35 }
  0xf1   : > { %v876_v42 = vld [vmem:[%s22207_s21 + $0xa8] sm:$0xfc]  ;;  %v1704_v45 = vld [vmem:[#allocation4 + $0x540] sm:$0xff]  ;;  %1097 = vmatmul.mubr.f32.gmra.mrb[22].mxu0 %v940_v47  ;;  %19947 = vmatprep.subr.bf16.mxu1 %v19946_v22  ;;  %v19950_v46 = vpack.c.bf16 %v1721_v41, %v1720_v40  ;;  %v946_v7 = vsel %vm919_vm1, %v944_v31, %v945_v38  ;;  %v877_v10 = vld [vmem:[%s22207_s21 + $0xb0] sm:$0x3] }
  0xf2   : > { %v953_v48 = vrot.slane %v876_v42, 2  ;;  %v1705_v50 = vld [vmem:[#allocation4 + $0x548] sm:$0xff]  ;;  %v875_v51 = vld [vmem:[%s22207_s21 + $0xa0] sm:$0xfc]  ;;  %19917 = vmatpush3.bf16.msra.mxu0 %v19916_v29  ;;  %v1449_v55 = vld [vmem:[#allocation4 + $0x4d8] sm:$0xff]  ;;  %1101 = vmatprep.mubr.f32.mxu0 %v949_v57  ;;  %v951_v60 = vrot.slane %v877_v10, 2 }
  0xf3   : > { %1260 = vmatmul.mubr.f32.gmra.mrb[22].mxu1 %v22272_v18  ;;  %v950_v54 = vrot.slane %v875_v51, 2  ;;  %v1432_v58 = vld [vmem:[#allocation4 + $0x450] sm:$0xff]  ;;  %v19952_v59 = vpack.c.bf16 %v1705_v50, %v1704_v45  ;;  %v1433_v61 = vld [vmem:[#allocation4 + $0x458] sm:$0xff]  ;;  %19919 = vmatprep.subr.bf16.mxu0 %v19918_v63  ;;  %v19922_v1 = vpack.c.bf16 %v1449_v55, %v1448_v52  ;;  %v880_v2 = vld [vmem:[%s22207_s21 + $0xc8] sm:$0xfc] }
  0xf4   : > { %19949 = vmatpush3.bf16.msra.mxu1 %v19948_v36  ;;  %v1722_v62 = vld [vmem:[#allocation4 + $0x5d0] sm:$0xff]  ;;  %v1723_v0 = vld [vmem:[#allocation4 + $0x5d8] sm:$0xff]  ;;  %1264 = vmatprep.mubr.f32.mxu1 %v22283_v37  ;;  %v955_v18 = vsel %vm919_vm1, %v953_v48, %v954_v49  ;;  %v959_v5 = vrot.slane %v880_v2, 2  ;;  %v879_v11 = vld [vmem:[%s22207_s21 + $0xc0] sm:$0xfc]  ;;  %v19924_v13 = vpack.c.bf16 %v1433_v61, %v1432_v58 }
  0xf5   : > { %v882_v23 = vld [vmem:[%s22207_s21 + $0xd8] sm:$0x3]  ;;  %v1706_v3 = vld [vmem:[#allocation4 + $0x550] sm:$0xff]  ;;  %1102 = vmatmul.mubr.f32.gmra.mrb[24].mxu0 %v946_v7  ;;  %19951 = vmatprep.subr.bf16.mxu1 %v19950_v46  ;;  %v19954_v4 = vpack.c.bf16 %v1723_v0, %v1722_v62  ;;  %v1450_v12 = vld [vmem:[#allocation4 + $0x4e0] sm:$0xff]  ;;  %v952_v37 = vsel %vm919_vm1, %v950_v54, %v951_v60  ;;  %v956_v15 = vrot.slane %v879_v11, 2 }
  0xf6   : > { %v960_v8 = vrot.slane %v882_v23, 2  ;;  %v1707_v9 = vld [vmem:[#allocation4 + $0x558] sm:$0xff]  ;;  %19921 = vmatpush3.bf16.msra.mxu0 %v19920_v53  ;;  %v881_v14 = vld [vmem:[%s22207_s21 + $0xd0] sm:$0x3]  ;;  %v1451_v34 = vld [vmem:[#allocation4 + $0x4e8] sm:$0xff]  ;;  %1106 = vmatprep.mubr.f32.mxu0 %v955_v18 }
  0xf7   : > { %1265 = vmatmul.mubr.f32.gmra.mrb[24].mxu1 %v22286_v43  ;;  %v1434_v16 = vld [vmem:[#allocation4 + $0x460] sm:$0xff]  ;;  %v19956_v17 = vpack.c.bf16 %v1707_v9, %v1706_v3  ;;  %v957_v19 = vrot.slane %v881_v14, 2  ;;  %v1435_v21 = vld [vmem:[#allocation4 + $0x468] sm:$0xff]  ;;  %19923 = vmatprep.subr.bf16.mxu0 %v19922_v1  ;;  %v19926_v25 = vpack.c.bf16 %v1451_v34, %v1450_v12  ;;  %v886_v27 = vld [vmem:[%s22207_s21 + $0xf8] sm:$0x3] }
  0xf8   : > { %19953 = vmatpush3.bf16.msra.mxu1 %v19952_v59  ;;  %v1724_v22 = vld [vmem:[#allocation4 + $0x5e0] sm:$0xff]  ;;  %v1725_v24 = vld [vmem:[#allocation4 + $0x5e8] sm:$0xff]  ;;  %1269 = vmatprep.mubr.f32.mxu1 %v22293_v56  ;;  %v961_v43 = vsel %vm919_vm1, %v959_v5, %v960_v8  ;;  %v966_v30 = vrot.slane %v886_v27, 2  ;;  %v1452_v35 = vld [vmem:[#allocation4 + $0x4f0] sm:$0xff]  ;;  %v19928_v36 = vpack.c.bf16 %v1435_v21, %v1434_v16 }
  0xf9   : > { %v884_v26 = vld [vmem:[%s22207_s21 + $0xe8] sm:$0xfc]  ;;  %v1708_v28 = vld [vmem:[#allocation4 + $0x560] sm:$0xff]  ;;  %1107 = vmatmul.mubr.f32.gmra.mrb[26].mxu0 %v952_v37  ;;  %19955 = vmatprep.subr.bf16.mxu1 %v19954_v4  ;;  %v19958_v47 = vpack.c.bf16 %v1725_v24, %v1724_v22  ;;  %v958_v56 = vsel %vm919_vm1, %v956_v15, %v957_v19  ;;  %v885_v38 = vld [vmem:[%s22207_s21 + $0xf0] sm:$0x3] }
  0xfa   : > { %v965_v29 = vrot.slane %v884_v26, 2  ;;  %v1709_v31 = vld [vmem:[#allocation4 + $0x568] sm:$0xff]  ;;  %v883_v32 = vld [vmem:[%s22207_s21 + $0xe0] sm:$0xfc]  ;;  %19925 = vmatpush3.bf16.msra.mxu0 %v19924_v13  ;;  %v1453_v40 = vld [vmem:[#allocation4 + $0x4f8] sm:$0xff]  ;;  %1111 = vmatprep.mubr.f32.mxu0 %v961_v43  ;;  %v963_v57 = vrot.slane %v885_v38, 2 }
  0xfb   : > { %1270 = vmatmul.mubr.f32.gmra.mrb[26].mxu1 %v22300_v6  ;;  %v962_v39 = vrot.slane %v883_v32, 2  ;;  %v19960_v41 = vpack.c.bf16 %v1709_v31, %v1708_v28  ;;  %v22380_v63 = vld [vmem:[%s22207_s21 + $0x108] sm:$0xff]  ;;  %v1436_v42 = vld [vmem:[#allocation4 + $0x470] sm:$0xff]  ;;  %v1437_v44 = vld [vmem:[#allocation4 + $0x478] sm:$0xff]  ;;  %19927 = vmatprep.subr.bf16.mxu0 %v19926_v25  ;;  %v19930_v45 = vpack.c.bf16 %v1453_v40, %v1452_v35 }
  0xfc   : > { %19957 = vmatpush3.bf16.msra.mxu1 %v19956_v17  ;;  %1274 = vmatprep.mubr.f32.mxu1 %v22307_v20  ;;  %v967_v6 = vsel %vm919_vm1, %v965_v29, %v966_v30  ;;  %v1726_v46 = vld [vmem:[#allocation4 + $0x5f0] sm:$0xff]  ;;  %v1727_v48 = vld [vmem:[#allocation4 + $0x5f8] sm:$0xff]  ;;  %v17685_v49 = vld [vmem:[%s22207_s21 + $0x28] sm:$0xfe]  ;;  %v19932_v54 = vpack.c.bf16 %v1437_v44, %v1436_v42 }
  0xfd   : > { %1112 = vmatmul.mubr.f32.gmra.mrb[28].mxu0 %v958_v56  ;;  %19959 = vmatprep.subr.bf16.mxu1 %v19958_v47  ;;  %v17682_v50 = vld [vmem:[%s22207_s21 + $0x100] sm:$0xff]  ;;  %v19962_v51 = vpack.c.bf16 %v1727_v48, %v1726_v46  ;;  %v17687_v52 = vld [vmem:[%s22207_s21 + $0x38] sm:$0x1]  ;;  %v1360_v7 = vrot.slane %v17685_v49, 1  ;;  %v1710_v53 = vld [vmem:[#allocation4 + $0x570] sm:$0xff]  ;;  %v964_v20 = vsel %vm919_vm1, %v962_v39, %v963_v57 }
  0xfe   : > { %v1711_v10 = vld [vmem:[#allocation4 + $0x578] sm:$0xff]  ;;  %19929 = vmatpush3.bf16.msra.mxu0 %v19928_v36  ;;  %v1361_v55 = vrot.slane %v17687_v52, 1  ;;  %v17684_v58 = vld [vmem:[%s22207_s21 + $0x20] sm:$0xfe]  ;;  %v17686_v59 = vld [vmem:[%s22207_s21 + $0x30] sm:$0x1]  ;;  %1116 = vmatprep.mubr.f32.mxu0 %v967_v6 }
  0xff   : > { %1275 = vmatmul.mubr.f32.gmra.mrb[28].mxu1 %v22314_v33  ;;  %v1875_v60 = vld [vmem:[#allocation4 + $0x680] sm:$0xff]  ;;  %v19964_v61 = vpack.c.bf16 %v1711_v10, %v1710_v53  ;;  %v1357_v62 = vrot.slane %v17684_v58, 1  ;;  %v1358_v0 = vrot.slane %v17686_v59, 1  ;;  %v1876_v18 = vld [vmem:[#allocation4 + $0x688] sm:$0xff]  ;;  %19931 = vmatprep.subr.bf16.mxu0 %v19930_v45  ;;  %v17719_v3 = vld [vmem:[%s22207_s21 + $0x38] sm:$0x3] }
 0x100   : > { %19961 = vmatpush3.bf16.msra.mxu1 %v19960_v41  ;;  %v17717_v1 = vld [vmem:[%s22207_s21 + $0x28] sm:$0xfc]  ;;  %v1859_v2 = vld [vmem:[#allocation4 + $0x600] sm:$0xff]  ;;  %1279 = vmatprep.mubr.f32.mxu1 %v22380_v63  ;;  %v1362_v33 = vsel %vm644_vm0, %v1360_v7, %v1361_v55  ;;  %v19966_v23 = vpack.c.bf16 %v1876_v18, %v1875_v60  ;;  %v1635_v9 = vrot.slane %v17719_v3, 2  ;;  %v17718_v11 = vld [vmem:[%s22207_s21 + $0x30] sm:$0x3] }
 0x101   : > { %v1634_v4 = vrot.slane %v17717_v1, 2  ;;  %v1860_v5 = vld [vmem:[#allocation4 + $0x608] sm:$0xff]  ;;  %v17716_v8 = vld [vmem:[%s22207_s21 + $0x20] sm:$0xfc]  ;;  %1117 = vmatmul.mubr.f32.gmra.mrb[30].mxu0 %v964_v20  ;;  %19963 = vmatprep.subr.bf16.mxu1 %v19962_v51  ;;  %v1359_v14 = vsel %vm644_vm0, %v1357_v62, %v1358_v0  ;;  %v1632_v34 = vrot.slane %v17718_v11, 2  ;;  %v1877_v27 = vld [vmem:[#allocation4 + $0x690] sm:$0xff] }
 0x102   : > { %v1631_v12 = vrot.slane %v17716_v8, 2  ;;  %v2149_v37 = vld [vmem:[#allocation4 + $0x780] sm:$0xff]  ;;  %v2150_v13 = vld [vmem:[#allocation4 + $0x788] sm:$0xff]  ;;  %19933 = vmatpush3.bf16.msra.mxu0 %v19932_v54  ;;  %v19968_v15 = vpack.c.bf16 %v1860_v5, %v1859_v2  ;;  %v17691_v19 = vld [vmem:[%s22207_s21 + $0x58] sm:$0x1]  ;;  %1518 = vmatprep.mubr.f32.mxu0 %v1362_v33 }
 0x103   : > { %1280 = vmatmul.mubr.f32.gmra.mrb[30].mxu1 %v17682_v50  ;;  %v19998_v16 = vpack.c.bf16 %v2150_v13, %v2149_v37  ;;  %v17689_v17 = vld [vmem:[%s22207_s21 + $0x48] sm:$0xfe]  ;;  %v2133_v21 = vld [vmem:[#allocation4 + $0x700] sm:$0xff]  ;;  %v1636_v22 = vsel %vm919_vm1, %v1634_v4, %v1635_v9  ;;  %v1367_v43 = vrot.slane %v17691_v19, 1  ;;  %19967 = vmatprep.subr.bf16.mxu0 %v19966_v23  ;;  %v17690_v29 = vld [vmem:[%s22207_s21 + $0x50] sm:$0x1] }
 0x104   : > { %19965 = vmatpush3.bf16.msra.mxu1 %v19964_v61  ;;  %v1366_v24 = vrot.slane %v17689_v17, 1  ;;  %v2134_v25 = vld [vmem:[#allocation4 + $0x708] sm:$0xff]  ;;  %v17688_v26 = vld [vmem:[%s22207_s21 + $0x40] sm:$0xfe]  ;;  %1792 = vmatprep.mubr.f32.mxu1 %v1636_v22  ;;  %v1633_v28 = vsel %vm919_vm1, %v1631_v12, %v1632_v34  ;;  %v1878_v31 = vld [vmem:[#allocation4 + $0x698] sm:$0xff]  ;;  %v1364_v56 = vrot.slane %v17690_v29, 1 }
 0x105   : > { %v20000_v47 = vpack.c.bf16 %v2134_v25, %v2133_v21  ;;  %v1363_v30 = vrot.slane %v17688_v26, 1  ;;  %v17721_v32 = vld [vmem:[%s22207_s21 + $0x48] sm:$0xfc]  ;;  %1519 = vmatmul.mubr.f32.vlgmr.msra.gmra.mrb[32].mxu0 %v1359_v14  ;;  %19999 = vmatprep.subr.bf16.mxu1 %v19998_v16  ;;  %v19970_v36 = vpack.c.bf16 %v1878_v31, %v1877_v27  ;;  %v17723_v38 = vld [vmem:[%s22207_s21 + $0x58] sm:$0x3]  ;;  %v1861_v40 = vld [vmem:[#allocation4 + $0x610] sm:$0xff] }
 0x106   : > { %v1368_v35 = vsel %vm644_vm0, %v1366_v24, %v1367_v43  ;;  %v1640_v39 = vrot.slane %v17721_v32, 2  ;;  %v1862_v41 = vld [vmem:[#allocation4 + $0x618] sm:$0xff]  ;;  %19969 = vmatpush3.bf16.msra.mxu0 %v19968_v15  ;;  %v1641_v57 = vrot.slane %v17723_v38, 2  ;;  %v17720_v44 = vld [vmem:[%s22207_s21 + $0x40] sm:$0xfc]  ;;  %v2151_v45 = vld [vmem:[#allocation4 + $0x790] sm:$0xff] }
 0x107   : > { %1793 = vmatmul.mubr.f32.vlgmr.msra.gmra.mrb[32].mxu1 %v1633_v28  ;;  %v19972_v42 = vpack.c.bf16 %v1862_v41, %v1861_v40  ;;  %v17722_v6 = vld [vmem:[%s22207_s21 + $0x50] sm:$0x3]  ;;  %1523 = vmatprep.mubr.f32.mxu0 %v1368_v35  ;;  %v1365_v46 = vsel %vm644_vm0, %v1363_v30, %v1364_v56  ;;  %v1637_v48 = vrot.slane %v17720_v44, 2  ;;  %v2152_v50 = vld [vmem:[#allocation4 + $0x798] sm:$0xff]  ;;  %v17693_v51 = vld [vmem:[%s22207_s21 + $0x68] sm:$0xfe] }
 0x108   : > { %20001 = vmatpush3.bf16.msra.mxu1 %v20000_v47  ;;  %v1638_v49 = vrot.slane %v17722_v6, 2  ;;  %v2135_v52 = vld [vmem:[#allocation4 + $0x710] sm:$0xff]  ;;  %19971 = vmatprep.subr.bf16.mxu0 %v19970_v36  ;;  %v1642_v7 = vsel %vm919_vm1, %v1640_v39, %v1641_v57  ;;  %v20002_v53 = vpack.c.bf16 %v2152_v50, %v2151_v45  ;;  %v17695_v10 = vld [vmem:[%s22207_s21 + $0x78] sm:$0x1]  ;;  %v1372_v20 = vrot.slane %v17693_v51, 1  ;;  %v1879_v0 = vld [vmem:[#allocation4 + $0x6a0] sm:$0xff] }
 0x109   : > { %v2136_v54 = vld [vmem:[#allocation4 + $0x718] sm:$0xff]  ;;  %v17692_v55 = vld [vmem:[%s22207_s21 + $0x60] sm:$0xfe]  ;;  %1524 = vmatmul.mubr.f32.gmra.mrb[34].mxu0 %v1365_v46  ;;  %1797 = vmatprep.mubr.f32.mxu1 %v1642_v7  ;;  %v1373_v59 = vrot.slane %v17695_v10, 1  ;;  %v17694_v61 = vld [vmem:[%s22207_s21 + $0x70] sm:$0x1] }
 0x10a   : > { %v1639_v58 = vsel %vm919_vm1, %v1637_v48, %v1638_v49  ;;  %v20004_v60 = vpack.c.bf16 %v2136_v54, %v2135_v52  ;;  %v1369_v62 = vrot.slane %v17692_v55, 1  ;;  %v1880_v18 = vld [vmem:[#allocation4 + $0x6a8] sm:$0xff]  ;;  %19973 = vmatpush3.bf16.msra.mxu0 %v19972_v42  ;;  %v1370_v1 = vrot.slane %v17694_v61, 1  ;;  %v17727_v23 = vld [vmem:[%s22207_s21 + $0x78] sm:$0x3]  ;;  %v1863_v3 = vld [vmem:[#allocation4 + $0x620] sm:$0xff]  ;;  %20003 = vmatprep.subr.bf16.mxu1 %v20002_v53 }
 0x10b   : > { %1798 = vmatmul.mubr.f32.gmra.mrb[34].mxu1 %v1639_v58  ;;  %v19974_v2 = vpack.c.bf16 %v1880_v18, %v1879_v0  ;;  %v17725_v33 = vld [vmem:[%s22207_s21 + $0x68] sm:$0xfc]  ;;  %v1374_v4 = vsel %vm644_vm0, %v1372_v20, %v1373_v59  ;;  %v1647_v8 = vrot.slane %v17727_v23, 2  ;;  %v17724_v11 = vld [vmem:[%s22207_s21 + $0x60] sm:$0xfc]  ;;  %v1881_v29 = vld [vmem:[#allocation4 + $0x6b0] sm:$0xff] }
 0x10c   : > { %v1646_v5 = vrot.slane %v17725_v33, 2  ;;  %v1864_v9 = vld [vmem:[#allocation4 + $0x628] sm:$0xff]  ;;  %v2153_v12 = vld [vmem:[#allocation4 + $0x7a0] sm:$0xff]  ;;  %1528 = vmatprep.mubr.f32.mxu0 %v1374_v4  ;;  %20005 = vmatpush3.bf16.msra.mxu1 %v20004_v60  ;;  %v1371_v37 = vsel %vm644_vm0, %v1369_v62, %v1370_v1  ;;  %v17726_v14 = vld [vmem:[%s22207_s21 + $0x70] sm:$0x3]  ;;  %v1643_v15 = vrot.slane %v17724_v11, 2 }
 0x10d   : > { %v19976_v13 = vpack.c.bf16 %v1864_v9, %v1863_v3  ;;  %v2154_v34 = vld [vmem:[#allocation4 + $0x7a8] sm:$0xff]  ;;  %1529 = vmatmul.mubr.f32.gmra.mrb[36].mxu0 %v1371_v37  ;;  %19975 = vmatprep.subr.bf16.mxu0 %v19974_v2  ;;  %v1644_v19 = vrot.slane %v17726_v14, 2  ;;  %v17699_v22 = vld [vmem:[%s22207_s21 + $0x98] sm:$0x1]  ;;  %v2137_v43 = vld [vmem:[#allocation4 + $0x720] sm:$0xff] }
 0x10e   : > { %v17697_v16 = vld [vmem:[%s22207_s21 + $0x88] sm:$0xfe]  ;;  %v1648_v17 = vsel %vm919_vm1, %v1646_v5, %v1647_v8  ;;  %v20006_v21 = vpack.c.bf16 %v2154_v34, %v2153_v12  ;;  %v1379_v26 = vrot.slane %v17699_v22, 1  ;;  %v17696_v28 = vld [vmem:[%s22207_s21 + $0x80] sm:$0xfe]  ;;  %v1882_v35 = vld [vmem:[#allocation4 + $0x6b8] sm:$0xff] }
 0x10f   : > { %v1378_v24 = vrot.slane %v17697_v16, 1  ;;  %v2138_v25 = vld [vmem:[#allocation4 + $0x728] sm:$0xff]  ;;  %1802 = vmatprep.mubr.f32.mxu1 %v1648_v17  ;;  %19977 = vmatpush3.bf16.msra.mxu0 %v19976_v13  ;;  %v17698_v47 = vld [vmem:[%s22207_s21 + $0x90] sm:$0x1]  ;;  %v1645_v30 = vsel %vm919_vm1, %v1643_v15, %v1644_v19  ;;  %v1375_v31 = vrot.slane %v17696_v28, 1  ;;  %v19978_v39 = vpack.c.bf16 %v1882_v35, %v1881_v29  ;;  %v1866_v57 = vld [vmem:[#allocation4 + $0x638] sm:$0xff] }
 0x110   : > { %v20008_v27 = vpack.c.bf16 %v2138_v25, %v2137_v43  ;;  %20007 = vmatprep.subr.bf16.mxu1 %v20006_v21  ;;  %v1376_v32 = vrot.slane %v17698_v47, 1  ;;  %v17729_v56 = vld [vmem:[%s22207_s21 + $0x88] sm:$0xfc]  ;;  %v1865_v36 = vld [vmem:[#allocation4 + $0x630] sm:$0xff]  ;;  %1803 = vmatmul.mubr.f32.gmra.mrb[36].mxu1 %v1645_v30  ;;  %v17731_v40 = vld [vmem:[%s22207_s21 + $0x98] sm:$0x3] }
 0x111   : > { %v1380_v38 = vsel %vm644_vm0, %v1378_v24, %v1379_v26  ;;  %v1652_v41 = vrot.slane %v17729_v56, 2  ;;  %v17728_v42 = vld [vmem:[%s22207_s21 + $0x80] sm:$0xfc]  ;;  %v1653_v6 = vrot.slane %v17731_v40, 2  ;;  %v19980_v45 = vpack.c.bf16 %v1866_v57, %v1865_v36  ;;  %v17730_v46 = vld [vmem:[%s22207_s21 + $0x90] sm:$0x3]  ;;  %19979 = vmatprep.subr.bf16.mxu0 %v19978_v39 }
 0x112   : > { %1533 = vmatprep.mubr.f32.mxu0 %v1380_v38  ;;  %20009 = vmatpush3.bf16.msra.mxu1 %v20008_v27  ;;  %v1377_v44 = vsel %vm644_vm0, %v1375_v31, %v1376_v32  ;;  %v1649_v48 = vrot.slane %v17728_v42, 2  ;;  %v2155_v49 = vld [vmem:[#allocation4 + $0x7b0] sm:$0xff]  ;;  %v2156_v50 = vld [vmem:[#allocation4 + $0x7b8] sm:$0xff]  ;;  %v1650_v51 = vrot.slane %v17730_v46, 2  ;;  %v17701_v7 = vld [vmem:[%s22207_s21 + $0xa8] sm:$0xfe] }
 0x113   : > { %1534 = vmatmul.mubr.f32.gmra.mrb[38].mxu0 %v1377_v44  ;;  %v20010_v52 = vpack.c.bf16 %v2156_v50, %v2155_v49  ;;  %v17703_v53 = vld [vmem:[%s22207_s21 + $0xb8] sm:$0x1]  ;;  %v2139_v10 = vld [vmem:[#allocation4 + $0x730] sm:$0xff]  ;;  %v1654_v20 = vsel %vm919_vm1, %v1652_v41, %v1653_v6  ;;  %v1384_v54 = vrot.slane %v17701_v7, 1  ;;  %v17700_v59 = vld [vmem:[%s22207_s21 + $0xa0] sm:$0xfe] }
 0x114   : > { %19981 = vmatpush3.bf16.msra.mxu0 %v19980_v45  ;;  %v1385_v55 = vrot.slane %v17703_v53, 1  ;;  %v2140_v58 = vld [vmem:[#allocation4 + $0x738] sm:$0xff]  ;;  %v1883_v60 = vld [vmem:[#allocation4 + $0x6c0] sm:$0xff]  ;;  %1807 = vmatprep.mubr.f32.mxu1 %v1654_v20  ;;  %v1651_v61 = vsel %vm919_vm1, %v1649_v48, %v1650_v51  ;;  %v17702_v0 = vld [vmem:[%s22207_s21 + $0xb0] sm:$0x1]  ;;  %v1381_v18 = vrot.slane %v17700_v59, 1 }
 0x115   : > { %20011 = vmatprep.subr.bf16.mxu1 %v20010_v52  ;;  %v20012_v62 = vpack.c.bf16 %v2140_v58, %v2139_v10  ;;  %v1884_v1 = vld [vmem:[#allocation4 + $0x6c8] sm:$0xff]  ;;  %1808 = vmatmul.mubr.f32.gmra.mrb[38].mxu1 %v1651_v61  ;;  %v1382_v23 = vrot.slane %v17702_v0, 1  ;;  %v17735_v4 = vld [vmem:[%s22207_s21 + $0xb8] sm:$0x3]  ;;  %v1867_v8 = vld [vmem:[#allocation4 + $0x640] sm:$0xff] }
 0x116   : > { %v17733_v2 = vld [vmem:[%s22207_s21 + $0xa8] sm:$0xfc]  ;;  %v1386_v33 = vsel %vm644_vm0, %v1384_v54, %v1385_v55  ;;  %v19982_v3 = vpack.c.bf16 %v1884_v1, %v1883_v60  ;;  %v1659_v11 = vrot.slane %v17735_v4, 2  ;;  %v17732_v37 = vld [vmem:[%s22207_s21 + $0xa0] sm:$0xfc]  ;;  %v1885_v32 = vld [vmem:[#allocation4 + $0x6d0] sm:$0xff] }
 0x117   : > { %v1658_v5 = vrot.slane %v17733_v2, 2  ;;  %v1868_v9 = vld [vmem:[#allocation4 + $0x648] sm:$0xff]  ;;  %1538 = vmatprep.mubr.f32.mxu0 %v1386_v33  ;;  %20013 = vmatpush3.bf16.msra.mxu1 %v20012_v62  ;;  %v17734_v13 = vld [vmem:[%s22207_s21 + $0xb0] sm:$0x3]  ;;  %v2157_v14 = vld [vmem:[#allocation4 + $0x7c0] sm:$0xff]  ;;  %v1383_v15 = vsel %vm644_vm0, %v1381_v18, %v1382_v23  ;;  %v1655_v34 = vrot.slane %v17732_v37, 2 }
 0x118   : > { %v19984_v12 = vpack.c.bf16 %v1868_v9, %v1867_v8  ;;  %19983 = vmatprep.subr.bf16.mxu0 %v19982_v3  ;;  %v1656_v16 = vrot.slane %v17734_v13, 2  ;;  %v2158_v17 = vld [vmem:[#allocation4 + $0x7c8] sm:$0xff]  ;;  %v2141_v21 = vld [vmem:[#allocation4 + $0x740] sm:$0xff]  ;;  %1539 = vmatmul.mubr.f32.gmra.mrb[40].mxu0 %v1383_v15  ;;  %v17707_v43 = vld [vmem:[%s22207_s21 + $0xd8] sm:$0x1] }
 0x119   : > { %v17705_v19 = vld [vmem:[%s22207_s21 + $0xc8] sm:$0xfe]  ;;  %v1660_v22 = vsel %vm919_vm1, %v1658_v5, %v1659_v11  ;;  %v20014_v24 = vpack.c.bf16 %v2158_v17, %v2157_v14  ;;  %v17704_v27 = vld [vmem:[%s22207_s21 + $0xc0] sm:$0xfe]  ;;  %v1391_v47 = vrot.slane %v17707_v43, 1  ;;  %v1886_v35 = vld [vmem:[#allocation4 + $0x6d8] sm:$0xff] }
 0x11a   : > { %v1390_v25 = vrot.slane %v17705_v19, 1  ;;  %v2142_v26 = vld [vmem:[#allocation4 + $0x748] sm:$0xff]  ;;  %1812 = vmatprep.mubr.f32.mxu1 %v1660_v22  ;;  %19985 = vmatpush3.bf16.msra.mxu0 %v19984_v12  ;;  %v1657_v28 = vsel %vm919_vm1, %v1655_v34, %v1656_v16  ;;  %v17706_v30 = vld [vmem:[%s22207_s21 + $0xd0] sm:$0x1]  ;;  %v1387_v31 = vrot.slane %v17704_v27, 1  ;;  %v19986_v36 = vpack.c.bf16 %v1886_v35, %v1885_v32  ;;  %v1870_v44 = vld [vmem:[#allocation4 + $0x658] sm:$0xff] }
 0x11b   : > { %v20016_v29 = vpack.c.bf16 %v2142_v26, %v2141_v21  ;;  %1813 = vmatmul.mubr.f32.gmra.mrb[40].mxu1 %v1657_v28  ;;  %20015 = vmatprep.subr.bf16.mxu1 %v20014_v24  ;;  %v1388_v56 = vrot.slane %v17706_v30, 1  ;;  %v17737_v38 = vld [vmem:[%s22207_s21 + $0xc8] sm:$0xfc]  ;;  %v17739_v39 = vld [vmem:[%s22207_s21 + $0xd8] sm:$0x3]  ;;  %v1869_v40 = vld [vmem:[#allocation4 + $0x650] sm:$0xff] }
 0x11c   : > { %v1392_v41 = vsel %vm644_vm0, %v1390_v25, %v1391_v47  ;;  %v1664_v57 = vrot.slane %v17737_v38, 2  ;;  %v1665_v42 = vrot.slane %v17739_v39, 2  ;;  %v17736_v6 = vld [vmem:[%s22207_s21 + $0xc0] sm:$0xfc]  ;;  %v2159_v45 = vld [vmem:[#allocation4 + $0x7d0] sm:$0xff]  ;;  %19987 = vmatprep.subr.bf16.mxu0 %v19986_v36  ;;  %v19988_v48 = vpack.c.bf16 %v1870_v44, %v1869_v40  ;;  %v2160_v51 = vld [vmem:[#allocation4 + $0x7d8] sm:$0xff] }
 0x11d   : > { %20017 = vmatpush3.bf16.msra.mxu1 %v20016_v29  ;;  %1543 = vmatprep.mubr.f32.mxu0 %v1392_v41  ;;  %v1389_v46 = vsel %vm644_vm0, %v1387_v31, %v1388_v56  ;;  %v17738_v49 = vld [vmem:[%s22207_s21 + $0xd0] sm:$0x3]  ;;  %v1661_v50 = vrot.slane %v17736_v6, 2  ;;  %v17709_v52 = vld [vmem:[%s22207_s21 + $0xe8] sm:$0xfe]  ;;  %v20018_v10 = vpack.c.bf16 %v2160_v51, %v2159_v45  ;;  %v2144_v58 = vld [vmem:[#allocation4 + $0x758] sm:$0xff] }
 0x11e   : > { %1544 = vmatmul.mubr.f32.gmra.mrb[42].mxu0 %v1389_v46  ;;  %v1666_v7 = vsel %vm919_vm1, %v1664_v57, %v1665_v42  ;;  %v1662_v53 = vrot.slane %v17738_v49, 2  ;;  %v17711_v20 = vld [vmem:[%s22207_s21 + $0xf8] sm:$0x1]  ;;  %v1396_v54 = vrot.slane %v17709_v52, 1  ;;  %v2143_v55 = vld [vmem:[#allocation4 + $0x750] sm:$0xff]  ;;  %v1887_v0 = vld [vmem:[#allocation4 + $0x6e0] sm:$0xff] }
 0x11f   : > { %1817 = vmatprep.mubr.f32.mxu1 %v1666_v7  ;;  %19989 = vmatpush3.bf16.msra.mxu0 %v19988_v48  ;;  %v1397_v59 = vrot.slane %v17711_v20, 1  ;;  %v20020_v60 = vpack.c.bf16 %v2144_v58, %v2143_v55  ;;  %v17708_v61 = vld [vmem:[%s22207_s21 + $0xe0] sm:$0xfe]  ;;  %v17710_v62 = vld [vmem:[%s22207_s21 + $0xf0] sm:$0x1]  ;;  %v1888_v33 = vld [vmem:[#allocation4 + $0x6e8] sm:$0xff] }
 0x120   : > { %v1663_v18 = vsel %vm919_vm1, %v1661_v50, %v1662_v53  ;;  %20019 = vmatprep.subr.bf16.mxu1 %v20018_v10  ;;  %v1393_v1 = vrot.slane %v17708_v61, 1  ;;  %v1394_v2 = vrot.slane %v17710_v62, 1  ;;  %v17741_v23 = vld [vmem:[%s22207_s21 + $0xe8] sm:$0xfc]  ;;  %v1871_v3 = vld [vmem:[#allocation4 + $0x660] sm:$0xff]  ;;  %v19990_v5 = vpack.c.bf16 %v1888_v33, %v1887_v0  ;;  %v1889_v29 = vld [vmem:[#allocation4 + $0x6f0] sm:$0xff] }
 0x121   : > { %1818 = vmatmul.mubr.f32.gmra.mrb[42].mxu1 %v1663_v18  ;;  %v1398_v4 = vsel %vm644_vm0, %v1396_v54, %v1397_v59  ;;  %v17743_v8 = vld [vmem:[%s22207_s21 + $0xf8] sm:$0x3]  ;;  %v1670_v9 = vrot.slane %v17741_v23, 2  ;;  %v1872_v11 = vld [vmem:[#allocation4 + $0x668] sm:$0xff]  ;;  %v17740_v12 = vld [vmem:[%s22207_s21 + $0xe0] sm:$0xfc] }
 0x122   : > { %1548 = vmatprep.mubr.f32.mxu0 %v1398_v4  ;;  %20021 = vmatpush3.bf16.msra.mxu1 %v20020_v60  ;;  %v1395_v37 = vsel %vm644_vm0, %v1393_v1, %v1394_v2  ;;  %v1671_v13 = vrot.slane %v17743_v8, 2  ;;  %v19992_v14 = vpack.c.bf16 %v1872_v11, %v1871_v3  ;;  %v17742_v15 = vld [vmem:[%s22207_s21 + $0xf0] sm:$0x3]  ;;  %v1667_v34 = vrot.slane %v17740_v12, 2  ;;  %v2161_v16 = vld [vmem:[#allocation4 + $0x7e0] sm:$0xff]  ;;  %v2162_v17 = vld [vmem:[#allocation4 + $0x7e8] sm:$0xff] }
 0x123   : > { %1549 = vmatmul.mubr.f32.gmra.mrb[44].mxu0 %v1395_v37  ;;  %19991 = vmatprep.subr.bf16.mxu0 %v19990_v5  ;;  %v1668_v19 = vrot.slane %v17742_v15, 2  ;;  %v20022_v21 = vpack.c.bf16 %v2162_v17, %v2161_v16  ;;  %v17713_v22 = vld [vmem:[%s22207_s21 + $0x108] sm:$0xfe]  ;;  %v17715_v24 = vld [vmem:[%s22207_s21 + $0x118] sm:$0x1]  ;;  %v2145_v43 = vld [vmem:[#allocation4 + $0x760] sm:$0xff] }
 0x124   : > { %v1672_v25 = vsel %vm919_vm1, %v1670_v9, %v1671_v13  ;;  %19993 = vmatpush3.bf16.msra.mxu0 %v19992_v14  ;;  %v1402_v26 = vrot.slane %v17713_v22, 1  ;;  %v1403_v27 = vrot.slane %v17715_v24, 1  ;;  %v2146_v28 = vld [vmem:[#allocation4 + $0x768] sm:$0xff]  ;;  %v17712_v47 = vld [vmem:[%s22207_s21 + $0x100] sm:$0xfe]  ;;  %v1890_v56 = vld [vmem:[#allocation4 + $0x6f8] sm:$0xff] }
 0x125   : > { %1822 = vmatprep.mubr.f32.mxu1 %v1672_v25  ;;  %v1669_v30 = vsel %vm919_vm1, %v1667_v34, %v1668_v19  ;;  %20023 = vmatprep.subr.bf16.mxu1 %v20022_v21  ;;  %v20024_v31 = vpack.c.bf16 %v2146_v28, %v2145_v43  ;;  %v17714_v32 = vld [vmem:[%s22207_s21 + $0x110] sm:$0x1]  ;;  %v1399_v35 = vrot.slane %v17712_v47, 1  ;;  %v17745_v36 = vld [vmem:[%s22207_s21 + $0x108] sm:$0xfc]  ;;  %v19994_v40 = vpack.c.bf16 %v1890_v56, %v1889_v29  ;;  %v1874_v44 = vld [vmem:[#allocation4 + $0x678] sm:$0xff] }
 0x126   : > { %1823 = vmatmul.mubr.f32.gmra.mrb[44].mxu1 %v1669_v30  ;;  %v1404_v38 = vsel %vm644_vm0, %v1402_v26, %v1403_v27  ;;  %v1400_v39 = vrot.slane %v17714_v32, 1  ;;  %v17747_v41 = vld [vmem:[%s22207_s21 + $0x118] sm:$0x3]  ;;  %v1676_v57 = vrot.slane %v17745_v36, 2  ;;  %v1873_v42 = vld [vmem:[#allocation4 + $0x670] sm:$0xff]  ;;  %v17749_v53 = vld [vmem:[%s22207_s21 + $0x48] sm:$0xff] }
 0x127   : > { %1553 = vmatprep.mubr.f32.mxu0 %v1404_v38  ;;  %20025 = vmatpush3.bf16.msra.mxu1 %v20024_v31  ;;  %v1677_v6 = vrot.slane %v17747_v41, 2  ;;  %v19996_v45 = vpack.c.bf16 %v1874_v44, %v1873_v42  ;;  %v17744_v46 = vld [vmem:[%s22207_s21 + $0x100] sm:$0xfc]  ;;  %v17746_v48 = vld [vmem:[%s22207_s21 + $0x110] sm:$0x3]  ;;  %v2164_v7 = vld [vmem:[#allocation4 + $0x7f8] sm:$0xff] }
 0x128   : > { %v2163_v49 = vld [vmem:[#allocation4 + $0x7f0] sm:$0xff]  ;;  %v1401_v50 = vsel %vm644_vm0, %v1399_v35, %v1400_v39  ;;  %19995 = vmatprep.subr.bf16.mxu0 %v19994_v40  ;;  %v1673_v51 = vrot.slane %v17744_v46, 2  ;;  %v1674_v52 = vrot.slane %v17746_v48, 2  ;;  %v2148_v55 = vld [vmem:[#allocation4 + $0x778] sm:$0xff]  ;;  %v17748_v58 = vld [vmem:[%s22207_s21 + $0x40] sm:$0xff] }
 0x129   : > { %v2147_v10 = vld [vmem:[#allocation4 + $0x770] sm:$0xff]  ;;  %1554 = vmatmul.mubr.f32.gmra.mrb[46].mxu0 %v1401_v50  ;;  %v1678_v20 = vsel %vm919_vm1, %v1676_v57, %v1677_v6  ;;  %v20026_v54 = vpack.c.bf16 %v2164_v7, %v2163_v49  ;;  %v2423_v59 = vld [vmem:[#allocation4 + $0x880] sm:$0xff]  ;;  %v2424_v62 = vld [vmem:[#allocation4 + $0x888] sm:$0xff] }
 0x12a   : > { %1827 = vmatprep.mubr.f32.mxu1 %v1678_v20  ;;  %19997 = vmatpush3.bf16.msra.mxu0 %v19996_v45  ;;  %v1675_v60 = vsel %vm919_vm1, %v1673_v51, %v1674_v52  ;;  %v20028_v61 = vpack.c.bf16 %v2148_v55, %v2147_v10  ;;  %v17765_v0 = vld [vmem:[%s22207_s21 + $0x48] sm:$0xfe]  ;;  %v17767_v18 = vld [vmem:[%s22207_s21 + $0x58] sm:$0x1]  ;;  %v20030_v1 = vpack.c.bf16 %v2424_v62, %v2423_v59  ;;  %v2407_v23 = vld [vmem:[#allocation4 + $0x800] sm:$0xff] }
 0x12b   : > { %1828 = vmatmul.mubr.f32.gmra.mrb[46].mxu1 %v1675_v60  ;;  %20027 = vmatprep.subr.bf16.mxu1 %v20026_v54  ;;  %v2071_v2 = vrot.slane %v17765_v0, 1  ;;  %v2072_v33 = vrot.slane %v17767_v18, 1  ;;  %v2408_v3 = vld [vmem:[#allocation4 + $0x808] sm:$0xff]  ;;  %v17764_v4 = vld [vmem:[%s22207_s21 + $0x40] sm:$0xfe]  ;;  %v2425_v14 = vld [vmem:[#allocation4 + $0x890] sm:$0xff] }
 0x12c   : > { %1955 = vmatprep.mubr.f32.mxu0 %v17749_v53  ;;  %20029 = vmatpush3.bf16.msra.mxu1 %v20028_v61  ;;  %v20032_v5 = vpack.c.bf16 %v2408_v3, %v2407_v23  ;;  %v17766_v8 = vld [vmem:[%s22207_s21 + $0x50] sm:$0x1]  ;;  %v2068_v9 = vrot.slane %v17764_v4, 1  ;;  %v17751_v11 = vld [vmem:[%s22207_s21 + $0x68] sm:$0xff]  ;;  %v17750_v12 = vld [vmem:[%s22207_s21 + $0x60] sm:$0xff] }
 0x12d   : > { %1956 = vmatmul.mubr.f32.vlgmr.msra.gmra.mrb[48].mxu0 %v17748_v58  ;;  %20031 = vmatprep.subr.bf16.mxu0 %v20030_v1  ;;  %v2073_v37 = vsel %vm644_vm0, %v2071_v2, %v2072_v33  ;;  %v2069_v13 = vrot.slane %v17766_v8, 1  ;;  %v2426_v15 = vld [vmem:[#allocation4 + $0x898] sm:$0xff]  ;;  %v17769_v34 = vld [vmem:[%s22207_s21 + $0x68] sm:$0xfe]  ;;  %v2409_v21 = vld [vmem:[#allocation4 + $0x810] sm:$0xff] }
 0x12e   : > { %2229 = vmatprep.mubr.f32.mxu1 %v2073_v37  ;;  %20033 = vmatpush3.bf16.msra.mxu0 %v20032_v5  ;;  %v20034_v16 = vpack.c.bf16 %v2426_v15, %v2425_v14  ;;  %v17771_v17 = vld [vmem:[%s22207_s21 + $0x78] sm:$0x1]  ;;  %v2077_v19 = vrot.slane %v17769_v34, 1  ;;  %v17768_v26 = vld [vmem:[%s22207_s21 + $0x60] sm:$0xfe]  ;;  %v17753_v29 = vld [vmem:[%s22207_s21 + $0x88] sm:$0xff] }
 0x12f   : > { %v2410_v22 = vld [vmem:[#allocation4 + $0x818] sm:$0xff]  ;;  %v2070_v24 = vsel %vm644_vm0, %v2068_v9, %v2069_v13  ;;  %1960 = vmatprep.mubr.f32.mxu0 %v17751_v11  ;;  %v2078_v43 = vrot.slane %v17771_v17, 1  ;;  %v17770_v27 = vld [vmem:[%s22207_s21 + $0x70] sm:$0x1]  ;;  %v2074_v28 = vrot.slane %v17768_v26, 1  ;;  %v2427_v30 = vld [vmem:[#allocation4 + $0x8a0] sm:$0xff] }
 0x130   : > { %v20036_v25 = vpack.c.bf16 %v2410_v22, %v2409_v21  ;;  %2230 = vmatmul.mubr.f32.vlgmr.msra.gmra.mrb[48].mxu1 %v2070_v24  ;;  %20035 = vmatprep.subr.bf16.mxu0 %v20034_v16  ;;  %v2075_v47 = vrot.slane %v17770_v27, 1  ;;  %v2428_v31 = vld [vmem:[#allocation4 + $0x8a8] sm:$0xff]  ;;  %v17775_v36 = vld [vmem:[%s22207_s21 + $0x98] sm:$0x1]  ;;  %v2411_v38 = vld [vmem:[#allocation4 + $0x820] sm:$0xff] }
 0x131   : > { %1961 = vmatmul.mubr.f32.gmra.mrb[50].mxu0 %v17750_v12  ;;  %v2079_v32 = vsel %vm644_vm0, %v2077_v19, %v2078_v43  ;;  %v20038_v35 = vpack.c.bf16 %v2428_v31, %v2427_v30  ;;  %v17773_v56 = vld [vmem:[%s22207_s21 + $0x88] sm:$0xfe]  ;;  %v17752_v40 = vld [vmem:[%s22207_s21 + $0x80] sm:$0xff]  ;;  %v2084_v57 = vrot.slane %v17775_v36, 1  ;;  %v17774_v45 = vld [vmem:[%s22207_s21 + $0x90] sm:$0x1] }
 0x132   : > { %2234 = vmatprep.mubr.f32.mxu1 %v2079_v32  ;;  %20037 = vmatpush3.bf16.msra.mxu0 %v20036_v25  ;;  %v2076_v39 = vsel %vm644_vm0, %v2074_v28, %v2075_v47  ;;  %v2083_v41 = vrot.slane %v17773_v56, 1  ;;  %v2412_v42 = vld [vmem:[#allocation4 + $0x828] sm:$0xff]  ;;  %v17772_v44 = vld [vmem:[%s22207_s21 + $0x80] sm:$0xfe]  ;;  %v2429_v49 = vld [vmem:[#allocation4 + $0x8b0] sm:$0xff]  ;;  %v2081_v51 = vrot.slane %v17774_v45, 1 }
 0x133   : > { %1965 = vmatprep.mubr.f32.mxu0 %v17753_v29  ;;  %20039 = vmatprep.subr.bf16.mxu0 %v20038_v35  ;;  %v20040_v6 = vpack.c.bf16 %v2412_v42, %v2411_v38  ;;  %v2080_v46 = vrot.slane %v17772_v44, 1  ;;  %v17755_v48 = vld [vmem:[%s22207_s21 + $0xa8] sm:$0xff]  ;;  %v2430_v52 = vld [vmem:[#allocation4 + $0x8b8] sm:$0xff]  ;;  %v2413_v55 = vld [vmem:[#allocation4 + $0x830] sm:$0xff] }
 0x134   : > { %2235 = vmatmul.mubr.f32.gmra.mrb[50].mxu1 %v2076_v39  ;;  %v2085_v50 = vsel %vm644_vm0, %v2083_v41, %v2084_v57  ;;  %v17777_v7 = vld [vmem:[%s22207_s21 + $0xa8] sm:$0xfe]  ;;  %v17779_v53 = vld [vmem:[%s22207_s21 + $0xb8] sm:$0x1]  ;;  %v20042_v10 = vpack.c.bf16 %v2430_v52, %v2429_v49  ;;  %v17776_v59 = vld [vmem:[%s22207_s21 + $0xa0] sm:$0xfe] }
 0x135   : > { %1966 = vmatmul.mubr.f32.gmra.mrb[52].mxu0 %v17752_v40  ;;  %2239 = vmatprep.mubr.f32.mxu1 %v2085_v50  ;;  %v2089_v20 = vrot.slane %v17777_v7, 1  ;;  %v2090_v54 = vrot.slane %v17779_v53, 1  ;;  %v2414_v58 = vld [vmem:[#allocation4 + $0x838] sm:$0xff]  ;;  %v2082_v60 = vsel %vm644_vm0, %v2080_v46, %v2081_v51  ;;  %v17754_v61 = vld [vmem:[%s22207_s21 + $0xa0] sm:$0xff]  ;;  %v17778_v0 = vld [vmem:[%s22207_s21 + $0xb0] sm:$0x1] }
 0x136   : > { %20041 = vmatpush3.bf16.msra.mxu0 %v20040_v6  ;;  %1970 = vmatprep.mubr.f32.mxu0 %v17755_v48  ;;  %v20044_v62 = vpack.c.bf16 %v2414_v58, %v2413_v55  ;;  %v2086_v18 = vrot.slane %v17776_v59, 1  ;;  %v17757_v1 = vld [vmem:[%s22207_s21 + $0xc8] sm:$0xff]  ;;  %v2087_v33 = vrot.slane %v17778_v0, 1  ;;  %v2431_v23 = vld [vmem:[#allocation4 + $0x8c0] sm:$0xff]  ;;  %v17783_v8 = vld [vmem:[%s22207_s21 + $0xd8] sm:$0x1] }
 0x137   : > { %20043 = vmatprep.subr.bf16.mxu0 %v20042_v10  ;;  %v2091_v2 = vsel %vm644_vm0, %v2089_v20, %v2090_v54  ;;  %v2432_v3 = vld [vmem:[#allocation4 + $0x8c8] sm:$0xff]  ;;  %v2415_v11 = vld [vmem:[#allocation4 + $0x840] sm:$0xff]  ;;  %v2096_v14 = vrot.slane %v17783_v8, 1  ;;  %v17782_v34 = vld [vmem:[%s22207_s21 + $0xd0] sm:$0x1] }
 0x138   : > { %v17781_v4 = vld [vmem:[%s22207_s21 + $0xc8] sm:$0xfe]  ;;  %2240 = vmatmul.mubr.f32.gmra.mrb[52].mxu1 %v2082_v60  ;;  %v20046_v5 = vpack.c.bf16 %v2432_v3, %v2431_v23  ;;  %v2088_v37 = vsel %vm644_vm0, %v2086_v18, %v2087_v33  ;;  %v17756_v13 = vld [vmem:[%s22207_s21 + $0xc0] sm:$0xff]  ;;  %v2093_v19 = vrot.slane %v17782_v34, 1  ;;  %v2433_v22 = vld [vmem:[#allocation4 + $0x8d0] sm:$0xff] }
 0x139   : > { %v2095_v9 = vrot.slane %v17781_v4, 1  ;;  %v2416_v12 = vld [vmem:[#allocation4 + $0x848] sm:$0xff]  ;;  %1971 = vmatmul.mubr.f32.gmra.mrb[54].mxu0 %v17754_v61  ;;  %2244 = vmatprep.mubr.f32.mxu1 %v2091_v2  ;;  %v17780_v15 = vld [vmem:[%s22207_s21 + $0xc0] sm:$0xfe]  ;;  %v2434_v24 = vld [vmem:[#allocation4 + $0x8d8] sm:$0xff] }
 0x13a   : > { %20045 = vmatpush3.bf16.msra.mxu0 %v20044_v62  ;;  %1975 = vmatprep.mubr.f32.mxu0 %v17757_v1  ;;  %v20048_v16 = vpack.c.bf16 %v2416_v12, %v2415_v11  ;;  %v2092_v17 = vrot.slane %v17780_v15, 1  ;;  %v17759_v21 = vld [vmem:[%s22207_s21 + $0xe8] sm:$0xff]  ;;  %v20050_v25 = vpack.c.bf16 %v2434_v24, %v2433_v22  ;;  %v17787_v27 = vld [vmem:[%s22207_s21 + $0xf8] sm:$0x1]  ;;  %v2417_v28 = vld [vmem:[#allocation4 + $0x850] sm:$0xff] }
 0x13b   : > { %20047 = vmatprep.subr.bf16.mxu0 %v20046_v5  ;;  %v2097_v43 = vsel %vm644_vm0, %v2095_v9, %v2096_v14  ;;  %v17785_v26 = vld [vmem:[%s22207_s21 + $0xe8] sm:$0xfe]  ;;  %v2102_v29 = vrot.slane %v17787_v27, 1  ;;  %v2418_v30 = vld [vmem:[#allocation4 + $0x858] sm:$0xff]  ;;  %v17784_v31 = vld [vmem:[%s22207_s21 + $0xe0] sm:$0xfe] }
 0x13c   : > { %2245 = vmatmul.mubr.f32.gmra.mrb[54].mxu1 %v2088_v37  ;;  %v2101_v47 = vrot.slane %v17785_v26, 1  ;;  %v2435_v32 = vld [vmem:[#allocation4 + $0x8e0] sm:$0xff]  ;;  %v2094_v35 = vsel %vm644_vm0, %v2092_v17, %v2093_v19  ;;  %v17786_v56 = vld [vmem:[%s22207_s21 + $0xf0] sm:$0x1]  ;;  %v2098_v36 = vrot.slane %v17784_v31, 1  ;;  %v2436_v38 = vld [vmem:[#allocation4 + $0x8e8] sm:$0xff]  ;;  %v20052_v57 = vpack.c.bf16 %v2418_v30, %v2417_v28 }
 0x13d   : > { %1976 = vmatmul.mubr.f32.gmra.mrb[56].mxu0 %v17756_v13  ;;  %2249 = vmatprep.mubr.f32.mxu1 %v2097_v43  ;;  %v17789_v39 = vld [vmem:[%s22207_s21 + $0x108] sm:$0xfe]  ;;  %v17758_v40 = vld [vmem:[%s22207_s21 + $0xe0] sm:$0xff]  ;;  %v2099_v42 = vrot.slane %v17786_v56, 1  ;;  %v17791_v44 = vld [vmem:[%s22207_s21 + $0x118] sm:$0x1]  ;;  %v20054_v46 = vpack.c.bf16 %v2436_v38, %v2435_v32 }
 0x13e   : > { %20049 = vmatpush3.bf16.msra.mxu0 %v20048_v16  ;;  %1980 = vmatprep.mubr.f32.mxu0 %v17759_v21  ;;  %v2103_v41 = vsel %vm644_vm0, %v2101_v47, %v2102_v29  ;;  %v2107_v6 = vrot.slane %v17789_v39, 1  ;;  %v2419_v45 = vld [vmem:[#allocation4 + $0x860] sm:$0xff]  ;;  %v2108_v48 = vrot.slane %v17791_v44, 1  ;;  %v2420_v49 = vld [vmem:[#allocation4 + $0x868] sm:$0xff]  ;;  %v17790_v51 = vld [vmem:[%s22207_s21 + $0x110] sm:$0x1] }
 0x13f   : > { %20051 = vmatprep.subr.bf16.mxu0 %v20050_v25  ;;  %v17788_v50 = vld [vmem:[%s22207_s21 + $0x100] sm:$0xfe]  ;;  %v2437_v52 = vld [vmem:[#allocation4 + $0x8f0] sm:$0xff]  ;;  %v2438_v7 = vld [vmem:[#allocation4 + $0x8f8] sm:$0xff]  ;;  %v2100_v53 = vsel %vm644_vm0, %v2098_v36, %v2099_v42  ;;  %v2105_v20 = vrot.slane %v17790_v51, 1  ;;  %v20056_v59 = vpack.c.bf16 %v2420_v49, %v2419_v45 }
 0x140   : > { %2250 = vmatmul.mubr.f32.gmra.mrb[56].mxu1 %v2094_v35  ;;  %v2104_v10 = vrot.slane %v17788_v50, 1  ;;  %v17793_v54 = vld [vmem:[%s22207_s21 + $0x128] sm:$0xfe]  ;;  %v17795_v55 = vld [vmem:[%s22207_s21 + $0x138] sm:$0x1]  ;;  %v2109_v58 = vsel %vm644_vm0, %v2107_v6, %v2108_v48  ;;  %v2421_v0 = vld [vmem:[#allocation4 + $0x870] sm:$0xff]  ;;  %v20058_v1 = vpack.c.bf16 %v2438_v7, %v2437_v52 }
 0x141   : > { %1981 = vmatmul.mubr.f32.gmra.mrb[58].mxu0 %v17758_v40  ;;  %2254 = vmatprep.mubr.f32.mxu1 %v2103_v41  ;;  %v17763_v60 = vld [vmem:[%s22207_s21 + $0x128] sm:$0xff]  ;;  %v2113_v61 = vrot.slane %v17793_v54, 1  ;;  %v2114_v62 = vrot.slane %v17795_v55, 1  ;;  %v17792_v18 = vld [vmem:[%s22207_s21 + $0x120] sm:$0xfe]  ;;  %v2422_v2 = vld [vmem:[#allocation4 + $0x878] sm:$0xff] }
 0x142   : > { %20053 = vmatpush3.bf16.msra.mxu0 %v20052_v57  ;;  %1985 = vmatprep.mubr.f32.mxu0 %v22380_v63  ;;  %v17794_v33 = vld [vmem:[%s22207_s21 + $0x130] sm:$0x1]  ;;  %v17797_v23 = vld [vmem:[%s22207_s21 + $0x48] sm:$0xfc]  ;;  %v2110_v63 = vrot.slane %v17792_v18, 1  ;;  %v21754_v8 = vld [vmem:[%s22207_s21 + $0x100] sm:$0xff]  ;;  %v2106_v9 = vsel %vm644_vm0, %v2104_v10, %v2105_v20  ;;  %v20060_v34 = vpack.c.bf16 %v2422_v2, %v2421_v0 }
 0x143   : > { %20055 = vmatprep.subr.bf16.mxu0 %v20054_v46  ;;  %v17799_v3 = vld [vmem:[%s22207_s21 + $0x58] sm:$0x3]  ;;  %v2345_v4 = vrot.slane %v17797_v23, 2  ;;  %v17796_v5 = vld [vmem:[%s22207_s21 + $0x40] sm:$0xfc]  ;;  %v2111_v11 = vrot.slane %v17794_v33, 1  ;;  %v2115_v15 = vsel %vm644_vm0, %v2113_v61, %v2114_v62 }
 0x144   : > { %2255 = vmatmul.mubr.f32.gmra.mrb[58].mxu1 %v2100_v53  ;;  %v2346_v12 = vrot.slane %v17799_v3, 2  ;;  %v17798_v37 = vld [vmem:[%s22207_s21 + $0x50] sm:$0x3]  ;;  %v17801_v13 = vld [vmem:[%s22207_s21 + $0x68] sm:$0xfc]  ;;  %v17762_v14 = vld [vmem:[%s22207_s21 + $0x120] sm:$0xff] }
 0x145   : > { %1986 = vmatmul.mubr.f32.gmra.mrb[60].mxu0 %v21754_v8  ;;  %2259 = vmatprep.mubr.f32.mxu1 %v2109_v58  ;;  %v2342_v16 = vrot.slane %v17796_v5, 2  ;;  %v2343_v17 = vrot.slane %v17798_v37, 2  ;;  %v17803_v19 = vld [vmem:[%s22207_s21 + $0x78] sm:$0x3]  ;;  %v2351_v22 = vrot.slane %v17801_v13, 2  ;;  %v2112_v28 = vsel %vm644_vm0, %v2110_v63, %v2111_v11 }
 0x146   : > { %20057 = vmatpush3.bf16.msra.mxu0 %v20056_v59  ;;  %1990 = vmatprep.mubr.f32.mxu0 %v17763_v60  ;;  %v2347_v21 = vsel %vm919_vm1, %v2345_v4, %v2346_v12  ;;  %v2352_v24 = vrot.slane %v17803_v19, 2  ;;  %v17800_v43 = vld [vmem:[%s22207_s21 + $0x60] sm:$0xfc]  ;;  %v17802_v25 = vld [vmem:[%s22207_s21 + $0x70] sm:$0x3] }
 0x147   : > { %20059 = vmatprep.subr.bf16.mxu0 %v20058_v1  ;;  %v17805_v26 = vld [vmem:[%s22207_s21 + $0x88] sm:$0xfc]  ;;  %v17807_v27 = vld [vmem:[%s22207_s21 + $0x98] sm:$0x3]  ;;  %v2344_v47 = vsel %vm919_vm1, %v2342_v16, %v2343_v17  ;;  %v2348_v29 = vrot.slane %v17800_v43, 2  ;;  %v2349_v30 = vrot.slane %v17802_v25, 2 }
 0x148   : > { %2260 = vmatmul.mubr.f32.gmra.mrb[60].mxu1 %v2106_v9  ;;  %v2353_v31 = vsel %vm919_vm1, %v2351_v22, %v2352_v24  ;;  %v2357_v32 = vrot.slane %v17805_v26, 2  ;;  %v2358_v35 = vrot.slane %v17807_v27, 2  ;;  %v17804_v56 = vld [vmem:[%s22207_s21 + $0x80] sm:$0xfc]  ;;  %v17806_v36 = vld [vmem:[%s22207_s21 + $0x90] sm:$0x3] }
 0x149   : > { %1991 = vmatmul.mubr.f32.gmra.mrb[62].mxu0 %v17762_v14  ;;  %2264 = vmatprep.mubr.f32.mxu1 %v2115_v15  ;;  %v17809_v38 = vld [vmem:[%s22207_s21 + $0xa8] sm:$0xfc]  ;;  %v17811_v39 = vld [vmem:[%s22207_s21 + $0xb8] sm:$0x3]  ;;  %v2350_v40 = vsel %vm919_vm1, %v2348_v29, %v2349_v30  ;;  %v2354_v41 = vrot.slane %v17804_v56, 2  ;;  %v2355_v57 = vrot.slane %v17806_v36, 2 }
 0x14a   : > { %20061 = vmatpush3.bf16.msra.mxu0 %v20060_v34  ;;  %2503 = vmatprep.mubr.f32.mxu0 %v2347_v21  ;;  %v2359_v42 = vsel %vm919_vm1, %v2357_v32, %v2358_v35  ;;  %v2363_v44 = vrot.slane %v17809_v38, 2  ;;  %v2364_v6 = vrot.slane %v17811_v39, 2  ;;  %v17808_v45 = vld [vmem:[%s22207_s21 + $0xa0] sm:$0xfc]  ;;  %v17810_v46 = vld [vmem:[%s22207_s21 + $0xb0] sm:$0x3] }
 0x14b   : > { %v17813_v48 = vld [vmem:[%s22207_s21 + $0xc8] sm:$0xfc]  ;;  %v17815_v49 = vld [vmem:[%s22207_s21 + $0xd8] sm:$0x3]  ;;  %v2356_v50 = vsel %vm919_vm1, %v2354_v41, %v2355_v57  ;;  %v2360_v51 = vrot.slane %v17808_v45, 2  ;;  %v2361_v52 = vrot.slane %v17810_v46, 2 }
 0x14c   : > { %2265 = vmatmul.mubr.f32.gmra.mrb[62].mxu1 %v2112_v28  ;;  %v2365_v7 = vsel %vm919_vm1, %v2363_v44, %v2364_v6  ;;  %v2369_v53 = vrot.slane %v17813_v48, 2  ;;  %v2370_v10 = vrot.slane %v17815_v49, 2  ;;  %v17812_v20 = vld [vmem:[%s22207_s21 + $0xc0] sm:$0xfc]  ;;  %v17814_v54 = vld [vmem:[%s22207_s21 + $0xd0] sm:$0x3] }
 0x14d   : > { %2504 = vmatmul.mubr.f32.vlgmr.msra.gmra.mrb[64].mxu0 %v2344_v47  ;;  %v17817_v55 = vld [vmem:[%s22207_s21 + $0xe8] sm:$0xfc]  ;;  %v17819_v58 = vld [vmem:[%s22207_s21 + $0xf8] sm:$0x3]  ;;  %v2362_v59 = vsel %vm919_vm1, %v2360_v51, %v2361_v52  ;;  %v2366_v60 = vrot.slane %v17812_v20, 2  ;;  %v2367_v61 = vrot.slane %v17814_v54, 2 }
 0x14e   : > { %2508 = vmatprep.mubr.f32.mxu0 %v2353_v31  ;;  %v2371_v62 = vsel %vm919_vm1, %v2369_v53, %v2370_v10  ;;  %v2375_v0 = vrot.slane %v17817_v55, 2  ;;  %v2376_v18 = vrot.slane %v17819_v58, 2  ;;  %v17816_v1 = vld [vmem:[%s22207_s21 + $0xe0] sm:$0xfc]  ;;  %v17818_v2 = vld [vmem:[%s22207_s21 + $0xf0] sm:$0x3] }
 0x14f   : > { %v17821_v33 = vld [vmem:[%s22207_s21 + $0x108] sm:$0xfc]  ;;  %v17823_v23 = vld [vmem:[%s22207_s21 + $0x118] sm:$0x3]  ;;  %v2368_v63 = vsel %vm919_vm1, %v2366_v60, %v2367_v61  ;;  %v2372_v3 = vrot.slane %v17816_v1, 2  ;;  %v2373_v4 = vrot.slane %v17818_v2, 2 }
 0x150   : > { %v2377_v5 = vsel %vm919_vm1, %v2375_v0, %v2376_v18  ;;  %v2381_v8 = vrot.slane %v17821_v33, 2  ;;  %v2382_v9 = vrot.slane %v17823_v23, 2  ;;  %v17820_v11 = vld [vmem:[%s22207_s21 + $0x100] sm:$0xfc]  ;;  %v17822_v12 = vld [vmem:[%s22207_s21 + $0x110] sm:$0x3] }
 0x151   : > { %2509 = vmatmul.mubr.f32.gmra.mrb[66].mxu0 %v2350_v40  ;;  %v17825_v37 = vld [vmem:[%s22207_s21 + $0x128] sm:$0xfc]  ;;  %v17827_v13 = vld [vmem:[%s22207_s21 + $0x138] sm:$0x3]  ;;  %v2374_v14 = vsel %vm919_vm1, %v2372_v3, %v2373_v4  ;;  %v2378_v15 = vrot.slane %v17820_v11, 2  ;;  %v2379_v34 = vrot.slane %v17822_v12, 2 }
 0x152   : > { %2513 = vmatprep.mubr.f32.mxu0 %v2359_v42  ;;  %v2383_v16 = vsel %vm919_vm1, %v2381_v8, %v2382_v9  ;;  %v2387_v17 = vrot.slane %v17825_v37, 2  ;;  %v2388_v19 = vrot.slane %v17827_v13, 2  ;;  %v17824_v21 = vld [vmem:[%s22207_s21 + $0x120] sm:$0xfc]  ;;  %v17826_v22 = vld [vmem:[%s22207_s21 + $0x130] sm:$0x3] }
 0x153   : > { %v2380_v24 = vsel %vm919_vm1, %v2378_v15, %v2379_v34  ;;  %v2384_v43 = vrot.slane %v17824_v21, 2  ;;  %v2385_v25 = vrot.slane %v17826_v22, 2  ;;  %v2605_v28 = vld [vmem:[%s24998_s3] sm:$0xff]  ;;  %v2606_v47 = vld [vmem:[%s24998_s3 + $0x8] sm:$0xff]  ;;  %v2607_v30 = vld [vmem:[%s24998_s3 + $0x10] sm:$0xff] }
 0x154   : > { %v2389_v26 = vsel %vm919_vm1, %v2387_v17, %v2388_v19  ;;  %v20062_v29 = vpack.c.bf16 %v2606_v47, %v2605_v28  ;;  %v2608_v31 = vld [vmem:[%s24998_s3 + $0x18] sm:$0xff]  ;;  %v2609_v35 = vld [vmem:[%s24998_s3 + $0x20] sm:$0xff]  ;;  %v2610_v56 = vld [vmem:[%s24998_s3 + $0x28] sm:$0xff] }
 0x155   : > { %2514 = vmatmul.mubr.f32.gmra.mrb[68].mxu0 %v2356_v50  ;;  %v2386_v27 = vsel %vm919_vm1, %v2384_v43, %v2385_v25  ;;  %v20066_v32 = vpack.c.bf16 %v2608_v31, %v2607_v30  ;;  %v20070_v36 = vpack.c.bf16 %v2610_v56, %v2609_v35  ;;  %v2611_v39 = vld [vmem:[%s24998_s3 + $0x30] sm:$0xff]  ;;  %v2612_v40 = vld [vmem:[%s24998_s3 + $0x38] sm:$0xff]  ;;  %v22620_v41 = vld [vmem:[#allocation6] ss:$0 sm:$0xff] }
 0x156   : > { %2518 = vmatprep.mubr.f32.mxu0 %v2365_v7  ;;  %20063 = vmatprep.subr.bf16.mxu1 %v20062_v29  ;;  %v20074_v44 = vpack.c.bf16 %v2612_v40, %v2611_v39  ;;  %v2613_v50 = vld [vmem:[%s24998_s3 + $0x40] sm:$0xff]  ;;  %v2614_v51 = vld [vmem:[%s24998_s3 + $0x48] sm:$0xff]  ;;  %v2615_v60 = vld [vmem:[%s24998_s3 + $0x50] sm:$0xff] }
 0x157   : > { %20065 = vmatpush3.bf16.msra.mxu1 %v20062_v29  ;;  %v20078_v53 = vpack.c.bf16 %v2614_v51, %v2613_v50  ;;  %v2616_v61 = vld [vmem:[%s24998_s3 + $0x58] sm:$0xff]  ;;  %v2617_v4 = vld [vmem:[%s24998_s3 + $0x60] sm:$0xff]  ;;  %v2619_v17 = vld [vmem:[%s24998_s3 + $0x70] sm:$0xff] }
 0x158   : > { %20067 = vmatprep.subr.bf16.mxu1 %v20066_v32  ;;  %v20082_v18 = vpack.c.bf16 %v2616_v61, %v2615_v60  ;;  %v2620_v19 = vld [vmem:[%s24998_s3 + $0x78] sm:$0xff]  ;;  %v17829_v29 = vld [vmem:[%s24998_s3 + $0x80] sm:$0xff]  ;;  %v17830_v30 = vld [vmem:[%s24998_s3 + $0x88] sm:$0xff] }
 0x159   : > { %2519 = vmatmul.mubr.f32.gmra.mrb[70].mxu0 %v2362_v59  ;;  %v22665_v35 = vpack.c.bf16 %v17830_v30, %v17829_v29 }
 0x15a   : > { %2523 = vmatprep.mubr.f32.mxu0 %v2371_v62 }
 0x15b   : > { %20069 = vmatpush3.bf16.msra.mxu1 %v20066_v32 }
 0x15c   : > { %20071 = vmatprep.subr.bf16.mxu1 %v20070_v36 }
 0x15d   : > { %2524 = vmatmul.mubr.f32.gmra.mrb[72].mxu0 %v2368_v63 }
 0x15e   : > { %2528 = vmatprep.mubr.f32.mxu0 %v2377_v5  ;;  %v2618_v5 = vld [vmem:[%s24998_s3 + $0x68] sm:$0xff] }
 0x15f   : > { %20073 = vmatpush3.bf16.msra.mxu1 %v20070_v36  ;;  %v20086_v11 = vpack.c.bf16 %v2618_v5, %v2617_v4 }
 0x160   : > { %20075 = vmatprep.subr.bf16.mxu1 %v20074_v44 }
 0x161   : > { %2529 = vmatmul.mubr.f32.gmra.mrb[74].mxu0 %v2374_v14  ;;  %v21964_v14 = vmov 0.0  }
 0x162   : > { %2533 = vmatprep.mubr.f32.mxu0 %v2383_v16  ;;  %2562 = vst [vmem:[#allocation2 + $0x10] sm:$0xff] %v21964_v14  ;;  %2563 = vst [vmem:[#allocation2 + $0x18] sm:$0x3] %v21964_v14  ;;  %19136 = vmatprep.mubr.f32.mxu1 %v21964_v14 }
 0x163   : > { %20077 = vmatpush3.bf16.msra.mxu1 %v20074_v44  ;;  %2560 = vst [vmem:[#allocation2] sm:$0xff] %v21964_v14  ;;  %2561 = vst [vmem:[#allocation2 + $0x8] sm:$0x3] %v21964_v14 }
 0x164   : > { %20079 = vmatprep.subr.bf16.mxu1 %v20078_v53  ;;  %2564 = vst [vmem:[#allocation2 + $0x20] sm:$0xff] %v21964_v14  ;;  %2565 = vst [vmem:[#allocation2 + $0x28] sm:$0x3] %v21964_v14 }
 0x165   : > { %2534 = vmatmul.mubr.f32.gmra.mrb[76].mxu0 %v2380_v24  ;;  %2566 = vst [vmem:[#allocation2 + $0x30] sm:$0xff] %v21964_v14  ;;  %2567 = vst [vmem:[#allocation2 + $0x38] sm:$0x3] %v21964_v14  ;;  %v20090_v24 = vpack.c.bf16 %v2620_v19, %v2619_v17 }
 0x166   : > { %2538 = vmatprep.mubr.f32.mxu0 %v2389_v26  ;;  %2568 = vst [vmem:[#allocation2 + $0x40] sm:$0xff] %v21964_v14  ;;  %2569 = vst [vmem:[#allocation2 + $0x48] sm:$0x3] %v21964_v14 }
 0x167   : > { %20081 = vmatpush3.bf16.msra.mxu1 %v20078_v53  ;;  %2570 = vst [vmem:[#allocation2 + $0x50] sm:$0xff] %v21964_v14  ;;  %2571 = vst [vmem:[#allocation2 + $0x58] sm:$0x3] %v21964_v14 }
 0x168   : > { %20083 = vmatprep.subr.bf16.mxu1 %v20082_v18  ;;  %2572 = vst [vmem:[#allocation2 + $0x60] sm:$0xff] %v21964_v14  ;;  %2573 = vst [vmem:[#allocation2 + $0x68] sm:$0x3] %v21964_v14 }
 0x169   : > { %2539 = vmatmul.mubr.f32.gmra.mrb[78].mxu0 %v2386_v27  ;;  %2574 = vst [vmem:[#allocation2 + $0x70] sm:$0xff] %v21964_v14  ;;  %2575 = vst [vmem:[#allocation2 + $0x78] sm:$0x3] %v21964_v14 }
 0x16a   : > { %2576 = vst [vmem:[#allocation2 + $0x80] sm:$0xff] %v21964_v14  ;;  %2577 = vst [vmem:[#allocation2 + $0x88] sm:$0x3] %v21964_v14 }
 0x16b   : > { %20085 = vmatpush3.bf16.msra.mxu1 %v20082_v18  ;;  %2578 = vst [vmem:[#allocation2 + $0x90] sm:$0xff] %v21964_v14  ;;  %2579 = vst [vmem:[#allocation2 + $0x98] sm:$0x3] %v21964_v14 }
 0x16c   : > { %20087 = vmatprep.subr.bf16.mxu1 %v20086_v11 }
 0x16f   : > { %20089 = vmatpush3.bf16.msra.mxu1 %v20086_v11 }
 0x170   : > { %20091 = vmatprep.subr.bf16.mxu1 %v20090_v24 }
 0x173   : > { %20093 = vmatpush3.bf16.msra.mxu1 %v20090_v24 }
 0x174   : > { %20095 = vmatprep.subr.bf16.mxu1 %v22665_v35 }
 0x198   : > { %v18260_v38 = vpop.f32.mrb[0].mxu0 }
 0x199   : > { %v18261_v57 = vpop.f32.mrb[1].mxu0 }
 0x19a   : > { %v18316_v42 = vpop.f32.mrb[0].mxu1  ;;  %v18262_v6 = vadd.f32 %v18261_v57, %v18260_v38 }
 0x19b   : > { %v18317_v45 = vpop.f32.mrb[1].mxu1 }
 0x19c   : > { %v18318_v46 = vadd.f32 %v18317_v45, %v18316_v42  ;;  %v572_v48 = vadd.f32 %v18262_v6, %v22620_v41  ;;  %v18263_v49 = vpop.f32.mrb[2].mxu0 }
 0x19d   : > { %v18264_v52 = vpop.f32.mrb[3].mxu0 }
 0x19e   : > { %v18319_v7 = vpop.f32.mrb[2].mxu1  ;;  %v22629_v10 = vadd.f32 %v18318_v46, %v572_v48  ;;  %v18265_v20 = vadd.f32 %v18264_v52, %v18263_v49 }
 0x19f   : > { %v18320_v54 = vpop.f32.mrb[3].mxu1 }
 0x1a0   : > { %v18321_v55 = vadd.f32 %v18320_v54, %v18319_v7  ;;  %v573_v58 = vadd.f32 %v18265_v20, %v22620_v41  ;;  %v18266_v59 = vpop.f32.mrb[4].mxu0 }
 0x1a1   : > { %v18267_v62 = vpop.f32.mrb[5].mxu0 }
 0x1a2   : > { %v18322_v0 = vpop.f32.mrb[4].mxu1  ;;  %v22638_v1 = vadd.f32 %v18321_v55, %v573_v58  ;;  %v18268_v2 = vadd.f32 %v18267_v62, %v18266_v59 }
 0x1a3   : > { %v18323_v33 = vpop.f32.mrb[5].mxu1 }
 0x1a4   : > { %v18324_v23 = vadd.f32 %v18323_v33, %v18322_v0  ;;  %v574_v63 = vadd.f32 %v18268_v2, %v22620_v41  ;;  %v18269_v3 = vpop.f32.mrb[6].mxu0 }
 0x1a5   : > { %v18270_v8 = vpop.f32.mrb[7].mxu0 }
 0x1a6   : > { %v18325_v9 = vpop.f32.mrb[6].mxu1  ;;  %v22647_v12 = vadd.f32 %v18324_v23, %v574_v63  ;;  %v18271_v37 = vadd.f32 %v18270_v8, %v18269_v3 }
 0x1a7   : > { %v18326_v13 = vpop.f32.mrb[7].mxu1 }
 0x1a8   : > { %v18327_v15 = vadd.f32 %v18326_v13, %v18325_v9  ;;  %v575_v34 = vadd.f32 %v18271_v37, %v22620_v41  ;;  %v18272_v16 = vpop.f32.mrb[8].mxu0 }
 0x1a9   : > { %v18273_v21 = vpop.f32.mrb[9].mxu0 }
 0x1aa   : > { %v18328_v22 = vpop.f32.mrb[8].mxu1  ;;  %v22656_v43 = vadd.f32 %v18327_v15, %v575_v34  ;;  %v18274_v25 = vadd.f32 %v18273_v21, %v18272_v16 }
 0x1ab   : > { %v18329_v26 = vpop.f32.mrb[9].mxu1 }
 0x1ac   : > { %v18330_v27 = vadd.f32 %v18329_v26, %v18328_v22  ;;  %v576_v28 = vadd.f32 %v18274_v25, %v22620_v41  ;;  %v18275_v47 = vpop.f32.mrb[10].mxu0 }
 0x1ad   : > { %v18276_v31 = vpop.f32.mrb[11].mxu0 }
 0x1ae   : > { %v18331_v32 = vpop.f32.mrb[10].mxu1  ;;  %v851_v56 = vadd.f32 %v18330_v27, %v576_v28  ;;  %v18277_v36 = vadd.f32 %v18276_v31, %v18275_v47 }
 0x1af   : > { %v18332_v38 = vpop.f32.mrb[11].mxu1 }
 0x1b0   : > { %v18333_v39 = vadd.f32 %v18332_v38, %v18331_v32  ;;  %v577_v40 = vadd.f32 %v18277_v36, %v22620_v41  ;;  %v18278_v57 = vpop.f32.mrb[12].mxu0 }
 0x1b1   : > { %v18279_v42 = vpop.f32.mrb[13].mxu0 }
 0x1b2   : > { %v18334_v44 = vpop.f32.mrb[12].mxu1  ;;  %v852_v6 = vadd.f32 %v18333_v39, %v577_v40  ;;  %v18280_v45 = vadd.f32 %v18279_v42, %v18278_v57 }
 0x1b3   : > { %v18335_v46 = vpop.f32.mrb[13].mxu1 }
 0x1b4   : > { %v18336_v48 = vadd.f32 %v18335_v46, %v18334_v44  ;;  %v578_v49 = vadd.f32 %v18280_v45, %v22620_v41  ;;  %v18281_v50 = vpop.f32.mrb[14].mxu0 }
 0x1b5   : > { %v18282_v51 = vpop.f32.mrb[15].mxu0 }
 0x1b6   : > { %v18337_v52 = vpop.f32.mrb[14].mxu1  ;;  %v853_v7 = vadd.f32 %v18336_v48, %v578_v49  ;;  %v18283_v53 = vadd.f32 %v18282_v51, %v18281_v50 }
 0x1b7   : > { %v18338_v20 = vpop.f32.mrb[15].mxu1 }
 0x1b8   : > { %v18339_v54 = vadd.f32 %v18338_v20, %v18337_v52  ;;  %v579_v55 = vadd.f32 %v18283_v53, %v22620_v41  ;;  %v18372_v58 = vpop.f32.mrb[16].mxu0 }
 0x1b9   : > { %v18373_v59 = vpop.f32.mrb[17].mxu0 }
 0x1ba   : > { %v18428_v60 = vpop.f32.mrb[16].mxu1  ;;  %v854_v61 = vadd.f32 %v18339_v54, %v579_v55  ;;  %v18374_v62 = vadd.f32 %v18373_v59, %v18372_v58 }
 0x1bb   : > { %v18429_v0 = vpop.f32.mrb[17].mxu1 }
 0x1bc   : > { %v18430_v18 = vadd.f32 %v18429_v0, %v18428_v60  ;;  %v1122_v2 = vadd.f32 %v18374_v62, %v22629_v10  ;;  %v18375_v33 = vpop.f32.mrb[18].mxu0 }
 0x1bd   : > { %v18376_v23 = vpop.f32.mrb[19].mxu0 }
 0x1be   : > { %v18431_v63 = vpop.f32.mrb[18].mxu1  ;;  %v1285_v3 = vadd.f32 %v18430_v18, %v1122_v2  ;;  %v18377_v4 = vadd.f32 %v18376_v23, %v18375_v33 }
 0x1bf   : > { %v18432_v5 = vpop.f32.mrb[19].mxu1 }
 0x1c0   : > { %v18433_v8 = vadd.f32 %v18432_v5, %v18431_v63  ;;  %v1123_v9 = vadd.f32 %v18377_v4, %v22638_v1  ;;  %v18378_v11 = vpop.f32.mrb[20].mxu0 }
 0x1c1   : > { %v18379_v41 = vpop.f32.mrb[21].mxu0 }
 0x1c2   : > { %v18434_v37 = vpop.f32.mrb[20].mxu1  ;;  %v1286_v13 = vadd.f32 %v18433_v8, %v1123_v9  ;;  %v18380_v14 = vadd.f32 %v18379_v41, %v18378_v11 }
 0x1c3   : > { %v18435_v15 = vpop.f32.mrb[21].mxu1 }
 0x1c4   : > { %v18436_v34 = vadd.f32 %v18435_v15, %v18434_v37  ;;  %v1124_v16 = vadd.f32 %v18380_v14, %v22647_v12  ;;  %v18381_v17 = vpop.f32.mrb[22].mxu0 }
 0x1c5   : > { %v18382_v10 = vpop.f32.mrb[23].mxu0 }
 0x1c6   : > { %v18437_v19 = vpop.f32.mrb[22].mxu1  ;;  %v1287_v21 = vadd.f32 %v18436_v34, %v1124_v16  ;;  %v18383_v22 = vadd.f32 %v18382_v10, %v18381_v17 }
 0x1c7   : > { %v18438_v24 = vpop.f32.mrb[23].mxu1 }
 0x1c8   : > { %v18439_v25 = vadd.f32 %v18438_v24, %v18437_v19  ;;  %v1125_v26 = vadd.f32 %v18383_v22, %v22656_v43  ;;  %v18384_v27 = vpop.f32.mrb[24].mxu0 }
 0x1c9   : > { %v18385_v1 = vpop.f32.mrb[25].mxu0 }
 0x1ca   : > { %v18440_v28 = vpop.f32.mrb[24].mxu1  ;;  %v1288_v47 = vadd.f32 %v18439_v25, %v1125_v26  ;;  %v18386_v29 = vadd.f32 %v18385_v1, %v18384_v27 }
 0x1cb   : > { %v18441_v30 = vpop.f32.mrb[25].mxu1 }
 0x1cc   : > { %v18442_v31 = vadd.f32 %v18441_v30, %v18440_v28  ;;  %v1126_v32 = vadd.f32 %v18386_v29, %v851_v56  ;;  %v18387_v36 = vpop.f32.mrb[26].mxu0 }
 0x1cd   : > { %v18388_v38 = vpop.f32.mrb[27].mxu0 }
 0x1ce   : > { %v18443_v12 = vpop.f32.mrb[26].mxu1  ;;  %v1289_v39 = vadd.f32 %v18442_v31, %v1126_v32  ;;  %v18389_v40 = vadd.f32 %v18388_v38, %v18387_v36 }
 0x1cf   : > { %v18444_v57 = vpop.f32.mrb[27].mxu1 }
 0x1d0   : > { %v18445_v42 = vadd.f32 %v18444_v57, %v18443_v12  ;;  %v1127_v44 = vadd.f32 %v18389_v40, %v852_v6  ;;  %v18390_v45 = vpop.f32.mrb[28].mxu0 }
 0x1d1   : > { %v18391_v46 = vpop.f32.mrb[29].mxu0 }
 0x1d2   : > { %v18446_v48 = vpop.f32.mrb[28].mxu1  ;;  %v1290_v43 = vadd.f32 %v18445_v42, %v1127_v44  ;;  %v18392_v49 = vadd.f32 %v18391_v46, %v18390_v45 }
 0x1d3   : > { %v18447_v50 = vpop.f32.mrb[29].mxu1 }
 0x1d4   : > { %v18448_v51 = vadd.f32 %v18447_v50, %v18446_v48  ;;  %v1128_v52 = vadd.f32 %v18392_v49, %v853_v7  ;;  %v18393_v53 = vpop.f32.mrb[30].mxu0 }
 0x1d5   : > { %v18394_v20 = vpop.f32.mrb[31].mxu0 }
 0x1d6   : > { %v18449_v54 = vpop.f32.mrb[30].mxu1  ;;  %v1291_v56 = vadd.f32 %v18448_v51, %v1128_v52  ;;  %v18395_v55 = vadd.f32 %v18394_v20, %v18393_v53 }
 0x1d7   : > { %v18450_v58 = vpop.f32.mrb[31].mxu1 }
 0x1d8   : > { %v18451_v59 = vadd.f32 %v18450_v58, %v18449_v54  ;;  %v1129_v60 = vadd.f32 %v18395_v55, %v854_v61  ;;  %v18484_v62 = vpop.f32.mrb[32].mxu0 }
 0x1d9   : > { %v18485_v0 = vpop.f32.mrb[33].mxu0 }
 0x1da   : > { %v18540_v18 = vpop.f32.mrb[32].mxu1  ;;  %v1292_v6 = vadd.f32 %v18451_v59, %v1129_v60  ;;  %v18486_v2 = vadd.f32 %v18485_v0, %v18484_v62 }
 0x1db   : > { %v18541_v33 = vpop.f32.mrb[33].mxu1 }
 0x1dc   : > { %v18542_v23 = vadd.f32 %v18541_v33, %v18540_v18  ;;  %v1559_v63 = vadd.f32 %v18486_v2, %v1285_v3  ;;  %v18487_v4 = vpop.f32.mrb[34].mxu0 }
 0x1dd   : > { %v18488_v5 = vpop.f32.mrb[35].mxu0 }
 0x1de   : > { %v18543_v8 = vpop.f32.mrb[34].mxu1  ;;  %v1833_v7 = vadd.f32 %v18542_v23, %v1559_v63  ;;  %v18489_v9 = vadd.f32 %v18488_v5, %v18487_v4 }
 0x1df   : > { %v18544_v11 = vpop.f32.mrb[35].mxu1 }
 0x1e0   : > { %v18545_v41 = vadd.f32 %v18544_v11, %v18543_v8  ;;  %v1560_v37 = vadd.f32 %v18489_v9, %v1286_v13  ;;  %v18490_v14 = vpop.f32.mrb[36].mxu0 }
 0x1e1   : > { %v18491_v15 = vpop.f32.mrb[37].mxu0 }
 0x1e2   : > { %v1834_v34 = vadd.f32 %v18545_v41, %v1560_v37  ;;  %v18492_v61 = vadd.f32 %v18491_v15, %v18490_v14 }
 0x1e3   : > { %v18546_v16 = vpop.f32.mrb[36].mxu1 }
 0x1e4   : > { %v1561_v17 = vadd.f32 %v18492_v61, %v1287_v21  ;;  %v18547_v10 = vpop.f32.mrb[37].mxu1 }
 0x1e5   : > { %v18548_v19 = vadd.f32 %v18547_v10, %v18546_v16 }
 0x1e6   : > { %v18493_v22 = vpop.f32.mrb[38].mxu0 }
 0x1e7   : > { %v18494_v24 = vpop.f32.mrb[39].mxu0  ;;  %v1835_v25 = vadd.f32 %v18548_v19, %v1561_v17 }
 0x1e8   : > { %v18495_v3 = vadd.f32 %v18494_v24, %v18493_v22  ;;  %v18549_v26 = vpop.f32.mrb[38].mxu1 }
 0x1e9   : > { %v18550_v1 = vpop.f32.mrb[39].mxu1 }
 0x1ea   : > { %v1562_v27 = vadd.f32 %v18495_v3, %v1288_v47  ;;  %v18551_v28 = vadd.f32 %v18550_v1, %v18549_v26 }
 0x1eb   : > { %v18496_v29 = vpop.f32.mrb[40].mxu0 }
 0x1ec   : > { %v1836_v30 = vadd.f32 %v18551_v28, %v1562_v27  ;;  %v18497_v31 = vpop.f32.mrb[41].mxu0 }
 0x1ed   : > { %v18498_v13 = vadd.f32 %v18497_v31, %v18496_v29 }
 0x1ee   : > { %v18552_v32 = vpop.f32.mrb[40].mxu1 }
 0x1ef   : > { %v18553_v36 = vpop.f32.mrb[41].mxu1  ;;  %v1563_v38 = vadd.f32 %v18498_v13, %v1289_v39 }
 0x1f0   : > { %v18554_v12 = vadd.f32 %v18553_v36, %v18552_v32 }
 0x1f1   : > { %v18499_v40 = vpop.f32.mrb[42].mxu0 }
 0x1f2   : > { %v1837_v21 = vadd.f32 %v18554_v12, %v1563_v38  ;;  %v18500_v57 = vpop.f32.mrb[43].mxu0 }
 0x1f3   : > { %v18501_v42 = vadd.f32 %v18500_v57, %v18499_v40 }
 0x1f4   : > { %v18555_v44 = vpop.f32.mrb[42].mxu1 }
 0x1f5   : > { %v1564_v45 = vadd.f32 %v18501_v42, %v1290_v43  ;;  %v18556_v46 = vpop.f32.mrb[43].mxu1 }
 0x1f6   : > { %v18557_v48 = vadd.f32 %v18556_v46, %v18555_v44  ;;  %v18502_v49 = vpop.f32.mrb[44].mxu0 }
 0x1f7   : > { %v18503_v47 = vpop.f32.mrb[45].mxu0 }
 0x1f8   : > { %v1838_v50 = vadd.f32 %v18557_v48, %v1564_v45  ;;  %v18504_v51 = vadd.f32 %v18503_v47, %v18502_v49 }
 0x1f9   : > { %v18558_v52 = vpop.f32.mrb[44].mxu1 }
 0x1fa   : > { %v1565_v53 = vadd.f32 %v18504_v51, %v1291_v56  ;;  %v18559_v20 = vpop.f32.mrb[45].mxu1 }
 0x1fb   : > { %v18560_v54 = vadd.f32 %v18559_v20, %v18558_v52 }
 0x1fc   : > { %v18505_v55 = vpop.f32.mrb[46].mxu0 }
 0x1fd   : > { %v1839_v58 = vadd.f32 %v18560_v54, %v1565_v53  ;;  %v18506_v39 = vpop.f32.mrb[47].mxu0 }
 0x1fe   : > { %v18507_v59 = vadd.f32 %v18506_v39, %v18505_v55  ;;  %v18561_v60 = vpop.f32.mrb[46].mxu1 }
 0x1ff   : > { %v18562_v62 = vpop.f32.mrb[47].mxu1 }
 0x200   : > { %v1566_v0 = vadd.f32 %v18507_v59, %v1292_v6  ;;  %v18563_v18 = vadd.f32 %v18562_v62, %v18561_v60  ;;  %v18596_v2 = vpop.f32.mrb[48].mxu0 }
 0x201   : > { %v18597_v43 = vpop.f32.mrb[49].mxu0 }
 0x202   : > { %v1840_v33 = vadd.f32 %v18563_v18, %v1566_v0  ;;  %v18598_v23 = vadd.f32 %v18597_v43, %v18596_v2 }
 0x203   : > { %v18652_v63 = vpop.f32.mrb[48].mxu1 }
 0x204   : > { %v1996_v4 = vadd.f32 %v18598_v23, %v1833_v7  ;;  %v18653_v5 = vpop.f32.mrb[49].mxu1  ;;  %v18599_v8 = vpop.f32.mrb[50].mxu0 }
 0x205   : > { %v18654_v9 = vadd.f32 %v18653_v5, %v18652_v63  ;;  %v18600_v56 = vpop.f32.mrb[51].mxu0 }
 0x206   : > { %v18601_v11 = vadd.f32 %v18600_v56, %v18599_v8 }
 0x207   : > { %v2270_v41 = vadd.f32 %v18654_v9, %v1996_v4  ;;  %v18655_v37 = vpop.f32.mrb[50].mxu1 }
 0x208   : > { %v1997_v14 = vadd.f32 %v18601_v11, %v1834_v34  ;;  %v18656_v15 = vpop.f32.mrb[51].mxu1  ;;  %v18602_v61 = vpop.f32.mrb[52].mxu0 }
 0x209   : > { %v18657_v16 = vadd.f32 %v18656_v15, %v18655_v37  ;;  %v18603_v17 = vpop.f32.mrb[53].mxu0 }
 0x20a   : > { %v18604_v6 = vadd.f32 %v18603_v17, %v18602_v61 }
 0x20b   : > { %v2271_v10 = vadd.f32 %v18657_v16, %v1997_v14  ;;  %v18658_v19 = vpop.f32.mrb[52].mxu1  ;;  %v17831_v16 = vld [vmem:[%s24998_s3 + $0x90] sm:$0xff] }
 0x20c   : > { %v1998_v22 = vadd.f32 %v18604_v6, %v1835_v25  ;;  %v18659_v24 = vpop.f32.mrb[53].mxu1  ;;  %v18605_v3 = vpop.f32.mrb[54].mxu0 }
 0x20d   : > { %v18660_v26 = vadd.f32 %v18659_v24, %v18658_v19  ;;  %v18606_v7 = vpop.f32.mrb[55].mxu0 }
 0x20e   : > { %v18607_v27 = vadd.f32 %v18606_v7, %v18605_v3  ;;  %v17834_v7 = vld [vmem:[%s24998_s3 + $0xa8] sm:$0xff] }
 0x20f   : > { %v2272_v1 = vadd.f32 %v18660_v26, %v1998_v22  ;;  %v18661_v28 = vpop.f32.mrb[54].mxu1  ;;  %v17833_v26 = vld [vmem:[%s24998_s3 + $0xa0] sm:$0xff] }
 0x210   : > { %v1999_v29 = vadd.f32 %v18607_v27, %v1836_v30  ;;  %v18662_v31 = vpop.f32.mrb[55].mxu1  ;;  %v18608_v13 = vpop.f32.mrb[56].mxu0 }
 0x211   : > { %v18663_v32 = vadd.f32 %v18662_v31, %v18661_v28  ;;  %v18609_v34 = vpop.f32.mrb[57].mxu0 }
 0x212   : > { %v18610_v36 = vadd.f32 %v18609_v34, %v18608_v13  ;;  %v20102_v13 = vpack.c.bf16 %v17834_v7, %v17833_v26  ;;  %v17835_v34 = vld [vmem:[%s24998_s3 + $0xb0] sm:$0xff]  ;;  %v17854_v26 = vld [vmem:[%s24998_s3 + $0x148] sm:$0xff] }
 0x213   : > { %v2273_v38 = vadd.f32 %v18663_v32, %v1999_v29  ;;  %v18664_v12 = vpop.f32.mrb[56].mxu1 }
 0x214   : > { %v2000_v40 = vadd.f32 %v18610_v36, %v1837_v21  ;;  %v18665_v57 = vpop.f32.mrb[57].mxu1  ;;  %v18611_v42 = vpop.f32.mrb[58].mxu0  ;;  %v17836_v36 = vld [vmem:[%s24998_s3 + $0xb8] sm:$0xff] }
 0x215   : > { %v18666_v44 = vadd.f32 %v18665_v57, %v18664_v12  ;;  %v18612_v25 = vpop.f32.mrb[59].mxu0 }
 0x216   : > { %v18613_v45 = vadd.f32 %v18612_v25, %v18611_v42  ;;  %v20106_v42 = vpack.c.bf16 %v17836_v36, %v17835_v34  ;;  %v17837_v25 = vld [vmem:[%s24998_s3 + $0xc0] sm:$0xff]  ;;  %v17858_v34 = vld [vmem:[%s24998_s3 + $0x168] sm:$0xff] }
 0x217   : > { %v2274_v46 = vadd.f32 %v18666_v44, %v2000_v40  ;;  %v18667_v48 = vpop.f32.mrb[58].mxu1 }
 0x218   : > { %v2001_v49 = vadd.f32 %v18613_v45, %v1838_v50  ;;  %v18668_v47 = vpop.f32.mrb[59].mxu1  ;;  %v18614_v51 = vpop.f32.mrb[60].mxu0  ;;  %v17838_v45 = vld [vmem:[%s24998_s3 + $0xc8] sm:$0xff] }
 0x219   : > { %v18669_v52 = vadd.f32 %v18668_v47, %v18667_v48  ;;  %v18615_v30 = vpop.f32.mrb[61].mxu0 }
 0x21a   : > { %v18616_v53 = vadd.f32 %v18615_v30, %v18614_v51 }
 0x21b   : > { %v22675_v20 = vadd.f32 %v18669_v52, %v2001_v49  ;;  %v18670_v54 = vpop.f32.mrb[60].mxu1  ;;  %v20110_v52 = vpack.c.bf16 %v17838_v45, %v17837_v25  ;;  %v17863_v45 = vld [vmem:[%s24998_s3 + $0x190] sm:$0xff] }
 0x21c   : > { %v2002_v55 = vadd.f32 %v18616_v53, %v1839_v58  ;;  %v18671_v39 = vpop.f32.mrb[61].mxu1  ;;  %v18617_v59 = vpop.f32.mrb[62].mxu0  ;;  %v17839_v53 = vld [vmem:[%s24998_s3 + $0xd0] sm:$0xff] }
 0x21d   : > { %v18672_v21 = vadd.f32 %v18671_v39, %v18670_v54  ;;  %v18618_v60 = vpop.f32.mrb[63].mxu0 }
 0x21e   : > { %v18619_v62 = vadd.f32 %v18618_v60, %v18617_v59 }
 0x21f   : > { %v22677_v0 = vadd.f32 %v18672_v21, %v2002_v55  ;;  %v18673_v18 = vpop.f32.mrb[62].mxu1 }
 0x220   : > { %v2003_v2 = vadd.f32 %v18619_v62, %v1840_v33  ;;  %v18674_v43 = vpop.f32.mrb[63].mxu1  ;;  %v18708_v50 = vpop.f32.mrb[64].mxu0 }
 0x221   : > { %v18675_v23 = vadd.f32 %v18674_v43, %v18673_v18  ;;  %v18709_v63 = vpop.f32.mrb[65].mxu0  ;;  %v17841_v18 = vld [vmem:[%s24998_s3 + $0xe0] sm:$0xff] }
 0x222   : > { %v18710_v4 = vadd.f32 %v18709_v63, %v18708_v50  ;;  %v17843_v63 = vld [vmem:[%s24998_s3 + $0xf0] sm:$0xff] }
 0x223   : > { %v22679_v5 = vadd.f32 %v18675_v23, %v2003_v2 }
 0x224   : > { %v2544_v8 = vadd.f32 %v18710_v4, %v2270_v41  ;;  %v18711_v9 = vpop.f32.mrb[66].mxu0  ;;  %v17832_v41 = vld [vmem:[%s24998_s3 + $0x98] sm:$0xff] }
 0x225   : > { %v18712_v56 = vpop.f32.mrb[67].mxu0  ;;  %v20098_v24 = vpack.c.bf16 %v17832_v41, %v17831_v16  ;;  %v17844_v4 = vld [vmem:[%s24998_s3 + $0xf8] sm:$0xff]  ;;  %v17849_v16 = vld [vmem:[%s24998_s3 + $0x120] sm:$0xff]  ;;  %v17850_v41 = vld [vmem:[%s24998_s3 + $0x128] sm:$0xff] }
 0x226   : > { %v22681_v58 = vmax.f32 %v2544_v8, 0.0  ;;  %v18713_v11 = vadd.f32 %v18712_v56, %v18711_v9  ;;  %v2734_v8 = vld [vmem:[#allocation2 + $0x1] sm:$0xff] }
 0x227   : > { %v17845_v56 = vld [vmem:[%s24998_s3 + $0x100] sm:$0xff] }
 0x228   : > { %2581 = vst [vmem:[#allocation2 + $0x11] sm:$0xff] %v22681_v58  ;;  %v2545_v37 = vadd.f32 %v18713_v11, %v2271_v10  ;;  %v18714_v14 = vpop.f32.mrb[68].mxu0  ;;  %v17846_v11 = vld [vmem:[%s24998_s3 + $0x108] sm:$0xff] }
 0x229   : > { %v18715_v15 = vpop.f32.mrb[69].mxu0 }
 0x22a   : > { %v22684_v61 = vmax.f32 %v2545_v37, 0.0  ;;  %v18716_v33 = vadd.f32 %v18715_v15, %v18714_v14  ;;  %v20126_v37 = vpack.c.bf16 %v17846_v11, %v17845_v56  ;;  %v17847_v14 = vld [vmem:[%s24998_s3 + $0x110] sm:$0xff]  ;;  %v17848_v15 = vld [vmem:[%s24998_s3 + $0x118] sm:$0xff]  ;;  %v17873_v11 = vld [vmem:[%s24998_s3 + $0x1e0] sm:$0xff] }
 0x22c   : > { %2582 = vst [vmem:[#allocation2 + $0x21] sm:$0xff] %v22684_v61  ;;  %v2546_v17 = vadd.f32 %v18716_v33, %v2272_v1  ;;  %v18717_v6 = vpop.f32.mrb[70].mxu0  ;;  %v20130_v33 = vpack.c.bf16 %v17848_v15, %v17847_v14  ;;  %v17875_v15 = vld [vmem:[%s24998_s3 + $0x1f0] sm:$0xff] }
 0x22d   : > { %v18718_v19 = vpop.f32.mrb[71].mxu0 }
 0x22e   : > { %v22693_v22 = vmax.f32 %v2546_v17, 0.0  ;;  %v18719_v10 = vadd.f32 %v18718_v19, %v18717_v6  ;;  %v20134_v17 = vpack.c.bf16 %v17850_v41, %v17849_v16  ;;  %v17851_v6 = vld [vmem:[%s24998_s3 + $0x130] sm:$0xff]  ;;  %v17852_v19 = vld [vmem:[%s24998_s3 + $0x138] sm:$0xff]  ;;  %v17877_v16 = vld [vmem:[%s24998_s3 + $0x200] sm:$0xff] }
 0x22f   : > { %v22695_v3 = vld [vmem:[#allocation2 + $0x10] sm:$0xff]  ;;  %v17878_v41 = vld [vmem:[%s24998_s3 + $0x208] sm:$0xff] }
 0x230   : > { %2583 = vst [vmem:[#allocation2 + $0x31] sm:$0xff] %v22693_v22  ;;  %v2547_v27 = vadd.f32 %v18719_v10, %v2273_v38  ;;  %v18720_v1 = vpop.f32.mrb[72].mxu0  ;;  %19137 = vmatmul.mubr.f32.vlgmr.msra.gmra.mrb[64].mxu1 %v22695_v3  ;;  %v20138_v10 = vpack.c.bf16 %v17852_v19, %v17851_v6  ;;  %v17879_v6 = vld [vmem:[%s24998_s3 + $0x210] sm:$0xff]  ;;  %v17880_v19 = vld [vmem:[%s24998_s3 + $0x218] sm:$0xff] }
 0x231   : > { %20097 = vmatpush3.bf16.msra.mxu1 %v22665_v35  ;;  %v18721_v28 = vpop.f32.mrb[73].mxu0 }
 0x232   : > { %v22706_v29 = vmax.f32 %v2547_v27, 0.0  ;;  %v18722_v31 = vadd.f32 %v18721_v28, %v18720_v1  ;;  %20099 = vmatprep.subr.bf16.mxu1 %v20098_v24  ;;  %v2872_v27 = vld [vmem:[#allocation2 + $0x2] sm:$0xff]  ;;  %v17855_v1 = vld [vmem:[%s24998_s3 + $0x150] sm:$0xff]  ;;  %v17856_v28 = vld [vmem:[%s24998_s3 + $0x158] sm:$0xff] }
 0x233   : > { %v22708_v32 = vld [vmem:[#allocation2 + $0x20] sm:$0xff] }
 0x234   : > { %2584 = vst [vmem:[#allocation2 + $0x41] sm:$0xff] %v22706_v29  ;;  %v2548_v38 = vadd.f32 %v18722_v31, %v2274_v46  ;;  %v18723_v35 = vpop.f32.mrb[74].mxu0  ;;  %19139 = vmatprep.mubr.f32.mxu1 %v22708_v32  ;;  %v20146_v31 = vpack.c.bf16 %v17856_v28, %v17855_v1  ;;  %v17884_v1 = vld [vmem:[%s24998_s3 + $0x238] sm:$0xff] }
 0x235   : > { %20101 = vmatpush3.bf16.msra.mxu1 %v20098_v24  ;;  %v18724_v12 = vpop.f32.mrb[75].mxu0  ;;  %v17853_v24 = vld [vmem:[%s24998_s3 + $0x140] sm:$0xff] }
 0x236   : > { %v22718_v40 = vmax.f32 %v2548_v38, 0.0  ;;  %v18725_v57 = vadd.f32 %v18724_v12, %v18723_v35  ;;  %20103 = vmatprep.subr.bf16.mxu1 %v20102_v13  ;;  %v20142_v7 = vpack.c.bf16 %v17854_v26, %v17853_v24  ;;  %v17859_v38 = vld [vmem:[%s24998_s3 + $0x170] sm:$0xff]  ;;  %v17860_v35 = vld [vmem:[%s24998_s3 + $0x178] sm:$0xff]  ;;  %v17881_v24 = vld [vmem:[%s24998_s3 + $0x220] sm:$0xff] }
 0x237   : > { %v22720_v44 = vld [vmem:[#allocation2 + $0x30] sm:$0xff]  ;;  %v20154_v12 = vpack.c.bf16 %v17860_v35, %v17859_v38  ;;  %v17882_v26 = vld [vmem:[%s24998_s3 + $0x228] sm:$0xff]  ;;  %v17888_v35 = vld [vmem:[%s24998_s3 + $0x258] sm:$0xff] }
 0x238   : > { %2585 = vst [vmem:[#allocation2 + $0x51] sm:$0xff] %v22718_v40  ;;  %v2549_v46 = vadd.f32 %v18725_v57, %v22675_v20  ;;  %v18726_v48 = vpop.f32.mrb[76].mxu0  ;;  %19140 = vmatmul.mubr.f32.gmra.mrb[66].mxu1 %v22720_v44  ;;  %v17840_v20 = vld [vmem:[%s24998_s3 + $0xd8] sm:$0xff]  ;;  %v17861_v57 = vld [vmem:[%s24998_s3 + $0x180] sm:$0xff]  ;;  %v17887_v38 = vld [vmem:[%s24998_s3 + $0x250] sm:$0xff] }
 0x239   : > { %20105 = vmatpush3.bf16.msra.mxu1 %v20102_v13  ;;  %v18727_v49 = vpop.f32.mrb[77].mxu0  ;;  %v20114_v60 = vpack.c.bf16 %v17840_v20, %v17839_v53  ;;  %v17857_v13 = vld [vmem:[%s24998_s3 + $0x160] sm:$0xff] }
 0x23a   : > { %v22731_v47 = vmax.f32 %v2549_v46, 0.0  ;;  %v18728_v51 = vadd.f32 %v18727_v49, %v18726_v48  ;;  %20107 = vmatprep.subr.bf16.mxu1 %v20106_v42  ;;  %v20150_v36 = vpack.c.bf16 %v17858_v34, %v17857_v13  ;;  %v17864_v46 = vld [vmem:[%s24998_s3 + $0x198] sm:$0xff]  ;;  %v22848_v53 = vld [vmem:[#allocation2 + $0x22] sm:$0xff] }
 0x23b   : > { %v22733_v30 = vld [vmem:[#allocation2 + $0x40] sm:$0xff]  ;;  %v20162_v48 = vpack.c.bf16 %v17864_v46, %v17863_v45  ;;  %v22839_v49 = vld [vmem:[#allocation2 + $0x12] sm:$0xff]  ;;  %v17886_v13 = vld [vmem:[%s24998_s3 + $0x248] sm:$0xff] }
 0x23c   : > { %2586 = vst [vmem:[#allocation2 + $0x61] sm:$0xff] %v22731_v47  ;;  %v2550_v54 = vadd.f32 %v18728_v51, %v22677_v0  ;;  %v18729_v55 = vpop.f32.mrb[78].mxu0  ;;  %19142 = vmatprep.mubr.f32.mxu1 %v22733_v30  ;;  %v17842_v0 = vld [vmem:[%s24998_s3 + $0xe8] sm:$0xff]  ;;  %v17865_v51 = vld [vmem:[%s24998_s3 + $0x1a0] sm:$0xff]  ;;  %v17891_v45 = vld [vmem:[%s24998_s3 + $0x270] sm:$0xff] }
 0x23d   : > { %20109 = vmatpush3.bf16.msra.mxu1 %v20106_v42  ;;  %v18730_v39 = vpop.f32.mrb[79].mxu0  ;;  %v20118_v50 = vpack.c.bf16 %v17842_v0, %v17841_v18  ;;  %v17862_v42 = vld [vmem:[%s24998_s3 + $0x188] sm:$0xff]  ;;  %v17869_v0 = vld [vmem:[%s24998_s3 + $0x1c0] sm:$0xff] }
 0x23e   : > { %v22744_v59 = vmax.f32 %v2550_v54, 0.0  ;;  %v18731_v21 = vadd.f32 %v18730_v39, %v18729_v55  ;;  %20111 = vmatprep.subr.bf16.mxu1 %v20110_v52  ;;  %v20158_v25 = vpack.c.bf16 %v17862_v42, %v17861_v57  ;;  %v22851_v54 = vld [vmem:[#allocation2 + $0x32] sm:$0xff]  ;;  %v17889_v57 = vld [vmem:[%s24998_s3 + $0x260] sm:$0xff]  ;;  %v17890_v42 = vld [vmem:[%s24998_s3 + $0x268] sm:$0xff] }
 0x23f   : > { %v22746_v62 = vld [vmem:[#allocation2 + $0x50] sm:$0xff]  ;;  %v17868_v39 = vld [vmem:[%s24998_s3 + $0x1b8] sm:$0xff] }
 0x240   : > { %2587 = vst [vmem:[#allocation2 + $0x71] sm:$0xff] %v22744_v59  ;;  %v2551_v2 = vadd.f32 %v18731_v21, %v22679_v5  ;;  %19143 = vmatmul.mubr.f32.gmra.mrb[68].mxu1 %v22746_v62  ;;  %v20122_v5 = vpack.c.bf16 %v17844_v4, %v17843_v63  ;;  %v17867_v55 = vld [vmem:[%s24998_s3 + $0x1b0] sm:$0xff]  ;;  %v22860_v21 = vld [vmem:[#allocation2 + $0x42] sm:$0xff] }
 0x241   : > { %20113 = vmatpush3.bf16.msra.mxu1 %v20110_v52  ;;  %v17866_v52 = vld [vmem:[%s24998_s3 + $0x1a8] sm:$0xff]  ;;  %v22863_v18 = vld [vmem:[#allocation2 + $0x52] sm:$0xff] }
 0x242   : > { %v22757_v43 = vmax.f32 %v2551_v2, 0.0  ;;  %20115 = vmatprep.subr.bf16.mxu1 %v20114_v60  ;;  %v20166_v20 = vpack.c.bf16 %v17866_v52, %v17865_v51  ;;  %v17870_v2 = vld [vmem:[%s24998_s3 + $0x1c8] sm:$0xff] }
 0x243   : > { %v22759_v23 = vld [vmem:[#allocation2 + $0x60] sm:$0xff]  ;;  %v20174_v63 = vpack.c.bf16 %v17870_v2, %v17869_v0  ;;  %v17894_v51 = vld [vmem:[%s24998_s3 + $0x288] sm:$0xff] }
 0x244   : > { %2588 = vst [vmem:[#allocation2 + $0x81] sm:$0xff] %v22757_v43  ;;  %19145 = vmatprep.mubr.f32.mxu1 %v22759_v23  ;;  %v17898_v0 = vld [vmem:[%s24998_s3 + $0x2a8] sm:$0xff] }
 0x245   : > { %20117 = vmatpush3.bf16.msra.mxu1 %v20114_v60  ;;  %v20170_v60 = vpack.c.bf16 %v17868_v39, %v17867_v55  ;;  %v17896_v55 = vld [vmem:[%s24998_s3 + $0x298] sm:$0xff] }
 0x246   : > { %20119 = vmatprep.subr.bf16.mxu1 %v20118_v50 }
 0x247   : > { %v22769_v9 = vld [vmem:[#allocation2 + $0x70] sm:$0xff] }
 0x248   : > { %19146 = vmatmul.mubr.f32.gmra.mrb[70].mxu1 %v22769_v9  ;;  %v22875_v4 = vld [vmem:[#allocation2 + $0x72] sm:$0xff] }
 0x249   : > { %20121 = vmatpush3.bf16.msra.mxu1 %v20118_v50  ;;  %19180 = vmatprep.mubr.f32.mxu1 %v2734_v8  ;;  %v22872_v50 = vld [vmem:[#allocation2 + $0x62] sm:$0xff]  ;;  %v17872_v8 = vld [vmem:[%s24998_s3 + $0x1d8] sm:$0xff] }
 0x24a   : > { %20123 = vmatprep.subr.bf16.mxu1 %v20122_v5 }
 0x24d   : > { %20125 = vmatpush3.bf16.msra.mxu1 %v20122_v5  ;;  %v17871_v5 = vld [vmem:[%s24998_s3 + $0x1d0] sm:$0xff] }
 0x24e   : > { %20127 = vmatprep.subr.bf16.mxu1 %v20126_v37  ;;  %v20178_v56 = vpack.c.bf16 %v17872_v8, %v17871_v5  ;;  %v17900_v5 = vld [vmem:[%s24998_s3 + $0x2b8] sm:$0xff] }
 0x250   : > { %19181 = vmatmul.mubr.f32.vlgmr.msra.gmra.mrb[64].mxu1 %v22681_v58 }
 0x251   : > { %19183 = vmatprep.mubr.f32.mxu1 %v22684_v61  ;;  %20129 = vmatpush3.bf16.msra.mxu1 %v20126_v37  ;;  %v17874_v37 = vld [vmem:[%s24998_s3 + $0x1e8] sm:$0xff] }
 0x252   : > { %20131 = vmatprep.subr.bf16.mxu1 %v20130_v33  ;;  %v20182_v14 = vpack.c.bf16 %v17874_v37, %v17873_v11  ;;  %v17902_v11 = vld [vmem:[%s24998_s3 + $0x2c8] sm:$0xff] }
 0x254   : > { %19184 = vmatmul.mubr.f32.gmra.mrb[66].mxu1 %v22693_v22 }
 0x255   : > { %19186 = vmatprep.mubr.f32.mxu1 %v22706_v29  ;;  %20133 = vmatpush3.bf16.msra.mxu1 %v20130_v33 }
 0x256   : > { %20135 = vmatprep.subr.bf16.mxu1 %v20134_v17 }
 0x258   : > { %19187 = vmatmul.mubr.f32.gmra.mrb[68].mxu1 %v22718_v40 }
 0x259   : > { %19189 = vmatprep.mubr.f32.mxu1 %v22731_v47  ;;  %20137 = vmatpush3.bf16.msra.mxu1 %v20134_v17  ;;  %v20190_v17 = vpack.c.bf16 %v17878_v41, %v17877_v16  ;;  %v3896_v16 = vld [vmem:[%s25000_s5 + $0x10] sm:$0xff] }
 0x25a   : > { %20139 = vmatprep.subr.bf16.mxu1 %v20138_v10 }
 0x25c   : > { %19190 = vmatmul.mubr.f32.gmra.mrb[70].mxu1 %v22744_v59 }
 0x25d   : > { %20141 = vmatpush3.bf16.msra.mxu1 %v20138_v10  ;;  %19224 = vmatprep.mubr.f32.mxu1 %v2872_v27  ;;  %v20194_v10 = vpack.c.bf16 %v17880_v19, %v17879_v6  ;;  %v17883_v27 = vld [vmem:[%s24998_s3 + $0x230] sm:$0xff] }
 0x25e   : > { %20143 = vmatprep.subr.bf16.mxu1 %v20142_v7  ;;  %v20202_v28 = vpack.c.bf16 %v17884_v1, %v17883_v27  ;;  %v17907_v1 = vld [vmem:[%s24998_s3 + $0x2f0] sm:$0xff] }
 0x261   : > { %20145 = vmatpush3.bf16.msra.mxu1 %v20142_v7  ;;  %v20198_v7 = vpack.c.bf16 %v17882_v26, %v17881_v24  ;;  %v3899_v24 = vld [vmem:[%s25000_s5 + $0x28] sm:$0xff] }
 0x262   : > { %20147 = vmatprep.subr.bf16.mxu1 %v20146_v31  ;;  %v17906_v26 = vld [vmem:[%s24998_s3 + $0x2e8] sm:$0xff] }
 0x265   : > { %20149 = vmatpush3.bf16.msra.mxu1 %v20146_v31  ;;  %v17885_v31 = vld [vmem:[%s24998_s3 + $0x240] sm:$0xff] }
 0x266   : > { %20151 = vmatprep.subr.bf16.mxu1 %v20150_v36  ;;  %v20206_v34 = vpack.c.bf16 %v17886_v13, %v17885_v31  ;;  %v17909_v13 = vld [vmem:[%s24998_s3 + $0x300] sm:$0xff] }
 0x269   : > { %20153 = vmatpush3.bf16.msra.mxu1 %v20150_v36  ;;  %v22933_v36 = vld [vmem:[#allocation2 + $0x80] sm:$0xff] }
 0x26a   : > { %20155 = vmatprep.subr.bf16.mxu1 %v20154_v12 }
 0x26d   : > { %20157 = vmatpush3.bf16.msra.mxu1 %v20154_v12  ;;  %v20210_v12 = vpack.c.bf16 %v17888_v35, %v17887_v38  ;;  %v17911_v35 = vld [vmem:[%s24998_s3 + $0x310] sm:$0xff] }
 0x26e   : > { %20159 = vmatprep.subr.bf16.mxu1 %v20158_v25 }
 0x270   : > { %19225 = vmatmul.mubr.f32.vlgmr.msra.gmra.mrb[64].mxu1 %v22839_v49 }
 0x271   : > { %19227 = vmatprep.mubr.f32.mxu1 %v22848_v53  ;;  %20161 = vmatpush3.bf16.msra.mxu1 %v20158_v25  ;;  %v20214_v25 = vpack.c.bf16 %v17890_v42, %v17889_v57  ;;  %v17913_v42 = vld [vmem:[%s24998_s3 + $0x320] sm:$0xff] }
 0x272   : > { %20163 = vmatprep.subr.bf16.mxu1 %v20162_v48 }
 0x274   : > { %19228 = vmatmul.mubr.f32.gmra.mrb[66].mxu1 %v22851_v54 }
 0x275   : > { %19230 = vmatprep.mubr.f32.mxu1 %v22860_v21  ;;  %20165 = vmatpush3.bf16.msra.mxu1 %v20162_v48  ;;  %v17893_v48 = vld [vmem:[%s24998_s3 + $0x280] sm:$0xff] }
 0x276   : > { %20167 = vmatprep.subr.bf16.mxu1 %v20166_v20  ;;  %v20222_v52 = vpack.c.bf16 %v17894_v51, %v17893_v48  ;;  %v17917_v51 = vld [vmem:[%s24998_s3 + $0x340] sm:$0xff] }
 0x278   : > { %19231 = vmatmul.mubr.f32.gmra.mrb[68].mxu1 %v22863_v18 }
 0x279   : > { %19233 = vmatprep.mubr.f32.mxu1 %v22872_v50  ;;  %20169 = vmatpush3.bf16.msra.mxu1 %v20166_v20  ;;  %v17895_v20 = vld [vmem:[%s24998_s3 + $0x290] sm:$0xff] }
 0x27a   : > { %20171 = vmatprep.subr.bf16.mxu1 %v20170_v60  ;;  %v20226_v39 = vpack.c.bf16 %v17896_v55, %v17895_v20  ;;  %v23065_v55 = vld [vmem:[#allocation2 + $0x82] sm:$0xff] }
 0x27c   : > { %19234 = vmatmul.mubr.f32.gmra.mrb[70].mxu1 %v22875_v4 }
 0x27d   : > { %20173 = vmatpush3.bf16.msra.mxu1 %v20170_v60  ;;  %19268 = vmatprep.mubr.f32.mxu1 %v22695_v3  ;;  %v17876_v3 = vld [vmem:[%s24998_s3 + $0x1f8] sm:$0xff]  ;;  %v17897_v60 = vld [vmem:[%s24998_s3 + $0x2a0] sm:$0xff] }
 0x27e   : > { %20175 = vmatprep.subr.bf16.mxu1 %v20174_v63  ;;  %v20186_v33 = vpack.c.bf16 %v17876_v3, %v17875_v15  ;;  %v20230_v2 = vpack.c.bf16 %v17898_v0, %v17897_v60  ;;  %v17904_v15 = vld [vmem:[%s24998_s3 + $0x2d8] sm:$0xff]  ;;  %v3894_v3 = vld [vmem:[%s25000_s5] sm:$0xff] }
 0x27f   : > { %v17920_v60 = vld [vmem:[%s24998_s3 + $0x358] sm:$0xff] }
 0x281   : > { %20177 = vmatpush3.bf16.msra.mxu1 %v20174_v63  ;;  %v17899_v63 = vld [vmem:[%s24998_s3 + $0x2b0] sm:$0xff] }
 0x282   : > { %20179 = vmatprep.subr.bf16.mxu1 %v20178_v56  ;;  %v20234_v8 = vpack.c.bf16 %v17900_v5, %v17899_v63  ;;  %v17922_v63 = vld [vmem:[%s24998_s3 + $0x368] sm:$0xff] }
 0x285   : > { %20181 = vmatpush3.bf16.msra.mxu1 %v20178_v56  ;;  %v17901_v56 = vld [vmem:[%s24998_s3 + $0x2c0] sm:$0xff] }
 0x286   : > { %20183 = vmatprep.subr.bf16.mxu1 %v20182_v14  ;;  %v20238_v37 = vpack.c.bf16 %v17902_v11, %v17901_v56  ;;  %v17925_v11 = vld [vmem:[%s24998_s3 + $0x380] sm:$0xff] }
 0x289   : > { %20185 = vmatpush3.bf16.msra.mxu1 %v20182_v14  ;;  %v17903_v14 = vld [vmem:[%s24998_s3 + $0x2d0] sm:$0xff] }
 0x28a   : > { %20187 = vmatprep.subr.bf16.mxu1 %v20186_v33  ;;  %v20242_v6 = vpack.c.bf16 %v17904_v15, %v17903_v14  ;;  %v17927_v15 = vld [vmem:[%s24998_s3 + $0x390] sm:$0xff] }
 0x28d   : > { %20189 = vmatpush3.bf16.msra.mxu1 %v20186_v33  ;;  %v3895_v33 = vld [vmem:[%s25000_s5 + $0x8] sm:$0xff] }
 0x28e   : > { %20191 = vmatprep.subr.bf16.mxu1 %v20190_v17  ;;  %v20350_v41 = vpack.c.bf16 %v3895_v33, %v3894_v3  ;;  %v17928_v3 = vld [vmem:[%s24998_s3 + $0x398] sm:$0xff] }
 0x28f   : > { %v20290_v33 = vpack.c.bf16 %v17928_v3, %v17927_v15 }
 0x290   : > { %19269 = vmatmul.mubr.f32.vlgmr.msra.gmra.mrb[64].mxu1 %v22708_v32  ;;  %20351 = vmatprep.subr.bf16.mxu0 %v20350_v41 }
 0x291   : > { %19271 = vmatprep.mubr.f32.mxu1 %v22720_v44  ;;  %20193 = vmatpush3.bf16.msra.mxu1 %v20190_v17  ;;  %v3897_v17 = vld [vmem:[%s25000_s5 + $0x18] sm:$0xff] }
 0x292   : > { %20195 = vmatprep.subr.bf16.mxu1 %v20194_v10  ;;  %v20354_v19 = vpack.c.bf16 %v3897_v17, %v3896_v16  ;;  %20353 = vmatpush3.bf16.msra.mxu0 %v20350_v41  ;;  %v17929_v16 = vld [vmem:[%s24998_s3 + $0x3a0] sm:$0xff]  ;;  %v17930_v41 = vld [vmem:[%s24998_s3 + $0x3a8] sm:$0xff] }
 0x293   : > { %v20294_v17 = vpack.c.bf16 %v17930_v41, %v17929_v16 }
 0x294   : > { %19272 = vmatmul.mubr.f32.gmra.mrb[66].mxu1 %v22733_v30  ;;  %20355 = vmatprep.subr.bf16.mxu0 %v20354_v19 }
 0x295   : > { %19274 = vmatprep.mubr.f32.mxu1 %v22746_v62  ;;  %20197 = vmatpush3.bf16.msra.mxu1 %v20194_v10  ;;  %v3898_v10 = vld [vmem:[%s25000_s5 + $0x20] sm:$0xff] }
 0x296   : > { %20199 = vmatprep.subr.bf16.mxu1 %v20198_v7  ;;  %20357 = vmatpush3.bf16.msra.mxu0 %v20354_v19  ;;  %v17932_v19 = vld [vmem:[%s24998_s3 + $0x3b8] sm:$0xff] }
 0x298   : > { %19275 = vmatmul.mubr.f32.gmra.mrb[68].mxu1 %v22759_v23 }
 0x299   : > { %19277 = vmatprep.mubr.f32.mxu1 %v22769_v9  ;;  %20201 = vmatpush3.bf16.msra.mxu1 %v20198_v7  ;;  %v20358_v7 = vpack.c.bf16 %v3899_v24, %v3898_v10  ;;  %v17934_v10 = vld [vmem:[%s24998_s3 + $0x3c8] sm:$0xff]  ;;  %v17936_v24 = vld [vmem:[%s24998_s3 + $0x3d8] sm:$0xff] }
 0x29a   : > { %20203 = vmatprep.subr.bf16.mxu1 %v20202_v28 }
 0x29b   : > { %20359 = vmatprep.subr.bf16.mxu0 %v20358_v7 }
 0x29c   : > { %19278 = vmatmul.mubr.f32.gmra.mrb[70].mxu1 %v22933_v36  ;;  %20361 = vmatpush3.bf16.msra.mxu0 %v20358_v7 }
 0x29d   : > { %20205 = vmatpush3.bf16.msra.mxu1 %v20202_v28  ;;  %19312 = vmatprep.mubr.f32.mxu1 %v22681_v58  ;;  %v17892_v58 = vld [vmem:[%s24998_s3 + $0x278] sm:$0xff] }
 0x29e   : > { %20207 = vmatprep.subr.bf16.mxu1 %v20206_v34  ;;  %v20218_v46 = vpack.c.bf16 %v17892_v58, %v17891_v45  ;;  %v17908_v28 = vld [vmem:[%s24998_s3 + $0x2f8] sm:$0xff]  ;;  %v17915_v58 = vld [vmem:[%s24998_s3 + $0x330] sm:$0xff] }
 0x29f   : > { %v20250_v31 = vpack.c.bf16 %v17908_v28, %v17907_v1  ;;  %v17941_v28 = vld [vmem:[%s24998_s3 + $0x400] sm:$0xff] }
 0x2a1   : > { %20209 = vmatpush3.bf16.msra.mxu1 %v20206_v34  ;;  %v17910_v34 = vld [vmem:[%s24998_s3 + $0x308] sm:$0xff] }
 0x2a2   : > { %20211 = vmatprep.subr.bf16.mxu1 %v20210_v12  ;;  %v20254_v38 = vpack.c.bf16 %v17910_v34, %v17909_v13  ;;  %v17943_v34 = vld [vmem:[%s24998_s3 + $0x410] sm:$0xff] }
 0x2a5   : > { %20213 = vmatpush3.bf16.msra.mxu1 %v20210_v12  ;;  %v17912_v12 = vld [vmem:[%s24998_s3 + $0x318] sm:$0xff] }
 0x2a6   : > { %20215 = vmatprep.subr.bf16.mxu1 %v20214_v25  ;;  %v20258_v57 = vpack.c.bf16 %v17912_v12, %v17911_v35  ;;  %v17945_v12 = vld [vmem:[%s24998_s3 + $0x420] sm:$0xff] }
 0x2a9   : > { %20217 = vmatpush3.bf16.msra.mxu1 %v20214_v25  ;;  %v17914_v25 = vld [vmem:[%s24998_s3 + $0x328] sm:$0xff] }
 0x2aa   : > { %20219 = vmatprep.subr.bf16.mxu1 %v20218_v46  ;;  %v20262_v45 = vpack.c.bf16 %v17914_v25, %v17913_v42  ;;  %v17947_v25 = vld [vmem:[%s24998_s3 + $0x430] sm:$0xff] }
 0x2ad   : > { %20221 = vmatpush3.bf16.msra.mxu1 %v20218_v46  ;;  %v17916_v46 = vld [vmem:[%s24998_s3 + $0x338] sm:$0xff] }
 0x2ae   : > { %20223 = vmatprep.subr.bf16.mxu1 %v20222_v52  ;;  %v20266_v48 = vpack.c.bf16 %v17916_v46, %v17915_v58  ;;  %v17950_v58 = vld [vmem:[%s24998_s3 + $0x448] sm:$0xff]  ;;  %v3570_v46 = vld [vmem:[#allocation2 + $0x91] sm:$0xff] }
 0x2b0   : > { %19313 = vmatmul.mubr.f32.vlgmr.msra.gmra.mrb[64].mxu1 %v22684_v61 }
 0x2b1   : > { %19315 = vmatprep.mubr.f32.mxu1 %v22693_v22  ;;  %20225 = vmatpush3.bf16.msra.mxu1 %v20222_v52  ;;  %v17918_v52 = vld [vmem:[%s24998_s3 + $0x348] sm:$0xff] }
 0x2b2   : > { %20227 = vmatprep.subr.bf16.mxu1 %v20226_v39  ;;  %v20270_v20 = vpack.c.bf16 %v17918_v52, %v17917_v51  ;;  %v17954_v51 = vld [vmem:[%s24998_s3 + $0x468] sm:$0xff] }
 0x2b4   : > { %19316 = vmatmul.mubr.f32.gmra.mrb[66].mxu1 %v22706_v29 }
 0x2b5   : > { %19318 = vmatprep.mubr.f32.mxu1 %v22718_v40  ;;  %20229 = vmatpush3.bf16.msra.mxu1 %v20226_v39  ;;  %v17919_v39 = vld [vmem:[%s24998_s3 + $0x350] sm:$0xff] }
 0x2b6   : > { %20231 = vmatprep.subr.bf16.mxu1 %v20230_v2  ;;  %v20274_v0 = vpack.c.bf16 %v17920_v60, %v17919_v39  ;;  %v3708_v60 = vld [vmem:[#allocation2 + $0x92] sm:$0xff] }
 0x2b8   : > { %19319 = vmatmul.mubr.f32.gmra.mrb[68].mxu1 %v22731_v47 }
 0x2b9   : > { %19321 = vmatprep.mubr.f32.mxu1 %v22744_v59  ;;  %20233 = vmatpush3.bf16.msra.mxu1 %v20230_v2  ;;  %v17921_v2 = vld [vmem:[%s24998_s3 + $0x360] sm:$0xff] }
 0x2ba   : > { %20235 = vmatprep.subr.bf16.mxu1 %v20234_v8  ;;  %v20278_v5 = vpack.c.bf16 %v17922_v63, %v17921_v2  ;;  %v17828_v2 = vld [vmem:[#allocation8] ss:$0 sm:$0xff] }
 0x2bc   : > { %19322 = vmatmul.mubr.f32.gmra.mrb[70].mxu1 %v22757_v43 }
 0x2bd   : > { %20237 = vmatpush3.bf16.msra.mxu1 %v20234_v8  ;;  %19356 = vmatprep.mubr.f32.mxu1 %v22839_v49  ;;  %v17905_v49 = vld [vmem:[%s24998_s3 + $0x2e0] sm:$0xff]  ;;  %v17923_v8 = vld [vmem:[%s24998_s3 + $0x370] sm:$0xff] }
 0x2be   : > { %20239 = vmatprep.subr.bf16.mxu1 %v20238_v37  ;;  %v20246_v27 = vpack.c.bf16 %v17906_v26, %v17905_v49  ;;  %v23129_v49 = vld [vmem:[#allocation2] sm:$0xff]  ;;  %v17938_v26 = vld [vmem:[%s24998_s3 + $0x3e8] sm:$0xff] }
 0x2bf   : > { %3853 = vst.msk [vmem:[#allocation3 + $0x20] sm:$0xff] %vm3847_vm2, %v23129_v49  ;;  %3848 = vst.msk [vmem:[#allocation3] sm:$0xff] %vm3847_vm2, %v23129_v49 }
 0x2c0   : > { %3854 = vst.msk [vmem:[#allocation3 + $0x28] sm:$0x3] %vm3849_vm3, %v23129_v49  ;;  %3850 = vst.msk [vmem:[#allocation3 + $0x8] sm:$0x3] %vm3849_vm3, %v23129_v49 }
 0x2c1   : > { %20241 = vmatpush3.bf16.msra.mxu1 %v20238_v37  ;;  %v17926_v37 = vld [vmem:[%s24998_s3 + $0x388] sm:$0xff]  ;;  %3851 = vst.msk [vmem:[#allocation3 + $0x10] sm:$0xff] %vm3847_vm2, %v23129_v49  ;;  %3855 = vst.msk [vmem:[#allocation3 + $0x30] sm:$0xff] %vm3847_vm2, %v23129_v49 }
 0x2c2   : > { %20243 = vmatprep.subr.bf16.mxu1 %v20242_v6  ;;  %v20286_v14 = vpack.c.bf16 %v17926_v37, %v17925_v11  ;;  %3852 = vst.msk [vmem:[#allocation3 + $0x18] sm:$0x3] %vm3849_vm3, %v23129_v49  ;;  %3856 = vst.msk [vmem:[#allocation3 + $0x38] sm:$0x3] %vm3849_vm3, %v23129_v49 }
 0x2c3   : > { %3857 = vst.msk [vmem:[#allocation3 + $0x40] sm:$0xff] %vm3847_vm2, %v23129_v49  ;;  %3859 = vst.msk [vmem:[#allocation3 + $0x50] sm:$0xff] %vm3847_vm2, %v23129_v49 }
 0x2c4   : > { %3858 = vst.msk [vmem:[#allocation3 + $0x48] sm:$0x3] %vm3849_vm3, %v23129_v49  ;;  %3860 = vst.msk [vmem:[#allocation3 + $0x58] sm:$0x3] %vm3849_vm3, %v23129_v49 }
 0x2c5   : > { %20245 = vmatpush3.bf16.msra.mxu1 %v20242_v6  ;;  %v17931_v6 = vld [vmem:[%s24998_s3 + $0x3b0] sm:$0xff]  ;;  %3861 = vst.msk [vmem:[#allocation3 + $0x60] sm:$0xff] %vm3847_vm2, %v23129_v49  ;;  %3863 = vst.msk [vmem:[#allocation3 + $0x70] sm:$0xff] %vm3847_vm2, %v23129_v49 }
 0x2c6   : > { %20247 = vmatprep.subr.bf16.mxu1 %v20246_v27  ;;  %3862 = vst.msk [vmem:[#allocation3 + $0x68] sm:$0x3] %vm3849_vm3, %v23129_v49  ;;  %3864 = vst.msk [vmem:[#allocation3 + $0x78] sm:$0x3] %vm3849_vm3, %v23129_v49 }
 0x2c7   : > { %3865 = vst.msk [vmem:[#allocation3 + $0x80] sm:$0xff] %vm3847_vm2, %v23129_v49  ;;  %3867 = vst.msk [vmem:[#allocation3 + $0x90] sm:$0xff] %vm3847_vm2, %v23129_v49 }
 0x2c8   : > { %3866 = vst.msk [vmem:[#allocation3 + $0x88] sm:$0x3] %vm3849_vm3, %v23129_v49  ;;  %3868 = vst.msk [vmem:[#allocation3 + $0x98] sm:$0x3] %vm3849_vm3, %v23129_v49 }
 0x2c9   : > { %20249 = vmatpush3.bf16.msra.mxu1 %v20246_v27  ;;  %v17939_v27 = vld [vmem:[%s24998_s3 + $0x3f0] sm:$0xff] }
 0x2ca   : > { %20251 = vmatprep.subr.bf16.mxu1 %v20250_v31 }
 0x2cd   : > { %20253 = vmatpush3.bf16.msra.mxu1 %v20250_v31  ;;  %v17942_v31 = vld [vmem:[%s24998_s3 + $0x408] sm:$0xff] }
 0x2ce   : > { %20255 = vmatprep.subr.bf16.mxu1 %v20254_v38  ;;  %v20318_v13 = vpack.c.bf16 %v17942_v31, %v17941_v28 }
 0x2d0   : > { %19357 = vmatmul.mubr.f32.vlgmr.msra.gmra.mrb[64].mxu1 %v22848_v53 }
 0x2d1   : > { %19359 = vmatprep.mubr.f32.mxu1 %v22851_v54  ;;  %20257 = vmatpush3.bf16.msra.mxu1 %v20254_v38  ;;  %v17944_v38 = vld [vmem:[%s24998_s3 + $0x418] sm:$0xff] }
 0x2d2   : > { %20259 = vmatprep.subr.bf16.mxu1 %v20258_v57  ;;  %v20322_v35 = vpack.c.bf16 %v17944_v38, %v17943_v34  ;;  %v17972_v38 = vld [vmem:[%s25000_s5 + $0x70] sm:$0xff] }
 0x2d4   : > { %19360 = vmatmul.mubr.f32.gmra.mrb[66].mxu1 %v22860_v21 }
 0x2d5   : > { %19362 = vmatprep.mubr.f32.mxu1 %v22863_v18  ;;  %20261 = vmatpush3.bf16.msra.mxu1 %v20258_v57  ;;  %v17946_v57 = vld [vmem:[%s24998_s3 + $0x428] sm:$0xff] }
 0x2d6   : > { %20263 = vmatprep.subr.bf16.mxu1 %v20262_v45  ;;  %v20326_v42 = vpack.c.bf16 %v17946_v57, %v17945_v12 }
 0x2d8   : > { %19363 = vmatmul.mubr.f32.gmra.mrb[68].mxu1 %v22872_v50 }
 0x2d9   : > { %19365 = vmatprep.mubr.f32.mxu1 %v22875_v4  ;;  %20265 = vmatpush3.bf16.msra.mxu1 %v20262_v45  ;;  %v17948_v45 = vld [vmem:[%s24998_s3 + $0x438] sm:$0xff] }
 0x2da   : > { %20267 = vmatprep.subr.bf16.mxu1 %v20266_v48 }
 0x2dc   : > { %19366 = vmatmul.mubr.f32.gmra.mrb[70].mxu1 %v23065_v55 }
 0x2dd   : > { %20269 = vmatpush3.bf16.msra.mxu1 %v20266_v48  ;;  %19400 = vmatprep.mubr.f32.mxu1 %v22708_v32  ;;  %v17924_v32 = vld [vmem:[%s24998_s3 + $0x378] sm:$0xff] }
 0x2de   : > { %20271 = vmatprep.subr.bf16.mxu1 %v20270_v20  ;;  %v20282_v56 = vpack.c.bf16 %v17924_v32, %v17923_v8  ;;  %v17952_v48 = vld [vmem:[%s24998_s3 + $0x458] sm:$0xff] }
 0x2e1   : > { %20273 = vmatpush3.bf16.msra.mxu1 %v20270_v20  ;;  %v17955_v20 = vld [vmem:[%s24998_s3 + $0x470] sm:$0xff] }
 0x2e2   : > { %20275 = vmatprep.subr.bf16.mxu1 %v20274_v0 }
 0x2e5   : > { %20277 = vmatpush3.bf16.msra.mxu1 %v20274_v0 }
 0x2e6   : > { %20279 = vmatprep.subr.bf16.mxu1 %v20278_v5 }
 0x2e9   : > { %20281 = vmatpush3.bf16.msra.mxu1 %v20278_v5 }
 0x2ea   : > { %20283 = vmatprep.subr.bf16.mxu1 %v20282_v56 }
 0x2ed   : > { %20285 = vmatpush3.bf16.msra.mxu1 %v20282_v56 }
 0x2ee   : > { %20287 = vmatprep.subr.bf16.mxu1 %v20286_v14 }
 0x2f0   : > { %19401 = vmatmul.mubr.f32.vlgmr.msra.gmra.mrb[64].mxu1 %v22720_v44  ;;  %v20298_v44 = vpack.c.bf16 %v17932_v19, %v17931_v6  ;;  %v17968_v19 = vld [vmem:[%s25000_s5 + $0x50] sm:$0xff] }
 0x2f1   : > { %19403 = vmatprep.mubr.f32.mxu1 %v22733_v30  ;;  %20289 = vmatpush3.bf16.msra.mxu1 %v20286_v14  ;;  %v17933_v30 = vld [vmem:[%s24998_s3 + $0x3c0] sm:$0xff] }
 0x2f2   : > { %20291 = vmatprep.subr.bf16.mxu1 %v20290_v33 }
 0x2f4   : > { %19404 = vmatmul.mubr.f32.gmra.mrb[66].mxu1 %v22746_v62  ;;  %v20302_v62 = vpack.c.bf16 %v17934_v10, %v17933_v30 }
 0x2f5   : > { %19406 = vmatprep.mubr.f32.mxu1 %v22759_v23  ;;  %20293 = vmatpush3.bf16.msra.mxu1 %v20290_v33  ;;  %v17935_v23 = vld [vmem:[%s24998_s3 + $0x3d0] sm:$0xff] }
 0x2f6   : > { %20295 = vmatprep.subr.bf16.mxu1 %v20294_v17 }
 0x2f8   : > { %19407 = vmatmul.mubr.f32.gmra.mrb[68].mxu1 %v22769_v9  ;;  %v20306_v9 = vpack.c.bf16 %v17936_v24, %v17935_v23 }
 0x2f9   : > { %19409 = vmatprep.mubr.f32.mxu1 %v22933_v36  ;;  %20297 = vmatpush3.bf16.msra.mxu1 %v20294_v17  ;;  %v17937_v36 = vld [vmem:[%s24998_s3 + $0x3e0] sm:$0xff] }
 0x2fa   : > { %20299 = vmatprep.subr.bf16.mxu1 %v20298_v44  ;;  %v20310_v7 = vpack.c.bf16 %v17938_v26, %v17937_v36 }
 0x2fc   : > { %19410 = vmatmul.mubr.f32.gmra.mrb[70].mxu1 %v23129_v49 }
 0x2fd   : > { %20301 = vmatpush3.bf16.msra.mxu1 %v20298_v44  ;;  %19444 = vmatprep.mubr.f32.mxu1 %v22684_v61  ;;  %v17940_v61 = vld [vmem:[%s24998_s3 + $0x3f8] sm:$0xff] }
 0x2fe   : > { %20303 = vmatprep.subr.bf16.mxu1 %v20302_v62  ;;  %v20314_v1 = vpack.c.bf16 %v17940_v61, %v17939_v27  ;;  %v17969_v44 = vld [vmem:[%s25000_s5 + $0x58] sm:$0xff]  ;;  %v17971_v27 = vld [vmem:[%s25000_s5 + $0x68] sm:$0xff] }
 0x2ff   : > { %v20370_v24 = vpack.c.bf16 %v17969_v44, %v17968_v19  ;;  %v18014_v19 = vld [vmem:[%s25000_s5 + $0x100] sm:$0xff]  ;;  %v18015_v44 = vld [vmem:[%s25000_s5 + $0x108] sm:$0xff] }
 0x301   : > { %20305 = vmatpush3.bf16.msra.mxu1 %v20302_v62 }
 0x302   : > { %20307 = vmatprep.subr.bf16.mxu1 %v20306_v9 }
 0x305   : > { %20309 = vmatpush3.bf16.msra.mxu1 %v20306_v9 }
 0x306   : > { %20311 = vmatprep.subr.bf16.mxu1 %v20310_v7 }
 0x309   : > { %20313 = vmatpush3.bf16.msra.mxu1 %v20310_v7  ;;  %v17970_v7 = vld [vmem:[%s25000_s5 + $0x60] sm:$0xff] }
 0x30a   : > { %20315 = vmatprep.subr.bf16.mxu1 %v20314_v1 }
 0x30d   : > { %20317 = vmatpush3.bf16.msra.mxu1 %v20314_v1 }
 0x30e   : > { %20319 = vmatprep.subr.bf16.mxu1 %v20318_v13 }
 0x310   : > { %19445 = vmatmul.mubr.f32.vlgmr.msra.gmra.mrb[64].mxu1 %v22693_v22  ;;  %v20330_v22 = vpack.c.bf16 %v17948_v45, %v17947_v25  ;;  %v17982_v25 = vld [vmem:[%s25000_s5 + $0x80] sm:$0xff]  ;;  %v17983_v45 = vld [vmem:[%s25000_s5 + $0x88] sm:$0xff] }
 0x311   : > { %19447 = vmatprep.mubr.f32.mxu1 %v22706_v29  ;;  %20321 = vmatpush3.bf16.msra.mxu1 %v20318_v13  ;;  %v17949_v29 = vld [vmem:[%s24998_s3 + $0x440] sm:$0xff]  ;;  %v20374_v13 = vpack.c.bf16 %v17971_v27, %v17970_v7  ;;  %v18019_v7 = vld [vmem:[%s25000_s5 + $0x128] sm:$0xff] }
 0x312   : > { %20323 = vmatprep.subr.bf16.mxu1 %v20322_v35 }
 0x314   : > { %19448 = vmatmul.mubr.f32.gmra.mrb[66].mxu1 %v22718_v40  ;;  %v20334_v40 = vpack.c.bf16 %v17950_v58, %v17949_v29  ;;  %v4039_v29 = vld [vmem:[#allocation3 + $0x1] sm:$0xff]  ;;  %v20382_v58 = vpack.c.bf16 %v17983_v45, %v17982_v25  ;;  %v18033_v25 = vld [vmem:[%s25000_s5 + $0x158] sm:$0xff] }
 0x315   : > { %19450 = vmatprep.mubr.f32.mxu1 %v22731_v47  ;;  %20325 = vmatpush3.bf16.msra.mxu1 %v20322_v35  ;;  %v17951_v47 = vld [vmem:[%s24998_s3 + $0x450] sm:$0xff]  ;;  %v17973_v35 = vld [vmem:[%s25000_s5 + $0x78] sm:$0xff] }
 0x316   : > { %20327 = vmatprep.subr.bf16.mxu1 %v20326_v42  ;;  %v20378_v57 = vpack.c.bf16 %v17973_v35, %v17972_v38 }
 0x318   : > { %19451 = vmatmul.mubr.f32.gmra.mrb[68].mxu1 %v22744_v59  ;;  %v20338_v59 = vpack.c.bf16 %v17952_v48, %v17951_v47  ;;  %v17985_v47 = vld [vmem:[%s25000_s5 + $0x98] sm:$0xff] }
 0x319   : > { %19453 = vmatprep.mubr.f32.mxu1 %v22757_v43  ;;  %20329 = vmatpush3.bf16.msra.mxu1 %v20326_v42  ;;  %v17953_v43 = vld [vmem:[%s24998_s3 + $0x460] sm:$0xff] }
 0x31a   : > { %20331 = vmatprep.subr.bf16.mxu1 %v20330_v22  ;;  %v20342_v52 = vpack.c.bf16 %v17954_v51, %v17953_v43  ;;  %v17986_v43 = vld [vmem:[%s25000_s5 + $0xa0] sm:$0xff]  ;;  %v17987_v51 = vld [vmem:[%s25000_s5 + $0xa8] sm:$0xff] }
 0x31c   : > { %19454 = vmatmul.mubr.f32.gmra.mrb[70].mxu1 %v3570_v46 }
 0x31d   : > { %20333 = vmatpush3.bf16.msra.mxu1 %v20330_v22  ;;  %19488 = vmatprep.mubr.f32.mxu1 %v22848_v53  ;;  %v17956_v53 = vld [vmem:[%s24998_s3 + $0x478] sm:$0xff] }
 0x31e   : > { %20335 = vmatprep.subr.bf16.mxu1 %v20334_v40  ;;  %v20346_v39 = vpack.c.bf16 %v17956_v53, %v17955_v20  ;;  %v20390_v20 = vpack.c.bf16 %v17987_v51, %v17986_v43  ;;  %v18046_v43 = vld [vmem:[%s25000_s5 + $0x180] sm:$0xff]  ;;  %v18047_v51 = vld [vmem:[%s25000_s5 + $0x188] sm:$0xff] }
 0x321   : > { %20337 = vmatpush3.bf16.msra.mxu1 %v20334_v40  ;;  %v17984_v40 = vld [vmem:[%s25000_s5 + $0x90] sm:$0xff] }
 0x322   : > { %20339 = vmatprep.subr.bf16.mxu1 %v20338_v59  ;;  %v20386_v48 = vpack.c.bf16 %v17985_v47, %v17984_v40  ;;  %v18036_v47 = vld [vmem:[%s25000_s5 + $0x170] sm:$0xff] }
 0x325   : > { %20341 = vmatpush3.bf16.msra.mxu1 %v20338_v59 }
 0x326   : > { %20343 = vmatprep.subr.bf16.mxu1 %v20342_v52 }
 0x329   : > { %20345 = vmatpush3.bf16.msra.mxu1 %v20342_v52 }
 0x32a   : > { %20347 = vmatprep.subr.bf16.mxu1 %v20346_v39 }
 0x32d   : > { %20349 = vmatpush3.bf16.msra.mxu1 %v20346_v39  ;;  %v17988_v39 = vld [vmem:[%s25000_s5 + $0xb0] sm:$0xff] }
 0x330   : > { %19489 = vmatmul.mubr.f32.vlgmr.msra.gmra.mrb[64].mxu1 %v22851_v54  ;;  %v3900_v54 = vld [vmem:[%s25000_s5 + $0x30] sm:$0xff] }
 0x331   : > { %19491 = vmatprep.mubr.f32.mxu1 %v22860_v21  ;;  %v3901_v21 = vld [vmem:[%s25000_s5 + $0x38] sm:$0xff] }
 0x334   : > { %19492 = vmatmul.mubr.f32.gmra.mrb[66].mxu1 %v22863_v18  ;;  %v20362_v18 = vpack.c.bf16 %v3901_v21, %v3900_v54 }
 0x335   : > { %19494 = vmatprep.mubr.f32.mxu1 %v22872_v50  ;;  %v17966_v50 = vld [vmem:[%s25000_s5 + $0x40] sm:$0xff] }
 0x336   : > { %20363 = vmatprep.subr.bf16.mxu0 %v20362_v18 }
 0x337   : > { %20365 = vmatpush3.bf16.msra.mxu0 %v20362_v18 }
 0x338   : > { %19495 = vmatmul.mubr.f32.gmra.mrb[68].mxu1 %v22875_v4  ;;  %v17967_v4 = vld [vmem:[%s25000_s5 + $0x48] sm:$0xff] }
 0x339   : > { %19497 = vmatprep.mubr.f32.mxu1 %v23065_v55  ;;  %v3886_v55 = vld [vmem:[#allocation3] sm:$0xff]  ;;  %v20366_v0 = vpack.c.bf16 %v17967_v4, %v17966_v50  ;;  %v17999_v4 = vld [vmem:[%s25000_s5 + $0xc8] sm:$0xff] }
 0x33a   : > { %19516 = vmatprep.mubr.msk.f32.mxu0 %vm3847_vm2, %v3886_v55  ;;  %v17998_v50 = vld [vmem:[%s25000_s5 + $0xc0] sm:$0xff] }
 0x33b   : > { %20367 = vmatprep.subr.bf16.mxu0 %v20366_v0 }
 0x33c   : > { %19498 = vmatmul.mubr.f32.gmra.mrb[70].mxu1 %v3708_v60  ;;  %v17989_v60 = vld [vmem:[%s25000_s5 + $0xb8] sm:$0xff] }
 0x33d   : > { %6643 = vmatprep.mubr.f32.mxu1 %v23129_v49  ;;  %v20394_v21 = vpack.c.bf16 %v17989_v60, %v17988_v39  ;;  %v18048_v60 = vld [vmem:[%s25000_s5 + $0x190] sm:$0xff] }
 0x403   : > { %v19490_v63 = vpop.f32.mrb[64].mxu1 }
 0x404   : > { %v21534_v5 = vadd.f32 %v19490_v63, %v17828_v2  ;;  %v3792_v8 = vpop.f32.mrb[65].mxu1 }
 0x405   : > { %v21535_v32 = vadd.f32 %v17828_v2, %v3792_v8  ;;  %v18001_v8 = vld [vmem:[%s25000_s5 + $0xd8] sm:$0xff] }
 0x406   : > { %v3840_v56 = vmax.f32 %v21534_v5, 0.0  ;;  %v18000_v5 = vld [vmem:[%s25000_s5 + $0xd0] sm:$0xff] }
 0x407   : > { %v3839_v11 = vmax.f32 %v21535_v32, 0.0  ;;  %v19493_v37 = vpop.f32.mrb[66].mxu1  ;;  %v20402_v32 = vpack.c.bf16 %v18001_v8, %v18000_v5  ;;  %v18052_v5 = vld [vmem:[%s25000_s5 + $0x1b0] sm:$0xff]  ;;  %v18053_v8 = vld [vmem:[%s25000_s5 + $0x1b8] sm:$0xff] }
 0x408   : > { %3871 = vst.msk [vmem:[#allocation3 + $0x21] sm:$0xff] %vm3847_vm2, %v3840_v56  ;;  %v21536_v14 = vadd.f32 %v19493_v37, %v17828_v2  ;;  %v3802_v15 = vpop.f32.mrb[67].mxu1  ;;  %v18003_v37 = vld [vmem:[%s25000_s5 + $0xe8] sm:$0xff] }
 0x409   : > { %3870 = vst.msk [vmem:[#allocation3 + $0x11] sm:$0xff] %vm3847_vm2, %v3839_v11  ;;  %v21537_v3 = vadd.f32 %v17828_v2, %v3802_v15  ;;  %v18002_v11 = vld [vmem:[%s25000_s5 + $0xe0] sm:$0xff] }
 0x40a   : > { %v3842_v33 = vmax.f32 %v21536_v14, 0.0  ;;  %v20406_v15 = vpack.c.bf16 %v18003_v37, %v18002_v11  ;;  %v18063_v11 = vld [vmem:[%s25000_s5 + $0x1c8] sm:$0xff] }
 0x40b   : > { %v3841_v16 = vmax.f32 %v21537_v3, 0.0  ;;  %v19496_v41 = vpop.f32.mrb[68].mxu1 }
 0x40c   : > { %3873 = vst.msk [vmem:[#allocation3 + $0x41] sm:$0xff] %vm3847_vm2, %v3842_v33  ;;  %v21538_v17 = vadd.f32 %v19496_v41, %v17828_v2  ;;  %v3812_v6 = vpop.f32.mrb[69].mxu1  ;;  %v18004_v33 = vld [vmem:[%s25000_s5 + $0xf0] sm:$0xff] }
 0x40d   : > { %3872 = vst.msk [vmem:[#allocation3 + $0x31] sm:$0xff] %vm3847_vm2, %v3841_v16  ;;  %v21539_v30 = vadd.f32 %v17828_v2, %v3812_v6  ;;  %v18005_v16 = vld [vmem:[%s25000_s5 + $0xf8] sm:$0xff] }
 0x40e   : > { %v3844_v10 = vmax.f32 %v21538_v17, 0.0  ;;  %v20410_v17 = vpack.c.bf16 %v18005_v16, %v18004_v33  ;;  %v18064_v33 = vld [vmem:[%s25000_s5 + $0x1d0] sm:$0xff]  ;;  %v18065_v16 = vld [vmem:[%s25000_s5 + $0x1d8] sm:$0xff] }
 0x40f   : > { %v3843_v62 = vmax.f32 %v21539_v30, 0.0  ;;  %v19499_v23 = vpop.f32.mrb[70].mxu1  ;;  %v23282_v1 = vld [vmem:[#allocation3 + $0x20] sm:$0xff] }
 0x410   : > { %3875 = vst.msk [vmem:[#allocation3 + $0x61] sm:$0xff] %vm3847_vm2, %v3844_v10  ;;  %v21540_v9 = vadd.f32 %v19499_v23, %v17828_v2  ;;  %v3822_v36 = vpop.f32.mrb[71].mxu1  ;;  %v23271_v26 = vld [vmem:[#allocation3 + $0x10] sm:$0xff]  ;;  %v23337_v52 = vld [vmem:[#allocation3 + $0x21] sm:$0xff]  ;;  %v20414_v10 = vpack.c.bf16 %v18015_v44, %v18014_v19 }
 0x411   : > { %3874 = vst.msk [vmem:[#allocation3 + $0x51] sm:$0xff] %vm3847_vm2, %v3843_v62  ;;  %v21541_v61 = vadd.f32 %v17828_v2, %v3822_v36  ;;  %19517 = vmatmul.mubr.msk.f32.vlgmr.msra.gmra.mrb[80].mxu0 %vm3847_vm2, %v23271_v26  ;;  %v23327_v59 = vld [vmem:[#allocation3 + $0x11] sm:$0xff]  ;;  %v20398_v2 = vpack.c.bf16 %v17999_v4, %v17998_v50  ;;  %v23390_v14 = vld [vmem:[#allocation3 + $0x22] sm:$0xff] }
 0x412   : > { %v3846_v28 = vmax.f32 %v21540_v9, 0.0  ;;  %19519 = vmatprep.mubr.msk.f32.mxu0 %vm3847_vm2, %v23282_v1  ;;  %20369 = vmatpush3.bf16.msra.mxu0 %v20366_v0  ;;  %v4193_v0 = vld [vmem:[#allocation3 + $0x2] sm:$0xff]  ;;  %v23380_v56 = vld [vmem:[#allocation3 + $0x12] sm:$0xff] }
 0x413   : > { %v3845_v31 = vmax.f32 %v21541_v61, 0.0  ;;  %20371 = vmatprep.subr.bf16.mxu0 %v20370_v24  ;;  %v23298_v12 = vld [vmem:[#allocation3 + $0x40] sm:$0xff]  ;;  %v18016_v23 = vld [vmem:[%s25000_s5 + $0x110] sm:$0xff]  ;;  %v18021_v61 = vld [vmem:[%s25000_s5 + $0x138] sm:$0xff] }
 0x414   : > { %3877 = vst.msk [vmem:[#allocation3 + $0x81] sm:$0xff] %vm3847_vm2, %v3846_v28  ;;  %v23287_v34 = vld [vmem:[#allocation3 + $0x30] sm:$0xff]  ;;  %v23351_v54 = vld [vmem:[#allocation3 + $0x41] sm:$0xff] }
 0x415   : > { %3876 = vst.msk [vmem:[#allocation3 + $0x71] sm:$0xff] %vm3847_vm2, %v3845_v31  ;;  %19520 = vmatmul.mubr.msk.f32.gmra.mrb[82].mxu0 %vm3847_vm2, %v23287_v34  ;;  %v23341_v53 = vld [vmem:[#allocation3 + $0x31] sm:$0xff]  ;;  %v23404_v41 = vld [vmem:[#allocation3 + $0x42] sm:$0xff] }
 0x416   : > { %19522 = vmatprep.mubr.msk.f32.mxu0 %vm3847_vm2, %v23298_v12  ;;  %20373 = vmatpush3.bf16.msra.mxu0 %v20370_v24  ;;  %v23394_v3 = vld [vmem:[#allocation3 + $0x32] sm:$0xff]  ;;  %v18018_v36 = vld [vmem:[%s25000_s5 + $0x120] sm:$0xff]  ;;  %v18067_v44 = vld [vmem:[%s25000_s5 + $0x1e8] sm:$0xff] }
 0x417   : > { %20375 = vmatprep.subr.bf16.mxu0 %v20374_v13  ;;  %v23312_v22 = vld [vmem:[#allocation3 + $0x60] sm:$0xff]  ;;  %v18017_v24 = vld [vmem:[%s25000_s5 + $0x118] sm:$0xff]  ;;  %v20422_v27 = vpack.c.bf16 %v18019_v7, %v18018_v36 }
 0x418   : > { %v23302_v42 = vld [vmem:[#allocation3 + $0x50] sm:$0xff]  ;;  %v23365_v55 = vld [vmem:[#allocation3 + $0x61] sm:$0xff]  ;;  %v20418_v9 = vpack.c.bf16 %v18017_v24, %v18016_v23  ;;  %v18069_v23 = vld [vmem:[%s25000_s5 + $0x1f8] sm:$0xff] }
 0x419   : > { %19523 = vmatmul.mubr.msk.f32.gmra.mrb[84].mxu0 %vm3847_vm2, %v23302_v42  ;;  %v23355_v18 = vld [vmem:[#allocation3 + $0x51] sm:$0xff]  ;;  %v23418_v30 = vld [vmem:[#allocation3 + $0x62] sm:$0xff] }
 0x41a   : > { %19525 = vmatprep.mubr.msk.f32.mxu0 %vm3847_vm2, %v23312_v22  ;;  %20377 = vmatpush3.bf16.msra.mxu0 %v20374_v13  ;;  %v23408_v6 = vld [vmem:[#allocation3 + $0x52] sm:$0xff]  ;;  %v18030_v31 = vld [vmem:[%s25000_s5 + $0x140] sm:$0xff]  ;;  %v18031_v13 = vld [vmem:[%s25000_s5 + $0x148] sm:$0xff] }
 0x41b   : > { %20379 = vmatprep.subr.bf16.mxu0 %v20378_v57  ;;  %v20430_v38 = vpack.c.bf16 %v18031_v13, %v18030_v31  ;;  %v23464_v35 = vld [vmem:[#allocation3 + $0x80] sm:$0xff]  ;;  %v18079_v24 = vld [vmem:[%s25000_s5 + $0x208] sm:$0xff]  ;;  %v18081_v36 = vld [vmem:[%s25000_s5 + $0x218] sm:$0xff] }
 0x41c   : > { %v23316_v46 = vld [vmem:[#allocation3 + $0x70] sm:$0xff]  ;;  %v23506_v39 = vld [vmem:[#allocation3 + $0x81] sm:$0xff] }
 0x41d   : > { %19526 = vmatmul.mubr.msk.f32.gmra.mrb[86].mxu0 %vm3847_vm2, %v23316_v46  ;;  %v23369_v63 = vld [vmem:[#allocation3 + $0x71] sm:$0xff]  ;;  %v18050_v4 = vld [vmem:[%s25000_s5 + $0x1a0] sm:$0xff] }
 0x41e   : > { %20381 = vmatpush3.bf16.msra.mxu0 %v20378_v57  ;;  %19544 = vmatprep.mubr.msk.f32.mxu0 %vm3847_vm2, %v4039_v29  ;;  %v23422_v62 = vld [vmem:[#allocation3 + $0x72] sm:$0xff]  ;;  %v18034_v29 = vld [vmem:[%s25000_s5 + $0x160] sm:$0xff] }
 0x41f   : > { %20383 = vmatprep.subr.bf16.mxu0 %v20382_v58  ;;  %v18032_v57 = vld [vmem:[%s25000_s5 + $0x150] sm:$0xff]  ;;  %v18066_v19 = vld [vmem:[%s25000_s5 + $0x1e0] sm:$0xff] }
 0x420   : > { %v20434_v45 = vpack.c.bf16 %v18033_v25, %v18032_v57  ;;  %v18082_v7 = vld [vmem:[%s25000_s5 + $0x220] sm:$0xff] }
 0x421   : > { %19545 = vmatmul.mubr.msk.f32.vlgmr.msra.gmra.mrb[80].mxu0 %vm3847_vm2, %v23327_v59 }
 0x422   : > { %19547 = vmatprep.mubr.msk.f32.mxu0 %vm3847_vm2, %v23337_v52  ;;  %20385 = vmatpush3.bf16.msra.mxu0 %v20382_v58  ;;  %v18035_v58 = vld [vmem:[%s25000_s5 + $0x168] sm:$0xff] }
 0x423   : > { %20387 = vmatprep.subr.bf16.mxu0 %v20386_v48  ;;  %v20438_v40 = vpack.c.bf16 %v18035_v58, %v18034_v29  ;;  %v5407_v58 = vld [vmem:[#allocation11 + $0x8] sm:$0xff] }
 0x425   : > { %19548 = vmatmul.mubr.msk.f32.gmra.mrb[82].mxu0 %vm3847_vm2, %v23341_v53 }
 0x426   : > { %19550 = vmatprep.mubr.msk.f32.mxu0 %vm3847_vm2, %v23351_v54  ;;  %20389 = vmatpush3.bf16.msra.mxu0 %v20386_v48  ;;  %v18037_v48 = vld [vmem:[%s25000_s5 + $0x178] sm:$0xff] }
 0x427   : > { %20391 = vmatprep.subr.bf16.mxu0 %v20390_v20 }
 0x429   : > { %19551 = vmatmul.mubr.msk.f32.gmra.mrb[84].mxu0 %vm3847_vm2, %v23355_v18 }
 0x42a   : > { %19553 = vmatprep.mubr.msk.f32.mxu0 %vm3847_vm2, %v23365_v55  ;;  %20393 = vmatpush3.bf16.msra.mxu0 %v20390_v20  ;;  %v20446_v20 = vpack.c.bf16 %v18047_v51, %v18046_v43  ;;  %v6553_v43 = vld [vmem:[#allocation11 + $0x348] sm:$0xff] }
 0x42b   : > { %20395 = vmatprep.subr.bf16.mxu0 %v20394_v21 }
 0x42d   : > { %19554 = vmatmul.mubr.msk.f32.gmra.mrb[86].mxu0 %vm3847_vm2, %v23369_v63 }
 0x42e   : > { %20397 = vmatpush3.bf16.msra.mxu0 %v20394_v21  ;;  %19572 = vmatprep.mubr.msk.f32.mxu0 %vm3847_vm2, %v4193_v0  ;;  %v18049_v21 = vld [vmem:[%s25000_s5 + $0x198] sm:$0xff]  ;;  %v18051_v0 = vld [vmem:[%s25000_s5 + $0x1a8] sm:$0xff] }
 0x42f   : > { %20399 = vmatprep.subr.bf16.mxu0 %v20398_v2  ;;  %v20450_v50 = vpack.c.bf16 %v18049_v21, %v18048_v60  ;;  %v6552_v60 = vld [vmem:[#allocation11 + $0x340] sm:$0xff] }
 0x431   : > { %19573 = vmatmul.mubr.msk.f32.vlgmr.msra.gmra.mrb[80].mxu0 %vm3847_vm2, %v23380_v56 }
 0x432   : > { %19575 = vmatprep.mubr.msk.f32.mxu0 %vm3847_vm2, %v23390_v14  ;;  %20401 = vmatpush3.bf16.msra.mxu0 %v20398_v2  ;;  %v20454_v2 = vpack.c.bf16 %v18051_v0, %v18050_v4  ;;  %v5406_v0 = vld [vmem:[#allocation11] sm:$0xff] }
 0x433   : > { %20403 = vmatprep.subr.bf16.mxu0 %v20402_v32 }
 0x435   : > { %19576 = vmatmul.mubr.msk.f32.gmra.mrb[82].mxu0 %vm3847_vm2, %v23394_v3 }
 0x436   : > { %19578 = vmatprep.mubr.msk.f32.mxu0 %vm3847_vm2, %v23404_v41  ;;  %20405 = vmatpush3.bf16.msra.mxu0 %v20402_v32  ;;  %v20458_v32 = vpack.c.bf16 %v18053_v8, %v18052_v5  ;;  %v5423_v8 = vld [vmem:[#allocation11 + $0x88] sm:$0xff] }
 0x437   : > { %20407 = vmatprep.subr.bf16.mxu0 %v20406_v15 }
 0x439   : > { %19579 = vmatmul.mubr.msk.f32.gmra.mrb[84].mxu0 %vm3847_vm2, %v23408_v6 }
 0x43a   : > { %19581 = vmatprep.mubr.msk.f32.mxu0 %vm3847_vm2, %v23418_v30  ;;  %20409 = vmatpush3.bf16.msra.mxu0 %v20406_v15  ;;  %v23548_v15 = vld [vmem:[#allocation3 + $0x82] sm:$0xff] }
 0x43b   : > { %20411 = vmatprep.subr.bf16.mxu0 %v20410_v17 }
 0x43d   : > { %19582 = vmatmul.mubr.msk.f32.gmra.mrb[86].mxu0 %vm3847_vm2, %v23422_v62 }
 0x43e   : > { %20413 = vmatpush3.bf16.msra.mxu0 %v20410_v17  ;;  %19600 = vmatprep.mubr.msk.f32.mxu0 %vm3847_vm2, %v23271_v26  ;;  %v18020_v26 = vld [vmem:[%s25000_s5 + $0x130] sm:$0xff]  ;;  %v20466_v17 = vpack.c.bf16 %v18065_v16, %v18064_v33  ;;  %v5422_v16 = vld [vmem:[#allocation11 + $0x80] sm:$0xff] }
 0x43f   : > { %20415 = vmatprep.subr.bf16.mxu0 %v20414_v10  ;;  %v20426_v28 = vpack.c.bf16 %v18021_v61, %v18020_v26  ;;  %v18085_v61 = vld [vmem:[%s25000_s5 + $0x238] sm:$0xff] }
 0x441   : > { %19601 = vmatmul.mubr.msk.f32.vlgmr.msra.gmra.mrb[80].mxu0 %vm3847_vm2, %v23282_v1 }
 0x442   : > { %19603 = vmatprep.mubr.msk.f32.mxu0 %vm3847_vm2, %v23287_v34  ;;  %20417 = vmatpush3.bf16.msra.mxu0 %v20414_v10  ;;  %v20470_v10 = vpack.c.bf16 %v18067_v44, %v18066_v19  ;;  %v6561_v44 = vld [vmem:[#allocation11 + $0x388] sm:$0xff] }
 0x443   : > { %20419 = vmatprep.subr.bf16.mxu0 %v20418_v9 }
 0x445   : > { %19604 = vmatmul.mubr.msk.f32.gmra.mrb[82].mxu0 %vm3847_vm2, %v23298_v12 }
 0x446   : > { %19606 = vmatprep.mubr.msk.f32.mxu0 %vm3847_vm2, %v23302_v42  ;;  %20421 = vmatpush3.bf16.msra.mxu0 %v20418_v9  ;;  %v18080_v9 = vld [vmem:[%s25000_s5 + $0x210] sm:$0xff] }
 0x447   : > { %20423 = vmatprep.subr.bf16.mxu0 %v20422_v27 }
 0x449   : > { %19607 = vmatmul.mubr.msk.f32.gmra.mrb[84].mxu0 %vm3847_vm2, %v23312_v22 }
 0x44a   : > { %19609 = vmatprep.mubr.msk.f32.mxu0 %vm3847_vm2, %v23316_v46  ;;  %20425 = vmatpush3.bf16.msra.mxu0 %v20422_v27  ;;  %v18083_v27 = vld [vmem:[%s25000_s5 + $0x228] sm:$0xff] }
 0x44b   : > { %20427 = vmatprep.subr.bf16.mxu0 %v20426_v28  ;;  %v20486_v26 = vpack.c.bf16 %v18083_v27, %v18082_v7  ;;  %v5408_v7 = vld [vmem:[#allocation11 + $0x10] sm:$0xff] }
 0x44c   : > { %v5416_v27 = vld [vmem:[#allocation11 + $0x50] sm:$0xff] }
 0x44d   : > { %19610 = vmatmul.mubr.msk.f32.gmra.mrb[86].mxu0 %vm3847_vm2, %v23464_v35 }
 0x44e   : > { %20429 = vmatpush3.bf16.msra.mxu0 %v20426_v28  ;;  %19628 = vmatprep.mubr.msk.f32.mxu0 %vm3847_vm2, %v23327_v59  ;;  %v20442_v59 = vpack.c.bf16 %v18037_v48, %v18036_v47  ;;  %v5415_v48 = vld [vmem:[#allocation11 + $0x48] sm:$0xff] }
 0x44f   : > { %20431 = vmatprep.subr.bf16.mxu0 %v20430_v38  ;;  %v20510_v4 = vpack.c.bf16 %v5415_v48, %v5407_v58 }
 0x451   : > { %19629 = vmatmul.mubr.msk.f32.vlgmr.msra.gmra.mrb[80].mxu0 %vm3847_vm2, %v23337_v52 }
 0x452   : > { %19631 = vmatprep.mubr.msk.f32.mxu0 %vm3847_vm2, %v23341_v53  ;;  %20433 = vmatpush3.bf16.msra.mxu0 %v20430_v38 }
 0x453   : > { %20435 = vmatprep.subr.bf16.mxu0 %v20434_v45 }
 0x455   : > { %19632 = vmatmul.mubr.msk.f32.gmra.mrb[82].mxu0 %vm3847_vm2, %v23351_v54 }
 0x456   : > { %19634 = vmatprep.mubr.msk.f32.mxu0 %vm3847_vm2, %v23355_v18  ;;  %20437 = vmatpush3.bf16.msra.mxu0 %v20434_v45 }
 0x457   : > { %20439 = vmatprep.subr.bf16.mxu0 %v20438_v40 }
 0x459   : > { %19635 = vmatmul.mubr.msk.f32.gmra.mrb[84].mxu0 %vm3847_vm2, %v23365_v55 }
 0x45a   : > { %19637 = vmatprep.mubr.msk.f32.mxu0 %vm3847_vm2, %v23369_v63  ;;  %20441 = vmatpush3.bf16.msra.mxu0 %v20438_v40 }
 0x45b   : > { %20443 = vmatprep.subr.bf16.mxu0 %v20442_v59 }
 0x45d   : > { %19638 = vmatmul.mubr.msk.f32.gmra.mrb[86].mxu0 %vm3847_vm2, %v23506_v39 }
 0x45e   : > { %20445 = vmatpush3.bf16.msra.mxu0 %v20442_v59  ;;  %19656 = vmatprep.mubr.msk.f32.mxu0 %vm3847_vm2, %v23380_v56  ;;  %v18062_v56 = vld [vmem:[%s25000_s5 + $0x1c0] sm:$0xff]  ;;  %v6545_v59 = vld [vmem:[#allocation11 + $0x308] sm:$0xff] }
 0x45f   : > { %20447 = vmatprep.subr.bf16.mxu0 %v20446_v20  ;;  %v20462_v37 = vpack.c.bf16 %v18063_v11, %v18062_v56 }
 0x461   : > { %19657 = vmatmul.mubr.msk.f32.vlgmr.msra.gmra.mrb[80].mxu0 %vm3847_vm2, %v23390_v14 }
 0x462   : > { %19659 = vmatprep.mubr.msk.f32.mxu0 %vm3847_vm2, %v23394_v3  ;;  %20449 = vmatpush3.bf16.msra.mxu0 %v20446_v20  ;;  %v20606_v20 = vpack.c.bf16 %v6553_v43, %v6545_v59  ;;  %v23656_v59 = vld [vmem:[#allocation2] sm:$0xff]  ;;  %v5427_v43 = vld [vmem:[#allocation11 + $0xa8] sm:$0xff] }
 0x463   : > { %20451 = vmatprep.subr.bf16.mxu0 %v20450_v50 }
 0x464   : > { %20607 = vmatprep.subr.bf16.mxu1 %v20606_v20 }
 0x465   : > { %19660 = vmatmul.mubr.msk.f32.gmra.mrb[82].mxu0 %vm3847_vm2, %v23404_v41 }
 0x466   : > { %19662 = vmatprep.mubr.msk.f32.mxu0 %vm3847_vm2, %v23408_v6  ;;  %20453 = vmatpush3.bf16.msra.mxu0 %v20450_v50 }
 0x467   : > { %20455 = vmatprep.subr.bf16.mxu0 %v20454_v2 }
 0x469   : > { %19663 = vmatmul.mubr.msk.f32.gmra.mrb[84].mxu0 %vm3847_vm2, %v23418_v30 }
 0x46a   : > { %19665 = vmatprep.mubr.msk.f32.mxu0 %vm3847_vm2, %v23422_v62  ;;  %20457 = vmatpush3.bf16.msra.mxu0 %v20454_v2  ;;  %v5414_v2 = vld [vmem:[#allocation11 + $0x40] sm:$0xff] }
 0x46b   : > { %20459 = vmatprep.subr.bf16.mxu0 %v20458_v32  ;;  %v20512_v56 = vpack.c.bf16 %v5414_v2, %v5406_v0  ;;  %v5426_v0 = vld [vmem:[#allocation11 + $0xa0] sm:$0xff] }
 0x46c   : > { %v5434_v2 = vld [vmem:[#allocation11 + $0xe0] sm:$0xff] }
 0x46d   : > { %19666 = vmatmul.mubr.msk.f32.gmra.mrb[86].mxu0 %vm3847_vm2, %v23548_v15 }
 0x46e   : > { %20461 = vmatpush3.bf16.msra.mxu0 %v20458_v32  ;;  %19684 = vmatprep.mubr.msk.f32.mxu0 %vm3847_vm2, %v23282_v1  ;;  %v18068_v1 = vld [vmem:[%s25000_s5 + $0x1f0] sm:$0xff] }
 0x46f   : > { %20463 = vmatprep.subr.bf16.mxu0 %v20462_v37  ;;  %v5431_v32 = vld [vmem:[#allocation11 + $0xc8] sm:$0xff] }
 0x470   : > { %v20514_v11 = vpack.c.bf16 %v5431_v32, %v5423_v8  ;;  %v5413_v8 = vld [vmem:[#allocation11 + $0x38] sm:$0xff] }
 0x471   : > { %19685 = vmatmul.mubr.msk.f32.vlgmr.msra.gmra.mrb[80].mxu0 %vm3847_vm2, %v23287_v34  ;;  %v20474_v34 = vpack.c.bf16 %v18069_v23, %v18068_v1  ;;  %v6560_v23 = vld [vmem:[#allocation11 + $0x380] sm:$0xff]  ;;  %v5421_v32 = vld [vmem:[#allocation11 + $0x78] sm:$0xff] }
 0x472   : > { %19687 = vmatprep.mubr.msk.f32.mxu0 %vm3847_vm2, %v23298_v12  ;;  %20465 = vmatpush3.bf16.msra.mxu0 %v20462_v37  ;;  %v18078_v12 = vld [vmem:[%s25000_s5 + $0x200] sm:$0xff] }
 0x473   : > { %20467 = vmatprep.subr.bf16.mxu0 %v20466_v17 }
 0x475   : > { %19688 = vmatmul.mubr.msk.f32.gmra.mrb[82].mxu0 %vm3847_vm2, %v23302_v42  ;;  %v4817_v42 = vld [vmem:[#allocation3 + $0x90] sm:$0xff] }
 0x476   : > { %19690 = vmatprep.mubr.msk.f32.mxu0 %vm3847_vm2, %v23312_v22  ;;  %20469 = vmatpush3.bf16.msra.mxu0 %v20466_v17  ;;  %v20478_v22 = vpack.c.bf16 %v18079_v24, %v18078_v12  ;;  %v5430_v17 = vld [vmem:[#allocation11 + $0xc0] sm:$0xff]  ;;  %v5409_v24 = vld [vmem:[#allocation11 + $0x18] sm:$0xff] }
 0x477   : > { %20471 = vmatprep.subr.bf16.mxu0 %v20470_v10  ;;  %v20516_v19 = vpack.c.bf16 %v5430_v17, %v5422_v16  ;;  %v6936_v16 = vld [vmem:[#allocation11 + $0x468] sm:$0xff]  ;;  %v20534_v17 = vpack.c.bf16 %v5421_v32, %v5413_v8  ;;  %v5805_v32 = vld [vmem:[#allocation11 + $0x198] sm:$0xff] }
 0x479   : > { %19691 = vmatmul.mubr.msk.f32.gmra.mrb[84].mxu0 %vm3847_vm2, %v23316_v46  ;;  %v20482_v46 = vpack.c.bf16 %v18081_v36, %v18080_v9  ;;  %v6549_v9 = vld [vmem:[#allocation11 + $0x328] sm:$0xff] }
 0x47a   : > { %19693 = vmatprep.mubr.msk.f32.mxu0 %vm3847_vm2, %v23464_v35  ;;  %20473 = vmatpush3.bf16.msra.mxu0 %v20470_v10  ;;  %v6569_v10 = vld [vmem:[#allocation11 + $0x3c8] sm:$0xff] }
 0x47b   : > { %20475 = vmatprep.subr.bf16.mxu0 %v20474_v34  ;;  %v20610_v1 = vpack.c.bf16 %v6569_v10, %v6561_v44  ;;  %v6557_v36 = vld [vmem:[#allocation11 + $0x368] sm:$0xff]  ;;  %v5420_v44 = vld [vmem:[#allocation11 + $0x70] sm:$0xff] }
 0x47d   : > { %19694 = vmatmul.mubr.msk.f32.gmra.mrb[86].mxu0 %vm3847_vm2, %v4817_v42  ;;  %v5417_v42 = vld [vmem:[#allocation11 + $0x58] sm:$0xff] }
 0x47e   : > { %20477 = vmatpush3.bf16.msra.mxu0 %v20474_v34  ;;  %19712 = vmatprep.mubr.msk.f32.mxu0 %vm3847_vm2, %v23337_v52  ;;  %v18084_v52 = vld [vmem:[%s25000_s5 + $0x230] sm:$0xff]  ;;  %v6568_v34 = vld [vmem:[#allocation11 + $0x3c0] sm:$0xff] }
 0x47f   : > { %20479 = vmatprep.subr.bf16.mxu0 %v20478_v22  ;;  %v20612_v12 = vpack.c.bf16 %v6568_v34, %v6560_v23  ;;  %v5437_v23 = vld [vmem:[#allocation11 + $0xf8] sm:$0xff] }
 0x481   : > { %19713 = vmatmul.mubr.msk.f32.vlgmr.msra.gmra.mrb[80].mxu0 %vm3847_vm2, %v23341_v53  ;;  %v20490_v53 = vpack.c.bf16 %v18085_v61, %v18084_v52  ;;  %v5433_v52 = vld [vmem:[#allocation11 + $0xd8] sm:$0xff] }
 0x482   : > { %19715 = vmatprep.mubr.msk.f32.mxu0 %vm3847_vm2, %v23351_v54  ;;  %20481 = vmatpush3.bf16.msra.mxu0 %v20478_v22  ;;  %v4971_v54 = vld [vmem:[#allocation3 + $0x91] sm:$0xff]  ;;  %v20518_v22 = vpack.c.bf16 %v5417_v42, %v5409_v24  ;;  %v6935_v24 = vld [vmem:[#allocation11 + $0x460] sm:$0xff] }
 0x483   : > { %20483 = vmatprep.subr.bf16.mxu0 %v20482_v46 }
 0x485   : > { %19716 = vmatmul.mubr.msk.f32.gmra.mrb[82].mxu0 %vm3847_vm2, %v23355_v18  ;;  %v5125_v18 = vld [vmem:[#allocation3 + $0x92] sm:$0xff] }
 0x486   : > { %19718 = vmatprep.mubr.msk.f32.mxu0 %vm3847_vm2, %v23365_v55  ;;  %20485 = vmatpush3.bf16.msra.mxu0 %v20482_v46  ;;  %v17957_v55 = vld [vmem:[#allocation9] ss:$0 sm:$0xff]  ;;  %v20622_v46 = vpack.c.bf16 %v6557_v36, %v6549_v9  ;;  %v6952_v9 = vld [vmem:[#allocation11 + $0x4e8] sm:$0xff] }
 0x487   : > { %20487 = vmatprep.subr.bf16.mxu0 %v20486_v26 }
 0x489   : > { %19719 = vmatmul.mubr.msk.f32.gmra.mrb[84].mxu0 %vm3847_vm2, %v23369_v63 }
 0x48a   : > { %19721 = vmatprep.mubr.msk.f32.mxu0 %vm3847_vm2, %v23506_v39  ;;  %20489 = vmatpush3.bf16.msra.mxu0 %v20486_v26  ;;  %v6544_v39 = vld [vmem:[#allocation11 + $0x300] sm:$0xff]  ;;  %v5425_v26 = vld [vmem:[#allocation11 + $0x98] sm:$0xff] }
 0x48b   : > { %20491 = vmatprep.subr.bf16.mxu0 %v20490_v53  ;;  %v20608_v21 = vpack.c.bf16 %v6552_v60, %v6544_v39  ;;  %v6931_v39 = vld [vmem:[#allocation11 + $0x440] sm:$0xff] }
 0x48d   : > { %19722 = vmatmul.mubr.msk.f32.gmra.mrb[86].mxu0 %vm3847_vm2, %v4971_v54  ;;  %20609 = vmatpush1.bf16.msra.mxu1 %v20608_v21  ;;  %v6556_v54 = vld [vmem:[#allocation11 + $0x360] sm:$0xff]  ;;  %v6940_v21 = vld [vmem:[#allocation11 + $0x488] sm:$0xff] }
 0x48e   : > { %20493 = vmatpush3.bf16.msra.mxu0 %v20490_v53  ;;  %19740 = vmatprep.mubr.msk.f32.mxu0 %vm3847_vm2, %v23390_v14  ;;  %v6548_v53 = vld [vmem:[#allocation11 + $0x320] sm:$0xff] }
 0x48f   : > { %20611 = vmatprep.subr.bf16.mxu1 %v20610_v1  ;;  %v5429_v1 = vld [vmem:[#allocation11 + $0xb8] sm:$0xff] }
 0x490   : > { %v20538_v36 = vpack.c.bf16 %v5437_v23, %v5429_v1  ;;  %v5812_v1 = vld [vmem:[#allocation11 + $0x1d0] sm:$0xff] }
 0x491   : > { %19741 = vmatmul.mubr.msk.f32.vlgmr.msra.gmra.mrb[80].mxu0 %vm3847_vm2, %v23394_v3  ;;  %20613 = vmatpush1.bf16.msra.mxu1 %v20612_v12  ;;  %v6927_v12 = vld [vmem:[#allocation11 + $0x420] sm:$0xff] }
 0x492   : > { %19743 = vmatprep.mubr.msk.f32.mxu0 %vm3847_vm2, %v23404_v41  ;;  %20623 = vmatprep.subr.bf16.mxu1 %v20622_v46  ;;  %v5428_v46 = vld [vmem:[#allocation11 + $0xb0] sm:$0xff] }
 0x495   : > { %19744 = vmatmul.mubr.msk.f32.gmra.mrb[82].mxu0 %vm3847_vm2, %v23408_v6 }
 0x496   : > { %19746 = vmatprep.mubr.msk.f32.mxu0 %vm3847_vm2, %v23418_v30 }
 0x499   : > { %19747 = vmatmul.mubr.msk.f32.gmra.mrb[84].mxu0 %vm3847_vm2, %v23422_v62 }
 0x49a   : > { %19749 = vmatprep.mubr.msk.f32.mxu0 %vm3847_vm2, %v23548_v15 }
 0x49d   : > { %19750 = vmatmul.mubr.msk.f32.gmra.mrb[86].mxu0 %vm3847_vm2, %v5125_v18 }
 0x564   : > { %v19742_v63 = vpop.f32.mrb[80].mxu0 }
 0x565   : > { %v21542_v14 = vadd.f32 %v19742_v63, %v17957_v55  ;;  %v5225_v3 = vpop.f32.mrb[81].mxu0  ;;  %v6565_v63 = vld [vmem:[#allocation11 + $0x3a8] sm:$0xff] }
 0x566   : > { %v21543_v41 = vadd.f32 %v17957_v55, %v5225_v3 }
 0x568   : > { %v20494_v28 = vpack.c.bf16 %v21542_v14, %v21543_v41  ;;  %5272 = vxpose.xlu0.b32.start [1/8] (short) (narrow) %v21543_v41, 32  ;;  %v19745_v6 = vpop.f32.mrb[82].mxu0  ;;  %v20522_v41 = vpack.c.bf16 %v5433_v52, %v5425_v26  ;;  %v5787_v26 = vld [vmem:[#allocation11 + $0x108] sm:$0xff] }
 0x569   : > { %v21544_v31 = vadd.f32 %v19745_v6, %v17957_v55  ;;  %v5235_v13 = vpop.f32.mrb[83].mxu0  ;;  %v5432_v6 = vld [vmem:[#allocation11 + $0xd0] sm:$0xff]  ;;  %v5795_v52 = vld [vmem:[#allocation11 + $0x148] sm:$0xff] }
 0x56a   : > { %v21545_v30 = vadd.f32 %v17957_v55, %v5235_v13  ;;  %20495 = vmatprep.subr.bf16.mxu0 %v20494_v28  ;;  %v5411_v13 = vld [vmem:[#allocation11 + $0x28] sm:$0xff] }
 0x56b   : > { %20497 = vmatpush3.bf16.msra.mxu0 %v20494_v28  ;;  %v5424_v28 = vld [vmem:[#allocation11 + $0x90] sm:$0xff] }
 0x56c   : > { %v20498_v62 = vpack.c.bf16 %v21544_v31, %v21545_v30  ;;  %5273 = vxpose.xlu0.b32.cont [2/8] (short) (narrow) %v21542_v14, 32  ;;  %v19748_v38 = vpop.f32.mrb[84].mxu0  ;;  %v6573_v14 = vld [vmem:[#allocation11 + $0x3e8] sm:$0xff] }
 0x56d   : > { %v21546_v35 = vadd.f32 %v19748_v38, %v17957_v55  ;;  %v5245_v57 = vpop.f32.mrb[85].mxu0  ;;  %v20626_v38 = vpack.c.bf16 %v6573_v14, %v6565_v63  ;;  %v7303_v14 = vld [vmem:[#allocation11 + $0x508] sm:$0xff] }
 0x56e   : > { %v21547_v25 = vadd.f32 %v17957_v55, %v5245_v57  ;;  %20499 = vmatprep.subr.bf16.mxu0 %v20498_v62  ;;  %v6572_v57 = vld [vmem:[#allocation11 + $0x3e0] sm:$0xff] }
 0x56f   : > { %20501 = vmatpush3.bf16.msra.mxu0 %v20498_v62 }
 0x570   : > { %v20502_v45 = vpack.c.bf16 %v21546_v35, %v21547_v25  ;;  %5274 = vxpose.xlu0.b32.cont [3/8] (short) (narrow) %v21545_v30, 32  ;;  %v19751_v29 = vpop.f32.mrb[86].mxu0  ;;  %v5419_v30 = vld [vmem:[#allocation11 + $0x68] sm:$0xff] }
 0x571   : > { %v21548_v40 = vadd.f32 %v19751_v29, %v17957_v55  ;;  %v5255_v47 = vpop.f32.mrb[87].mxu0  ;;  %v6932_v29 = vld [vmem:[#allocation11 + $0x448] sm:$0xff]  ;;  %v20526_v58 = vpack.c.bf16 %v5419_v30, %v5411_v13 }
 0x572   : > { %v21549_v51 = vadd.f32 %v17957_v55, %v5255_v47  ;;  %20503 = vmatprep.subr.bf16.mxu0 %v20502_v45  ;;  %v20520_v55 = vpack.c.bf16 %v5416_v27, %v5408_v7  ;;  %v5418_v47 = vld [vmem:[#allocation11 + $0x60] sm:$0xff]  ;;  %v5436_v7 = vld [vmem:[#allocation11 + $0xf0] sm:$0xff]  ;;  %v20656_v27 = vpack.c.bf16 %v6935_v24, %v6927_v12  ;;  %v5803_v30 = vld [vmem:[#allocation11 + $0x188] sm:$0xff] }
 0x573   : > { %20505 = vmatpush3.bf16.msra.mxu0 %v20502_v45  ;;  %v6924_v45 = vld [vmem:[#allocation11 + $0x408] sm:$0xff]  ;;  %v20540_v63 = vpack.c.bf16 %v5436_v7, %v5428_v46 }
 0x574   : > { %v20506_v50 = vpack.c.bf16 %v21548_v40, %v21549_v51  ;;  %5275 = vxpose.xlu0.b32.cont [4/8] (short) (narrow) %v21544_v31, 32  ;;  %v20624_v31 = vpack.c.bf16 %v6556_v54, %v6548_v53  ;;  %v20638_v20 = vpack.c.bf16 %v6932_v29, %v6924_v45  ;;  %v7319_v29 = vld [vmem:[#allocation11 + $0x588] sm:$0xff] }
 0x575   : > { %v5799_v12 = vld [vmem:[#allocation11 + $0x168] sm:$0xff] }
 0x576   : > { %20507 = vmatprep.subr.bf16.mxu0 %v20506_v50  ;;  %v7682_v46 = vld [vmem:[#allocation11 + $0x608] sm:$0xff] }
 0x577   : > { %20509 = vmatpush3.bf16.msra.mxu0 %v20506_v50  ;;  %v6948_v50 = vld [vmem:[#allocation11 + $0x4c8] sm:$0xff] }
 0x578   : > { %5276 = vxpose.xlu0.b32.cont [5/8] (short) (narrow) %v21547_v25, 32  ;;  %20511 = vmatprep.subr.bf16.mxu0 %v20510_v4  ;;  %v20524_v25 = vpack.c.bf16 %v5432_v6, %v5424_v28  ;;  %v20542_v28 = vpack.c.bf16 %v5795_v52, %v5787_v26  ;;  %v5786_v6 = vld [vmem:[#allocation11 + $0x100] sm:$0xff]  ;;  %v7690_v7 = vld [vmem:[#allocation11 + $0x648] sm:$0xff] }
 0x579   : > { %v5790_v26 = vld [vmem:[#allocation11 + $0x120] sm:$0xff] }
 0x57a   : > { %v5798_v52 = vld [vmem:[#allocation11 + $0x160] sm:$0xff] }
 0x57c   : > { %5277 = vxpose.xlu0.b32.cont [6/8] (short) (narrow) %v21546_v35, 32  ;;  %v6564_v35 = vld [vmem:[#allocation11 + $0x3a0] sm:$0xff] }
 0x57d   : > { %v20628_v48 = vpack.c.bf16 %v6572_v57, %v6564_v35  ;;  %v7302_v57 = vld [vmem:[#allocation11 + $0x500] sm:$0xff] }
 0x580   : > { %5278 = vxpose.xlu0.b32.cont [7/8] (short) (narrow) %v21549_v51, 32  ;;  %v5435_v51 = vld [vmem:[#allocation11 + $0xe8] sm:$0xff] }
 0x581   : > { %v20530_v4 = vpack.c.bf16 %v5435_v51, %v5427_v43  ;;  %v5789_v51 = vld [vmem:[#allocation11 + $0x118] sm:$0xff] }
 0x584   : > { %5279 = vxpose.xlu0.b32.end [8/8] (short) (narrow) %v21548_v40, 32  ;;  %v5410_v40 = vld [vmem:[#allocation11 + $0x20] sm:$0xff] }
 0x585   : > { %v20528_v60 = vpack.c.bf16 %v5418_v47, %v5410_v40  ;;  %v5802_v47 = vld [vmem:[#allocation11 + $0x180] sm:$0xff] }
 0x5e8   : > { %v5288_v5 = vpop.trf.xlu0 }
 0x5e9   : > { %19768 = vmatprep.mubr.msk.f32.mxu0 %vm3847_vm2, %v5288_v5 }
 0x5ec   : > { %v5289_v37 = vpop.trf.xlu0 }
 0x5ed   : > { %19769 = vmatmul.mubr.msk.f32.vlgmr.msra.gmra.mrb[88].mxu0 %vm3847_vm2, %v5289_v37  ;;  %v6947_v37 = vld [vmem:[#allocation11 + $0x4c0] sm:$0xff] }
 0x5ee   : > { %20513 = vmatpush1.bf16.msra.mxu0 %v20512_v56  ;;  %v20642_v56 = vpack.c.bf16 %v6948_v50, %v6940_v21  ;;  %v7307_v50 = vld [vmem:[#allocation11 + $0x528] sm:$0xff] }
 0x5ef   : > { %20515 = vmatprep.subr.bf16.mxu0 %v20514_v11  ;;  %v6939_v11 = vld [vmem:[#allocation11 + $0x480] sm:$0xff] }
 0x5f0   : > { %v5290_v15 = vpop.trf.xlu0  ;;  %v20644_v10 = vpack.c.bf16 %v6947_v37, %v6939_v11  ;;  %v7306_v37 = vld [vmem:[#allocation11 + $0x520] sm:$0xff] }
 0x5f1   : > { %19771 = vmatprep.mubr.msk.f32.mxu0 %vm3847_vm2, %v5290_v15  ;;  %v20532_v15 = vpack.c.bf16 %v5434_v2, %v5426_v0  ;;  %v5788_v2 = vld [vmem:[#allocation11 + $0x110] sm:$0xff] }
 0x5f2   : > { %20517 = vmatpush1.bf16.msra.mxu0 %v20516_v19  ;;  %v5412_v19 = vld [vmem:[#allocation11 + $0x30] sm:$0xff] }
 0x5f3   : > { %20519 = vmatprep.subr.bf16.mxu0 %v20518_v22  ;;  %v20536_v42 = vpack.c.bf16 %v5420_v44, %v5412_v19  ;;  %v6944_v22 = vld [vmem:[#allocation11 + $0x4a8] sm:$0xff] }
 0x5f4   : > { %v5291_v33 = vpop.trf.xlu0  ;;  %v20658_v54 = vpack.c.bf16 %v6952_v9, %v6944_v22  ;;  %v7322_v22 = vld [vmem:[#allocation11 + $0x5a0] sm:$0xff] }
 0x5f5   : > { %19772 = vmatmul.mubr.msk.f32.gmra.mrb[90].mxu0 %vm3847_vm2, %v5291_v33  ;;  %v6928_v33 = vld [vmem:[#allocation11 + $0x428] sm:$0xff]  ;;  %v7330_v9 = vld [vmem:[#allocation11 + $0x5e0] sm:$0xff] }
 0x5f6   : > { %5506 = vmatprep.mubr.f32.mxu0 %v23129_v49  ;;  %v20654_v34 = vpack.c.bf16 %v6936_v16, %v6928_v33  ;;  %v7323_v16 = vld [vmem:[#allocation11 + $0x5a8] sm:$0xff] }
 0x6c0   : > { %v23644_v61 = vpop.f32.mrb[88].mxu0 }
 0x6c1   : > { %v5382_v18 = vpop.f32.mrb[89].mxu0 }
 0x6c2   : > { %v23646_v3 = vmul.f32 0.015625, %v5382_v18  ;;  %v6943_v18 = vld [vmem:[#allocation11 + $0x4a0] sm:$0xff] }
 0x6c4   : > { %18098 = vmatmul.mubr.msk.f32.vlgmr.msra.gmra.mrb[92].mxu0 %vm5438_vm4, %v23646_v3  ;;  %v23651_v62 = vrot.slane %v23646_v3, 3  ;;  %v23668_v53 = vrot.slane %v23646_v3, 4  ;;  %v23681_v19 = vrot.slane %v23646_v3, 1  ;;  %v23686_v24 = vrot.slane %v23646_v3, 5 }
 0x6c5   : > { %20521 = vmatpush1.bf16.msra.mxu0 %v20520_v55  ;;  %5577 = vmatprep.mubr.f32.mxu0 %v23129_v49  ;;  %v6923_v49 = vld [vmem:[#allocation11 + $0x400] sm:$0xff] }
 0x6c6   : > { %18110 = vmatmul.mubr.msk.f32.vlgmr.msra.gmra.mrb[72].mxu1 %vm5438_vm4, %v23651_v62  ;;  %20523 = vmatprep.subr.bf16.mxu0 %v20522_v41  ;;  %v20640_v5 = vpack.c.bf16 %v6931_v39, %v6923_v49  ;;  %v6951_v55 = vld [vmem:[#allocation11 + $0x4e0] sm:$0xff]  ;;  %v7311_v41 = vld [vmem:[#allocation11 + $0x548] sm:$0xff] }
 0x6c7   : > { %20625 = vmatpush1.bf16.msra.mxu1 %v20624_v31  ;;  %6785 = vmatprep.mubr.f32.mxu1 %v23656_v59  ;;  %v5794_v31 = vld [vmem:[#allocation11 + $0x140] sm:$0xff]  ;;  %v20660_v13 = vpack.c.bf16 %v6951_v55, %v6943_v18  ;;  %v20670_v35 = vpack.c.bf16 %v7311_v41, %v7303_v14  ;;  %v5807_v18 = vld [vmem:[#allocation11 + $0x1a8] sm:$0xff] }
 0x6c8   : > { %20627 = vmatprep.subr.bf16.mxu1 %v20626_v38  ;;  %v5811_v38 = vld [vmem:[#allocation11 + $0x1c8] sm:$0xff]  ;;  %v20544_v45 = vpack.c.bf16 %v5794_v31, %v5786_v6  ;;  %v7318_v39 = vld [vmem:[#allocation11 + $0x580] sm:$0xff] }
 0x6c9   : > { %20525 = vmatpush1.bf16.msra.mxu0 %v20524_v25  ;;  %v7310_v25 = vld [vmem:[#allocation11 + $0x540] sm:$0xff]  ;;  %v20546_v40 = vpack.c.bf16 %v5811_v38, %v5803_v30  ;;  %v5815_v55 = vld [vmem:[#allocation11 + $0x1e8] sm:$0xff] }
 0x6ca   : > { %20527 = vmatprep.subr.bf16.mxu0 %v20526_v58  ;;  %v7327_v58 = vld [vmem:[#allocation11 + $0x5c8] sm:$0xff]  ;;  %v20672_v43 = vpack.c.bf16 %v7310_v25, %v7302_v57  ;;  %v7681_v14 = vld [vmem:[#allocation11 + $0x600] sm:$0xff]  ;;  %v5793_v57 = vld [vmem:[#allocation11 + $0x138] sm:$0xff] }
 0x6cb   : > { %20629 = vmatpush1.bf16.msra.mxu1 %v20628_v48  ;;  %v5810_v48 = vld [vmem:[#allocation11 + $0x1c0] sm:$0xff]  ;;  %v20674_v49 = vpack.c.bf16 %v7327_v58, %v7319_v29  ;;  %v7698_v6 = vld [vmem:[#allocation11 + $0x688] sm:$0xff]  ;;  %v5801_v25 = vld [vmem:[#allocation11 + $0x178] sm:$0xff] }
 0x6cc   : > { %18099 = vmatmul.mubr.msk.f32.vlgmr.msra.gmra.mrb[94].mxu0 %vm5438_vm4, %v23646_v3  ;;  %20639 = vmatprep.subr.bf16.mxu1 %v20638_v20  ;;  %v5797_v20 = vld [vmem:[#allocation11 + $0x158] sm:$0xff]  ;;  %v20548_v21 = vpack.c.bf16 %v5810_v48, %v5802_v47  ;;  %v7689_v41 = vld [vmem:[#allocation11 + $0x640] sm:$0xff]  ;;  %v7706_v31 = vld [vmem:[#allocation11 + $0x6c8] sm:$0xff] }
 0x6cd   : > { %20529 = vmatpush1.bf16.msra.mxu0 %v20528_v60  ;;  %5648 = vmatprep.mubr.f32.mxu0 %v23656_v59  ;;  %v7326_v60 = vld [vmem:[#allocation11 + $0x5c0] sm:$0xff]  ;;  %v20550_v0 = vpack.c.bf16 %v5797_v20, %v5789_v51  ;;  %v7686_v47 = vld [vmem:[#allocation11 + $0x628] sm:$0xff]  ;;  %v5792_v51 = vld [vmem:[#allocation11 + $0x130] sm:$0xff] }
 0x6ce   : > { %18112 = vmatmul.mubr.msk.f32.vlgmr.msra.gmra.mrb[74].mxu1 %vm5438_vm4, %v23651_v62  ;;  %20531 = vmatprep.subr.bf16.mxu0 %v20530_v4  ;;  %v7315_v4 = vld [vmem:[#allocation11 + $0x568] sm:$0xff]  ;;  %v20676_v8 = vpack.c.bf16 %v7326_v60, %v7318_v39  ;;  %v5806_v30 = vld [vmem:[#allocation11 + $0x1a0] sm:$0xff]  ;;  %v5800_v20 = vld [vmem:[#allocation11 + $0x170] sm:$0xff] }
 0x6cf   : > { %20641 = vmatpush1.bf16.msra.mxu1 %v20640_v5  ;;  %7022 = vmatprep.mubr.f32.mxu1 %v23656_v59  ;;  %v5796_v5 = vld [vmem:[#allocation11 + $0x150] sm:$0xff]  ;;  %v20686_v11 = vpack.c.bf16 %v7315_v4, %v7307_v50  ;;  %v5814_v38 = vld [vmem:[#allocation11 + $0x1e0] sm:$0xff]  ;;  %v7694_v48 = vld [vmem:[#allocation11 + $0x668] sm:$0xff] }
 0x6d0   : > { %20643 = vmatprep.subr.bf16.mxu1 %v20642_v56  ;;  %v5813_v56 = vld [vmem:[#allocation11 + $0x1d8] sm:$0xff]  ;;  %v20552_v33 = vpack.c.bf16 %v5796_v5, %v5788_v2  ;;  %v7697_v29 = vld [vmem:[#allocation11 + $0x680] sm:$0xff]  ;;  %v7702_v2 = vld [vmem:[#allocation11 + $0x6a8] sm:$0xff] }
 0x6d1   : > { %20533 = vmatpush1.bf16.msra.mxu0 %v20532_v15  ;;  %v7314_v15 = vld [vmem:[#allocation11 + $0x560] sm:$0xff]  ;;  %v20554_v44 = vpack.c.bf16 %v5813_v56, %v5805_v32  ;;  %v5809_v39 = vld [vmem:[#allocation11 + $0x1b8] sm:$0xff]  ;;  %v7710_v5 = vld [vmem:[#allocation11 + $0x6e8] sm:$0xff] }
 0x6d2   : > { %20535 = vmatprep.subr.bf16.mxu0 %v20534_v17  ;;  %v7331_v17 = vld [vmem:[#allocation11 + $0x5e8] sm:$0xff]  ;;  %v20688_v23 = vpack.c.bf16 %v7314_v15, %v7306_v37  ;;  %v7705_v58 = vld [vmem:[#allocation11 + $0x6c0] sm:$0xff]  ;;  %v5817_v60 = vld [vmem:[#allocation11 + $0x1f8] sm:$0xff] }
 0x6d3   : > { %20645 = vmatpush1.bf16.msra.mxu1 %v20644_v10  ;;  %v5804_v10 = vld [vmem:[#allocation11 + $0x190] sm:$0xff]  ;;  %v7685_v50 = vld [vmem:[#allocation11 + $0x620] sm:$0xff]  ;;  %v6166_v37 = vld [vmem:[#allocation11 + $0x208] sm:$0xff] }
 0x6d4   : > { %18100 = vmatmul.mubr.msk.f32.vlgmr.msra.gmra.mrb[96].mxu0 %vm5438_vm4, %v23646_v3  ;;  %20655 = vmatprep.subr.bf16.mxu1 %v20654_v34  ;;  %v5791_v34 = vld [vmem:[#allocation11 + $0x128] sm:$0xff]  ;;  %v7693_v4 = vld [vmem:[#allocation11 + $0x660] sm:$0xff]  ;;  %v5808_v32 = vld [vmem:[#allocation11 + $0x1b0] sm:$0xff] }
 0x6d5   : > { %20537 = vmatpush1.bf16.msra.mxu0 %v20536_v42  ;;  %5719 = vmatprep.mubr.f32.mxu0 %v23656_v59  ;;  %v20690_v42 = vpack.c.bf16 %v7331_v17, %v7323_v16  ;;  %v5816_v56 = vld [vmem:[#allocation11 + $0x1f0] sm:$0xff]  ;;  %v6174_v15 = vld [vmem:[#allocation11 + $0x248] sm:$0xff]  ;;  %v20722_v16 = vpack.c.bf16 %v7710_v5, %v7702_v2  ;;  %v7701_v17 = vld [vmem:[#allocation11 + $0x6a0] sm:$0xff]  ;;  %v23719_v2 = vrot.slane %v23646_v3, 7 }
 0x6d6   : > { %18114 = vmatmul.mubr.msk.f32.vlgmr.msra.gmra.mrb[76].mxu1 %vm5438_vm4, %v23668_v53  ;;  %20539 = vmatprep.subr.bf16.mxu0 %v20538_v36  ;;  %v20556_v36 = vpack.c.bf16 %v5812_v1, %v5804_v10  ;;  %v20572_v10 = vpack.c.bf16 %v5816_v56, %v5808_v32  ;;  %v8061_v1 = vld [vmem:[#allocation11 + $0x708] sm:$0xff]  ;;  %v8088_v32 = vld [vmem:[#allocation11 + $0x7e0] sm:$0xff] }
 0x6d7   : > { %20657 = vmatpush1.bf16.msra.mxu1 %v20656_v27  ;;  %7164 = vmatprep.mubr.f32.mxu1 %v23656_v59  ;;  %v20558_v27 = vpack.c.bf16 %v5799_v12, %v5791_v34  ;;  %v20574_v34 = vpack.c.bf16 %v6174_v15, %v6166_v37  ;;  %v6165_v12 = vld [vmem:[#allocation11 + $0x200] sm:$0xff]  ;;  %v8448_v37 = vld [vmem:[#allocation11 + $0x848] sm:$0xff] }
 0x6d8   : > { %20659 = vmatprep.subr.bf16.mxu1 %v20658_v54  ;;  %v20692_v54 = vpack.c.bf16 %v7330_v9, %v7322_v22  ;;  %v6182_v9 = vld [vmem:[#allocation11 + $0x288] sm:$0xff] }
 0x6d9   : > { %20541 = vmatpush1.bf16.msra.mxu0 %v20540_v63  ;;  %v20702_v63 = vpack.c.bf16 %v7690_v7, %v7682_v46  ;;  %v8060_v7 = vld [vmem:[#allocation11 + $0x700] sm:$0xff] }
 0x6da   : > { %20543 = vmatprep.subr.bf16.mxu0 %v20542_v28  ;;  %v20560_v28 = vpack.c.bf16 %v5798_v52, %v5790_v26  ;;  %v8077_v52 = vld [vmem:[#allocation11 + $0x788] sm:$0xff] }
 0x6db   : > { %20661 = vmatpush1.bf16.msra.mxu1 %v20660_v13  ;;  %v20562_v13 = vpack.c.bf16 %v5815_v55, %v5807_v18  ;;  %v6181_v55 = vld [vmem:[#allocation11 + $0x280] sm:$0xff] }
 0x6dc   : > { %18101 = vmatmul.mubr.msk.f32.vlgmr.msra.gmra.mrb[98].mxu0 %vm5438_vm4, %v23646_v3  ;;  %20671 = vmatprep.subr.bf16.mxu1 %v20670_v35  ;;  %v20704_v35 = vpack.c.bf16 %v7689_v41, %v7681_v14  ;;  %v6168_v41 = vld [vmem:[#allocation11 + $0x218] sm:$0xff] }
 0x6dd   : > { %20545 = vmatpush1.bf16.msra.mxu0 %v20544_v45  ;;  %5885 = vmatprep.mubr.f32.mxu0 %v23656_v59  ;;  %v20706_v45 = vpack.c.bf16 %v7706_v31, %v7698_v6  ;;  %v8076_v31 = vld [vmem:[#allocation11 + $0x780] sm:$0xff] }
 0x6de   : > { %18116 = vmatmul.mubr.msk.f32.vlgmr.msra.gmra.mrb[78].mxu1 %vm5438_vm4, %v23668_v53  ;;  %20547 = vmatprep.subr.bf16.mxu0 %v20546_v40  ;;  %v20564_v40 = vpack.c.bf16 %v5814_v38, %v5806_v30  ;;  %v8065_v38 = vld [vmem:[#allocation11 + $0x728] sm:$0xff] }
 0x6df   : > { %20673 = vmatpush1.bf16.msra.mxu1 %v20672_v43  ;;  %7401 = vmatprep.mubr.f32.mxu1 %v23656_v59  ;;  %v20566_v43 = vpack.c.bf16 %v5801_v25, %v5793_v57  ;;  %v6167_v25 = vld [vmem:[#allocation11 + $0x210] sm:$0xff] }
 0x6e0   : > { %20675 = vmatprep.subr.bf16.mxu1 %v20674_v49  ;;  %v20708_v49 = vpack.c.bf16 %v7705_v58, %v7697_v29  ;;  %v6192_v58 = vld [vmem:[#allocation11 + $0x2d8] sm:$0xff] }
 0x6e1   : > { %20549 = vmatpush1.bf16.msra.mxu0 %v20548_v21  ;;  %v20718_v21 = vpack.c.bf16 %v7694_v48, %v7686_v47  ;;  %v8064_v47 = vld [vmem:[#allocation11 + $0x720] sm:$0xff] }
 0x6e2   : > { %20551 = vmatprep.subr.bf16.mxu0 %v20550_v0  ;;  %v20568_v0 = vpack.c.bf16 %v5800_v20, %v5792_v51  ;;  %v8072_v48 = vld [vmem:[#allocation11 + $0x760] sm:$0xff]  ;;  %v8081_v51 = vld [vmem:[#allocation11 + $0x7a8] sm:$0xff] }
 0x6e3   : > { %20677 = vmatpush1.bf16.msra.mxu1 %v20676_v8  ;;  %v20570_v8 = vpack.c.bf16 %v5817_v60, %v5809_v39  ;;  %v8089_v20 = vld [vmem:[#allocation11 + $0x7e8] sm:$0xff]  ;;  %v6183_v60 = vld [vmem:[#allocation11 + $0x290] sm:$0xff] }
 0x6e4   : > { %18102 = vmatmul.mubr.msk.f32.vlgmr.msra.gmra.mrb[100].mxu0 %vm5438_vm4, %v23681_v19  ;;  %20687 = vmatprep.subr.bf16.mxu1 %v20686_v11  ;;  %v20720_v11 = vpack.c.bf16 %v7693_v4, %v7685_v50  ;;  %v20752_v50 = vpack.c.bf16 %v8072_v48, %v8064_v47  ;;  %v6170_v4 = vld [vmem:[#allocation11 + $0x228] sm:$0xff]  ;;  %v20754_v5 = vpack.c.bf16 %v8089_v20, %v8081_v51  ;;  %v6195_v47 = vld [vmem:[#allocation11 + $0x2f0] sm:$0xff]  ;;  %v6555_v51 = vld [vmem:[#allocation11 + $0x358] sm:$0xff] }
 0x6e5   : > { %20553 = vmatpush1.bf16.msra.mxu0 %v20552_v33  ;;  %5956 = vmatprep.mubr.f32.mxu0 %v23656_v59  ;;  %v23701_v33 = vrot.slane %v23646_v3, 6 }
 0x6e6   : > { %18118 = vmatmul.mubr.msk.f32.vlgmr.msra.gmra.mrb[80].mxu1 %vm5438_vm4, %v23686_v24  ;;  %20555 = vmatprep.subr.bf16.mxu0 %v20554_v44  ;;  %v7709_v44 = vld [vmem:[#allocation11 + $0x6e0] sm:$0xff] }
 0x6e7   : > { %20689 = vmatpush1.bf16.msra.mxu1 %v20688_v23  ;;  %7543 = vmatprep.mubr.f32.mxu1 %v23656_v59  ;;  %v8069_v23 = vld [vmem:[#allocation11 + $0x748] sm:$0xff]  ;;  %v20724_v22 = vpack.c.bf16 %v7709_v44, %v7701_v17  ;;  %v6177_v17 = vld [vmem:[#allocation11 + $0x260] sm:$0xff] }
 0x6e8   : > { %20691 = vmatprep.subr.bf16.mxu1 %v20690_v42  ;;  %v6173_v42 = vld [vmem:[#allocation11 + $0x240] sm:$0xff]  ;;  %v20734_v46 = vpack.c.bf16 %v8069_v23, %v8061_v1  ;;  %v6186_v44 = vld [vmem:[#allocation11 + $0x2a8] sm:$0xff] }
 0x6e9   : > { %20557 = vmatpush1.bf16.msra.mxu0 %v20556_v36  ;;  %v6190_v36 = vld [vmem:[#allocation11 + $0x2c8] sm:$0xff]  ;;  %v20576_v26 = vpack.c.bf16 %v6173_v42, %v6165_v12  ;;  %v8439_v23 = vld [vmem:[#allocation11 + $0x800] sm:$0xff] }
 0x6ea   : > { %20559 = vmatprep.subr.bf16.mxu0 %v20558_v27  ;;  %v8068_v27 = vld [vmem:[#allocation11 + $0x740] sm:$0xff]  ;;  %v20578_v18 = vpack.c.bf16 %v6190_v36, %v6182_v9  ;;  %v8456_v42 = vld [vmem:[#allocation11 + $0x888] sm:$0xff] }
 0x6eb   : > { %20693 = vmatpush1.bf16.msra.mxu1 %v20692_v54  ;;  %v8085_v54 = vld [vmem:[#allocation11 + $0x7c8] sm:$0xff]  ;;  %v20736_v14 = vpack.c.bf16 %v8068_v27, %v8060_v7  ;;  %v6185_v36 = vld [vmem:[#allocation11 + $0x2a0] sm:$0xff]  ;;  %v6172_v27 = vld [vmem:[#allocation11 + $0x238] sm:$0xff] }
 0x6ec   : > { %18103 = vmatmul.mubr.msk.f32.vlgmr.msra.gmra.mrb[102].mxu0 %vm5438_vm4, %v23681_v19  ;;  %20703 = vmatprep.subr.bf16.mxu1 %v20702_v63  ;;  %v6189_v63 = vld [vmem:[#allocation11 + $0x2c0] sm:$0xff]  ;;  %v20738_v6 = vpack.c.bf16 %v8085_v54, %v8077_v52 }
 0x6ed   : > { %20561 = vmatpush1.bf16.msra.mxu0 %v20560_v28  ;;  %6027 = vmatprep.mubr.f32.mxu0 %v23656_v59  ;;  %v6176_v28 = vld [vmem:[#allocation11 + $0x258] sm:$0xff]  ;;  %v20580_v30 = vpack.c.bf16 %v6189_v63, %v6181_v55  ;;  %v8455_v54 = vld [vmem:[#allocation11 + $0x880] sm:$0xff]  ;;  %v8444_v63 = vld [vmem:[#allocation11 + $0x828] sm:$0xff] }
 0x6ee   : > { %18120 = vmatmul.mubr.msk.f32.vlgmr.msra.gmra.mrb[82].mxu1 %vm5438_vm4, %v23686_v24  ;;  %20563 = vmatprep.subr.bf16.mxu0 %v20562_v13  ;;  %v8084_v13 = vld [vmem:[#allocation11 + $0x7c0] sm:$0xff]  ;;  %v20582_v57 = vpack.c.bf16 %v6176_v28, %v6168_v41  ;;  %v6171_v28 = vld [vmem:[#allocation11 + $0x230] sm:$0xff] }
 0x6ef   : > { %20705 = vmatpush1.bf16.msra.mxu1 %v20704_v35  ;;  %7780 = vmatprep.mubr.f32.mxu1 %v23656_v59  ;;  %v8073_v35 = vld [vmem:[#allocation11 + $0x768] sm:$0xff]  ;;  %v20740_v29 = vpack.c.bf16 %v8084_v13, %v8076_v31  ;;  %v6188_v13 = vld [vmem:[#allocation11 + $0x2b8] sm:$0xff] }
 0x6f0   : > { %20707 = vmatprep.subr.bf16.mxu1 %v20706_v45  ;;  %v6175_v45 = vld [vmem:[#allocation11 + $0x250] sm:$0xff] }
 0x6f1   : > { %20565 = vmatpush1.bf16.msra.mxu0 %v20564_v40  ;;  %v20750_v40 = vpack.c.bf16 %v8073_v35, %v8065_v38  ;;  %v8443_v35 = vld [vmem:[#allocation11 + $0x820] sm:$0xff] }
 0x6f2   : > { %20567 = vmatprep.subr.bf16.mxu0 %v20566_v43  ;;  %v20584_v43 = vpack.c.bf16 %v6175_v45, %v6167_v25  ;;  %v8460_v45 = vld [vmem:[#allocation11 + $0x8a8] sm:$0xff] }
 0x6f3   : > { %20709 = vmatpush1.bf16.msra.mxu1 %v20708_v49  ;;  %v23714_v49 = vrot.slane %v23646_v3, 2 }
 0x6f4   : > { %18104 = vmatmul.mubr.msk.f32.vlgmr.msra.gmra.mrb[104].mxu0 %vm5438_vm4, %v23681_v19  ;;  %20719 = vmatprep.subr.bf16.mxu1 %v20718_v21  ;;  %v6191_v21 = vld [vmem:[#allocation11 + $0x2d0] sm:$0xff] }
 0x6f5   : > { %20569 = vmatpush1.bf16.msra.mxu0 %v20568_v0  ;;  %6098 = vmatprep.mubr.f32.mxu0 %v23656_v59  ;;  %v6178_v0 = vld [vmem:[#allocation11 + $0x268] sm:$0xff]  ;;  %v20588_v56 = vpack.c.bf16 %v6191_v21, %v6183_v60  ;;  %v8459_v21 = vld [vmem:[#allocation11 + $0x8a0] sm:$0xff] }
 0x6f6   : > { %18122 = vmatmul.mubr.msk.f32.vlgmr.msra.gmra.mrb[84].mxu1 %vm5438_vm4, %v23701_v33  ;;  %20571 = vmatprep.subr.bf16.mxu0 %v20570_v8  ;;  %v8080_v8 = vld [vmem:[#allocation11 + $0x7a0] sm:$0xff]  ;;  %v20590_v15 = vpack.c.bf16 %v6178_v0, %v6170_v4  ;;  %v8819_v0 = vld [vmem:[#allocation11 + $0x908] sm:$0xff] }
 0x6f7   : > { %20721 = vmatpush1.bf16.msra.mxu1 %v20720_v11  ;;  %7922 = vmatprep.mubr.f32.mxu1 %v23656_v59  ;;  %v8440_v11 = vld [vmem:[#allocation11 + $0x808] sm:$0xff]  ;;  %v20756_v3 = vpack.c.bf16 %v8088_v32, %v8080_v8  ;;  %v6554_v32 = vld [vmem:[#allocation11 + $0x350] sm:$0xff] }
 0x6f8   : > { %20723 = vmatprep.subr.bf16.mxu1 %v20722_v16  ;;  %v6169_v16 = vld [vmem:[#allocation11 + $0x220] sm:$0xff]  ;;  %v20766_v1 = vpack.c.bf16 %v8448_v37, %v8440_v11  ;;  %v6563_v11 = vld [vmem:[#allocation11 + $0x398] sm:$0xff] }
 0x6f9   : > { %20573 = vmatpush1.bf16.msra.mxu0 %v20572_v10  ;;  %v6194_v10 = vld [vmem:[#allocation11 + $0x2e8] sm:$0xff]  ;;  %v20592_v12 = vpack.c.bf16 %v6177_v17, %v6169_v16  ;;  %v6571_v37 = vld [vmem:[#allocation11 + $0x3d8] sm:$0xff]  ;;  %v8818_v16 = vld [vmem:[#allocation11 + $0x900] sm:$0xff] }
 0x6fa   : > { %20575 = vmatprep.subr.bf16.mxu0 %v20574_v34  ;;  %v8447_v34 = vld [vmem:[#allocation11 + $0x840] sm:$0xff]  ;;  %v20594_v9 = vpack.c.bf16 %v6194_v10, %v6186_v44  ;;  %v8835_v44 = vld [vmem:[#allocation11 + $0x988] sm:$0xff] }
 0x6fb   : > { %20725 = vmatpush1.bf16.msra.mxu1 %v20724_v22  ;;  %v8464_v22 = vld [vmem:[#allocation11 + $0x8c8] sm:$0xff]  ;;  %v20768_v7 = vpack.c.bf16 %v8447_v34, %v8439_v23  ;;  %v8826_v17 = vld [vmem:[#allocation11 + $0x940] sm:$0xff]  ;;  %v6562_v23 = vld [vmem:[#allocation11 + $0x390] sm:$0xff] }
 0x6fc   : > { %18105 = vmatmul.mubr.msk.f32.vlgmr.msra.gmra.mrb[106].mxu0 %vm5438_vm4, %v23681_v19  ;;  %20735 = vmatprep.subr.bf16.mxu1 %v20734_v46  ;;  %v6184_v19 = vld [vmem:[#allocation11 + $0x298] sm:$0xff]  ;;  %v6193_v46 = vld [vmem:[#allocation11 + $0x2e0] sm:$0xff]  ;;  %v20770_v52 = vpack.c.bf16 %v8464_v22, %v8456_v42  ;;  %v8843_v10 = vld [vmem:[#allocation11 + $0x9c8] sm:$0xff] }
 0x6fd   : > { %20577 = vmatpush1.bf16.msra.mxu0 %v20576_v26  ;;  %6264 = vmatprep.mubr.f32.mxu0 %v23656_v59  ;;  %v20586_v39 = vpack.c.bf16 %v6192_v58, %v6184_v19  ;;  %v6180_v26 = vld [vmem:[#allocation11 + $0x278] sm:$0xff]  ;;  %v20596_v55 = vpack.c.bf16 %v6193_v46, %v6185_v36  ;;  %v23731_v19 = vpop.f32.mrb[90].mxu0  ;;  %v6570_v34 = vld [vmem:[#allocation11 + $0x3d0] sm:$0xff]  ;;  %v8834_v36 = vld [vmem:[#allocation11 + $0x980] sm:$0xff] }
 0x6fe   : > { %18124 = vmatmul.mubr.msk.f32.vlgmr.msra.gmra.mrb[86].mxu1 %vm5438_vm4, %v23701_v33  ;;  %20579 = vmatprep.subr.bf16.mxu0 %v20578_v18  ;;  %v8463_v18 = vld [vmem:[#allocation11 + $0x8c0] sm:$0xff]  ;;  %v20598_v41 = vpack.c.bf16 %v6180_v26, %v6172_v27  ;;  %v23733_v20 = vpop.f32.mrb[91].mxu0  ;;  %v6551_v42 = vld [vmem:[#allocation11 + $0x338] sm:$0xff]  ;;  %v8823_v27 = vld [vmem:[#allocation11 + $0x928] sm:$0xff] }
 0x6ff   : > { %20737 = vmatpush1.bf16.msra.mxu1 %v20736_v14  ;;  %8159 = vmatprep.mubr.f32.mxu1 %v23656_v59  ;;  %v8452_v14 = vld [vmem:[#allocation11 + $0x868] sm:$0xff]  ;;  %v20772_v31 = vpack.c.bf16 %v8463_v18, %v8455_v54  ;;  %v6559_v22 = vld [vmem:[#allocation11 + $0x378] sm:$0xff]  ;;  %v8842_v46 = vld [vmem:[#allocation11 + $0x9c0] sm:$0xff] }
 0x700   : > { %20739 = vmatprep.subr.bf16.mxu1 %v20738_v6  ;;  %v6179_v6 = vld [vmem:[#allocation11 + $0x270] sm:$0xff]  ;;  %v20782_v38 = vpack.c.bf16 %v8452_v14, %v8444_v63  ;;  %v8831_v26 = vld [vmem:[#allocation11 + $0x968] sm:$0xff]  ;;  %v6575_v63 = vld [vmem:[#allocation11 + $0x3f8] sm:$0xff] }
 0x701   : > { %20581 = vmatpush1.bf16.msra.mxu0 %v20580_v30  ;;  %v6196_v30 = vld [vmem:[#allocation11 + $0x2f8] sm:$0xff]  ;;  %v20600_v25 = vpack.c.bf16 %v6179_v6, %v6171_v28  ;;  %v6550_v54 = vld [vmem:[#allocation11 + $0x330] sm:$0xff]  ;;  %v20814_v14 = vpack.c.bf16 %v8831_v26, %v8823_v27  ;;  %v8830_v28 = vld [vmem:[#allocation11 + $0x960] sm:$0xff] }
 0x702   : > { %20583 = vmatprep.subr.bf16.mxu0 %v20582_v57  ;;  %v8451_v57 = vld [vmem:[#allocation11 + $0x860] sm:$0xff]  ;;  %v20602_v58 = vpack.c.bf16 %v6196_v30, %v6188_v13  ;;  %v6558_v18 = vld [vmem:[#allocation11 + $0x370] sm:$0xff]  ;;  %v8847_v13 = vld [vmem:[#allocation11 + $0x9e8] sm:$0xff] }
 0x703   : > { %20741 = vmatpush1.bf16.msra.mxu1 %v20740_v29  ;;  %v8468_v29 = vld [vmem:[#allocation11 + $0x8e8] sm:$0xff]  ;;  %v20784_v48 = vpack.c.bf16 %v8451_v57, %v8443_v35  ;;  %v20632_v6 = vpack.c.bf16 %v6558_v18, %v6550_v54  ;;  %v6574_v35 = vld [vmem:[#allocation11 + $0x3f0] sm:$0xff]  ;;  %v6954_v27 = vld [vmem:[#allocation11 + $0x4f8] sm:$0xff] }
 0x704   : > { %18106 = vmatmul.mubr.msk.f32.vlgmr.msra.gmra.mrb[108].mxu0 %vm5438_vm4, %v23714_v49  ;;  %20751 = vmatprep.subr.bf16.mxu1 %v20750_v40  ;;  %v6187_v40 = vld [vmem:[#allocation11 + $0x2b0] sm:$0xff]  ;;  %v20786_v60 = vpack.c.bf16 %v8468_v29, %v8460_v45  ;;  %v6934_v45 = vld [vmem:[#allocation11 + $0x458] sm:$0xff]  ;;  %v9209_v54 = vld [vmem:[#allocation11 + $0xa60] sm:$0xff] }
 0x705   : > { %20585 = vmatpush1.bf16.msra.mxu0 %v20584_v43  ;;  %6335 = vmatprep.mubr.f32.mxu0 %v23656_v59  ;;  %v6547_v43 = vld [vmem:[#allocation11 + $0x318] sm:$0xff]  ;;  %v20604_v4 = vpack.c.bf16 %v6195_v47, %v6187_v40  ;;  %v8838_v40 = vld [vmem:[#allocation11 + $0x9a0] sm:$0xff] }
 0x706   : > { %18126 = vmatmul.mubr.msk.f32.vlgmr.msra.gmra.mrb[88].mxu1 %vm5438_vm4, %v23719_v2  ;;  %20587 = vmatprep.subr.bf16.mxu0 %v20586_v39  ;;  %v23736_v39 = vmul.f32 0.015625, %v23644_v61  ;;  %v20614_v8 = vpack.c.bf16 %v6555_v51, %v6547_v43  ;;  %v6546_v61 = vld [vmem:[#allocation11 + $0x310] sm:$0xff]  ;;  %v8846_v47 = vld [vmem:[#allocation11 + $0x9e0] sm:$0xff]  ;;  %v9198_v43 = vld [vmem:[#allocation11 + $0xa08] sm:$0xff] }
 0x707   : > { %20753 = vmatpush1.bf16.msra.mxu1 %v20752_v50  ;;  %8301 = vmatprep.mubr.f32.mxu1 %v23656_v59  ;;  %v8467_v50 = vld [vmem:[#allocation11 + $0x8e0] sm:$0xff]  ;;  %v9206_v51 = vld [vmem:[#allocation11 + $0xa48] sm:$0xff] }
 0x708   : > { %20755 = vmatprep.subr.bf16.mxu1 %v20754_v5  ;;  %v8827_v5 = vld [vmem:[#allocation11 + $0x948] sm:$0xff]  ;;  %v23753_v29 = vrot.slane %v23736_v39, 1 }
 0x709   : > { %20589 = vmatpush1.bf16.msra.mxu0 %v20588_v56  ;;  %v20788_v56 = vpack.c.bf16 %v8467_v50, %v8459_v21  ;;  %v6925_v21 = vld [vmem:[#allocation11 + $0x410] sm:$0xff] }
 0x70a   : > { %20591 = vmatprep.subr.bf16.mxu0 %v20590_v15  ;;  %v20798_v15 = vpack.c.bf16 %v8827_v5, %v8819_v0  ;;  %v6933_v50 = vld [vmem:[#allocation11 + $0x450] sm:$0xff]  ;;  %v6942_v0 = vld [vmem:[#allocation11 + $0x498] sm:$0xff] }
 0x70b   : > { %20757 = vmatpush1.bf16.msra.mxu1 %v20756_v3  ;;  %v20616_v3 = vpack.c.bf16 %v6554_v32, %v6546_v61  ;;  %v6950_v5 = vld [vmem:[#allocation11 + $0x4d8] sm:$0xff]  ;;  %v9197_v61 = vld [vmem:[#allocation11 + $0xa00] sm:$0xff] }
 0x70c   : > { %18107 = vmatmul.mubr.msk.f32.vlgmr.msra.gmra.mrb[110].mxu0 %vm5438_vm4, %v23714_v49  ;;  %20767 = vmatprep.subr.bf16.mxu1 %v20766_v1  ;;  %v20618_v1 = vpack.c.bf16 %v6571_v37, %v6563_v11  ;;  %v9205_v32 = vld [vmem:[#allocation11 + $0xa40] sm:$0xff]  ;;  %v9214_v11 = vld [vmem:[#allocation11 + $0xa88] sm:$0xff] }
 0x70d   : > { %20593 = vmatpush1.bf16.msra.mxu0 %v20592_v12  ;;  %6406 = vmatprep.mubr.f32.mxu0 %v23656_v59  ;;  %v20800_v12 = vpack.c.bf16 %v8826_v17, %v8818_v16  ;;  %v9222_v37 = vld [vmem:[#allocation11 + $0xac8] sm:$0xff]  ;;  %v6941_v16 = vld [vmem:[#allocation11 + $0x490] sm:$0xff] }
 0x70e   : > { %18128 = vmatmul.mubr.msk.f32.vlgmr.msra.gmra.mrb[90].mxu1 %vm5438_vm4, %v23719_v2  ;;  %20595 = vmatprep.subr.bf16.mxu0 %v20594_v9  ;;  %v20802_v9 = vpack.c.bf16 %v8843_v10, %v8835_v44  ;;  %v6949_v17 = vld [vmem:[#allocation11 + $0x4d0] sm:$0xff]  ;;  %v6930_v44 = vld [vmem:[#allocation11 + $0x438] sm:$0xff] }
 0x70f   : > { %20769 = vmatpush1.bf16.msra.mxu1 %v20768_v7  ;;  %8538 = vmatprep.mubr.f32.mxu1 %v23656_v59  ;;  %v20620_v7 = vpack.c.bf16 %v6570_v34, %v6562_v23  ;;  %v6938_v10 = vld [vmem:[#allocation11 + $0x478] sm:$0xff]  ;;  %v9213_v23 = vld [vmem:[#allocation11 + $0xa80] sm:$0xff] }
 0x710   : > { %20771 = vmatprep.subr.bf16.mxu1 %v20770_v52  ;;  %v20630_v52 = vpack.c.bf16 %v6559_v22, %v6551_v42  ;;  %v9221_v34 = vld [vmem:[#allocation11 + $0xac0] sm:$0xff]  ;;  %v9202_v42 = vld [vmem:[#allocation11 + $0xa28] sm:$0xff] }
 0x711   : > { %20597 = vmatpush1.bf16.msra.mxu0 %v20596_v55  ;;  %v20804_v55 = vpack.c.bf16 %v8842_v46, %v8834_v36  ;;  %v9210_v22 = vld [vmem:[#allocation11 + $0xa68] sm:$0xff]  ;;  %v6929_v36 = vld [vmem:[#allocation11 + $0x430] sm:$0xff] }
 0x712   : > { %20599 = vmatprep.subr.bf16.mxu0 %v20598_v41  ;;  %v8822_v41 = vld [vmem:[#allocation11 + $0x920] sm:$0xff]  ;;  %v6937_v46 = vld [vmem:[#allocation11 + $0x470] sm:$0xff]  ;;  %v20846_v26 = vpack.c.bf16 %v9210_v22, %v9202_v42  ;;  %v7333_v42 = vld [vmem:[#allocation11 + $0x5f8] sm:$0xff] }
 0x713   : > { %20773 = vmatpush1.bf16.msra.mxu1 %v20772_v31  ;;  %v8839_v31 = vld [vmem:[#allocation11 + $0x9a8] sm:$0xff]  ;;  %v20816_v57 = vpack.c.bf16 %v8830_v28, %v8822_v41  ;;  %v20664_v18 = vpack.c.bf16 %v6937_v46, %v6929_v36  ;;  %v6953_v41 = vld [vmem:[#allocation11 + $0x4f0] sm:$0xff]  ;;  %v9588_v36 = vld [vmem:[#allocation11 + $0xb60] sm:$0xff] }
 0x714   : > { %18108 = vmatmul.mubr.msk.f32.vlgmr.msra.gmra.mrb[112].mxu0 %vm5438_vm4, %v23714_v49  ;;  %20783 = vmatprep.subr.bf16.mxu1 %v20782_v38  ;;  %v6566_v38 = vld [vmem:[#allocation11 + $0x3b0] sm:$0xff] }
 0x715   : > { %20601 = vmatpush1.bf16.msra.mxu0 %v20600_v25  ;;  %6477 = vmatprep.mubr.f32.mxu0 %v23656_v59  ;;  %v6926_v25 = vld [vmem:[#allocation11 + $0x418] sm:$0xff] }
 0x716   : > { %18130 = vmatmul.mubr.msk.f32.vlgmr.msra.gmra.mrb[92].mxu1 %vm5438_vm4, %v23736_v39  ;;  %20603 = vmatprep.subr.bf16.mxu0 %v20602_v58  ;;  %v20818_v58 = vpack.c.bf16 %v8847_v13, %v8839_v31  ;;  %v7313_v31 = vld [vmem:[#allocation11 + $0x558] sm:$0xff]  ;;  %v23768_v13 = vrot.slane %v23736_v39, 2 }
 0x717   : > { %20785 = vmatpush1.bf16.msra.mxu1 %v20784_v48  ;;  %8680 = vmatprep.mubr.f32.mxu1 %v23656_v59  ;;  %v20636_v48 = vpack.c.bf16 %v6574_v35, %v6566_v38  ;;  %v9217_v38 = vld [vmem:[#allocation11 + $0xaa0] sm:$0xff] }
 0x718   : > { %20787 = vmatprep.subr.bf16.mxu1 %v20786_v60  ;;  %v20646_v60 = vpack.c.bf16 %v6934_v45, %v6926_v25  ;;  %v9225_v35 = vld [vmem:[#allocation11 + $0xae0] sm:$0xff]  ;;  %v9577_v25 = vld [vmem:[#allocation11 + $0xb08] sm:$0xff] }
 0x719   : > { %20605 = vmatpush1.bf16.msra.mxu0 %v20604_v4  ;;  %v20820_v4 = vpack.c.bf16 %v8846_v47, %v8838_v40  ;;  %v9585_v45 = vld [vmem:[#allocation11 + $0xb48] sm:$0xff]  ;;  %v7304_v40 = vld [vmem:[#allocation11 + $0x510] sm:$0xff] }
 0x71a   : > { %20615 = vmatprep.subr.bf16.mxu0 %v20614_v8  ;;  %v20830_v8 = vpack.c.bf16 %v9206_v51, %v9198_v43  ;;  %v7312_v47 = vld [vmem:[#allocation11 + $0x550] sm:$0xff]  ;;  %v23773_v43 = vld [vmem:[#allocation2] sm:$0xff] }
 0x71b   : > { %20789 = vmatpush1.bf16.msra.mxu1 %v20788_v56  ;;  %v20648_v56 = vpack.c.bf16 %v6933_v50, %v6925_v21  ;;  %v7321_v51 = vld [vmem:[#allocation11 + $0x598] sm:$0xff]  ;;  %v20862_v21 = vpack.c.bf16 %v9585_v45, %v9577_v25  ;;  %v9584_v50 = vld [vmem:[#allocation11 + $0xb40] sm:$0xff] }
 0x71c   : > { %18109 = vmatmul.mubr.msk.f32.vlgmr.msra.gmra.mrb[114].mxu0 %vm5438_vm4, %v23714_v49  ;;  %20799 = vmatprep.subr.bf16.mxu1 %v20798_v15  ;;  %v6567_v49 = vld [vmem:[#allocation11 + $0x3b8] sm:$0xff]  ;;  %v20650_v15 = vpack.c.bf16 %v6950_v5, %v6942_v0  ;;  %v9593_v0 = vld [vmem:[#allocation11 + $0xb88] sm:$0xff] }
 0x71d   : > { %20617 = vmatpush1.bf16.msra.mxu0 %v20616_v3  ;;  %6714 = vmatprep.mubr.f32.mxu0 %v23656_v59  ;;  %v20634_v30 = vpack.c.bf16 %v6575_v63, %v6567_v49  ;;  %v20832_v3 = vpack.c.bf16 %v9205_v32, %v9197_v61  ;;  %v9226_v49 = vld [vmem:[#allocation11 + $0xae8] sm:$0xff]  ;;  %v7320_v61 = vld [vmem:[#allocation11 + $0x590] sm:$0xff]  ;;  %v7700_v25 = vld [vmem:[#allocation11 + $0x698] sm:$0xff] }
 0x71e   : > { %18132 = vmatmul.mubr.msk.f32.vlgmr.msra.gmra.mrb[94].mxu1 %vm5438_vm4, %v23736_v39  ;;  %20619 = vmatprep.subr.bf16.mxu0 %v20618_v1  ;;  %v20834_v1 = vpack.c.bf16 %v9222_v37, %v9214_v11  ;;  %v9601_v5 = vld [vmem:[#allocation11 + $0xbc8] sm:$0xff]  ;;  %v7328_v32 = vld [vmem:[#allocation11 + $0x5d0] sm:$0xff]  ;;  %v7309_v11 = vld [vmem:[#allocation11 + $0x538] sm:$0xff] }
 0x71f   : > { %20801 = vmatpush1.bf16.msra.mxu1 %v20800_v12  ;;  %8917 = vmatprep.mubr.f32.mxu1 %v23656_v59  ;;  %v20652_v12 = vpack.c.bf16 %v6949_v17, %v6941_v16  ;;  %v7317_v37 = vld [vmem:[#allocation11 + $0x578] sm:$0xff]  ;;  %v9592_v16 = vld [vmem:[#allocation11 + $0xb80] sm:$0xff] }
 0x720   : > { %20803 = vmatprep.subr.bf16.mxu1 %v20802_v9  ;;  %v20662_v9 = vpack.c.bf16 %v6938_v10, %v6930_v44  ;;  %v9600_v17 = vld [vmem:[#allocation11 + $0xbc0] sm:$0xff]  ;;  %v9581_v44 = vld [vmem:[#allocation11 + $0xb28] sm:$0xff]  ;;  %v7708_v45 = vld [vmem:[#allocation11 + $0x6d8] sm:$0xff] }
 0x721   : > { %20621 = vmatpush1.bf16.msra.mxu0 %v20620_v7  ;;  %v20836_v7 = vpack.c.bf16 %v9221_v34, %v9213_v23  ;;  %v9589_v10 = vld [vmem:[#allocation11 + $0xb68] sm:$0xff]  ;;  %v7308_v23 = vld [vmem:[#allocation11 + $0x530] sm:$0xff] }
 0x722   : > { %20631 = vmatprep.subr.bf16.mxu0 %v20630_v52  ;;  %v9201_v52 = vld [vmem:[#allocation11 + $0xa20] sm:$0xff]  ;;  %v7316_v34 = vld [vmem:[#allocation11 + $0x570] sm:$0xff]  ;;  %v20878_v22 = vpack.c.bf16 %v9589_v10, %v9581_v44  ;;  %v7712_v44 = vld [vmem:[#allocation11 + $0x6f8] sm:$0xff] }
 0x723   : > { %20805 = vmatpush1.bf16.msra.mxu1 %v20804_v55  ;;  %v9218_v55 = vld [vmem:[#allocation11 + $0xaa8] sm:$0xff]  ;;  %v20848_v28 = vpack.c.bf16 %v9209_v54, %v9201_v52  ;;  %v20696_v46 = vpack.c.bf16 %v7316_v34, %v7308_v23  ;;  %v7332_v52 = vld [vmem:[#allocation11 + $0x5f0] sm:$0xff]  ;;  %v9967_v23 = vld [vmem:[#allocation11 + $0xc60] sm:$0xff] }
 0x724   : > { %18111 = vmatmul.mubr.msk.f32.vlgmr.msra.gmra.mrb[116].mxu0 %vm5438_vm4, %v23651_v62  ;;  %20815 = vmatprep.subr.bf16.mxu1 %v20814_v14  ;;  %v6945_v14 = vld [vmem:[#allocation11 + $0x4b0] sm:$0xff] }
 0x725   : > { %20633 = vmatpush1.bf16.msra.mxu0 %v20632_v6  ;;  %6856 = vmatprep.mubr.f32.mxu0 %v23656_v59  ;;  %v7305_v6 = vld [vmem:[#allocation11 + $0x518] sm:$0xff] }
 0x726   : > { %18134 = vmatmul.mubr.msk.f32.vlgmr.msra.gmra.mrb[96].mxu1 %vm5438_vm4, %v23753_v29  ;;  %20635 = vmatprep.subr.bf16.mxu0 %v20634_v30  ;;  %v20850_v30 = vpack.c.bf16 %v9226_v49, %v9218_v55  ;;  %v7692_v55 = vld [vmem:[#allocation11 + $0x658] sm:$0xff]  ;;  %v23785_v49 = vrot.slane %v23736_v39, 3 }
 0x727   : > { %20817 = vmatpush1.bf16.msra.mxu1 %v20816_v57  ;;  %9059 = vmatprep.mubr.f32.mxu1 %v23656_v59  ;;  %v20668_v57 = vpack.c.bf16 %v6953_v41, %v6945_v14  ;;  %v9596_v14 = vld [vmem:[#allocation11 + $0xba0] sm:$0xff] }
 0x728   : > { %20819 = vmatprep.subr.bf16.mxu1 %v20818_v58  ;;  %v20678_v58 = vpack.c.bf16 %v7313_v31, %v7305_v6  ;;  %v9604_v41 = vld [vmem:[#allocation11 + $0xbe0] sm:$0xff]  ;;  %v9956_v6 = vld [vmem:[#allocation11 + $0xc08] sm:$0xff] }
 0x729   : > { %20637 = vmatpush1.bf16.msra.mxu0 %v20636_v48  ;;  %v20852_v48 = vpack.c.bf16 %v9225_v35, %v9217_v38  ;;  %v9964_v31 = vld [vmem:[#allocation11 + $0xc48] sm:$0xff]  ;;  %v7683_v38 = vld [vmem:[#allocation11 + $0x610] sm:$0xff] }
 0x72a   : > { %20647 = vmatprep.subr.bf16.mxu0 %v20646_v60  ;;  %v7329_v60 = vld [vmem:[#allocation11 + $0x5d8] sm:$0xff]  ;;  %v7691_v35 = vld [vmem:[#allocation11 + $0x650] sm:$0xff] }
 0x72b   : > { %20821 = vmatpush1.bf16.msra.mxu1 %v20820_v4  ;;  %v20680_v4 = vpack.c.bf16 %v7312_v47, %v7304_v40  ;;  %v9955_v40 = vld [vmem:[#allocation11 + $0xc00] sm:$0xff] }
 0x72c   : > { %18113 = vmatmul.mubr.msk.f32.vlgmr.msra.gmra.mrb[118].mxu0 %vm5438_vm4, %v23651_v62  ;;  %20831 = vmatprep.subr.bf16.mxu1 %v20830_v8  ;;  %v6946_v62 = vld [vmem:[#allocation11 + $0x4b8] sm:$0xff]  ;;  %v20682_v8 = vpack.c.bf16 %v7329_v60, %v7321_v51  ;;  %v9963_v47 = vld [vmem:[#allocation11 + $0xc40] sm:$0xff]  ;;  %v9972_v51 = vld [vmem:[#allocation11 + $0xc88] sm:$0xff] }
 0x72d   : > { %20649 = vmatpush1.bf16.msra.mxu0 %v20648_v56  ;;  %7093 = vmatprep.mubr.f32.mxu0 %v23656_v59  ;;  %v20666_v63 = vpack.c.bf16 %v6954_v27, %v6946_v62  ;;  %v9605_v62 = vld [vmem:[#allocation11 + $0xbe8] sm:$0xff] }
 0x72e   : > { %18136 = vmatmul.mubr.msk.f32.vlgmr.msra.gmra.mrb[98].mxu1 %vm5438_vm4, %v23753_v29  ;;  %20651 = vmatprep.subr.bf16.mxu0 %v20650_v15  ;;  %v20866_v15 = vpack.c.bf16 %v9601_v5, %v9593_v0  ;;  %v9980_v60 = vld [vmem:[#allocation11 + $0xcc8] sm:$0xff]  ;;  %v7688_v0 = vld [vmem:[#allocation11 + $0x638] sm:$0xff] }
 0x72f   : > { %20833 = vmatpush1.bf16.msra.mxu1 %v20832_v3  ;;  %9296 = vmatprep.mubr.f32.mxu1 %v23656_v59  ;;  %v20684_v3 = vpack.c.bf16 %v7328_v32, %v7320_v61  ;;  %v7696_v5 = vld [vmem:[#allocation11 + $0x678] sm:$0xff]  ;;  %v9971_v61 = vld [vmem:[#allocation11 + $0xc80] sm:$0xff] }
 0x730   : > { %20835 = vmatprep.subr.bf16.mxu1 %v20834_v1  ;;  %v20694_v1 = vpack.c.bf16 %v7317_v37, %v7309_v11  ;;  %v9979_v32 = vld [vmem:[#allocation11 + $0xcc0] sm:$0xff]  ;;  %v9960_v11 = vld [vmem:[#allocation11 + $0xc28] sm:$0xff] }
 0x731   : > { %20653 = vmatpush1.bf16.msra.mxu0 %v20652_v12  ;;  %v20868_v12 = vpack.c.bf16 %v9600_v17, %v9592_v16  ;;  %v9968_v37 = vld [vmem:[#allocation11 + $0xc68] sm:$0xff]  ;;  %v7687_v16 = vld [vmem:[#allocation11 + $0x630] sm:$0xff] }
 0x732   : > { %20663 = vmatprep.subr.bf16.mxu0 %v20662_v9  ;;  %v9580_v9 = vld [vmem:[#allocation11 + $0xb20] sm:$0xff]  ;;  %v7695_v17 = vld [vmem:[#allocation11 + $0x670] sm:$0xff]  ;;  %v20910_v10 = vpack.c.bf16 %v9968_v37, %v9960_v11  ;;  %v8091_v11 = vld [vmem:[#allocation11 + $0x7f8] sm:$0xff] }
 0x733   : > { %20837 = vmatpush1.bf16.msra.mxu1 %v20836_v7  ;;  %v9597_v7 = vld [vmem:[#allocation11 + $0xba8] sm:$0xff]  ;;  %v20880_v54 = vpack.c.bf16 %v9588_v36, %v9580_v9  ;;  %v20728_v34 = vpack.c.bf16 %v7695_v17, %v7687_v16  ;;  %v7711_v9 = vld [vmem:[#allocation11 + $0x6f0] sm:$0xff]  ;;  %v10346_v16 = vld [vmem:[#allocation11 + $0xd60] sm:$0xff] }
 0x734   : > { %18115 = vmatmul.mubr.msk.f32.vlgmr.msra.gmra.mrb[120].mxu0 %vm5438_vm4, %v23668_v53  ;;  %20847 = vmatprep.subr.bf16.mxu1 %v20846_v26  ;;  %v7324_v26 = vld [vmem:[#allocation11 + $0x5b0] sm:$0xff] }
 0x735   : > { %20665 = vmatpush1.bf16.msra.mxu0 %v20664_v18  ;;  %7235 = vmatprep.mubr.f32.mxu0 %v23656_v59  ;;  %v9576_v59 = vld [vmem:[#allocation11 + $0xb00] sm:$0xff]  ;;  %v7684_v18 = vld [vmem:[#allocation11 + $0x618] sm:$0xff] }
 0x736   : > { %18138 = vmatmul.mubr.msk.f32.vlgmr.msra.gmra.mrb[100].mxu1 %vm5438_vm4, %v23768_v13  ;;  %20667 = vmatprep.subr.bf16.mxu0 %v20666_v63  ;;  %v20864_v56 = vpack.c.bf16 %v9584_v50, %v9576_v59  ;;  %v20882_v63 = vpack.c.bf16 %v9605_v62, %v9597_v7  ;;  %v7699_v59 = vld [vmem:[#allocation11 + $0x690] sm:$0xff]  ;;  %v8071_v7 = vld [vmem:[#allocation11 + $0x758] sm:$0xff]  ;;  %v23800_v62 = vrot.slane %v23736_v39, 4 }
 0x737   : > { %20849 = vmatpush1.bf16.msra.mxu1 %v20848_v28  ;;  %9438 = vmatprep.mubr.f32.mxu1 %v23773_v43  ;;  %v20700_v28 = vpack.c.bf16 %v7332_v52, %v7324_v26  ;;  %v7707_v50 = vld [vmem:[#allocation11 + $0x6d0] sm:$0xff]  ;;  %v9975_v26 = vld [vmem:[#allocation11 + $0xca0] sm:$0xff] }
 0x738   : > { %20851 = vmatprep.subr.bf16.mxu1 %v20850_v30  ;;  %v20710_v30 = vpack.c.bf16 %v7692_v55, %v7684_v18  ;;  %v9983_v52 = vld [vmem:[#allocation11 + $0xce0] sm:$0xff]  ;;  %v10335_v18 = vld [vmem:[#allocation11 + $0xd08] sm:$0xff] }
 0x739   : > { %20669 = vmatpush1.bf16.msra.mxu0 %v20668_v57  ;;  %v20884_v57 = vpack.c.bf16 %v9604_v41, %v9596_v14  ;;  %v10343_v55 = vld [vmem:[#allocation11 + $0xd48] sm:$0xff]  ;;  %v8062_v14 = vld [vmem:[#allocation11 + $0x710] sm:$0xff] }
 0x73a   : > { %20679 = vmatprep.subr.bf16.mxu0 %v20678_v58  ;;  %v20894_v58 = vpack.c.bf16 %v9964_v31, %v9956_v6  ;;  %v8070_v41 = vld [vmem:[#allocation11 + $0x750] sm:$0xff]  ;;  %v8079_v6 = vld [vmem:[#allocation11 + $0x798] sm:$0xff] }
 0x73b   : > { %20853 = vmatpush1.bf16.msra.mxu1 %v20852_v48  ;;  %v20712_v48 = vpack.c.bf16 %v7691_v35, %v7683_v38  ;;  %v8087_v31 = vld [vmem:[#allocation11 + $0x7d8] sm:$0xff]  ;;  %v10334_v38 = vld [vmem:[#allocation11 + $0xd00] sm:$0xff] }
 0x73c   : > { %18117 = vmatmul.mubr.msk.f32.vlgmr.msra.gmra.mrb[122].mxu0 %vm5438_vm4, %v23668_v53  ;;  %20863 = vmatprep.subr.bf16.mxu1 %v20862_v21  ;;  %v7325_v53 = vld [vmem:[#allocation11 + $0x5b8] sm:$0xff]  ;;  %v20714_v21 = vpack.c.bf16 %v7708_v45, %v7700_v25  ;;  %v10342_v35 = vld [vmem:[#allocation11 + $0xd40] sm:$0xff]  ;;  %v10351_v25 = vld [vmem:[#allocation11 + $0xd88] sm:$0xff] }
 0x73d   : > { %20681 = vmatpush1.bf16.msra.mxu0 %v20680_v4  ;;  %7472 = vmatprep.mubr.f32.mxu0 %v23773_v43  ;;  %v20698_v27 = vpack.c.bf16 %v7333_v42, %v7325_v53  ;;  %v20896_v4 = vpack.c.bf16 %v9963_v47, %v9955_v40  ;;  %v9984_v53 = vld [vmem:[#allocation11 + $0xce8] sm:$0xff]  ;;  %v8078_v40 = vld [vmem:[#allocation11 + $0x790] sm:$0xff] }
 0x73e   : > { %18140 = vmatmul.mubr.msk.f32.vlgmr.msra.gmra.mrb[102].mxu1 %vm5438_vm4, %v23768_v13  ;;  %20683 = vmatprep.subr.bf16.mxu0 %v20682_v8  ;;  %v20898_v8 = vpack.c.bf16 %v9980_v60, %v9972_v51  ;;  %v10359_v45 = vld [vmem:[#allocation11 + $0xdc8] sm:$0xff]  ;;  %v8086_v47 = vld [vmem:[#allocation11 + $0x7d0] sm:$0xff]  ;;  %v8067_v51 = vld [vmem:[#allocation11 + $0x738] sm:$0xff] }
 0x73f   : > { %20865 = vmatpush1.bf16.msra.mxu1 %v20864_v56  ;;  %9675 = vmatprep.mubr.f32.mxu1 %v23773_v43  ;;  %v20716_v56 = vpack.c.bf16 %v7707_v50, %v7699_v59  ;;  %v8075_v60 = vld [vmem:[#allocation11 + $0x778] sm:$0xff]  ;;  %v10350_v59 = vld [vmem:[#allocation11 + $0xd80] sm:$0xff] }
 0x740   : > { %20867 = vmatprep.subr.bf16.mxu1 %v20866_v15  ;;  %v20726_v15 = vpack.c.bf16 %v7696_v5, %v7688_v0  ;;  %v10358_v50 = vld [vmem:[#allocation11 + $0xdc0] sm:$0xff]  ;;  %v10339_v0 = vld [vmem:[#allocation11 + $0xd28] sm:$0xff] }
 0x741   : > { %20685 = vmatpush1.bf16.msra.mxu0 %v20684_v3  ;;  %v20900_v3 = vpack.c.bf16 %v9979_v32, %v9971_v61  ;;  %v10347_v5 = vld [vmem:[#allocation11 + $0xd68] sm:$0xff]  ;;  %v8066_v61 = vld [vmem:[#allocation11 + $0x730] sm:$0xff] }
 0x742   : > { %20695 = vmatprep.subr.bf16.mxu0 %v20694_v1  ;;  %v9959_v1 = vld [vmem:[#allocation11 + $0xc20] sm:$0xff]  ;;  %v8074_v32 = vld [vmem:[#allocation11 + $0x770] sm:$0xff]  ;;  %v20942_v37 = vpack.c.bf16 %v10347_v5, %v10339_v0  ;;  %v8470_v0 = vld [vmem:[#allocation11 + $0x8f8] sm:$0xff] }
 0x743   : > { %20869 = vmatpush1.bf16.msra.mxu1 %v20868_v12  ;;  %v9976_v12 = vld [vmem:[#allocation11 + $0xca8] sm:$0xff]  ;;  %v20912_v36 = vpack.c.bf16 %v9967_v23, %v9959_v1  ;;  %v20760_v17 = vpack.c.bf16 %v8074_v32, %v8066_v61  ;;  %v8090_v1 = vld [vmem:[#allocation11 + $0x7f0] sm:$0xff]  ;;  %v10725_v61 = vld [vmem:[#allocation11 + $0xe60] sm:$0xff] }
 0x744   : > { %18119 = vmatmul.mubr.msk.f32.vlgmr.msra.gmra.mrb[124].mxu0 %vm5438_vm4, %v23686_v24  ;;  %20879 = vmatprep.subr.bf16.mxu1 %v20878_v22  ;;  %v7703_v22 = vld [vmem:[#allocation11 + $0x6b0] sm:$0xff] }
 0x745   : > { %20697 = vmatpush1.bf16.msra.mxu0 %v20696_v46  ;;  %7614 = vmatprep.mubr.f32.mxu0 %v23773_v43  ;;  %v8063_v46 = vld [vmem:[#allocation11 + $0x718] sm:$0xff] }
 0x746   : > { %18142 = vmatmul.mubr.msk.f32.vlgmr.msra.gmra.mrb[104].mxu1 %vm5438_vm4, %v23785_v49  ;;  %20699 = vmatprep.subr.bf16.mxu0 %v20698_v27  ;;  %v20914_v27 = vpack.c.bf16 %v9984_v53, %v9976_v12  ;;  %v8450_v12 = vld [vmem:[#allocation11 + $0x858] sm:$0xff]  ;;  %v23815_v53 = vrot.slane %v23736_v39, 5 }
 0x747   : > { %20881 = vmatpush1.bf16.msra.mxu1 %v20880_v54  ;;  %9817 = vmatprep.mubr.f32.mxu1 %v23773_v43  ;;  %v20732_v54 = vpack.c.bf16 %v7711_v9, %v7703_v22  ;;  %v10354_v22 = vld [vmem:[#allocation11 + $0xda0] sm:$0xff] }
 0x748   : > { %20883 = vmatprep.subr.bf16.mxu1 %v20882_v63  ;;  %v20742_v63 = vpack.c.bf16 %v8071_v7, %v8063_v46  ;;  %v10362_v9 = vld [vmem:[#allocation11 + $0xde0] sm:$0xff]  ;;  %v10714_v46 = vld [vmem:[#allocation11 + $0xe08] sm:$0xff] }
 0x749   : > { %20701 = vmatpush1.bf16.msra.mxu0 %v20700_v28  ;;  %v20916_v28 = vpack.c.bf16 %v9983_v52, %v9975_v26  ;;  %v10722_v7 = vld [vmem:[#allocation11 + $0xe48] sm:$0xff]  ;;  %v8441_v26 = vld [vmem:[#allocation11 + $0x810] sm:$0xff] }
 0x74a   : > { %20711 = vmatprep.subr.bf16.mxu0 %v20710_v30  ;;  %v20926_v30 = vpack.c.bf16 %v10343_v55, %v10335_v18  ;;  %v8449_v52 = vld [vmem:[#allocation11 + $0x850] sm:$0xff]  ;;  %v8458_v18 = vld [vmem:[#allocation11 + $0x898] sm:$0xff] }
 0x74b   : > { %20885 = vmatpush1.bf16.msra.mxu1 %v20884_v57  ;;  %v20744_v57 = vpack.c.bf16 %v8070_v41, %v8062_v14  ;;  %v8466_v55 = vld [vmem:[#allocation11 + $0x8d8] sm:$0xff]  ;;  %v10713_v14 = vld [vmem:[#allocation11 + $0xe00] sm:$0xff] }
 0x74c   : > { %18121 = vmatmul.mubr.msk.f32.vlgmr.msra.gmra.mrb[126].mxu0 %vm5438_vm4, %v23686_v24  ;;  %20895 = vmatprep.subr.bf16.mxu1 %v20894_v58  ;;  %v7704_v24 = vld [vmem:[#allocation11 + $0x6b8] sm:$0xff]  ;;  %v20746_v58 = vpack.c.bf16 %v8087_v31, %v8079_v6  ;;  %v10721_v41 = vld [vmem:[#allocation11 + $0xe40] sm:$0xff]  ;;  %v10730_v6 = vld [vmem:[#allocation11 + $0xe88] sm:$0xff] }
 0x74d   : > { %20713 = vmatpush1.bf16.msra.mxu0 %v20712_v48  ;;  %7851 = vmatprep.mubr.f32.mxu0 %v23773_v43  ;;  %v20730_v42 = vpack.c.bf16 %v7712_v44, %v7704_v24  ;;  %v20928_v48 = vpack.c.bf16 %v10342_v35, %v10334_v38  ;;  %v10363_v24 = vld [vmem:[#allocation11 + $0xde8] sm:$0xff]  ;;  %v8457_v38 = vld [vmem:[#allocation11 + $0x890] sm:$0xff] }
 0x74e   : > { %18144 = vmatmul.mubr.msk.f32.vlgmr.msra.gmra.mrb[106].mxu1 %vm5438_vm4, %v23785_v49  ;;  %20715 = vmatprep.subr.bf16.mxu0 %v20714_v21  ;;  %v20930_v21 = vpack.c.bf16 %v10359_v45, %v10351_v25  ;;  %v10738_v31 = vld [vmem:[#allocation11 + $0xec8] sm:$0xff]  ;;  %v8465_v35 = vld [vmem:[#allocation11 + $0x8d0] sm:$0xff]  ;;  %v8446_v25 = vld [vmem:[#allocation11 + $0x838] sm:$0xff] }
 0x74f   : > { %20897 = vmatpush1.bf16.msra.mxu1 %v20896_v4  ;;  %10054 = vmatprep.mubr.f32.mxu1 %v23773_v43  ;;  %v20748_v4 = vpack.c.bf16 %v8086_v47, %v8078_v40  ;;  %v8454_v45 = vld [vmem:[#allocation11 + $0x878] sm:$0xff]  ;;  %v10729_v40 = vld [vmem:[#allocation11 + $0xe80] sm:$0xff] }
 0x750   : > { %20899 = vmatprep.subr.bf16.mxu1 %v20898_v8  ;;  %v20758_v8 = vpack.c.bf16 %v8075_v60, %v8067_v51  ;;  %v10737_v47 = vld [vmem:[#allocation11 + $0xec0] sm:$0xff]  ;;  %v10718_v51 = vld [vmem:[#allocation11 + $0xe28] sm:$0xff] }
 0x751   : > { %20717 = vmatpush1.bf16.msra.mxu0 %v20716_v56  ;;  %v20932_v56 = vpack.c.bf16 %v10358_v50, %v10350_v59  ;;  %v10726_v60 = vld [vmem:[#allocation11 + $0xe68] sm:$0xff]  ;;  %v8445_v59 = vld [vmem:[#allocation11 + $0x830] sm:$0xff] }
 0x752   : > { %20727 = vmatprep.subr.bf16.mxu0 %v20726_v15  ;;  %v10338_v15 = vld [vmem:[#allocation11 + $0xd20] sm:$0xff]  ;;  %v8453_v50 = vld [vmem:[#allocation11 + $0x870] sm:$0xff]  ;;  %v20974_v5 = vpack.c.bf16 %v10726_v60, %v10718_v51  ;;  %v8841_v51 = vld [vmem:[#allocation11 + $0x9b8] sm:$0xff] }
 0x753   : > { %20901 = vmatpush1.bf16.msra.mxu1 %v20900_v3  ;;  %v10355_v3 = vld [vmem:[#allocation11 + $0xda8] sm:$0xff]  ;;  %v20944_v23 = vpack.c.bf16 %v10346_v16, %v10338_v15  ;;  %v20792_v32 = vpack.c.bf16 %v8453_v50, %v8445_v59  ;;  %v8469_v15 = vld [vmem:[#allocation11 + $0x8f0] sm:$0xff]  ;;  %v8849_v60 = vld [vmem:[#allocation11 + $0x9f8] sm:$0xff] }
 0x754   : > { %18123 = vmatmul.mubr.msk.f32.vlgmr.msra.gmra.mrb[128].mxu0 %vm5438_vm4, %v23701_v33  ;;  %20911 = vmatprep.subr.bf16.mxu1 %v20910_v10  ;;  %v8082_v10 = vld [vmem:[#allocation11 + $0x7b0] sm:$0xff]  ;;  %v11096_v59 = vld [vmem:[#allocation11 + $0xf20] sm:$0xff] }
 0x755   : > { %20729 = vmatpush1.bf16.msra.mxu0 %v20728_v34  ;;  %7993 = vmatprep.mubr.f32.mxu0 %v23773_v43  ;;  %v8442_v34 = vld [vmem:[#allocation11 + $0x818] sm:$0xff]  ;;  %v11104_v50 = vld [vmem:[#allocation11 + $0xf60] sm:$0xff] }
 0x756   : > { %18146 = vmatmul.mubr.msk.f32.vlgmr.msra.gmra.mrb[108].mxu1 %vm5438_vm4, %v23800_v62  ;;  %20731 = vmatprep.subr.bf16.mxu0 %v20730_v42  ;;  %v20946_v42 = vpack.c.bf16 %v10363_v24, %v10355_v3  ;;  %v8829_v3 = vld [vmem:[#allocation11 + $0x958] sm:$0xff]  ;;  %v23830_v24 = vrot.slane %v23736_v39, 6 }
 0x757   : > { %20913 = vmatpush1.bf16.msra.mxu1 %v20912_v36  ;;  %10196 = vmatprep.mubr.f32.mxu1 %v23773_v43  ;;  %v20764_v36 = vpack.c.bf16 %v8090_v1, %v8082_v10  ;;  %v10733_v10 = vld [vmem:[#allocation11 + $0xea0] sm:$0xff] }
 0x758   : > { %20915 = vmatprep.subr.bf16.mxu1 %v20914_v27  ;;  %v20774_v27 = vpack.c.bf16 %v8450_v12, %v8442_v34  ;;  %v10741_v1 = vld [vmem:[#allocation11 + $0xee0] sm:$0xff]  ;;  %v11093_v34 = vld [vmem:[#allocation11 + $0xf08] sm:$0xff] }
 0x759   : > { %20733 = vmatpush1.bf16.msra.mxu0 %v20732_v54  ;;  %v20948_v54 = vpack.c.bf16 %v10362_v9, %v10354_v22  ;;  %v11101_v12 = vld [vmem:[#allocation11 + $0xf48] sm:$0xff]  ;;  %v8820_v22 = vld [vmem:[#allocation11 + $0x910] sm:$0xff] }
 0x75a   : > { %20743 = vmatprep.subr.bf16.mxu0 %v20742_v63  ;;  %v20958_v63 = vpack.c.bf16 %v10722_v7, %v10714_v46  ;;  %v8828_v9 = vld [vmem:[#allocation11 + $0x950] sm:$0xff]  ;;  %v8837_v46 = vld [vmem:[#allocation11 + $0x998] sm:$0xff] }
 0x75b   : > { %20917 = vmatpush1.bf16.msra.mxu1 %v20916_v28  ;;  %v20776_v28 = vpack.c.bf16 %v8449_v52, %v8441_v26  ;;  %v8845_v7 = vld [vmem:[#allocation11 + $0x9d8] sm:$0xff]  ;;  %v11092_v26 = vld [vmem:[#allocation11 + $0xf00] sm:$0xff] }
 0x75c   : > { %18125 = vmatmul.mubr.msk.f32.vlgmr.msra.gmra.mrb[130].mxu0 %vm5438_vm4, %v23701_v33  ;;  %20927 = vmatprep.subr.bf16.mxu1 %v20926_v30  ;;  %v8083_v33 = vld [vmem:[#allocation11 + $0x7b8] sm:$0xff]  ;;  %v20778_v30 = vpack.c.bf16 %v8466_v55, %v8458_v18  ;;  %v11100_v52 = vld [vmem:[#allocation11 + $0xf40] sm:$0xff]  ;;  %v11109_v18 = vld [vmem:[#allocation11 + $0xf88] sm:$0xff] }
 0x75d   : > { %20745 = vmatpush1.bf16.msra.mxu0 %v20744_v57  ;;  %8230 = vmatprep.mubr.f32.mxu0 %v23773_v43  ;;  %v20762_v44 = vpack.c.bf16 %v8091_v11, %v8083_v33  ;;  %v20960_v57 = vpack.c.bf16 %v10721_v41, %v10713_v14  ;;  %v10742_v33 = vld [vmem:[#allocation11 + $0xee8] sm:$0xff]  ;;  %v8836_v14 = vld [vmem:[#allocation11 + $0x990] sm:$0xff] }
 0x75e   : > { %18148 = vmatmul.mubr.msk.f32.vlgmr.msra.gmra.mrb[110].mxu1 %vm5438_vm4, %v23800_v62  ;;  %20747 = vmatprep.subr.bf16.mxu0 %v20746_v58  ;;  %v20962_v58 = vpack.c.bf16 %v10738_v31, %v10730_v6  ;;  %v11117_v55 = vld [vmem:[#allocation11 + $0xfc8] sm:$0xff]  ;;  %v8844_v41 = vld [vmem:[#allocation11 + $0x9d0] sm:$0xff]  ;;  %v8825_v6 = vld [vmem:[#allocation11 + $0x938] sm:$0xff] }
 0x75f   : > { %20929 = vmatpush1.bf16.msra.mxu1 %v20928_v48  ;;  %10433 = vmatprep.mubr.f32.mxu1 %v23773_v43  ;;  %v20780_v48 = vpack.c.bf16 %v8465_v35, %v8457_v38  ;;  %v8833_v31 = vld [vmem:[#allocation11 + $0x978] sm:$0xff]  ;;  %v11108_v38 = vld [vmem:[#allocation11 + $0xf80] sm:$0xff] }
 0x760   : > { %20931 = vmatprep.subr.bf16.mxu1 %v20930_v21  ;;  %v20790_v21 = vpack.c.bf16 %v8454_v45, %v8446_v25  ;;  %v11116_v35 = vld [vmem:[#allocation11 + $0xfc0] sm:$0xff]  ;;  %v11097_v25 = vld [vmem:[#allocation11 + $0xf28] sm:$0xff] }
 0x761   : > { %20749 = vmatpush1.bf16.msra.mxu0 %v20748_v4  ;;  %v20964_v4 = vpack.c.bf16 %v10737_v47, %v10729_v40  ;;  %v11105_v45 = vld [vmem:[#allocation11 + $0xf68] sm:$0xff]  ;;  %v8824_v40 = vld [vmem:[#allocation11 + $0x930] sm:$0xff] }
 0x762   : > { %20759 = vmatprep.subr.bf16.mxu0 %v20758_v8  ;;  %v10717_v8 = vld [vmem:[#allocation11 + $0xe20] sm:$0xff]  ;;  %v8832_v47 = vld [vmem:[#allocation11 + $0x970] sm:$0xff] }
 0x763   : > { %20933 = vmatpush1.bf16.msra.mxu1 %v20932_v56  ;;  %v10734_v56 = vld [vmem:[#allocation11 + $0xea8] sm:$0xff]  ;;  %v20976_v16 = vpack.c.bf16 %v10725_v61, %v10717_v8  ;;  %v8840_v8 = vld [vmem:[#allocation11 + $0x9b0] sm:$0xff] }
 0x764   : > { %18127 = vmatmul.mubr.msk.f32.vlgmr.msra.gmra.mrb[132].mxu0 %vm5438_vm4, %v23719_v2  ;;  %20943 = vmatprep.subr.bf16.mxu1 %v20942_v37  ;;  %v8461_v37 = vld [vmem:[#allocation11 + $0x8b0] sm:$0xff] }
 0x765   : > { %20761 = vmatpush1.bf16.msra.mxu0 %v20760_v17  ;;  %8372 = vmatprep.mubr.f32.mxu0 %v23773_v43  ;;  %v8821_v17 = vld [vmem:[#allocation11 + $0x918] sm:$0xff]  ;;  %v8848_v61 = vld [vmem:[#allocation11 + $0x9f0] sm:$0xff] }
 0x766   : > { %18150 = vmatmul.mubr.msk.f32.vlgmr.msra.gmra.mrb[112].mxu1 %vm5438_vm4, %v23815_v53  ;;  %20763 = vmatprep.subr.bf16.mxu0 %v20762_v44  ;;  %v20978_v44 = vpack.c.bf16 %v10742_v33, %v10734_v56  ;;  %v9200_v56 = vld [vmem:[#allocation11 + $0xa18] sm:$0xff] }
 0x767   : > { %20945 = vmatpush1.bf16.msra.mxu1 %v20944_v23  ;;  %10575 = vmatprep.mubr.f32.mxu1 %v23773_v43  ;;  %v20796_v23 = vpack.c.bf16 %v8469_v15, %v8461_v37  ;;  %v9208_v33 = vld [vmem:[#allocation11 + $0xa58] sm:$0xff]  ;;  %v11112_v15 = vld [vmem:[#allocation11 + $0xfa0] sm:$0xff] }
 0x768   : > { %20947 = vmatprep.subr.bf16.mxu1 %v20946_v42  ;;  %v20806_v42 = vpack.c.bf16 %v8829_v3, %v8821_v17  ;;  %v20828_v17 = vpack.c.bf16 %v8848_v61, %v8840_v8  ;;  %v11472_v3 = vld [vmem:[#allocation11 + $0x1008] sm:$0xff]  ;;  %v11491_v8 = vld [vmem:[#allocation11 + $0x10a0] sm:$0xff] }
 0x769   : > { %20765 = vmatpush1.bf16.msra.mxu0 %v20764_v36  ;;  %v20980_v36 = vpack.c.bf16 %v10741_v1, %v10733_v10  ;;  %v20838_v10 = vpack.c.bf16 %v9208_v33, %v9200_v56  ;;  %v9199_v1 = vld [vmem:[#allocation11 + $0xa10] sm:$0xff]  ;;  %v11499_v61 = vld [vmem:[#allocation11 + $0x10e0] sm:$0xff]  ;;  %v11859_v56 = vld [vmem:[#allocation11 + $0x1148] sm:$0xff] }
 0x76a   : > { %20775 = vmatprep.subr.bf16.mxu0 %v20774_v27  ;;  %v20990_v27 = vpack.c.bf16 %v11101_v12, %v11093_v34  ;;  %v9216_v34 = vld [vmem:[#allocation11 + $0xa98] sm:$0xff] }
 0x76b   : > { %20949 = vmatpush1.bf16.msra.mxu1 %v20948_v54  ;;  %v20808_v54 = vpack.c.bf16 %v8828_v9, %v8820_v22  ;;  %v9224_v12 = vld [vmem:[#allocation11 + $0xad8] sm:$0xff]  ;;  %v11471_v22 = vld [vmem:[#allocation11 + $0x1000] sm:$0xff] }
 0x76c   : > { %18129 = vmatmul.mubr.msk.f32.vlgmr.msra.gmra.mrb[134].mxu0 %vm5438_vm4, %v23719_v2  ;;  %20959 = vmatprep.subr.bf16.mxu1 %v20958_v63  ;;  %v8462_v2 = vld [vmem:[#allocation11 + $0x8b8] sm:$0xff]  ;;  %v20810_v63 = vpack.c.bf16 %v8845_v7, %v8837_v46  ;;  %v11479_v9 = vld [vmem:[#allocation11 + $0x1040] sm:$0xff]  ;;  %v11488_v46 = vld [vmem:[#allocation11 + $0x1088] sm:$0xff] }
 0x76d   : > { %20777 = vmatpush1.bf16.msra.mxu0 %v20776_v28  ;;  %8609 = vmatprep.mubr.f32.mxu0 %v23773_v43  ;;  %v20794_v11 = vpack.c.bf16 %v8470_v0, %v8462_v2  ;;  %v20992_v28 = vpack.c.bf16 %v11100_v52, %v11092_v26  ;;  %v11113_v2 = vld [vmem:[#allocation11 + $0xfa8] sm:$0xff]  ;;  %v9215_v26 = vld [vmem:[#allocation11 + $0xa90] sm:$0xff] }
 0x76e   : > { %18152 = vmatmul.mubr.msk.f32.vlgmr.msra.gmra.mrb[114].mxu1 %vm5438_vm4, %v23815_v53  ;;  %20779 = vmatprep.subr.bf16.mxu0 %v20778_v30  ;;  %v20994_v30 = vpack.c.bf16 %v11117_v55, %v11109_v18  ;;  %v11121_v0 = vld [vmem:[#allocation11 + $0xfe8] sm:$0xff]  ;;  %v9223_v52 = vld [vmem:[#allocation11 + $0xad0] sm:$0xff]  ;;  %v9204_v18 = vld [vmem:[#allocation11 + $0xa38] sm:$0xff] }
 0x76f   : > { %20961 = vmatpush1.bf16.msra.mxu1 %v20960_v57  ;;  %10812 = vmatprep.mubr.f32.mxu1 %v23773_v43  ;;  %v20812_v57 = vpack.c.bf16 %v8844_v41, %v8836_v14  ;;  %v21010_v37 = vpack.c.bf16 %v11121_v0, %v11113_v2  ;;  %v11496_v7 = vld [vmem:[#allocation11 + $0x10c8] sm:$0xff]  ;;  %v9212_v55 = vld [vmem:[#allocation11 + $0xa78] sm:$0xff]  ;;  %v11487_v14 = vld [vmem:[#allocation11 + $0x1080] sm:$0xff] }
 0x770   : > { %20963 = vmatprep.subr.bf16.mxu1 %v20962_v58  ;;  %v20822_v58 = vpack.c.bf16 %v8833_v31, %v8825_v6  ;;  %v11495_v41 = vld [vmem:[#allocation11 + $0x10c0] sm:$0xff]  ;;  %v11476_v6 = vld [vmem:[#allocation11 + $0x1028] sm:$0xff]  ;;  %v9579_v2 = vld [vmem:[#allocation11 + $0xb18] sm:$0xff] }
 0x771   : > { %20781 = vmatpush1.bf16.msra.mxu0 %v20780_v48  ;;  %v20996_v48 = vpack.c.bf16 %v11116_v35, %v11108_v38  ;;  %v11484_v31 = vld [vmem:[#allocation11 + $0x1068] sm:$0xff]  ;;  %v9203_v38 = vld [vmem:[#allocation11 + $0xa30] sm:$0xff]  ;;  %v9587_v0 = vld [vmem:[#allocation11 + $0xb58] sm:$0xff] }
 0x772   : > { %20791 = vmatprep.subr.bf16.mxu0 %v20790_v21  ;;  %v21006_v21 = vpack.c.bf16 %v11105_v45, %v11097_v25  ;;  %v9211_v35 = vld [vmem:[#allocation11 + $0xa70] sm:$0xff]  ;;  %v9228_v25 = vld [vmem:[#allocation11 + $0xaf8] sm:$0xff]  ;;  %v21038_v45 = vpack.c.bf16 %v11484_v31, %v11476_v6  ;;  %v20870_v33 = vpack.c.bf16 %v9587_v0, %v9579_v2  ;;  %v11866_v31 = vld [vmem:[#allocation11 + $0x1180] sm:$0xff] }
 0x773   : > { %20965 = vmatpush1.bf16.msra.mxu1 %v20964_v4  ;;  %v20824_v4 = vpack.c.bf16 %v8832_v47, %v8824_v40  ;;  %v11483_v40 = vld [vmem:[#allocation11 + $0x1060] sm:$0xff]  ;;  %v20856_v47 = vpack.c.bf16 %v9211_v35, %v9203_v38  ;;  %v11855_v35 = vld [vmem:[#allocation11 + $0x1128] sm:$0xff] }
 0x774   : > { %18131 = vmatmul.mubr.msk.f32.vlgmr.msra.gmra.mrb[136].mxu0 %vm5438_vm4, %v23736_v39  ;;  %20975 = vmatprep.subr.bf16.mxu1 %v20974_v5  ;;  %v20826_v5 = vpack.c.bf16 %v8849_v60, %v8841_v51  ;;  %v11500_v51 = vld [vmem:[#allocation11 + $0x10e8] sm:$0xff]  ;;  %v23858_v60 = vmul.f32 0.015625, %v23733_v20 }
 0x775   : > { %20793 = vmatpush1.bf16.msra.mxu0 %v20792_v32  ;;  %8751 = vmatprep.mubr.f32.mxu0 %v23773_v43  ;;  %v21008_v32 = vpack.c.bf16 %v11104_v50, %v11096_v59  ;;  %v9219_v59 = vld [vmem:[#allocation11 + $0xab0] sm:$0xff]  ;;  %v11851_v20 = vld [vmem:[#allocation11 + $0x1108] sm:$0xff] }
 0x776   : > { %18154 = vmatmul.mubr.msk.f32.vlgmr.msra.gmra.mrb[116].mxu1 %vm5438_vm4, %v23830_v24  ;;  %20795 = vmatprep.subr.bf16.mxu0 %v20794_v11  ;;  %v23845_v11 = vrot.slane %v23736_v39, 7  ;;  %v9227_v50 = vld [vmem:[#allocation11 + $0xaf0] sm:$0xff] }
 0x777   : > { %20977 = vmatpush1.bf16.msra.mxu1 %v20976_v16  ;;  %10954 = vmatprep.mubr.f32.mxu1 %v23773_v43  ;;  %v11120_v16 = vld [vmem:[#allocation11 + $0xfe0] sm:$0xff] }
 0x778   : > { %20979 = vmatprep.subr.bf16.mxu1 %v20978_v44  ;;  %v11480_v44 = vld [vmem:[#allocation11 + $0x1048] sm:$0xff] }
 0x779   : > { %20797 = vmatpush1.bf16.msra.mxu0 %v20796_v23  ;;  %v9207_v23 = vld [vmem:[#allocation11 + $0xa50] sm:$0xff] }
 0x77a   : > { %20807 = vmatprep.subr.bf16.mxu0 %v20806_v42  ;;  %v21022_v42 = vpack.c.bf16 %v11480_v44, %v11472_v3  ;;  %v5741_v44 = vlaneseq }
 0x77b   : > { %20981 = vmatpush1.bf16.msra.mxu1 %v20980_v36  ;;  %v20840_v36 = vpack.c.bf16 %v9207_v23, %v9199_v1  ;;  %v9595_v1 = vld [vmem:[#allocation11 + $0xb98] sm:$0xff] }
 0x77c   : > { %18133 = vmatmul.mubr.msk.f32.vlgmr.msra.gmra.mrb[138].mxu0 %vm5438_vm4, %v23736_v39  ;;  %20991 = vmatprep.subr.bf16.mxu1 %v20990_v27  ;;  %v21012_v39 = vpack.c.bf16 %v11120_v16, %v11112_v15  ;;  %v20842_v27 = vpack.c.bf16 %v9224_v12, %v9216_v34  ;;  %v9586_v15 = vld [vmem:[#allocation11 + $0xb50] sm:$0xff]  ;;  %v9603_v23 = vld [vmem:[#allocation11 + $0xbd8] sm:$0xff]  ;;  %v21054_v34 = vpack.c.bf16 %v11859_v56, %v11851_v20  ;;  %v11850_v12 = vld [vmem:[#allocation11 + $0x1100] sm:$0xff] }
 0x77d   : > { %20809 = vmatpush1.bf16.msra.mxu0 %v20808_v54  ;;  %8988 = vmatprep.mubr.f32.mxu0 %v23773_v43  ;;  %v21024_v54 = vpack.c.bf16 %v11479_v9, %v11471_v22  ;;  %v9598_v20 = vld [vmem:[#allocation11 + $0xbb0] sm:$0xff] }
 0x77e   : > { %18156 = vmatmul.mubr.msk.f32.vlgmr.msra.gmra.mrb[118].mxu1 %vm5438_vm4, %v23830_v24  ;;  %20811 = vmatprep.subr.bf16.mxu0 %v20810_v63  ;;  %v21026_v63 = vpack.c.bf16 %v11496_v7, %v11488_v46  ;;  %v11867_v46 = vld [vmem:[#allocation11 + $0x1188] sm:$0xff] }
 0x77f   : > { %20993 = vmatpush1.bf16.msra.mxu1 %v20992_v28  ;;  %11191 = vmatprep.mubr.f32.mxu1 %v23773_v43  ;;  %v20844_v28 = vpack.c.bf16 %v9223_v52, %v9215_v26  ;;  %v11875_v7 = vld [vmem:[#allocation11 + $0x11c8] sm:$0xff]  ;;  %v20874_v26 = vpack.c.bf16 %v9603_v23, %v9595_v1  ;;  %v9594_v52 = vld [vmem:[#allocation11 + $0xb90] sm:$0xff]  ;;  %v11878_v1 = vld [vmem:[#allocation11 + $0x11e0] sm:$0xff] }
 0x780   : > { %20995 = vmatprep.subr.bf16.mxu1 %v20994_v30  ;;  %v20854_v30 = vpack.c.bf16 %v9212_v55, %v9204_v18  ;;  %v5742_v55 = vshrl.u32 %v5741_v44, 7  ;;  %v21058_v6 = vpack.c.bf16 %v11875_v7, %v11867_v46  ;;  %v9965_v46 = vld [vmem:[#allocation11 + $0xc50] sm:$0xff] }
 0x781   : > { %20813 = vmatpush1.bf16.msra.mxu0 %v20812_v57  ;;  %v21028_v57 = vpack.c.bf16 %v11495_v41, %v11487_v14  ;;  %v9583_v41 = vld [vmem:[#allocation11 + $0xb38] sm:$0xff] }
 0x782   : > { %20823 = vmatprep.subr.bf16.mxu0 %v20822_v58  ;;  %v11475_v58 = vld [vmem:[#allocation11 + $0x1020] sm:$0xff] }
 0x783   : > { %20997 = vmatpush1.bf16.msra.mxu1 %v20996_v48  ;;  %v11492_v48 = vld [vmem:[#allocation11 + $0x10a8] sm:$0xff] }
 0x784   : > { %18135 = vmatmul.mubr.msk.f32.vlgmr.msra.gmra.mrb[140].mxu0 %vm5438_vm4, %v23753_v29  ;;  %21007 = vmatprep.subr.bf16.mxu1 %v21006_v21 }
 0x785   : > { %20825 = vmatpush1.bf16.msra.mxu0 %v20824_v4  ;;  %9130 = vmatprep.mubr.f32.mxu0 %v23773_v43  ;;  %v21040_v4 = vpack.c.bf16 %v11483_v40, %v11475_v58 }
 0x786   : > { %18158 = vmatmul.mubr.msk.f32.vlgmr.msra.gmra.mrb[120].mxu1 %vm5438_vm4, %v23845_v11  ;;  %20827 = vmatprep.subr.bf16.mxu0 %v20826_v5  ;;  %v21042_v5 = vpack.c.bf16 %v11500_v51, %v11492_v48  ;;  %v9607_v48 = vld [vmem:[#allocation11 + $0xbf8] sm:$0xff] }
 0x787   : > { %21009 = vmatpush1.bf16.msra.mxu1 %v21008_v32  ;;  %11333 = vmatprep.mubr.f32.mxu1 %v23773_v43  ;;  %v20860_v32 = vpack.c.bf16 %v9227_v50, %v9219_v59  ;;  %v11854_v59 = vld [vmem:[#allocation11 + $0x1120] sm:$0xff] }
 0x788   : > { %21011 = vmatprep.subr.bf16.mxu1 %v21010_v37  ;;  %v9578_v37 = vld [vmem:[#allocation11 + $0xb10] sm:$0xff]  ;;  %v11862_v50 = vld [vmem:[#allocation11 + $0x1160] sm:$0xff] }
 0x789   : > { %20829 = vmatpush1.bf16.msra.mxu0 %v20828_v17  ;;  %v21965_v17 = vmov 1966171168  }
 0x78a   : > { %20839 = vmatprep.subr.bf16.mxu0 %v20838_v10  ;;  %v5739_v3 = vunpack.c.l.s4 %v21965_v17  ;;  %v21044_v10 = vpack.c.bf16 %v11499_v61, %v11491_v8  ;;  %v11879_v8 = vld [vmem:[#allocation11 + $0x11e8] sm:$0xff]  ;;  %v9966_v17 = vld [vmem:[#allocation11 + $0xc58] sm:$0xff] }
 0x78b   : > { %21013 = vmatpush1.bf16.msra.mxu1 %v21012_v39 }
 0x78c   : > { %18137 = vmatmul.mubr.msk.f32.vlgmr.msra.gmra.mrb[142].mxu0 %vm5438_vm4, %v23753_v29  ;;  %21023 = vmatprep.subr.bf16.mxu1 %v21022_v42  ;;  %v9220_v29 = vld [vmem:[#allocation11 + $0xab8] sm:$0xff]  ;;  %v11858_v42 = vld [vmem:[#allocation11 + $0x1140] sm:$0xff]  ;;  %v5740_v18 = vunpack.c.0.s8 %v5739_v3  ;;  %v23898_v3 = vrot.slane %v23858_v60, 1 }
 0x78d   : > { %20841 = vmatpush1.bf16.msra.mxu0 %v20840_v36  ;;  %9367 = vmatprep.mubr.f32.mxu0 %v23773_v43  ;;  %v20858_v21 = vpack.c.bf16 %v9228_v25, %v9220_v29  ;;  %v20872_v36 = vpack.c.bf16 %v9586_v15, %v9578_v37  ;;  %v21056_v14 = vpack.c.bf16 %v11858_v42, %v11850_v12  ;;  %v9582_v25 = vld [vmem:[#allocation11 + $0xb30] sm:$0xff]  ;;  %v12230_v12 = vld [vmem:[#allocation11 + $0x1208] sm:$0xff] }
 0x78e   : > { %18160 = vmatmul.mubr.msk.f32.vlgmr.msra.gmra.mrb[122].mxu1 %vm5438_vm4, %v23845_v11  ;;  %20843 = vmatprep.subr.bf16.mxu0 %v20842_v27  ;;  %v23880_v58 = vsub.s32 %v5740_v18, %v5742_v55  ;;  %v21072_v15 = vpack.c.bf16 %v11862_v50, %v11854_v59  ;;  %v12238_v42 = vld [vmem:[#allocation11 + $0x1248] sm:$0xff]  ;;  %v11876_v37 = vld [vmem:[#allocation11 + $0x11d0] sm:$0xff] }
 0x78f   : > { %21025 = vmatpush1.bf16.msra.mxu1 %v21024_v54  ;;  %11570 = vmatprep.mubr.f32.mxu1 %v23773_v43  ;;  %v9602_v54 = vld [vmem:[#allocation11 + $0xbd0] sm:$0xff]  ;;  %v21086_v55 = vpack.c.bf16 %v12238_v42, %v12230_v12  ;;  %v12234_v50 = vld [vmem:[#allocation11 + $0x1228] sm:$0xff] }
 0x790   : > { %21027 = vmatprep.subr.bf16.mxu1 %v21026_v63  ;;  %v20876_v38 = vpack.c.bf16 %v9602_v54, %v9594_v52  ;;  %v9974_v52 = vld [vmem:[#allocation11 + $0xc98] sm:$0xff]  ;;  %v12250_v12 = vld [vmem:[#allocation11 + $0x12a8] sm:$0xff] }
 0x791   : > { %20845 = vmatpush1.bf16.msra.mxu0 %v20844_v28  ;;  %v9591_v28 = vld [vmem:[#allocation11 + $0xb78] sm:$0xff]  ;;  %v12258_v42 = vld [vmem:[#allocation11 + $0x12e8] sm:$0xff] }
 0x792   : > { %20855 = vmatprep.subr.bf16.mxu0 %v20854_v30  ;;  %v11874_v30 = vld [vmem:[#allocation11 + $0x11c0] sm:$0xff]  ;;  %v20886_v29 = vpack.c.bf16 %v9591_v28, %v9583_v41  ;;  %v9982_v54 = vld [vmem:[#allocation11 + $0xcd8] sm:$0xff] }
 0x793   : > { %21029 = vmatpush1.bf16.msra.mxu1 %v21028_v57  ;;  %v11863_v57 = vld [vmem:[#allocation11 + $0x1168] sm:$0xff]  ;;  %v21060_v40 = vpack.c.bf16 %v11874_v30, %v11866_v31  ;;  %v12237_v41 = vld [vmem:[#allocation11 + $0x1240] sm:$0xff] }
 0x794   : > { %18139 = vmatmul.mubr.msk.f32.vlgmr.msra.gmra.mrb[144].mxu0 %vm5438_vm4, %v23768_v13  ;;  %21039 = vmatprep.subr.bf16.mxu1 %v21038_v45  ;;  %v9590_v45 = vld [vmem:[#allocation11 + $0xb70] sm:$0xff]  ;;  %v12246_v30 = vld [vmem:[#allocation11 + $0x1288] sm:$0xff] }
 0x795   : > { %20857 = vmatpush1.bf16.msra.mxu0 %v20856_v47  ;;  %9509 = vmatprep.mubr.f32.mxu0 %v23773_v43  ;;  %v9599_v47 = vld [vmem:[#allocation11 + $0xbb8] sm:$0xff]  ;;  %v20888_v0 = vpack.c.bf16 %v9590_v45, %v9582_v25  ;;  %v9981_v25 = vld [vmem:[#allocation11 + $0xcd0] sm:$0xff] }
 0x796   : > { %18162 = vmatmul.mubr.msk.f32.vlgmr.msra.gmra.mrb[124].mxu1 %vm5438_vm4, %v23858_v60  ;;  %20859 = vmatprep.subr.bf16.mxu0 %v20858_v21  ;;  %v21070_v21 = vpack.c.bf16 %v11863_v57, %v11855_v35  ;;  %v20906_v57 = vpack.c.bf16 %v9982_v54, %v9974_v52 }
 0x797   : > { %21041 = vmatpush1.bf16.msra.mxu1 %v21040_v4  ;;  %v23865_v16 = vpop.f32.mrb[92].mxu0  ;;  %11712 = vmatprep.mubr.f32.mxu1 %v23773_v43 }
 0x798   : > { %v5510_v39 = vpop.f32.mrb[93].mxu0  ;;  %21043 = vmatprep.subr.bf16.mxu1 %v21042_v5  ;;  %v11871_v5 = vld [vmem:[#allocation11 + $0x11a8] sm:$0xff] }
 0x799   : > { %v5734_v22 = vcombine.low %v23865_v16, %v5510_v39  ;;  %20861 = vmatpush1.bf16.msra.mxu0 %v20860_v32  ;;  %v23869_v9 = vpop.f32.mrb[72].mxu1  ;;  %v20890_v32 = vpack.c.bf16 %v9607_v48, %v9599_v47  ;;  %v9958_v16 = vld [vmem:[#allocation11 + $0xc18] sm:$0xff]  ;;  %v21074_v44 = vpack.c.bf16 %v11879_v8, %v11871_v5  ;;  %v9961_v5 = vld [vmem:[#allocation11 + $0xc30] sm:$0xff] }
 0x79a   : > { %v23871_v27 = vpop.f32.mrb[73].mxu1  ;;  %20871 = vmatprep.subr.bf16.mxu0 %v20870_v33  ;;  %v9970_v47 = vld [vmem:[#allocation11 + $0xc78] sm:$0xff]  ;;  %v9969_v8 = vld [vmem:[#allocation11 + $0xc70] sm:$0xff] }
 0x79b   : > { %v6871_v63 = vcombine.low %v23869_v9, %v23871_v27  ;;  %21045 = vmatpush1.bf16.msra.mxu1 %v21044_v10  ;;  %v23888_v56 = vrot.slane %v5734_v22, %v23880_v58  ;;  %v11870_v10 = vld [vmem:[#allocation11 + $0x11a0] sm:$0xff]  ;;  %v20902_v22 = vpack.c.bf16 %v9966_v17, %v9958_v16 }
 0x79c   : > { %18141 = vmatmul.mubr.msk.f32.vlgmr.msra.gmra.mrb[146].mxu0 %vm5438_vm4, %v23768_v13  ;;  %21055 = vmatprep.subr.bf16.mxu1 %v21054_v34  ;;  %v23902_v34 = vld [vmem:[#allocation2] sm:$0xff] }
 0x79d   : > { %20873 = vmatpush1.bf16.msra.mxu0 %v20872_v36  ;;  %9746 = vmatprep.mubr.f32.mxu0 %v23773_v43  ;;  %v9957_v36 = vld [vmem:[#allocation11 + $0xc10] sm:$0xff]  ;;  %v12233_v17 = vld [vmem:[#allocation11 + $0x1220] sm:$0xff] }
 0x79e   : > { %18164 = vmatmul.mubr.msk.f32.vlgmr.msra.gmra.mrb[126].mxu1 %vm5438_vm4, %v23858_v60  ;;  %20875 = vmatprep.subr.bf16.mxu0 %v20874_v26  ;;  %v21076_v26 = vpack.c.bf16 %v11878_v1, %v11870_v10  ;;  %v20904_v31 = vpack.c.bf16 %v9965_v46, %v9957_v36  ;;  %v9977_v46 = vld [vmem:[#allocation11 + $0xcb0] sm:$0xff]  ;;  %v14140_v9 = vld [vmem:[#allocation11 + $0x1780] sm:$0xff] }
 0x79f   : > { %v5579_v13 = vpop.f32.mrb[94].mxu0  ;;  %21057 = vmatpush1.bf16.msra.mxu1 %v21056_v14  ;;  %11949 = vmatprep.mubr.f32.mxu1 %v23773_v43  ;;  %v9606_v43 = vld [vmem:[#allocation11 + $0xbf0] sm:$0xff]  ;;  %v12229_v14 = vld [vmem:[#allocation11 + $0x1200] sm:$0xff] }
 0x7a0   : > { %v5581_v51 = vpop.f32.mrb[95].mxu0  ;;  %21059 = vmatprep.subr.bf16.mxu1 %v21058_v6  ;;  %v20892_v39 = vpack.c.bf16 %v9606_v43, %v9598_v20  ;;  %v9978_v20 = vld [vmem:[#allocation11 + $0xcb8] sm:$0xff]  ;;  %v14148_v27 = vld [vmem:[#allocation11 + $0x17c0] sm:$0xff] }
 0x7a1   : > { %v5735_v4 = vcombine.low %v5579_v13, %v5581_v51  ;;  %v23883_v2 = vpop.f32.mrb[74].mxu1  ;;  %20877 = vmatpush1.bf16.msra.mxu0 %v20876_v38  ;;  %v12254_v38 = vld [vmem:[#allocation11 + $0x12c8] sm:$0xff]  ;;  %v21088_v13 = vpack.c.bf16 %v12237_v41, %v12229_v14  ;;  %v12245_v51 = vld [vmem:[#allocation11 + $0x1280] sm:$0xff]  ;;  %v9986_v43 = vld [vmem:[#allocation11 + $0xcf8] sm:$0xff]  ;;  %v23934_v41 = vrot.slane %v23858_v60, 2 }
 0x7a2   : > { %v23885_v61 = vpop.f32.mrb[75].mxu1  ;;  %20887 = vmatprep.subr.bf16.mxu0 %v20886_v29  ;;  %v9973_v29 = vld [vmem:[#allocation11 + $0xc90] sm:$0xff]  ;;  %v21090_v48 = vpack.c.bf16 %v12254_v38, %v12246_v30  ;;  %v20922_v36 = vpack.c.bf16 %v9986_v43, %v9978_v20  ;;  %v10345_v14 = vld [vmem:[#allocation11 + $0xd58] sm:$0xff]  ;;  %v12249_v30 = vld [vmem:[#allocation11 + $0x12a0] sm:$0xff] }
 0x7a3   : > { %v23891_v33 = vrot.slane %v5735_v4, %v23880_v58  ;;  %21061 = vmatpush1.bf16.msra.mxu1 %v21060_v40  ;;  %v9962_v40 = vld [vmem:[#allocation11 + $0xc38] sm:$0xff]  ;;  %v20908_v59 = vpack.c.bf16 %v9981_v25, %v9973_v29  ;;  %v12242_v4 = vld [vmem:[#allocation11 + $0x1268] sm:$0xff]  ;;  %v12257_v38 = vld [vmem:[#allocation11 + $0x12e0] sm:$0xff] }
 0x7a4   : > { %18143 = vmatmul.mubr.msk.f32.vlgmr.msra.gmra.mrb[148].mxu0 %vm5438_vm4, %v23785_v49  ;;  %21071 = vmatprep.subr.bf16.mxu1 %v21070_v21  ;;  %v12253_v21 = vld [vmem:[#allocation11 + $0x12c0] sm:$0xff]  ;;  %v21102_v16 = vpack.c.bf16 %v12242_v4, %v12234_v50  ;;  %v12609_v29 = vld [vmem:[#allocation11 + $0x1308] sm:$0xff]  ;;  %v10353_v50 = vld [vmem:[#allocation11 + $0xd98] sm:$0xff] }
 0x7a5   : > { %v5766_v23 = vcombine.low %v23888_v56, %v23891_v33  ;;  %20889 = vmatpush1.bf16.msra.mxu0 %v20888_v0  ;;  %9888 = vmatprep.mubr.f32.mxu0 %v23902_v34  ;;  %v20918_v0 = vpack.c.bf16 %v9970_v47, %v9962_v40  ;;  %v12617_v25 = vld [vmem:[#allocation11 + $0x1348] sm:$0xff]  ;;  %v10336_v40 = vld [vmem:[#allocation11 + $0xd10] sm:$0xff]  ;;  %v10361_v4 = vld [vmem:[#allocation11 + $0xdd8] sm:$0xff] }
 0x7a6   : > { %18166 = vmatmul.mubr.msk.f32.vlgmr.msra.gmra.mrb[128].mxu1 %vm5438_vm4, %v23898_v3  ;;  %20891 = vmatprep.subr.bf16.mxu0 %v20890_v32  ;;  %v10344_v47 = vld [vmem:[#allocation11 + $0xd50] sm:$0xff]  ;;  %v12625_v20 = vld [vmem:[#allocation11 + $0x1388] sm:$0xff] }
 0x7a7   : > { %v23907_v7 = vpop.f32.mrb[96].mxu0  ;;  %21073 = vmatpush1.bf16.msra.mxu1 %v21072_v15  ;;  %12091 = vmatprep.mubr.f32.mxu1 %v23902_v34  ;;  %v12633_v43 = vld [vmem:[#allocation11 + $0x13c8] sm:$0xff] }
 0x7a8   : > { %v5652_v18 = vpop.f32.mrb[97].mxu0  ;;  %21075 = vmatprep.subr.bf16.mxu1 %v21074_v44  ;;  %v12241_v44 = vld [vmem:[#allocation11 + $0x1260] sm:$0xff] }
 0x7a9   : > { %v5736_v28 = vcombine.low %v23907_v7, %v5652_v18  ;;  %v23911_v6 = vpop.f32.mrb[76].mxu1  ;;  %20893 = vmatpush1.bf16.msra.mxu0 %v20892_v39  ;;  %v20920_v39 = vpack.c.bf16 %v9969_v8, %v9961_v5  ;;  %v9985_v7 = vld [vmem:[#allocation11 + $0xcf0] sm:$0xff]  ;;  %v21104_v18 = vpack.c.bf16 %v12241_v44, %v12233_v17  ;;  %v21118_v5 = vpack.c.bf16 %v12617_v25, %v12609_v29  ;;  %v12608_v8 = vld [vmem:[#allocation11 + $0x1300] sm:$0xff] }
 0x7aa   : > { %v23913_v35 = vpop.f32.mrb[77].mxu1  ;;  %20903 = vmatprep.subr.bf16.mxu0 %v20902_v22  ;;  %v10352_v17 = vld [vmem:[#allocation11 + $0xd90] sm:$0xff]  ;;  %v12612_v25 = vld [vmem:[#allocation11 + $0x1320] sm:$0xff] }
 0x7ab   : > { %21077 = vmatpush1.bf16.msra.mxu1 %v21076_v26  ;;  %v5758_v26 = vrot.slane %v5736_v28, %v23880_v58  ;;  %v10360_v44 = vld [vmem:[#allocation11 + $0xdd0] sm:$0xff] }
 0x7ac   : > { %18145 = vmatmul.mubr.msk.f32.vlgmr.msra.gmra.mrb[150].mxu0 %vm5438_vm4, %v23785_v49  ;;  %21087 = vmatprep.subr.bf16.mxu1 %v21086_v55  ;;  %v21092_v49 = vpack.c.bf16 %v12253_v21, %v12245_v51  ;;  %v10337_v55 = vld [vmem:[#allocation11 + $0xd18] sm:$0xff] }
 0x7ad   : > { %20905 = vmatpush1.bf16.msra.mxu0 %v20904_v31  ;;  %10125 = vmatprep.mubr.f32.mxu0 %v23902_v34  ;;  %v21106_v31 = vpack.c.bf16 %v12258_v42, %v12250_v12  ;;  %v10341_v12 = vld [vmem:[#allocation11 + $0xd38] sm:$0xff] }
 0x7ae   : > { %18168 = vmatmul.mubr.msk.f32.vlgmr.msra.gmra.mrb[130].mxu1 %vm5438_vm4, %v23898_v3  ;;  %20907 = vmatprep.subr.bf16.mxu0 %v20906_v57  ;;  %v20924_v57 = vpack.c.bf16 %v9985_v7, %v9977_v46  ;;  %v10349_v42 = vld [vmem:[#allocation11 + $0xd78] sm:$0xff]  ;;  %v12624_v46 = vld [vmem:[#allocation11 + $0x1380] sm:$0xff] }
 0x7af   : > { %v5721_v32 = vpop.f32.mrb[98].mxu0  ;;  %21089 = vmatpush1.bf16.msra.mxu1 %v21088_v13  ;;  %12328 = vmatprep.mubr.f32.mxu1 %v23902_v34  ;;  %v20934_v13 = vpack.c.bf16 %v10345_v14, %v10337_v55  ;;  %v12632_v7 = vld [vmem:[#allocation11 + $0x13c0] sm:$0xff]  ;;  %v20950_v55 = vpack.c.bf16 %v10349_v42, %v10341_v12  ;;  %v10340_v14 = vld [vmem:[#allocation11 + $0xd30] sm:$0xff] }
 0x7b0   : > { %v5723_v15 = vpop.f32.mrb[99].mxu0  ;;  %21091 = vmatprep.subr.bf16.mxu1 %v21090_v48  ;;  %v23943_v48 = vrot.slane %v5766_v23, %v23880_v58  ;;  %v12636_v12 = vld [vmem:[#allocation11 + $0x13e0] sm:$0xff] }
 0x7b1   : > { %v5737_v10 = vcombine.low %v5721_v32, %v5723_v15  ;;  %v23923_v1 = vpop.f32.mrb[78].mxu1  ;;  %20909 = vmatpush1.bf16.msra.mxu0 %v20908_v59  ;;  %v21108_v59 = vpack.c.bf16 %v12257_v38, %v12249_v30  ;;  %v12616_v32 = vld [vmem:[#allocation11 + $0x1340] sm:$0xff]  ;;  %v10357_v38 = vld [vmem:[#allocation11 + $0xdb8] sm:$0xff] }
 0x7b2   : > { %v23925_v22 = vpop.f32.mrb[79].mxu1  ;;  %20919 = vmatprep.subr.bf16.mxu0 %v20918_v0 }
 0x7b3   : > { %v5765_v52 = vrot.slane %v5737_v10, %v23880_v58  ;;  %21093 = vmatpush1.bf16.msra.mxu1 %v21092_v49  ;;  %v20936_v49 = vpack.c.bf16 %v10344_v47, %v10336_v40 }
 0x7b4   : > { %18147 = vmatmul.mubr.msk.f32.vlgmr.msra.gmra.mrb[152].mxu0 %vm5438_vm4, %v23800_v62  ;;  %21103 = vmatprep.subr.bf16.mxu1 %v21102_v16  ;;  %v20938_v16 = vpack.c.bf16 %v10361_v4, %v10353_v50  ;;  %v12637_v50 = vld [vmem:[#allocation11 + $0x13e8] sm:$0xff] }
 0x7b5   : > { %v5767_v28 = vcombine.low %v5758_v26, %v5765_v52  ;;  %20921 = vmatpush1.bf16.msra.mxu0 %v20920_v39  ;;  %10267 = vmatprep.mubr.f32.mxu0 %v23902_v34  ;;  %v21120_v39 = vpack.c.bf16 %v12616_v32, %v12608_v8  ;;  %v20940_v26 = vpack.c.bf16 %v10360_v44, %v10352_v17  ;;  %v12613_v52 = vld [vmem:[#allocation11 + $0x1328] sm:$0xff]  ;;  %v10364_v8 = vld [vmem:[#allocation11 + $0xdf0] sm:$0xff]  ;;  %v10724_v17 = vld [vmem:[#allocation11 + $0xe58] sm:$0xff]  ;;  %v23981_v44 = vrot.slane %v23858_v60, 3 }
 0x7b6   : > { %18170 = vmatmul.mubr.msk.f32.vlgmr.msra.gmra.mrb[132].mxu1 %vm5438_vm4, %v23934_v41  ;;  %20923 = vmatprep.subr.bf16.mxu0 %v20922_v36  ;;  %v21122_v36 = vpack.c.bf16 %v12633_v43, %v12625_v20  ;;  %v11486_v20 = vld [vmem:[#allocation11 + $0x1078] sm:$0xff] }
 0x7b7   : > { %v23946_v51 = vrot.slane %v5767_v28, %v23880_v58  ;;  %v23948_v21 = vpop.f32.mrb[100].mxu0  ;;  %21105 = vmatpush1.bf16.msra.mxu1 %v21104_v18  ;;  %12470 = vmatprep.mubr.f32.mxu1 %v23902_v34  ;;  %v12621_v18 = vld [vmem:[#allocation11 + $0x1368] sm:$0xff]  ;;  %v10365_v28 = vld [vmem:[#allocation11 + $0xdf8] sm:$0xff] }
 0x7b8   : > { %v5889_v0 = vpop.f32.mrb[101].mxu0  ;;  %21107 = vmatprep.subr.bf16.mxu1 %v21106_v31  ;;  %v10348_v31 = vld [vmem:[#allocation11 + $0xd70] sm:$0xff]  ;;  %v21134_v29 = vpack.c.bf16 %v12621_v18, %v12613_v52 }
 0x7b9   : > { %v5782_v56 = vcombine.low %v23943_v48, %v23946_v51  ;;  %v6113_v33 = vcombine.low %v23948_v21, %v5889_v0  ;;  %v23954_v23 = vpop.f32.mrb[80].mxu1  ;;  %20925 = vmatpush1.bf16.msra.mxu0 %v20924_v57  ;;  %v20952_v21 = vpack.c.bf16 %v10348_v31, %v10340_v14  ;;  %v20954_v0 = vpack.c.bf16 %v10365_v28, %v10357_v38  ;;  %v10715_v52 = vld [vmem:[#allocation11 + $0xe10] sm:$0xff]  ;;  %v10732_v31 = vld [vmem:[#allocation11 + $0xe98] sm:$0xff]  ;;  %v12987_v28 = vld [vmem:[#allocation11 + $0x1400] sm:$0xff] }
 0x7ba   : > { %v23956_v15 = vpop.f32.mrb[81].mxu1  ;;  %20935 = vmatprep.subr.bf16.mxu0 %v20934_v13  ;;  %v12620_v13 = vld [vmem:[#allocation11 + $0x1360] sm:$0xff]  ;;  %v10723_v18 = vld [vmem:[#allocation11 + $0xe50] sm:$0xff] }
 0x7bb   : > { %21109 = vmatpush1.bf16.msra.mxu1 %v21108_v59  ;;  %v12629_v59 = vld [vmem:[#allocation11 + $0x13a8] sm:$0xff]  ;;  %v23971_v32 = vrot.slane %v6113_v33, %v23880_v58  ;;  %v21136_v43 = vpack.c.bf16 %v12620_v13, %v12612_v25  ;;  %v12628_v33 = vld [vmem:[#allocation11 + $0x13a0] sm:$0xff]  ;;  %v20968_v13 = vpack.c.bf16 %v10723_v18, %v10715_v52  ;;  %v10719_v52 = vld [vmem:[#allocation11 + $0xe30] sm:$0xff] }
 0x7bc   : > { %18149 = vmatmul.mubr.msk.f32.vlgmr.msra.gmra.mrb[154].mxu0 %vm5438_vm4, %v23800_v62  ;;  %21119 = vmatprep.subr.bf16.mxu1 %v21118_v5  ;;  %v21124_v62 = vpack.c.bf16 %v12632_v7, %v12624_v46  ;;  %v10356_v5 = vld [vmem:[#allocation11 + $0xdb0] sm:$0xff]  ;;  %v12988_v46 = vld [vmem:[#allocation11 + $0x1408] sm:$0xff]  ;;  %v21140_v14 = vpack.c.bf16 %v12636_v12, %v12628_v33  ;;  %v13003_v33 = vld [vmem:[#allocation11 + $0x1480] sm:$0xff] }
 0x7bd   : > { %20937 = vmatpush1.bf16.msra.mxu0 %v20936_v49  ;;  %10504 = vmatprep.mubr.f32.mxu0 %v23902_v34  ;;  %v12996_v7 = vld [vmem:[#allocation11 + $0x1448] sm:$0xff]  ;;  %v13011_v12 = vld [vmem:[#allocation11 + $0x14c0] sm:$0xff]  ;;  %v10727_v18 = vld [vmem:[#allocation11 + $0xe70] sm:$0xff] }
 0x7be   : > { %18172 = vmatmul.mubr.msk.f32.vlgmr.msra.gmra.mrb[134].mxu1 %vm5438_vm4, %v23934_v41  ;;  %20939 = vmatprep.subr.bf16.mxu0 %v20938_v16  ;;  %v10716_v16 = vld [vmem:[#allocation11 + $0xe18] sm:$0xff]  ;;  %v21150_v38 = vpack.c.bf16 %v12996_v7, %v12988_v46  ;;  %v12992_v46 = vld [vmem:[#allocation11 + $0x1428] sm:$0xff] }
 0x7bf   : > { %v5958_v30 = vpop.f32.mrb[102].mxu0  ;;  %21121 = vmatpush1.bf16.msra.mxu1 %v21120_v39  ;;  %12707 = vmatprep.mubr.f32.mxu1 %v23902_v34  ;;  %v21138_v39 = vpack.c.bf16 %v12637_v50, %v12629_v59  ;;  %v13000_v7 = vld [vmem:[#allocation11 + $0x1468] sm:$0xff] }
 0x7c0   : > { %v5960_v57 = vpop.f32.mrb[103].mxu0  ;;  %21123 = vmatprep.subr.bf16.mxu1 %v21122_v36  ;;  %v20956_v36 = vpack.c.bf16 %v10364_v8, %v10356_v5  ;;  %v10739_v5 = vld [vmem:[#allocation11 + $0xed0] sm:$0xff] }
 0x7c1   : > { %v6114_v40 = vcombine.low %v5958_v30, %v5960_v57  ;;  %v23966_v47 = vpop.f32.mrb[82].mxu1  ;;  %20941 = vmatpush1.bf16.msra.mxu0 %v20940_v26  ;;  %v20966_v26 = vpack.c.bf16 %v10724_v17, %v10716_v16  ;;  %v10740_v30 = vld [vmem:[#allocation11 + $0xed8] sm:$0xff]  ;;  %v12995_v57 = vld [vmem:[#allocation11 + $0x1440] sm:$0xff] }
 0x7c2   : > { %v23968_v4 = vpop.f32.mrb[83].mxu1  ;;  %20951 = vmatprep.subr.bf16.mxu0 %v20950_v55  ;;  %v20970_v50 = vpack.c.bf16 %v10740_v30, %v10732_v31  ;;  %v10720_v16 = vld [vmem:[#allocation11 + $0xe38] sm:$0xff] }
 0x7c3   : > { %v23974_v49 = vrot.slane %v6114_v40, %v23880_v58  ;;  %21125 = vmatpush1.bf16.msra.mxu1 %v21124_v62  ;;  %v13004_v40 = vld [vmem:[#allocation11 + $0x1488] sm:$0xff]  ;;  %v10728_v17 = vld [vmem:[#allocation11 + $0xe78] sm:$0xff] }
 0x7c4   : > { %18151 = vmatmul.mubr.msk.f32.vlgmr.msra.gmra.mrb[156].mxu0 %vm5438_vm4, %v23815_v53  ;;  %21135 = vmatprep.subr.bf16.mxu1 %v21134_v29  ;;  %v10744_v31 = vld [vmem:[#allocation11 + $0xef8] sm:$0xff] }
 0x7c5   : > { %v6145_v42 = vcombine.low %v23971_v32, %v23974_v49  ;;  %20953 = vmatpush1.bf16.msra.mxu0 %v20952_v21  ;;  %10646 = vmatprep.mubr.f32.mxu0 %v23902_v34  ;;  %v13012_v21 = vld [vmem:[#allocation11 + $0x14c8] sm:$0xff] }
 0x7c6   : > { %18174 = vmatmul.mubr.msk.f32.vlgmr.msra.gmra.mrb[136].mxu1 %vm5438_vm4, %v23981_v44  ;;  %20955 = vmatprep.subr.bf16.mxu0 %v20954_v0  ;;  %v10731_v0 = vld [vmem:[#allocation11 + $0xe90] sm:$0xff] }
 0x7c7   : > { %v23988_v55 = vpop.f32.mrb[104].mxu0  ;;  %21137 = vmatpush1.bf16.msra.mxu1 %v21136_v43  ;;  %12849 = vmatprep.mubr.f32.mxu1 %v23902_v34  ;;  %v21152_v43 = vpack.c.bf16 %v12995_v57, %v12987_v28  ;;  %v12999_v28 = vld [vmem:[#allocation11 + $0x1460] sm:$0xff] }
 0x7c8   : > { %v6031_v62 = vpop.f32.mrb[105].mxu0  ;;  %21139 = vmatprep.subr.bf16.mxu1 %v21138_v39  ;;  %v21154_v39 = vpack.c.bf16 %v13012_v21, %v13004_v40  ;;  %v20984_v40 = vpack.c.bf16 %v10727_v18, %v10719_v52  ;;  %v13008_v21 = vld [vmem:[#allocation11 + $0x14a8] sm:$0xff]  ;;  %v13007_v52 = vld [vmem:[#allocation11 + $0x14a0] sm:$0xff] }
 0x7c9   : > { %v6115_v29 = vcombine.low %v23988_v55, %v6031_v62  ;;  %v23992_v25 = vpop.f32.mrb[84].mxu1  ;;  %20957 = vmatpush1.bf16.msra.mxu0 %v20956_v36  ;;  %v20972_v36 = vpack.c.bf16 %v10739_v5, %v10731_v0  ;;  %v21166_v62 = vpack.c.bf16 %v13000_v7, %v12992_v46  ;;  %v11095_v46 = vld [vmem:[#allocation11 + $0xf18] sm:$0xff]  ;;  %v24015_v7 = vrot.slane %v23858_v60, 4  ;;  %v13015_v18 = vld [vmem:[#allocation11 + $0x14e0] sm:$0xff] }
 0x7ca   : > { %v23994_v59 = vpop.f32.mrb[85].mxu1  ;;  %20967 = vmatprep.subr.bf16.mxu0 %v20966_v26  ;;  %v20982_v26 = vpack.c.bf16 %v10728_v17, %v10720_v16  ;;  %v10743_v16 = vld [vmem:[#allocation11 + $0xef0] sm:$0xff] }
 0x7cb   : > { %21141 = vmatpush1.bf16.msra.mxu1 %v21140_v14  ;;  %v10736_v14 = vld [vmem:[#allocation11 + $0xeb8] sm:$0xff]  ;;  %v6137_v17 = vrot.slane %v6115_v29, %v23880_v58 }
 0x7cc   : > { %18153 = vmatmul.mubr.msk.f32.vlgmr.msra.gmra.mrb[158].mxu0 %vm5438_vm4, %v23815_v53  ;;  %21151 = vmatprep.subr.bf16.mxu1 %v21150_v38  ;;  %v21156_v53 = vpack.c.bf16 %v13011_v12, %v13003_v33  ;;  %v12991_v38 = vld [vmem:[#allocation11 + $0x1420] sm:$0xff]  ;;  %v20986_v5 = vpack.c.bf16 %v10744_v31, %v10736_v14  ;;  %v13367_v14 = vld [vmem:[#allocation11 + $0x1508] sm:$0xff] }
 0x7cd   : > { %20969 = vmatpush1.bf16.msra.mxu0 %v20968_v13  ;;  %10883 = vmatprep.mubr.f32.mxu0 %v23902_v34  ;;  %v21168_v12 = vpack.c.bf16 %v12999_v28, %v12991_v38  ;;  %v5405_v31 = vld [vmem:[#allocation12] sm:$0xff]  ;;  %v11094_v38 = vld [vmem:[#allocation11 + $0xf10] sm:$0xff] }
 0x7ce   : > { %18176 = vmatmul.mubr.msk.f32.vlgmr.msra.gmra.mrb[138].mxu1 %vm5438_vm4, %v23981_v44  ;;  %20971 = vmatprep.subr.bf16.mxu0 %v20970_v50  ;;  %v13016_v50 = vld [vmem:[#allocation11 + $0x14e8] sm:$0xff]  ;;  %v11102_v28 = vld [vmem:[#allocation11 + $0xf50] sm:$0xff]  ;;  %v5784_v32 = vadd.f32 %v5782_v56, %v5405_v31  ;;  %v11099_v56 = vld [vmem:[#allocation11 + $0xf38] sm:$0xff] }
 0x7cf   : > { %v6100_v55 = vpop.f32.mrb[106].mxu0  ;;  %21153 = vmatpush1.bf16.msra.mxu1 %v21152_v43  ;;  %13086 = vmatprep.mubr.f32.mxu1 %v23902_v34  ;;  %v10735_v43 = vld [vmem:[#allocation11 + $0xeb0] sm:$0xff]  ;;  %v11107_v31 = vld [vmem:[#allocation11 + $0xf78] sm:$0xff] }
 0x7d0   : > { %v6102_v30 = vpop.f32.mrb[107].mxu0  ;;  %21155 = vmatprep.subr.bf16.mxu1 %v21154_v39 }
 0x7d1   : > { %v6116_v57 = vcombine.low %v6100_v55, %v6102_v30  ;;  %v24004_v13 = vpop.f32.mrb[86].mxu1  ;;  %20973 = vmatpush1.bf16.msra.mxu0 %v20972_v36  ;;  %v11103_v36 = vld [vmem:[#allocation11 + $0xf58] sm:$0xff]  ;;  %v20988_v55 = vpack.c.bf16 %v10743_v16, %v10735_v43 }
 0x7d2   : > { %v24006_v0 = vpop.f32.mrb[87].mxu1  ;;  %20983 = vmatprep.subr.bf16.mxu0 %v20982_v26  ;;  %v21170_v26 = vpack.c.bf16 %v13016_v50, %v13008_v21  ;;  %v20998_v30 = vpack.c.bf16 %v11103_v36, %v11095_v46  ;;  %v21172_v21 = vpack.c.bf16 %v13015_v18, %v13007_v52  ;;  %v11111_v50 = vld [vmem:[#allocation11 + $0xf98] sm:$0xff]  ;;  %v13383_v36 = vld [vmem:[#allocation11 + $0x1588] sm:$0xff] }
 0x7d3   : > { %v6144_v39 = vrot.slane %v6116_v57, %v23880_v58  ;;  %21157 = vmatpush1.bf16.msra.mxu1 %v21156_v53  ;;  %v13375_v53 = vld [vmem:[#allocation11 + $0x1548] sm:$0xff]  ;;  %v11119_v43 = vld [vmem:[#allocation11 + $0xfd8] sm:$0xff] }
 0x7d4   : > { %18155 = vmatmul.mubr.msk.f32.vlgmr.msra.gmra.mrb[160].mxu0 %vm5438_vm4, %v23830_v24  ;;  %21167 = vmatprep.subr.bf16.mxu1 %v21166_v62  ;;  %v6153_v62 = vrot.slane %v6145_v42, %v23880_v58  ;;  %v13391_v52 = vld [vmem:[#allocation11 + $0x15c8] sm:$0xff] }
 0x7d5   : > { %v6146_v29 = vcombine.low %v6137_v17, %v6144_v39  ;;  %20985 = vmatpush1.bf16.msra.mxu0 %v20984_v40  ;;  %11025 = vmatprep.mubr.f32.mxu0 %v23902_v34  ;;  %v13366_v17 = vld [vmem:[#allocation11 + $0x1500] sm:$0xff] }
 0x7d6   : > { %18178 = vmatmul.mubr.msk.f32.vlgmr.msra.gmra.mrb[140].mxu1 %vm5438_vm4, %v24015_v7  ;;  %20987 = vmatprep.subr.bf16.mxu0 %v20986_v5  ;;  %v21182_v5 = vpack.c.bf16 %v13375_v53, %v13367_v14  ;;  %v13374_v39 = vld [vmem:[#allocation11 + $0x1540] sm:$0xff]  ;;  %v11118_v14 = vld [vmem:[#allocation11 + $0xfd0] sm:$0xff] }
 0x7d7   : > { %v6160_v57 = vrot.slane %v6146_v29, %v23880_v58  ;;  %v24025_v40 = vpop.f32.mrb[108].mxu0  ;;  %21169 = vmatpush1.bf16.msra.mxu1 %v21168_v12  ;;  %13228 = vmatprep.mubr.f32.mxu1 %v23902_v34  ;;  %v21000_v12 = vpack.c.bf16 %v11102_v28, %v11094_v38  ;;  %v11110_v29 = vld [vmem:[#allocation11 + $0xf90] sm:$0xff]  ;;  %v21184_v51 = vpack.c.bf16 %v13374_v39, %v13366_v17  ;;  %v13382_v38 = vld [vmem:[#allocation11 + $0x1580] sm:$0xff] }
 0x7d8   : > { %v6268_v16 = vpop.f32.mrb[109].mxu0  ;;  %21171 = vmatprep.subr.bf16.mxu1 %v21170_v26  ;;  %v21002_v26 = vpack.c.bf16 %v11119_v43, %v11111_v50  ;;  %v13390_v28 = vld [vmem:[#allocation11 + $0x15c0] sm:$0xff]  ;;  %v11106_v50 = vld [vmem:[#allocation11 + $0xf70] sm:$0xff] }
 0x7d9   : > { %v6161_v49 = vcombine.low %v6153_v62, %v6160_v57  ;;  %v6492_v42 = vcombine.low %v24025_v40, %v6268_v16  ;;  %v24032_v46 = vpop.f32.mrb[88].mxu1  ;;  %20989 = vmatpush1.bf16.msra.mxu0 %v20988_v55  ;;  %v21186_v55 = vpack.c.bf16 %v13391_v52, %v13383_v36  ;;  %v13371_v62 = vld [vmem:[#allocation11 + $0x1528] sm:$0xff]  ;;  %v21014_v40 = vpack.c.bf16 %v11107_v31, %v11099_v56  ;;  %v11115_v16 = vld [vmem:[#allocation11 + $0xfb8] sm:$0xff]  ;;  %v11114_v56 = vld [vmem:[#allocation11 + $0xfb0] sm:$0xff] }
 0x7da   : > { %v24034_v18 = vpop.f32.mrb[89].mxu1  ;;  %20999 = vmatprep.subr.bf16.mxu0 %v20998_v30  ;;  %v21004_v30 = vpack.c.bf16 %v11118_v14, %v11110_v29  ;;  %v13379_v57 = vld [vmem:[#allocation11 + $0x1568] sm:$0xff]  ;;  %v11122_v31 = vld [vmem:[#allocation11 + $0xff0] sm:$0xff] }
 0x7db   : > { %v24036_v53 = vadd.f32 %v6161_v49, %v5784_v32  ;;  %21173 = vmatpush1.bf16.msra.mxu1 %v21172_v21  ;;  %v11098_v21 = vld [vmem:[#allocation11 + $0xf30] sm:$0xff]  ;;  %v21198_v39 = vpack.c.bf16 %v13379_v57, %v13371_v62  ;;  %v13370_v32 = vld [vmem:[#allocation11 + $0x1520] sm:$0xff]  ;;  %v13395_v29 = vld [vmem:[#allocation11 + $0x15e8] sm:$0xff] }
 0x7dc   : > { %18157 = vmatmul.mubr.msk.f32.vlgmr.msra.gmra.mrb[162].mxu0 %vm5438_vm4, %v23830_v24  ;;  %21183 = vmatprep.subr.bf16.mxu1 %v21182_v5  ;;  %v21188_v24 = vpack.c.bf16 %v13390_v28, %v13382_v38  ;;  %v11123_v5 = vld [vmem:[#allocation11 + $0xff8] sm:$0xff]  ;;  %v13378_v49 = vld [vmem:[#allocation11 + $0x1560] sm:$0xff]  ;;  %v21016_v52 = vpack.c.bf16 %v11106_v50, %v11098_v21  ;;  %v24051_v38 = vrot.slane %v6492_v42, %v23880_v58 }
 0x7dd   : > { %21001 = vmatpush1.bf16.msra.mxu0 %v21000_v12  ;;  %11262 = vmatprep.mubr.f32.mxu0 %v23902_v34  ;;  %v11474_v62 = vld [vmem:[#allocation11 + $0x1018] sm:$0xff]  ;;  %v13386_v42 = vld [vmem:[#allocation11 + $0x15a0] sm:$0xff] }
 0x7de   : > { %18180 = vmatmul.mubr.msk.f32.vlgmr.msra.gmra.mrb[142].mxu1 %vm5438_vm4, %v24015_v7  ;;  %21003 = vmatprep.subr.bf16.mxu0 %v21002_v26  ;;  %v13387_v26 = vld [vmem:[#allocation11 + $0x15a8] sm:$0xff]  ;;  %v11482_v57 = vld [vmem:[#allocation11 + $0x1058] sm:$0xff]  ;;  %v13394_v50 = vld [vmem:[#allocation11 + $0x15e0] sm:$0xff] }
 0x7df   : > { %v6337_v43 = vpop.f32.mrb[110].mxu0  ;;  %21185 = vmatpush1.bf16.msra.mxu1 %v21184_v51  ;;  %13465 = vmatprep.mubr.f32.mxu1 %v23902_v34  ;;  %v21018_v51 = vpack.c.bf16 %v11123_v5, %v11115_v16  ;;  %v21202_v21 = vpack.c.bf16 %v13395_v29, %v13387_v26  ;;  %v21020_v16 = vpack.c.bf16 %v11122_v31, %v11114_v56  ;;  %v13754_v5 = vld [vmem:[#allocation11 + $0x1648] sm:$0xff]  ;;  %v11490_v26 = vld [vmem:[#allocation11 + $0x1098] sm:$0xff]  ;;  %v13745_v31 = vld [vmem:[#allocation11 + $0x1600] sm:$0xff] }
 0x7e0   : > { %v6339_v17 = vpop.f32.mrb[111].mxu0  ;;  %21187 = vmatprep.subr.bf16.mxu1 %v21186_v55  ;;  %v13753_v28 = vld [vmem:[#allocation11 + $0x1640] sm:$0xff] }
 0x7e1   : > { %v6493_v12 = vcombine.low %v6337_v43, %v6339_v17  ;;  %v24046_v36 = vpop.f32.mrb[90].mxu1  ;;  %21005 = vmatpush1.bf16.msra.mxu0 %v21004_v30  ;;  %v21200_v30 = vpack.c.bf16 %v13378_v49, %v13370_v32  ;;  %v21030_v17 = vpack.c.bf16 %v11482_v57, %v11474_v62  ;;  %v11473_v32 = vld [vmem:[#allocation11 + $0x1010] sm:$0xff]  ;;  %v13762_v62 = vld [vmem:[#allocation11 + $0x1688] sm:$0xff] }
 0x7e2   : > { %v24048_v14 = vpop.f32.mrb[91].mxu1  ;;  %21015 = vmatprep.subr.bf16.mxu0 %v21014_v40  ;;  %v24061_v40 = vrot.slane %v23858_v60, 5  ;;  %v11481_v49 = vld [vmem:[#allocation11 + $0x1050] sm:$0xff]  ;;  %v13770_v57 = vld [vmem:[#allocation11 + $0x16c8] sm:$0xff] }
 0x7e3   : > { %v24054_v55 = vrot.slane %v6493_v12, %v23880_v58  ;;  %21189 = vmatpush1.bf16.msra.mxu1 %v21188_v24  ;;  %v13746_v24 = vld [vmem:[#allocation11 + $0x1608] sm:$0xff]  ;;  %v21204_v12 = vpack.c.bf16 %v13394_v50, %v13386_v42  ;;  %v11489_v42 = vld [vmem:[#allocation11 + $0x1090] sm:$0xff] }
 0x7e4   : > { %18159 = vmatmul.mubr.msk.f32.vlgmr.msra.gmra.mrb[164].mxu0 %vm5438_vm4, %v23845_v11  ;;  %21199 = vmatprep.subr.bf16.mxu1 %v21198_v39  ;;  %v21214_v56 = vpack.c.bf16 %v13754_v5, %v13746_v24  ;;  %v11497_v50 = vld [vmem:[#allocation11 + $0x10d0] sm:$0xff]  ;;  %v21216_v24 = vpack.c.bf16 %v13753_v28, %v13745_v31  ;;  %v11478_v5 = vld [vmem:[#allocation11 + $0x1038] sm:$0xff] }
 0x7e5   : > { %v6524_v43 = vcombine.low %v24051_v38, %v24054_v55  ;;  %21017 = vmatpush1.bf16.msra.mxu0 %v21016_v52  ;;  %11404 = vmatprep.mubr.f32.mxu0 %v23902_v34  ;;  %v11498_v52 = vld [vmem:[#allocation11 + $0x10d8] sm:$0xff]  ;;  %v21046_v28 = vpack.c.bf16 %v11486_v20, %v11478_v5  ;;  %v13766_v20 = vld [vmem:[#allocation11 + $0x16a8] sm:$0xff] }
 0x7e6   : > { %18182 = vmatmul.mubr.msk.f32.vlgmr.msra.gmra.mrb[144].mxu1 %vm5438_vm4, %v24061_v40  ;;  %21019 = vmatprep.subr.bf16.mxu0 %v21018_v51  ;;  %v21032_v51 = vpack.c.bf16 %v11481_v49, %v11473_v32  ;;  %v13761_v32 = vld [vmem:[#allocation11 + $0x1680] sm:$0xff]  ;;  %v11502_v31 = vld [vmem:[#allocation11 + $0x10f8] sm:$0xff]  ;;  %v13774_v5 = vld [vmem:[#allocation11 + $0x16e8] sm:$0xff] }
 0x7e7   : > { %v24068_v39 = vpop.f32.mrb[112].mxu0  ;;  %21201 = vmatpush1.bf16.msra.mxu1 %v21200_v30  ;;  %13607 = vmatprep.mubr.f32.mxu1 %v23902_v34  ;;  %v21034_v30 = vpack.c.bf16 %v11498_v52, %v11490_v26  ;;  %v13769_v49 = vld [vmem:[#allocation11 + $0x16c0] sm:$0xff]  ;;  %v13758_v26 = vld [vmem:[#allocation11 + $0x1668] sm:$0xff]  ;;  %v11485_v52 = vld [vmem:[#allocation11 + $0x1070] sm:$0xff] }
 0x7e8   : > { %v6410_v29 = vpop.f32.mrb[113].mxu0  ;;  %21203 = vmatprep.subr.bf16.mxu1 %v21202_v21  ;;  %v14141_v55 = vld [vmem:[#allocation11 + $0x1788] sm:$0xff] }
 0x7e9   : > { %v6494_v48 = vcombine.low %v24068_v39, %v6410_v29  ;;  %v24072_v33 = vpop.f32.mrb[92].mxu1  ;;  %21021 = vmatpush1.bf16.msra.mxu0 %v21020_v16  ;;  %v21218_v16 = vpack.c.bf16 %v13770_v57, %v13762_v62  ;;  %v21036_v39 = vpack.c.bf16 %v11497_v50, %v11489_v42  ;;  %v13749_v57 = vld [vmem:[#allocation11 + $0x1620] sm:$0xff] }
 0x7ea   : > { %v24074_v8 = vpop.f32.mrb[93].mxu1  ;;  %21031 = vmatprep.subr.bf16.mxu0 %v21030_v17  ;;  %v13750_v17 = vld [vmem:[#allocation11 + $0x1628] sm:$0xff]  ;;  %v13757_v42 = vld [vmem:[#allocation11 + $0x1660] sm:$0xff] }
 0x7eb   : > { %21205 = vmatpush1.bf16.msra.mxu1 %v21204_v12  ;;  %v11477_v12 = vld [vmem:[#allocation11 + $0x1030] sm:$0xff]  ;;  %v21230_v62 = vpack.c.bf16 %v13758_v26, %v13750_v17  ;;  %v6516_v54 = vrot.slane %v6494_v48, %v23880_v58  ;;  %v21232_v26 = vpack.c.bf16 %v13757_v42, %v13749_v57  ;;  %v14124_v17 = vld [vmem:[#allocation11 + $0x1700] sm:$0xff] }
 0x7ec   : > { %18161 = vmatmul.mubr.msk.f32.vlgmr.msra.gmra.mrb[166].mxu0 %vm5438_vm4, %v23845_v11  ;;  %21215 = vmatprep.subr.bf16.mxu1 %v21214_v56  ;;  %v21220_v11 = vpack.c.bf16 %v13769_v49, %v13761_v32  ;;  %v11494_v56 = vld [vmem:[#allocation11 + $0x10b8] sm:$0xff]  ;;  %v11493_v32 = vld [vmem:[#allocation11 + $0x10b0] sm:$0xff] }
 0x7ed   : > { %21033 = vmatpush1.bf16.msra.mxu0 %v21032_v51  ;;  %11641 = vmatprep.mubr.f32.mxu0 %v23902_v34  ;;  %v11501_v49 = vld [vmem:[#allocation11 + $0x10f0] sm:$0xff] }
 0x7ee   : > { %18184 = vmatmul.mubr.msk.f32.vlgmr.msra.gmra.mrb[146].mxu1 %vm5438_vm4, %v24061_v40  ;;  %21035 = vmatprep.subr.bf16.mxu0 %v21034_v30  ;;  %v21048_v30 = vpack.c.bf16 %v11485_v52, %v11477_v12  ;;  %v24095_v12 = vrot.slane %v23858_v60, 6  ;;  %v13765_v52 = vld [vmem:[#allocation11 + $0x16a0] sm:$0xff]  ;;  %v11852_v42 = vld [vmem:[#allocation11 + $0x1110] sm:$0xff] }
 0x7ef   : > { %v6479_v29 = vpop.f32.mrb[114].mxu0  ;;  %21217 = vmatpush1.bf16.msra.mxu1 %v21216_v24  ;;  %13844 = vmatprep.mubr.f32.mxu1 %v23902_v34  ;;  %v21050_v24 = vpack.c.bf16 %v11502_v31, %v11494_v56  ;;  %v13773_v56 = vld [vmem:[#allocation11 + $0x16e0] sm:$0xff]  ;;  %v21052_v31 = vpack.c.bf16 %v11501_v49, %v11493_v32  ;;  %v11869_v32 = vld [vmem:[#allocation11 + $0x1198] sm:$0xff] }
 0x7f0   : > { %v6481_v51 = vpop.f32.mrb[115].mxu0  ;;  %21219 = vmatprep.subr.bf16.mxu1 %v21218_v16  ;;  %v11877_v49 = vld [vmem:[#allocation11 + $0x11d8] sm:$0xff] }
 0x7f1   : > { %v6495_v50 = vcombine.low %v6479_v29, %v6481_v51  ;;  %v24084_v21 = vpop.f32.mrb[94].mxu1  ;;  %21037 = vmatpush1.bf16.msra.mxu0 %v21036_v39  ;;  %v11853_v29 = vld [vmem:[#allocation11 + $0x1118] sm:$0xff]  ;;  %v14125_v51 = vld [vmem:[#allocation11 + $0x1708] sm:$0xff] }
 0x7f2   : > { %v24086_v10 = vpop.f32.mrb[95].mxu1  ;;  %21047 = vmatprep.subr.bf16.mxu0 %v21046_v28  ;;  %v11861_v39 = vld [vmem:[#allocation11 + $0x1158] sm:$0xff]  ;;  %v21234_v28 = vpack.c.bf16 %v13774_v5, %v13766_v20  ;;  %v21236_v20 = vpack.c.bf16 %v13773_v56, %v13765_v52  ;;  %v14132_v5 = vld [vmem:[#allocation11 + $0x1740] sm:$0xff]  ;;  %v21066_v52 = vpack.c.bf16 %v11877_v49, %v11869_v32  ;;  %v11868_v56 = vld [vmem:[#allocation11 + $0x1190] sm:$0xff]  ;;  %v21252_v32 = vpack.c.bf16 %v14148_v27, %v14140_v9 }
 0x7f3   : > { %v6523_v16 = vrot.slane %v6495_v50, %v23880_v58  ;;  %21221 = vmatpush1.bf16.msra.mxu1 %v21220_v11  ;;  %v14133_v11 = vld [vmem:[#allocation11 + $0x1748] sm:$0xff]  ;;  %v21062_v57 = vpack.c.bf16 %v11861_v39, %v11853_v29  ;;  %v11860_v50 = vld [vmem:[#allocation11 + $0x1150] sm:$0xff]  ;;  %v11873_v49 = vld [vmem:[#allocation11 + $0x11b8] sm:$0xff] }
 0x7f4   : > { %18163 = vmatmul.mubr.msk.f32.vlgmr.msra.gmra.mrb[168].mxu0 %vm5438_vm4, %v23858_v60  ;;  %21231 = vmatprep.subr.bf16.mxu1 %v21230_v62  ;;  %v6532_v62 = vrot.slane %v6524_v43, %v23880_v58  ;;  %v21064_v38 = vpack.c.bf16 %v11860_v50, %v11852_v42  ;;  %v14149_v43 = vld [vmem:[#allocation11 + $0x17c8] sm:$0xff]  ;;  %v12255_v9 = vld [vmem:[#allocation11 + $0x12d0] sm:$0xff] }
 0x7f5   : > { %v6525_v48 = vcombine.low %v6516_v54, %v6523_v16  ;;  %21049 = vmatpush1.bf16.msra.mxu0 %v21048_v30  ;;  %11783 = vmatprep.mubr.f32.mxu0 %v23902_v34  ;;  %v21246_v16 = vpack.c.bf16 %v14133_v11, %v14125_v51  ;;  %v21250_v42 = vpack.c.bf16 %v14149_v43, %v14141_v55  ;;  %v14129_v50 = vld [vmem:[#allocation11 + $0x1728] sm:$0xff] }
 0x7f6   : > { %18186 = vmatmul.mubr.msk.f32.vlgmr.msra.gmra.mrb[148].mxu1 %vm5438_vm4, %v24095_v12  ;;  %21051 = vmatprep.subr.bf16.mxu0 %v21050_v24 }
 0x7f7   : > { %v6539_v54 = vrot.slane %v6525_v48, %v23880_v58  ;;  %v6716_v30 = vpop.f32.mrb[116].mxu0  ;;  %21233 = vmatpush1.bf16.msra.mxu1 %v21232_v26  ;;  %13986 = vmatprep.mubr.f32.mxu1 %v23902_v34  ;;  %v21248_v26 = vpack.c.bf16 %v14132_v5, %v14124_v17  ;;  %v11857_v17 = vld [vmem:[#allocation11 + $0x1138] sm:$0xff] }
 0x7f8   : > { %v6718_v24 = vpop.f32.mrb[117].mxu0  ;;  %21235 = vmatprep.subr.bf16.mxu1 %v21234_v28  ;;  %v24114_v28 = vrot.slane %v6871_v63, %v23880_v58 }
 0x7f9   : > { %v6540_v29 = vcombine.low %v6532_v62, %v6539_v54  ;;  %v6872_v39 = vcombine.low %v6716_v30, %v6718_v24  ;;  %v24106_v45 = vpop.f32.mrb[96].mxu1  ;;  %21053 = vmatpush1.bf16.msra.mxu0 %v21052_v31  ;;  %v14137_v62 = vld [vmem:[#allocation11 + $0x1768] sm:$0xff]  ;;  %v11856_v30 = vld [vmem:[#allocation11 + $0x1130] sm:$0xff]  ;;  %v11881_v24 = vld [vmem:[#allocation11 + $0x11f8] sm:$0xff] }
 0x7fa   : > { %v24108_v48 = vpop.f32.mrb[97].mxu1  ;;  %21063 = vmatprep.subr.bf16.mxu0 %v21062_v57  ;;  %v11865_v57 = vld [vmem:[#allocation11 + $0x1178] sm:$0xff] }
 0x7fb   : > { %v24117_v51 = vadd.f32 %v6540_v29, %v24036_v53  ;;  %v24120_v31 = vrot.slane %v6872_v39, %v23880_v58  ;;  %v9145_v11 = vcombine.low %v24106_v45, %v24108_v48  ;;  %21237 = vmatpush1.bf16.msra.mxu1 %v21236_v20  ;;  %v21068_v53 = vpack.c.bf16 %v11876_v37, %v11868_v56  ;;  %v11864_v20 = vld [vmem:[#allocation11 + $0x1170] sm:$0xff]  ;;  %v14128_v29 = vld [vmem:[#allocation11 + $0x1720] sm:$0xff]  ;;  %v14153_v56 = vld [vmem:[#allocation11 + $0x17e8] sm:$0xff] }
 0x7fc   : > { %18165 = vmatmul.mubr.msk.f32.vlgmr.msra.gmra.mrb[170].mxu0 %vm5438_vm4, %v23858_v60  ;;  %21247 = vmatprep.subr.bf16.mxu1 %v21246_v16  ;;  %v21078_v54 = vpack.c.bf16 %v11865_v57, %v11857_v17  ;;  %v21262_v37 = vpack.c.bf16 %v14137_v62, %v14129_v50  ;;  %v14136_v39 = vld [vmem:[#allocation11 + $0x1760] sm:$0xff]  ;;  %v21080_v43 = vpack.c.bf16 %v11864_v20, %v11856_v30  ;;  %v12240_v50 = vld [vmem:[#allocation11 + $0x1258] sm:$0xff]  ;;  %v24146_v62 = vrot.slane %v23858_v60, 7  ;;  %v12231_v60 = vld [vmem:[#allocation11 + $0x1210] sm:$0xff] }
 0x7fd   : > { %v6903_v63 = vcombine.low %v24114_v28, %v24120_v31  ;;  %21065 = vmatpush1.bf16.msra.mxu0 %v21064_v38  ;;  %12020 = vmatprep.mubr.f32.mxu0 %v23902_v34  ;;  %v11872_v31 = vld [vmem:[#allocation11 + $0x11b0] sm:$0xff]  ;;  %v25019_v17 = vcombine.low %v23883_v2, %v23885_v61  ;;  %v21264_v27 = vpack.c.bf16 %v14136_v39, %v14128_v29  ;;  %v14144_v30 = vld [vmem:[#allocation11 + $0x17a0] sm:$0xff] }
 0x7fe   : > { %18188 = vmatmul.mubr.msk.f32.vlgmr.msra.gmra.mrb[150].mxu1 %vm5438_vm4, %v24095_v12  ;;  %21067 = vmatprep.subr.bf16.mxu0 %v21066_v52  ;;  %v14145_v52 = vld [vmem:[#allocation11 + $0x17a8] sm:$0xff]  ;;  %v14152_v2 = vld [vmem:[#allocation11 + $0x17e0] sm:$0xff] }
 0x7ff   : > { %v6858_v5 = vpop.f32.mrb[118].mxu0  ;;  %21249 = vmatpush1.bf16.msra.mxu1 %v21248_v26  ;;  %14223 = vmatprep.mubr.f32.mxu1 %v23902_v34  ;;  %v21082_v26 = vpack.c.bf16 %v11881_v24, %v11873_v49  ;;  %v11880_v34 = vld [vmem:[#allocation11 + $0x11f0] sm:$0xff]  ;;  %v6895_v57 = vrot.slane %v25019_v17, %v23880_v58  ;;  %v14512_v49 = vld [vmem:[#allocation11 + $0x1848] sm:$0xff]  ;;  %v6911_v29 = vrot.slane %v6903_v63, %v23880_v58  ;;  %v16414_v45 = vld [vmem:[#allocation11 + $0x1d80] sm:$0xff] }
 0x800   : > { %v6860_v16 = vpop.f32.mrb[119].mxu0  ;;  %21251 = vmatprep.subr.bf16.mxu1 %v21250_v42  ;;  %v21084_v20 = vpack.c.bf16 %v11880_v34, %v11872_v31  ;;  %v12256_v31 = vld [vmem:[#allocation11 + $0x12d8] sm:$0xff]  ;;  %v14520_v63 = vld [vmem:[#allocation11 + $0x1888] sm:$0xff]  ;;  %v16422_v48 = vld [vmem:[#allocation11 + $0x1dc0] sm:$0xff] }
 0x801   : > { %v6874_v38 = vcombine.low %v6858_v5, %v6860_v16  ;;  %v24132_v55 = vpop.f32.mrb[98].mxu1  ;;  %21069 = vmatpush1.bf16.msra.mxu0 %v21068_v53  ;;  %v12232_v53 = vld [vmem:[#allocation11 + $0x1218] sm:$0xff]  ;;  %v12239_v16 = vld [vmem:[#allocation11 + $0x1250] sm:$0xff] }
 0x802   : > { %v24134_v28 = vpop.f32.mrb[99].mxu1  ;;  %21079 = vmatprep.subr.bf16.mxu0 %v21078_v54  ;;  %v21266_v54 = vpack.c.bf16 %v14153_v56, %v14145_v52  ;;  %v24148_v5 = vld [vmem:[#allocation2] sm:$0xff]  ;;  %v21094_v24 = vpack.c.bf16 %v12240_v50, %v12232_v53  ;;  %v21096_v53 = vpack.c.bf16 %v12239_v16, %v12231_v60  ;;  %v14528_v50 = vld [vmem:[#allocation11 + $0x18c8] sm:$0xff] }
 0x803   : > { %v6902_v42 = vrot.slane %v6874_v38, %v23880_v58  ;;  %21253 = vmatpush1.bf16.msra.mxu1 %v21252_v32  ;;  %v14504_v32 = vld [vmem:[#allocation11 + $0x1808] sm:$0xff]  ;;  %v14511_v52 = vld [vmem:[#allocation11 + $0x1840] sm:$0xff]  ;;  %v12248_v56 = vld [vmem:[#allocation11 + $0x1298] sm:$0xff] }
 0x804   : > { %18167 = vmatmul.mubr.msk.f32.vlgmr.msra.gmra.mrb[172].mxu0 %vm5438_vm4, %v23898_v3  ;;  %21263 = vmatprep.subr.bf16.mxu1 %v21262_v37  ;;  %v14503_v37 = vld [vmem:[#allocation11 + $0x1800] sm:$0xff]  ;;  %v21278_v17 = vpack.c.bf16 %v14512_v49, %v14504_v32  ;;  %v12244_v16 = vld [vmem:[#allocation11 + $0x1278] sm:$0xff] }
 0x805   : > { %v6904_v61 = vcombine.low %v6895_v57, %v6902_v42  ;;  %21081 = vmatpush1.bf16.msra.mxu0 %v21080_v43  ;;  %12162 = vmatprep.mubr.f32.mxu0 %v24148_v5  ;;  %v21268_v43 = vpack.c.bf16 %v14152_v2, %v14144_v30  ;;  %v21098_v30 = vpack.c.bf16 %v12256_v31, %v12248_v56  ;;  %v12247_v2 = vld [vmem:[#allocation11 + $0x1290] sm:$0xff] }
 0x806   : > { %18190 = vmatmul.mubr.msk.f32.vlgmr.msra.gmra.mrb[152].mxu1 %vm5438_vm4, %v24146_v62  ;;  %21083 = vmatprep.subr.bf16.mxu0 %v21082_v26 }
 0x807   : > { %v6918_v39 = vrot.slane %v6904_v61, %v23880_v58  ;;  %v7095_v38 = vpop.f32.mrb[120].mxu0  ;;  %21265 = vmatpush1.bf16.msra.mxu1 %v21264_v27  ;;  %14365 = vmatprep.mubr.f32.mxu1 %v24148_v5  ;;  %v21280_v27 = vpack.c.bf16 %v14511_v52, %v14503_v37  ;;  %v21282_v37 = vpack.c.bf16 %v14528_v50, %v14520_v63  ;;  %v12235_v52 = vld [vmem:[#allocation11 + $0x1230] sm:$0xff] }
 0x808   : > { %v7097_v34 = vpop.f32.mrb[121].mxu0  ;;  %21267 = vmatprep.subr.bf16.mxu1 %v21266_v54  ;;  %v25020_v54 = vcombine.low %v23911_v6, %v23913_v35  ;;  %v14519_v6 = vld [vmem:[#allocation11 + $0x1880] sm:$0xff] }
 0x809   : > { %v6919_v26 = vcombine.low %v6911_v29, %v6918_v39  ;;  %v7251_v57 = vcombine.low %v7095_v38, %v7097_v34  ;;  %v24156_v42 = vpop.f32.mrb[100].mxu1  ;;  %21085 = vmatpush1.bf16.msra.mxu0 %v21084_v20  ;;  %v14527_v35 = vld [vmem:[#allocation11 + $0x18c0] sm:$0xff]  ;;  %v21100_v29 = vpack.c.bf16 %v12255_v9, %v12247_v2  ;;  %v14508_v39 = vld [vmem:[#allocation11 + $0x1828] sm:$0xff]  ;;  %v12252_v34 = vld [vmem:[#allocation11 + $0x12b8] sm:$0xff] }
 0x80a   : > { %v24158_v61 = vpop.f32.mrb[101].mxu1  ;;  %21095 = vmatprep.subr.bf16.mxu0 %v21094_v24  ;;  %v24164_v32 = vrot.slane %v25020_v54, %v23880_v58  ;;  %v12236_v24 = vld [vmem:[#allocation11 + $0x1238] sm:$0xff]  ;;  %v14516_v38 = vld [vmem:[#allocation11 + $0x1868] sm:$0xff]  ;;  %v21284_v31 = vpack.c.bf16 %v14527_v35, %v14519_v6  ;;  %v12634_v35 = vld [vmem:[#allocation11 + $0x13d0] sm:$0xff] }
 0x80b   : > { %v24167_v49 = vadd.f32 %v6919_v26, %v24117_v51  ;;  %v24170_v20 = vrot.slane %v7251_v57, %v23880_v58  ;;  %v9524_v60 = vcombine.low %v24156_v42, %v24158_v61  ;;  %21269 = vmatpush1.bf16.msra.mxu1 %v21268_v43  ;;  %v21110_v43 = vpack.c.bf16 %v12244_v16, %v12236_v24  ;;  %v14507_v57 = vld [vmem:[#allocation11 + $0x1820] sm:$0xff]  ;;  %v14524_v2 = vld [vmem:[#allocation11 + $0x18a8] sm:$0xff]  ;;  %v12259_v24 = vld [vmem:[#allocation11 + $0x12f0] sm:$0xff] }
 0x80c   : > { %18169 = vmatmul.mubr.msk.f32.vlgmr.msra.gmra.mrb[174].mxu0 %vm5438_vm4, %v23898_v3  ;;  %21279 = vmatprep.subr.bf16.mxu1 %v21278_v17  ;;  %v12243_v3 = vld [vmem:[#allocation11 + $0x1270] sm:$0xff]  ;;  %v12260_v17 = vld [vmem:[#allocation11 + $0x12f8] sm:$0xff]  ;;  %v21294_v9 = vpack.c.bf16 %v14516_v38, %v14508_v39  ;;  %v14532_v54 = vld [vmem:[#allocation11 + $0x18e8] sm:$0xff]  ;;  %v25021_v16 = vcombine.low %v23923_v1, %v23925_v22 }
 0x80d   : > { %v7282_v51 = vcombine.low %v24164_v32, %v24170_v20  ;;  %21097 = vmatpush1.bf16.msra.mxu0 %v21096_v53  ;;  %12399 = vmatprep.mubr.f32.mxu0 %v24148_v5  ;;  %v14515_v53 = vld [vmem:[#allocation11 + $0x1860] sm:$0xff]  ;;  %v12251_v20 = vld [vmem:[#allocation11 + $0x12b0] sm:$0xff]  ;;  %v12611_v39 = vld [vmem:[#allocation11 + $0x1318] sm:$0xff] }
 0x80e   : > { %18192 = vmatmul.mubr.msk.f32.vlgmr.msra.gmra.mrb[154].mxu1 %vm5438_vm4, %v24146_v62  ;;  %21099 = vmatprep.subr.bf16.mxu0 %v21098_v30  ;;  %v21112_v30 = vpack.c.bf16 %v12243_v3, %v12235_v52  ;;  %v12619_v38 = vld [vmem:[#allocation11 + $0x1358] sm:$0xff]  ;;  %v24194_v52 = vmul.f32 0.015625, %v23731_v19  ;;  %v14523_v3 = vld [vmem:[#allocation11 + $0x18a0] sm:$0xff] }
 0x80f   : > { %v7237_v56 = vpop.f32.mrb[122].mxu0  ;;  %21281 = vmatpush1.bf16.msra.mxu1 %v21280_v27  ;;  %14602 = vmatprep.mubr.f32.mxu1 %v24148_v5  ;;  %v21114_v27 = vpack.c.bf16 %v12260_v17, %v12252_v34  ;;  %v14531_v1 = vld [vmem:[#allocation11 + $0x18e0] sm:$0xff]  ;;  %v14883_v34 = vld [vmem:[#allocation11 + $0x1908] sm:$0xff]  ;;  %v21126_v19 = vpack.c.bf16 %v12619_v38, %v12611_v39  ;;  %v12610_v17 = vld [vmem:[#allocation11 + $0x1310] sm:$0xff] }
 0x810   : > { %v7239_v26 = vpop.f32.mrb[123].mxu0  ;;  %21283 = vmatprep.subr.bf16.mxu1 %v21282_v37  ;;  %v7274_v37 = vrot.slane %v25021_v16, %v23880_v58  ;;  %v14907_v38 = vld [vmem:[#allocation11 + $0x19c8] sm:$0xff]  ;;  %v16793_v42 = vld [vmem:[#allocation11 + $0x1e80] sm:$0xff] }
 0x811   : > { %v7253_v63 = vcombine.low %v7237_v56, %v7239_v26  ;;  %v24182_v50 = vpop.f32.mrb[102].mxu1  ;;  %21101 = vmatpush1.bf16.msra.mxu0 %v21100_v29  ;;  %v21296_v29 = vpack.c.bf16 %v14515_v53, %v14507_v57  ;;  %v21116_v56 = vpack.c.bf16 %v12259_v24, %v12251_v20  ;;  %v12618_v26 = vld [vmem:[#allocation11 + $0x1350] sm:$0xff]  ;;  %v14882_v57 = vld [vmem:[#allocation11 + $0x1900] sm:$0xff]  ;;  %v12635_v20 = vld [vmem:[#allocation11 + $0x13d8] sm:$0xff] }
 0x812   : > { %v24184_v32 = vpop.f32.mrb[103].mxu1  ;;  %21111 = vmatprep.subr.bf16.mxu0 %v21110_v43  ;;  %v21298_v43 = vpack.c.bf16 %v14532_v54, %v14524_v2  ;;  %v14890_v2 = vld [vmem:[#allocation11 + $0x1940] sm:$0xff]  ;;  %v12627_v54 = vld [vmem:[#allocation11 + $0x1398] sm:$0xff]  ;;  %v21128_v39 = vpack.c.bf16 %v12618_v26, %v12610_v17  ;;  %v13013_v17 = vld [vmem:[#allocation11 + $0x14d0] sm:$0xff] }
 0x813   : > { %v7281_v6 = vrot.slane %v7253_v63, %v23880_v58  ;;  %21285 = vmatpush1.bf16.msra.mxu1 %v21284_v31  ;;  %v14891_v31 = vld [vmem:[#allocation11 + $0x1948] sm:$0xff]  ;;  %v12623_v26 = vld [vmem:[#allocation11 + $0x1378] sm:$0xff]  ;;  %v16801_v61 = vld [vmem:[#allocation11 + $0x1ec0] sm:$0xff] }
 0x814   : > { %18171 = vmatmul.mubr.msk.f32.vlgmr.msra.gmra.mrb[176].mxu0 %vm5438_vm4, %v23934_v41  ;;  %21295 = vmatprep.subr.bf16.mxu1 %v21294_v9  ;;  %v7290_v9 = vrot.slane %v7282_v51, %v23880_v58  ;;  %v21310_v16 = vpack.c.bf16 %v14891_v31, %v14883_v34  ;;  %v14899_v51 = vld [vmem:[#allocation11 + $0x1988] sm:$0xff] }
 0x815   : > { %v7283_v22 = vcombine.low %v7274_v37, %v7281_v6  ;;  %21113 = vmatpush1.bf16.msra.mxu0 %v21112_v30  ;;  %12541 = vmatprep.mubr.f32.mxu0 %v24148_v5  ;;  %v21300_v30 = vpack.c.bf16 %v14531_v1, %v14523_v3  ;;  %v21130_v3 = vpack.c.bf16 %v12635_v20, %v12627_v54  ;;  %v12626_v1 = vld [vmem:[#allocation11 + $0x1390] sm:$0xff] }
 0x816   : > { %18194 = vmatmul.mubr.msk.f32.vlgmr.msra.gmra.mrb[156].mxu1 %vm5438_vm4, %v24194_v52  ;;  %21115 = vmatprep.subr.bf16.mxu0 %v21114_v27 }
 0x817   : > { %v7297_v53 = vrot.slane %v7283_v22, %v23880_v58  ;;  %v7474_v63 = vpop.f32.mrb[124].mxu0  ;;  %21297 = vmatpush1.bf16.msra.mxu1 %v21296_v29  ;;  %14744 = vmatprep.mubr.f32.mxu1 %v24148_v5  ;;  %v21312_v29 = vpack.c.bf16 %v14890_v2, %v14882_v57  ;;  %v21314_v57 = vpack.c.bf16 %v14907_v38, %v14899_v51  ;;  %v12614_v2 = vld [vmem:[#allocation11 + $0x1330] sm:$0xff] }
 0x818   : > { %v7476_v24 = vpop.f32.mrb[125].mxu0  ;;  %21299 = vmatprep.subr.bf16.mxu1 %v21298_v43  ;;  %v25022_v43 = vcombine.low %v23954_v23, %v23956_v15  ;;  %v14898_v23 = vld [vmem:[#allocation11 + $0x1980] sm:$0xff] }
 0x819   : > { %v7298_v27 = vcombine.low %v7290_v9, %v7297_v53  ;;  %v7630_v37 = vcombine.low %v7474_v63, %v7476_v24  ;;  %v24204_v6 = vpop.f32.mrb[104].mxu1  ;;  %21117 = vmatpush1.bf16.msra.mxu0 %v21116_v56  ;;  %v14906_v15 = vld [vmem:[#allocation11 + $0x19c0] sm:$0xff]  ;;  %v21132_v9 = vpack.c.bf16 %v12634_v35, %v12626_v1  ;;  %v14887_v53 = vld [vmem:[#allocation11 + $0x1928] sm:$0xff]  ;;  %v12631_v24 = vld [vmem:[#allocation11 + $0x13b8] sm:$0xff] }
 0x81a   : > { %v24206_v22 = vpop.f32.mrb[105].mxu1  ;;  %21127 = vmatprep.subr.bf16.mxu0 %v21126_v19  ;;  %v24212_v34 = vrot.slane %v25022_v43, %v23880_v58  ;;  %v12615_v19 = vld [vmem:[#allocation11 + $0x1338] sm:$0xff]  ;;  %v14895_v63 = vld [vmem:[#allocation11 + $0x1968] sm:$0xff]  ;;  %v21316_v20 = vpack.c.bf16 %v14906_v15, %v14898_v23 }
 0x81b   : > { %v24215_v31 = vadd.f32 %v7298_v27, %v24167_v49  ;;  %v24218_v56 = vrot.slane %v7630_v37, %v23880_v58  ;;  %21301 = vmatpush1.bf16.msra.mxu1 %v21300_v30  ;;  %v21142_v30 = vpack.c.bf16 %v12623_v26, %v12615_v19  ;;  %v21326_v35 = vpack.c.bf16 %v14895_v63, %v14887_v53  ;;  %v14886_v37 = vld [vmem:[#allocation11 + $0x1920] sm:$0xff]  ;;  %v14903_v1 = vld [vmem:[#allocation11 + $0x19a8] sm:$0xff]  ;;  %v12638_v19 = vld [vmem:[#allocation11 + $0x13f0] sm:$0xff] }
 0x81c   : > { %18173 = vmatmul.mubr.msk.f32.vlgmr.msra.gmra.mrb[178].mxu0 %vm5438_vm4, %v23934_v41  ;;  %21311 = vmatprep.subr.bf16.mxu1 %v21310_v16  ;;  %v12622_v41 = vld [vmem:[#allocation11 + $0x1370] sm:$0xff]  ;;  %v12639_v16 = vld [vmem:[#allocation11 + $0x13f8] sm:$0xff]  ;;  %v14911_v43 = vld [vmem:[#allocation11 + $0x19e8] sm:$0xff]  ;;  %v25023_v26 = vcombine.low %v23966_v47, %v23968_v4 }
 0x81d   : > { %v7661_v49 = vcombine.low %v24212_v34, %v24218_v56  ;;  %21129 = vmatpush1.bf16.msra.mxu0 %v21128_v39  ;;  %12778 = vmatprep.mubr.f32.mxu0 %v24148_v5  ;;  %v14894_v39 = vld [vmem:[#allocation11 + $0x1960] sm:$0xff]  ;;  %v12630_v56 = vld [vmem:[#allocation11 + $0x13b0] sm:$0xff]  ;;  %v12990_v53 = vld [vmem:[#allocation11 + $0x1418] sm:$0xff] }
 0x81e   : > { %18196 = vmatmul.mubr.msk.f32.vlgmr.msra.gmra.mrb[158].mxu1 %vm5438_vm4, %v24194_v52  ;;  %21131 = vmatprep.subr.bf16.mxu0 %v21130_v3  ;;  %v21144_v3 = vpack.c.bf16 %v12622_v41, %v12614_v2  ;;  %v12998_v63 = vld [vmem:[#allocation11 + $0x1458] sm:$0xff]  ;;  %v21330_v2 = vpack.c.bf16 %v14911_v43, %v14903_v1  ;;  %v14902_v41 = vld [vmem:[#allocation11 + $0x19a0] sm:$0xff]  ;;  %v15286_v15 = vld [vmem:[#allocation11 + $0x1ac8] sm:$0xff] }
 0x81f   : > { %v7616_v54 = vpop.f32.mrb[126].mxu0  ;;  %21313 = vmatpush1.bf16.msra.mxu1 %v21312_v29  ;;  %14981 = vmatprep.mubr.f32.mxu1 %v24148_v5  ;;  %v21146_v29 = vpack.c.bf16 %v12639_v16, %v12631_v24  ;;  %v14910_v47 = vld [vmem:[#allocation11 + $0x19e0] sm:$0xff]  ;;  %v15262_v24 = vld [vmem:[#allocation11 + $0x1a08] sm:$0xff]  ;;  %v21158_v16 = vpack.c.bf16 %v12998_v63, %v12990_v53 }
 0x820   : > { %v7618_v27 = vpop.f32.mrb[127].mxu0  ;;  %21315 = vmatprep.subr.bf16.mxu1 %v21314_v57  ;;  %v7653_v57 = vrot.slane %v25023_v26, %v23880_v58  ;;  %v15269_v43 = vld [vmem:[#allocation11 + $0x1a40] sm:$0xff] }
 0x821   : > { %v7632_v51 = vcombine.low %v7616_v54, %v7618_v27  ;;  %v24230_v38 = vpop.f32.mrb[106].mxu1  ;;  %21133 = vmatpush1.bf16.msra.mxu0 %v21132_v9  ;;  %v21328_v9 = vpack.c.bf16 %v14894_v39, %v14886_v37  ;;  %v21148_v54 = vpack.c.bf16 %v12638_v19, %v12630_v56  ;;  %v12989_v27 = vld [vmem:[#allocation11 + $0x1410] sm:$0xff]  ;;  %v15261_v39 = vld [vmem:[#allocation11 + $0x1a00] sm:$0xff]  ;;  %v13006_v56 = vld [vmem:[#allocation11 + $0x1498] sm:$0xff] }
 0x822   : > { %v24232_v34 = vpop.f32.mrb[107].mxu1  ;;  %21143 = vmatprep.subr.bf16.mxu0 %v21142_v30  ;;  %v24244_v30 = vrot.slane %v24194_v52, 1  ;;  %v12997_v37 = vld [vmem:[#allocation11 + $0x1450] sm:$0xff]  ;;  %v13014_v19 = vld [vmem:[#allocation11 + $0x14d8] sm:$0xff] }
 0x823   : > { %v7660_v23 = vrot.slane %v7632_v51, %v23880_v58  ;;  %21317 = vmatpush1.bf16.msra.mxu1 %v21316_v20  ;;  %v15270_v20 = vld [vmem:[#allocation11 + $0x1a48] sm:$0xff]  ;;  %v21160_v63 = vpack.c.bf16 %v12997_v37, %v12989_v27  ;;  %v13002_v37 = vld [vmem:[#allocation11 + $0x1478] sm:$0xff]  ;;  %v13392_v27 = vld [vmem:[#allocation11 + $0x15d0] sm:$0xff] }
 0x824   : > { %18175 = vmatmul.mubr.msk.f32.vlgmr.msra.gmra.mrb[180].mxu0 %vm5438_vm4, %v23981_v44  ;;  %21327 = vmatprep.subr.bf16.mxu1 %v21326_v35  ;;  %v7669_v35 = vrot.slane %v7661_v49, %v23880_v58  ;;  %v15278_v49 = vld [vmem:[#allocation11 + $0x1a88] sm:$0xff] }
 0x825   : > { %v7662_v4 = vcombine.low %v7653_v57, %v7660_v23  ;;  %21145 = vmatpush1.bf16.msra.mxu0 %v21144_v3  ;;  %12920 = vmatprep.mubr.f32.mxu0 %v24148_v5  ;;  %v21332_v3 = vpack.c.bf16 %v14910_v47, %v14902_v41  ;;  %v21342_v57 = vpack.c.bf16 %v15270_v20, %v15262_v24  ;;  %v13005_v47 = vld [vmem:[#allocation11 + $0x1490] sm:$0xff] }
 0x826   : > { %18198 = vmatmul.mubr.msk.f32.vlgmr.msra.gmra.mrb[160].mxu1 %vm5438_vm4, %v24244_v30  ;;  %21147 = vmatprep.subr.bf16.mxu0 %v21146_v29  ;;  %v21162_v41 = vpack.c.bf16 %v13014_v19, %v13006_v56  ;;  %v13010_v19 = vld [vmem:[#allocation11 + $0x14b8] sm:$0xff] }
 0x827   : > { %v7676_v51 = vrot.slane %v7662_v4, %v23880_v58  ;;  %v7853_v1 = vpop.f32.mrb[128].mxu0  ;;  %21329 = vmatpush1.bf16.msra.mxu1 %v21328_v9  ;;  %15123 = vmatprep.mubr.f32.mxu1 %v24148_v5  ;;  %v21344_v9 = vpack.c.bf16 %v15269_v43, %v15261_v39  ;;  %v21346_v39 = vpack.c.bf16 %v15286_v15, %v15278_v49  ;;  %v12993_v43 = vld [vmem:[#allocation11 + $0x1430] sm:$0xff] }
 0x828   : > { %v7855_v26 = vpop.f32.mrb[129].mxu0  ;;  %21331 = vmatprep.subr.bf16.mxu1 %v21330_v2  ;;  %v25024_v2 = vcombine.low %v23992_v25, %v23994_v59  ;;  %v15277_v25 = vld [vmem:[#allocation11 + $0x1a80] sm:$0xff] }
 0x829   : > { %v7677_v29 = vcombine.low %v7669_v35, %v7676_v51  ;;  %v8009_v23 = vcombine.low %v7853_v1, %v7855_v26  ;;  %v24252_v53 = vpop.f32.mrb[108].mxu1  ;;  %21149 = vmatpush1.bf16.msra.mxu0 %v21148_v54  ;;  %v15285_v59 = vld [vmem:[#allocation11 + $0x1ac0] sm:$0xff]  ;;  %v21164_v35 = vpack.c.bf16 %v13013_v17, %v13005_v47  ;;  %v15266_v51 = vld [vmem:[#allocation11 + $0x1a28] sm:$0xff]  ;;  %v13018_v26 = vld [vmem:[#allocation11 + $0x14f8] sm:$0xff] }
 0x82a   : > { %v24254_v4 = vpop.f32.mrb[109].mxu1  ;;  %21159 = vmatprep.subr.bf16.mxu0 %v21158_v16  ;;  %v24260_v24 = vrot.slane %v25024_v2, %v23880_v58  ;;  %v12994_v16 = vld [vmem:[#allocation11 + $0x1438] sm:$0xff]  ;;  %v15274_v1 = vld [vmem:[#allocation11 + $0x1a68] sm:$0xff]  ;;  %v21348_v15 = vpack.c.bf16 %v15285_v59, %v15277_v25 }
 0x82b   : > { %v24263_v20 = vadd.f32 %v7677_v29, %v24215_v31  ;;  %v24266_v54 = vrot.slane %v8009_v23, %v23880_v58  ;;  %21333 = vmatpush1.bf16.msra.mxu1 %v21332_v3  ;;  %v21174_v3 = vpack.c.bf16 %v13002_v37, %v12994_v16  ;;  %v21358_v17 = vpack.c.bf16 %v15274_v1, %v15266_v51  ;;  %v15265_v29 = vld [vmem:[#allocation11 + $0x1a20] sm:$0xff]  ;;  %v15282_v47 = vld [vmem:[#allocation11 + $0x1aa8] sm:$0xff]  ;;  %v13017_v16 = vld [vmem:[#allocation11 + $0x14f0] sm:$0xff] }
 0x82c   : > { %18177 = vmatmul.mubr.msk.f32.vlgmr.msra.gmra.mrb[182].mxu0 %vm5438_vm4, %v23981_v44  ;;  %21343 = vmatprep.subr.bf16.mxu1 %v21342_v57  ;;  %v13001_v44 = vld [vmem:[#allocation11 + $0x1470] sm:$0xff]  ;;  %v15273_v23 = vld [vmem:[#allocation11 + $0x1a60] sm:$0xff]  ;;  %v15290_v2 = vld [vmem:[#allocation11 + $0x1ae8] sm:$0xff]  ;;  %v25025_v37 = vcombine.low %v24004_v13, %v24006_v0 }
 0x82d   : > { %v8040_v31 = vcombine.low %v24260_v24, %v24266_v54  ;;  %21161 = vmatpush1.bf16.msra.mxu0 %v21160_v63  ;;  %13157 = vmatprep.mubr.f32.mxu0 %v24148_v5  ;;  %v13009_v54 = vld [vmem:[#allocation11 + $0x14b0] sm:$0xff]  ;;  %v13369_v51 = vld [vmem:[#allocation11 + $0x1518] sm:$0xff]  ;;  %v15289_v13 = vld [vmem:[#allocation11 + $0x1ae0] sm:$0xff] }
 0x82e   : > { %18200 = vmatmul.mubr.msk.f32.vlgmr.msra.gmra.mrb[162].mxu1 %vm5438_vm4, %v24244_v30  ;;  %21163 = vmatprep.subr.bf16.mxu0 %v21162_v41  ;;  %v21176_v41 = vpack.c.bf16 %v13001_v44, %v12993_v43  ;;  %v13377_v1 = vld [vmem:[#allocation11 + $0x1558] sm:$0xff]  ;;  %v21362_v43 = vpack.c.bf16 %v15290_v2, %v15282_v47  ;;  %v15281_v44 = vld [vmem:[#allocation11 + $0x1aa0] sm:$0xff]  ;;  %v15665_v59 = vld [vmem:[#allocation11 + $0x1bc8] sm:$0xff] }
 0x82f   : > { %v7995_v56 = vpop.f32.mrb[130].mxu0  ;;  %21345 = vmatpush1.bf16.msra.mxu1 %v21344_v9  ;;  %15360 = vmatprep.mubr.f32.mxu1 %v24148_v5  ;;  %v21178_v9 = vpack.c.bf16 %v13018_v26, %v13010_v19  ;;  %v15641_v19 = vld [vmem:[#allocation11 + $0x1b08] sm:$0xff]  ;;  %v21190_v26 = vpack.c.bf16 %v13377_v1, %v13369_v51  ;;  %v15648_v2 = vld [vmem:[#allocation11 + $0x1b40] sm:$0xff] }
 0x830   : > { %v7997_v57 = vpop.f32.mrb[131].mxu0  ;;  %21347 = vmatprep.subr.bf16.mxu1 %v21346_v39  ;;  %v8032_v39 = vrot.slane %v25025_v37, %v23880_v58 }
 0x831   : > { %v8011_v63 = vcombine.low %v7995_v56, %v7997_v57  ;;  %v24278_v49 = vpop.f32.mrb[110].mxu1  ;;  %21165 = vmatpush1.bf16.msra.mxu0 %v21164_v35  ;;  %v21360_v35 = vpack.c.bf16 %v15273_v23, %v15265_v29  ;;  %v21180_v56 = vpack.c.bf16 %v13017_v16, %v13009_v54  ;;  %v13368_v57 = vld [vmem:[#allocation11 + $0x1510] sm:$0xff]  ;;  %v15640_v23 = vld [vmem:[#allocation11 + $0x1b00] sm:$0xff]  ;;  %v13385_v54 = vld [vmem:[#allocation11 + $0x1598] sm:$0xff] }
 0x832   : > { %v24280_v24 = vpop.f32.mrb[111].mxu1  ;;  %21175 = vmatprep.subr.bf16.mxu0 %v21174_v3  ;;  %v24292_v3 = vrot.slane %v24194_v52, 2  ;;  %v13376_v29 = vld [vmem:[#allocation11 + $0x1550] sm:$0xff]  ;;  %v13393_v16 = vld [vmem:[#allocation11 + $0x15d8] sm:$0xff] }
 0x833   : > { %v8039_v25 = vrot.slane %v8011_v63, %v23880_v58  ;;  %21349 = vmatpush1.bf16.msra.mxu1 %v21348_v15  ;;  %v15649_v15 = vld [vmem:[#allocation11 + $0x1b48] sm:$0xff]  ;;  %v21192_v1 = vpack.c.bf16 %v13376_v29, %v13368_v57  ;;  %v13381_v29 = vld [vmem:[#allocation11 + $0x1578] sm:$0xff]  ;;  %v13771_v57 = vld [vmem:[#allocation11 + $0x16d0] sm:$0xff] }
 0x834   : > { %18179 = vmatmul.mubr.msk.f32.vlgmr.msra.gmra.mrb[184].mxu0 %vm5438_vm4, %v24015_v7  ;;  %21359 = vmatprep.subr.bf16.mxu1 %v21358_v17  ;;  %v8048_v17 = vrot.slane %v8040_v31, %v23880_v58  ;;  %v15657_v31 = vld [vmem:[#allocation11 + $0x1b88] sm:$0xff] }
 0x835   : > { %v8041_v0 = vcombine.low %v8032_v39, %v8039_v25  ;;  %21177 = vmatpush1.bf16.msra.mxu0 %v21176_v41  ;;  %13299 = vmatprep.mubr.f32.mxu0 %v24148_v5  ;;  %v21364_v41 = vpack.c.bf16 %v15289_v13, %v15281_v44  ;;  %v21374_v39 = vpack.c.bf16 %v15649_v15, %v15641_v19  ;;  %v13384_v13 = vld [vmem:[#allocation11 + $0x1590] sm:$0xff] }
 0x836   : > { %18202 = vmatmul.mubr.msk.f32.vlgmr.msra.gmra.mrb[164].mxu1 %vm5438_vm4, %v24292_v3  ;;  %21179 = vmatprep.subr.bf16.mxu0 %v21178_v9  ;;  %v21194_v44 = vpack.c.bf16 %v13393_v16, %v13385_v54  ;;  %v13389_v16 = vld [vmem:[#allocation11 + $0x15b8] sm:$0xff] }
 0x837   : > { %v8055_v63 = vrot.slane %v8041_v0, %v23880_v58  ;;  %v8232_v47 = vpop.f32.mrb[132].mxu0  ;;  %21361 = vmatpush1.bf16.msra.mxu1 %v21360_v35  ;;  %15502 = vmatprep.mubr.f32.mxu1 %v24148_v5  ;;  %v21376_v35 = vpack.c.bf16 %v15648_v2, %v15640_v23  ;;  %v21378_v23 = vpack.c.bf16 %v15665_v59, %v15657_v31  ;;  %v13372_v2 = vld [vmem:[#allocation11 + $0x1530] sm:$0xff] }
 0x838   : > { %v8234_v37 = vpop.f32.mrb[133].mxu0  ;;  %21363 = vmatprep.subr.bf16.mxu1 %v21362_v43  ;;  %v25026_v43 = vcombine.low %v24032_v46, %v24034_v18  ;;  %v15656_v46 = vld [vmem:[#allocation11 + $0x1b80] sm:$0xff] }
 0x839   : > { %v8056_v9 = vcombine.low %v8048_v17, %v8055_v63  ;;  %v8388_v25 = vcombine.low %v8232_v47, %v8234_v37  ;;  %v24300_v51 = vpop.f32.mrb[112].mxu1  ;;  %21181 = vmatpush1.bf16.msra.mxu0 %v21180_v56  ;;  %v15664_v18 = vld [vmem:[#allocation11 + $0x1bc0] sm:$0xff]  ;;  %v21196_v17 = vpack.c.bf16 %v13392_v27, %v13384_v13  ;;  %v15645_v63 = vld [vmem:[#allocation11 + $0x1b28] sm:$0xff]  ;;  %v13397_v37 = vld [vmem:[#allocation11 + $0x15f8] sm:$0xff] }
 0x83a   : > { %v24302_v0 = vpop.f32.mrb[113].mxu1  ;;  %21191 = vmatprep.subr.bf16.mxu0 %v21190_v26  ;;  %v24308_v19 = vrot.slane %v25026_v43, %v23880_v58  ;;  %v13373_v26 = vld [vmem:[#allocation11 + $0x1538] sm:$0xff]  ;;  %v15653_v47 = vld [vmem:[#allocation11 + $0x1b68] sm:$0xff]  ;;  %v21380_v59 = vpack.c.bf16 %v15664_v18, %v15656_v46 }
 0x83b   : > { %v24311_v15 = vadd.f32 %v8056_v9, %v24263_v20  ;;  %v24314_v56 = vrot.slane %v8388_v25, %v23880_v58  ;;  %21365 = vmatpush1.bf16.msra.mxu1 %v21364_v41  ;;  %v21206_v41 = vpack.c.bf16 %v13381_v29, %v13373_v26  ;;  %v21390_v27 = vpack.c.bf16 %v15653_v47, %v15645_v63  ;;  %v15644_v9 = vld [vmem:[#allocation11 + $0x1b20] sm:$0xff]  ;;  %v15661_v13 = vld [vmem:[#allocation11 + $0x1ba8] sm:$0xff]  ;;  %v13396_v26 = vld [vmem:[#allocation11 + $0x15f0] sm:$0xff] }
 0x83c   : > { %18181 = vmatmul.mubr.msk.f32.vlgmr.msra.gmra.mrb[186].mxu0 %vm5438_vm4, %v24015_v7  ;;  %21375 = vmatprep.subr.bf16.mxu1 %v21374_v39  ;;  %v13380_v7 = vld [vmem:[#allocation11 + $0x1570] sm:$0xff]  ;;  %v15652_v25 = vld [vmem:[#allocation11 + $0x1b60] sm:$0xff]  ;;  %v15669_v43 = vld [vmem:[#allocation11 + $0x1be8] sm:$0xff]  ;;  %v25027_v29 = vcombine.low %v24046_v36, %v24048_v14 }
 0x83d   : > { %v8419_v20 = vcombine.low %v24308_v19, %v24314_v56  ;;  %21193 = vmatpush1.bf16.msra.mxu0 %v21192_v1  ;;  %13536 = vmatprep.mubr.f32.mxu0 %v24148_v5  ;;  %v13388_v56 = vld [vmem:[#allocation11 + $0x15b0] sm:$0xff]  ;;  %v13748_v63 = vld [vmem:[#allocation11 + $0x1618] sm:$0xff]  ;;  %v15668_v36 = vld [vmem:[#allocation11 + $0x1be0] sm:$0xff] }
 0x83e   : > { %18204 = vmatmul.mubr.msk.f32.vlgmr.msra.gmra.mrb[166].mxu1 %vm5438_vm4, %v24292_v3  ;;  %21195 = vmatprep.subr.bf16.mxu0 %v21194_v44  ;;  %v21208_v44 = vpack.c.bf16 %v13380_v7, %v13372_v2  ;;  %v13756_v47 = vld [vmem:[#allocation11 + $0x1658] sm:$0xff]  ;;  %v21394_v2 = vpack.c.bf16 %v15669_v43, %v15661_v13  ;;  %v15660_v7 = vld [vmem:[#allocation11 + $0x1ba0] sm:$0xff]  ;;  %v16044_v18 = vld [vmem:[#allocation11 + $0x1cc8] sm:$0xff] }
 0x83f   : > { %v8374_v54 = vpop.f32.mrb[134].mxu0  ;;  %21377 = vmatpush1.bf16.msra.mxu1 %v21376_v35  ;;  %15739 = vmatprep.mubr.f32.mxu1 %v24148_v5  ;;  %v21210_v35 = vpack.c.bf16 %v13397_v37, %v13389_v16  ;;  %v16020_v16 = vld [vmem:[#allocation11 + $0x1c08] sm:$0xff]  ;;  %v21222_v37 = vpack.c.bf16 %v13756_v47, %v13748_v63  ;;  %v16027_v43 = vld [vmem:[#allocation11 + $0x1c40] sm:$0xff] }
 0x840   : > { %v8376_v39 = vpop.f32.mrb[135].mxu0  ;;  %21379 = vmatprep.subr.bf16.mxu1 %v21378_v23  ;;  %v8411_v23 = vrot.slane %v25027_v29, %v23880_v58 }
 0x841   : > { %v8390_v1 = vcombine.low %v8374_v54, %v8376_v39  ;;  %v24326_v31 = vpop.f32.mrb[114].mxu1  ;;  %21197 = vmatpush1.bf16.msra.mxu0 %v21196_v17  ;;  %v21392_v17 = vpack.c.bf16 %v15652_v25, %v15644_v9  ;;  %v21212_v54 = vpack.c.bf16 %v13396_v26, %v13388_v56  ;;  %v13747_v39 = vld [vmem:[#allocation11 + $0x1610] sm:$0xff]  ;;  %v16019_v25 = vld [vmem:[#allocation11 + $0x1c00] sm:$0xff]  ;;  %v13764_v56 = vld [vmem:[#allocation11 + $0x1698] sm:$0xff] }
 0x842   : > { %v24328_v19 = vpop.f32.mrb[115].mxu1  ;;  %21207 = vmatprep.subr.bf16.mxu0 %v21206_v41  ;;  %v24340_v41 = vrot.slane %v24194_v52, 3  ;;  %v13755_v9 = vld [vmem:[#allocation11 + $0x1650] sm:$0xff]  ;;  %v13772_v26 = vld [vmem:[#allocation11 + $0x16d8] sm:$0xff] }
 0x843   : > { %v8418_v46 = vrot.slane %v8390_v1, %v23880_v58  ;;  %21381 = vmatpush1.bf16.msra.mxu1 %v21380_v59  ;;  %v16028_v59 = vld [vmem:[#allocation11 + $0x1c48] sm:$0xff]  ;;  %v21224_v47 = vpack.c.bf16 %v13755_v9, %v13747_v39  ;;  %v13760_v9 = vld [vmem:[#allocation11 + $0x1678] sm:$0xff] }
 0x844   : > { %18183 = vmatmul.mubr.msk.f32.vlgmr.msra.gmra.mrb[188].mxu0 %vm5438_vm4, %v24061_v40  ;;  %21391 = vmatprep.subr.bf16.mxu1 %v21390_v27  ;;  %v8427_v27 = vrot.slane %v8419_v20, %v23880_v58  ;;  %v16036_v20 = vld [vmem:[#allocation11 + $0x1c88] sm:$0xff] }
 0x845   : > { %v8420_v14 = vcombine.low %v8411_v23, %v8418_v46  ;;  %21209 = vmatpush1.bf16.msra.mxu0 %v21208_v44  ;;  %13678 = vmatprep.mubr.f32.mxu0 %v24148_v5  ;;  %v21396_v44 = vpack.c.bf16 %v15668_v36, %v15660_v7  ;;  %v21406_v23 = vpack.c.bf16 %v16028_v59, %v16020_v16  ;;  %v13763_v36 = vld [vmem:[#allocation11 + $0x1690] sm:$0xff] }
 0x846   : > { %18206 = vmatmul.mubr.msk.f32.vlgmr.msra.gmra.mrb[168].mxu1 %vm5438_vm4, %v24340_v41  ;;  %21211 = vmatprep.subr.bf16.mxu0 %v21210_v35  ;;  %v21226_v7 = vpack.c.bf16 %v13772_v26, %v13764_v56  ;;  %v13768_v26 = vld [vmem:[#allocation11 + $0x16b8] sm:$0xff] }
 0x847   : > { %v8434_v1 = vrot.slane %v8420_v14, %v23880_v58  ;;  %v8611_v13 = vpop.f32.mrb[136].mxu0  ;;  %21393 = vmatpush1.bf16.msra.mxu1 %v21392_v17  ;;  %15881 = vmatprep.mubr.f32.mxu1 %v24148_v5  ;;  %v21408_v17 = vpack.c.bf16 %v16027_v43, %v16019_v25  ;;  %v21410_v25 = vpack.c.bf16 %v16044_v18, %v16036_v20  ;;  %v13751_v43 = vld [vmem:[#allocation11 + $0x1630] sm:$0xff] }
 0x848   : > { %v8613_v29 = vpop.f32.mrb[137].mxu0  ;;  %21395 = vmatprep.subr.bf16.mxu1 %v21394_v2  ;;  %v25028_v2 = vcombine.low %v24072_v33, %v24074_v8  ;;  %v16035_v8 = vld [vmem:[#allocation11 + $0x1c80] sm:$0xff] }
 0x849   : > { %v8435_v35 = vcombine.low %v8427_v27, %v8434_v1  ;;  %v8767_v46 = vcombine.low %v8611_v13, %v8613_v29  ;;  %v24348_v63 = vpop.f32.mrb[116].mxu1  ;;  %21213 = vmatpush1.bf16.msra.mxu0 %v21212_v54  ;;  %v16043_v33 = vld [vmem:[#allocation11 + $0x1cc0] sm:$0xff]  ;;  %v21228_v27 = vpack.c.bf16 %v13771_v57, %v13763_v36  ;;  %v16024_v1 = vld [vmem:[#allocation11 + $0x1c28] sm:$0xff]  ;;  %v13776_v29 = vld [vmem:[#allocation11 + $0x16f8] sm:$0xff] }
 0x84a   : > { %v24350_v14 = vpop.f32.mrb[117].mxu1  ;;  %21223 = vmatprep.subr.bf16.mxu0 %v21222_v37  ;;  %v24356_v16 = vrot.slane %v25028_v2, %v23880_v58  ;;  %v13752_v37 = vld [vmem:[#allocation11 + $0x1638] sm:$0xff]  ;;  %v16032_v13 = vld [vmem:[#allocation11 + $0x1c68] sm:$0xff]  ;;  %v21412_v18 = vpack.c.bf16 %v16043_v33, %v16035_v8 }
 0x84b   : > { %v24359_v59 = vadd.f32 %v8435_v35, %v24311_v15  ;;  %v24362_v54 = vrot.slane %v8767_v46, %v23880_v58  ;;  %v11040_v39 = vcombine.low %v24348_v63, %v24350_v14  ;;  %21397 = vmatpush1.bf16.msra.mxu1 %v21396_v44  ;;  %v21238_v44 = vpack.c.bf16 %v13760_v9, %v13752_v37  ;;  %v16023_v35 = vld [vmem:[#allocation11 + $0x1c20] sm:$0xff]  ;;  %v16040_v36 = vld [vmem:[#allocation11 + $0x1ca8] sm:$0xff]  ;;  %v13775_v37 = vld [vmem:[#allocation11 + $0x16f0] sm:$0xff] }
 0x84c   : > { %18185 = vmatmul.mubr.msk.f32.vlgmr.msra.gmra.mrb[190].mxu0 %vm5438_vm4, %v24061_v40  ;;  %21407 = vmatprep.subr.bf16.mxu1 %v21406_v23  ;;  %v13759_v40 = vld [vmem:[#allocation11 + $0x1670] sm:$0xff]  ;;  %v21422_v57 = vpack.c.bf16 %v16032_v13, %v16024_v1  ;;  %v16031_v46 = vld [vmem:[#allocation11 + $0x1c60] sm:$0xff]  ;;  %v16048_v2 = vld [vmem:[#allocation11 + $0x1ce8] sm:$0xff]  ;;  %v25029_v9 = vcombine.low %v24084_v21, %v24086_v10 }
 0x84d   : > { %v8798_v15 = vcombine.low %v24356_v16, %v24362_v54  ;;  %21225 = vmatpush1.bf16.msra.mxu0 %v21224_v47  ;;  %13915 = vmatprep.mubr.f32.mxu0 %v24148_v5  ;;  %v13767_v54 = vld [vmem:[#allocation11 + $0x16b0] sm:$0xff]  ;;  %v14127_v1 = vld [vmem:[#allocation11 + $0x1718] sm:$0xff]  ;;  %v16047_v10 = vld [vmem:[#allocation11 + $0x1ce0] sm:$0xff] }
 0x84e   : > { %18208 = vmatmul.mubr.msk.f32.vlgmr.msra.gmra.mrb[170].mxu1 %vm5438_vm4, %v24340_v41  ;;  %21227 = vmatprep.subr.bf16.mxu0 %v21226_v7  ;;  %v21240_v7 = vpack.c.bf16 %v13759_v40, %v13751_v43  ;;  %v14135_v13 = vld [vmem:[#allocation11 + $0x1758] sm:$0xff]  ;;  %v21426_v43 = vpack.c.bf16 %v16048_v2, %v16040_v36  ;;  %v16039_v40 = vld [vmem:[#allocation11 + $0x1ca0] sm:$0xff]  ;;  %v16423_v33 = vld [vmem:[#allocation11 + $0x1dc8] sm:$0xff] }
 0x84f   : > { %v8753_v56 = vpop.f32.mrb[138].mxu0  ;;  %21409 = vmatpush1.bf16.msra.mxu1 %v21408_v17  ;;  %16118 = vmatprep.mubr.f32.mxu1 %v24148_v5  ;;  %v21242_v17 = vpack.c.bf16 %v13776_v29, %v13768_v26  ;;  %v16399_v26 = vld [vmem:[#allocation11 + $0x1d08] sm:$0xff]  ;;  %v21254_v29 = vpack.c.bf16 %v14135_v13, %v14127_v1  ;;  %v16406_v2 = vld [vmem:[#allocation11 + $0x1d40] sm:$0xff]  ;;  %v16025_v63 = vld [vmem:[#allocation11 + $0x1c30] sm:$0xff] }
 0x850   : > { %v8755_v23 = vpop.f32.mrb[139].mxu0  ;;  %21411 = vmatprep.subr.bf16.mxu1 %v21410_v25  ;;  %v8790_v25 = vrot.slane %v25029_v9, %v23880_v58  ;;  %v16033_v14 = vld [vmem:[#allocation11 + $0x1c70] sm:$0xff] }
 0x851   : > { %v8769_v47 = vcombine.low %v8753_v56, %v8755_v23  ;;  %v24374_v20 = vpop.f32.mrb[118].mxu1  ;;  %21229 = vmatpush1.bf16.msra.mxu0 %v21228_v27  ;;  %v21424_v27 = vpack.c.bf16 %v16031_v46, %v16023_v35  ;;  %v21244_v56 = vpack.c.bf16 %v13775_v37, %v13767_v54  ;;  %v14126_v23 = vld [vmem:[#allocation11 + $0x1710] sm:$0xff]  ;;  %v16398_v46 = vld [vmem:[#allocation11 + $0x1d00] sm:$0xff]  ;;  %v14143_v54 = vld [vmem:[#allocation11 + $0x1798] sm:$0xff] }
 0x852   : > { %v24376_v16 = vpop.f32.mrb[119].mxu1  ;;  %21239 = vmatprep.subr.bf16.mxu0 %v21238_v44  ;;  %v24388_v44 = vrot.slane %v24194_v52, 4  ;;  %v14134_v35 = vld [vmem:[#allocation11 + $0x1750] sm:$0xff]  ;;  %v14151_v37 = vld [vmem:[#allocation11 + $0x17d8] sm:$0xff] }
 0x853   : > { %v8797_v8 = vrot.slane %v8769_v47, %v23880_v58  ;;  %21413 = vmatpush1.bf16.msra.mxu1 %v21412_v18  ;;  %v16407_v18 = vld [vmem:[#allocation11 + $0x1d48] sm:$0xff]  ;;  %v21256_v13 = vpack.c.bf16 %v14134_v35, %v14126_v23  ;;  %v14139_v23 = vld [vmem:[#allocation11 + $0x1778] sm:$0xff] }
 0x854   : > { %18187 = vmatmul.mubr.msk.f32.vlgmr.msra.gmra.mrb[192].mxu0 %vm5438_vm4, %v24095_v12  ;;  %21423 = vmatprep.subr.bf16.mxu1 %v21422_v57  ;;  %v8806_v57 = vrot.slane %v8798_v15, %v23880_v58  ;;  %v16415_v15 = vld [vmem:[#allocation11 + $0x1d88] sm:$0xff] }
 0x855   : > { %v8799_v21 = vcombine.low %v8790_v25, %v8797_v8  ;;  %21241 = vmatpush1.bf16.msra.mxu0 %v21240_v7  ;;  %14057 = vmatprep.mubr.f32.mxu0 %v24148_v5  ;;  %v21428_v7 = vpack.c.bf16 %v16047_v10, %v16039_v40  ;;  %v21438_v25 = vpack.c.bf16 %v16407_v18, %v16399_v26  ;;  %v14150_v10 = vld [vmem:[#allocation11 + $0x17d0] sm:$0xff] }
 0x856   : > { %18210 = vmatmul.mubr.msk.f32.vlgmr.msra.gmra.mrb[172].mxu1 %vm5438_vm4, %v24388_v44  ;;  %21243 = vmatprep.subr.bf16.mxu0 %v21242_v17  ;;  %v21258_v40 = vpack.c.bf16 %v14151_v37, %v14143_v54  ;;  %v21442_v35 = vpack.c.bf16 %v16423_v33, %v16415_v15  ;;  %v14138_v33 = vld [vmem:[#allocation11 + $0x1770] sm:$0xff]  ;;  %v14147_v54 = vld [vmem:[#allocation11 + $0x17b8] sm:$0xff] }
 0x857   : > { %v8813_v47 = vrot.slane %v8799_v21, %v23880_v58  ;;  %v8990_v36 = vpop.f32.mrb[140].mxu0  ;;  %21425 = vmatpush1.bf16.msra.mxu1 %v21424_v27  ;;  %16260 = vmatprep.mubr.f32.mxu1 %v24148_v5  ;;  %v21440_v27 = vpack.c.bf16 %v16406_v2, %v16398_v46  ;;  %v14142_v5 = vld [vmem:[#allocation11 + $0x1790] sm:$0xff]  ;;  %v24418_v46 = vld [vmem:[#allocation2] sm:$0xff]  ;;  %v21444_v2 = vpack.c.bf16 %v16422_v48, %v16414_v45  ;;  %v16802_v48 = vld [vmem:[#allocation11 + $0x1ec8] sm:$0xff] }
 0x858   : > { %v8992_v9 = vpop.f32.mrb[141].mxu0  ;;  %21427 = vmatprep.subr.bf16.mxu1 %v21426_v43  ;;  %v24404_v43 = vrot.slane %v9145_v11, %v23880_v58  ;;  %v14155_v37 = vld [vmem:[#allocation11 + $0x17f8] sm:$0xff]  ;;  %v14529_v18 = vld [vmem:[#allocation11 + $0x18d0] sm:$0xff] }
 0x859   : > { %v8814_v17 = vcombine.low %v8806_v57, %v8813_v47  ;;  %v9146_v8 = vcombine.low %v8990_v36, %v8992_v9  ;;  %v24396_v1 = vpop.f32.mrb[120].mxu1  ;;  %21245 = vmatpush1.bf16.msra.mxu0 %v21244_v56  ;;  %v16403_v57 = vld [vmem:[#allocation11 + $0x1d28] sm:$0xff]  ;;  %v14130_v36 = vld [vmem:[#allocation11 + $0x1730] sm:$0xff] }
 0x85a   : > { %v24398_v21 = vpop.f32.mrb[121].mxu1  ;;  %21255 = vmatprep.subr.bf16.mxu0 %v21254_v29  ;;  %v14131_v29 = vld [vmem:[#allocation11 + $0x1738] sm:$0xff]  ;;  %v16411_v47 = vld [vmem:[#allocation11 + $0x1d68] sm:$0xff] }
 0x85b   : > { %v24407_v26 = vadd.f32 %v8814_v17, %v24359_v59  ;;  %v24410_v56 = vrot.slane %v9146_v8, %v23880_v58  ;;  %21429 = vmatpush1.bf16.msra.mxu1 %v21428_v7  ;;  %v21260_v59 = vpack.c.bf16 %v14150_v10, %v14142_v5  ;;  %v16402_v17 = vld [vmem:[#allocation11 + $0x1d20] sm:$0xff]  ;;  %v16419_v5 = vld [vmem:[#allocation11 + $0x1da8] sm:$0xff] }
 0x85c   : > { %18189 = vmatmul.mubr.msk.f32.vlgmr.msra.gmra.mrb[194].mxu0 %vm5438_vm4, %v24095_v12  ;;  %21439 = vmatprep.subr.bf16.mxu1 %v21438_v25  ;;  %v21270_v12 = vpack.c.bf16 %v14139_v23, %v14131_v29  ;;  %v21454_v25 = vpack.c.bf16 %v16411_v47, %v16403_v57  ;;  %v16410_v8 = vld [vmem:[#allocation11 + $0x1d60] sm:$0xff]  ;;  %v16427_v10 = vld [vmem:[#allocation11 + $0x1de8] sm:$0xff]  ;;  %v14154_v29 = vld [vmem:[#allocation11 + $0x17f0] sm:$0xff]  ;;  %v25030_v23 = vcombine.low %v24132_v55, %v24134_v28 }
 0x85d   : > { %v9177_v11 = vcombine.low %v24404_v43, %v24410_v56  ;;  %21257 = vmatpush1.bf16.msra.mxu0 %v21256_v13  ;;  %14294 = vmatprep.mubr.f32.mxu0 %v24418_v46  ;;  %v14146_v56 = vld [vmem:[#allocation11 + $0x17b0] sm:$0xff]  ;;  %v14506_v57 = vld [vmem:[#allocation11 + $0x1818] sm:$0xff]  ;;  %v16426_v55 = vld [vmem:[#allocation11 + $0x1de0] sm:$0xff] }
 0x85e   : > { %18212 = vmatmul.mubr.msk.f32.vlgmr.msra.gmra.mrb[174].mxu1 %vm5438_vm4, %v24388_v44  ;;  %21259 = vmatprep.subr.bf16.mxu0 %v21258_v40  ;;  %v21272_v40 = vpack.c.bf16 %v14138_v33, %v14130_v36  ;;  %v14514_v47 = vld [vmem:[#allocation11 + $0x1858] sm:$0xff]  ;;  %v21458_v36 = vpack.c.bf16 %v16427_v10, %v16419_v5  ;;  %v16418_v33 = vld [vmem:[#allocation11 + $0x1da0] sm:$0xff] }
 0x85f   : > { %v9132_v7 = vpop.f32.mrb[142].mxu0  ;;  %21441 = vmatpush1.bf16.msra.mxu1 %v21440_v27  ;;  %16497 = vmatprep.mubr.f32.mxu1 %v24418_v46  ;;  %v21274_v27 = vpack.c.bf16 %v14155_v37, %v14147_v54  ;;  %v16778_v54 = vld [vmem:[#allocation11 + $0x1e08] sm:$0xff]  ;;  %v21286_v37 = vpack.c.bf16 %v14514_v47, %v14506_v57  ;;  %v16785_v10 = vld [vmem:[#allocation11 + $0x1e40] sm:$0xff] }
 0x860   : > { %v9134_v9 = vpop.f32.mrb[143].mxu0  ;;  %21443 = vmatprep.subr.bf16.mxu1 %v21442_v35  ;;  %v9169_v35 = vrot.slane %v25030_v23, %v23880_v58 }
 0x861   : > { %v9148_v13 = vcombine.low %v9132_v7, %v9134_v9  ;;  %v24424_v15 = vpop.f32.mrb[122].mxu1  ;;  %21261 = vmatpush1.bf16.msra.mxu0 %v21260_v59  ;;  %v21456_v59 = vpack.c.bf16 %v16410_v8, %v16402_v17  ;;  %v21276_v7 = vpack.c.bf16 %v14154_v29, %v14146_v56  ;;  %v14505_v9 = vld [vmem:[#allocation11 + $0x1810] sm:$0xff]  ;;  %v16777_v8 = vld [vmem:[#allocation11 + $0x1e00] sm:$0xff]  ;;  %v14522_v56 = vld [vmem:[#allocation11 + $0x1898] sm:$0xff] }
 0x862   : > { %v24426_v43 = vpop.f32.mrb[123].mxu1  ;;  %21271 = vmatprep.subr.bf16.mxu0 %v21270_v12  ;;  %v24438_v12 = vrot.slane %v24194_v52, 5  ;;  %v14513_v17 = vld [vmem:[#allocation11 + $0x1850] sm:$0xff]  ;;  %v14530_v29 = vld [vmem:[#allocation11 + $0x18d8] sm:$0xff] }
 0x863   : > { %v9176_v45 = vrot.slane %v9148_v13, %v23880_v58  ;;  %21445 = vmatpush1.bf16.msra.mxu1 %v21444_v2  ;;  %v16786_v2 = vld [vmem:[#allocation11 + $0x1e48] sm:$0xff]  ;;  %v21288_v47 = vpack.c.bf16 %v14513_v17, %v14505_v9  ;;  %v14518_v9 = vld [vmem:[#allocation11 + $0x1878] sm:$0xff] }
 0x864   : > { %18191 = vmatmul.mubr.msk.f32.vlgmr.msra.gmra.mrb[196].mxu0 %vm5438_vm4, %v24146_v62  ;;  %21455 = vmatprep.subr.bf16.mxu1 %v21454_v25  ;;  %v9185_v25 = vrot.slane %v9177_v11, %v23880_v58  ;;  %v16794_v11 = vld [vmem:[#allocation11 + $0x1e88] sm:$0xff] }
 0x865   : > { %v9178_v28 = vcombine.low %v9169_v35, %v9176_v45  ;;  %21273 = vmatpush1.bf16.msra.mxu0 %v21272_v40  ;;  %14436 = vmatprep.mubr.f32.mxu0 %v24418_v46  ;;  %v21460_v40 = vpack.c.bf16 %v16426_v55, %v16418_v33  ;;  %v21470_v35 = vpack.c.bf16 %v16786_v2, %v16778_v54  ;;  %v14521_v55 = vld [vmem:[#allocation11 + $0x1890] sm:$0xff] }
 0x866   : > { %18214 = vmatmul.mubr.msk.f32.vlgmr.msra.gmra.mrb[176].mxu1 %vm5438_vm4, %v24438_v12  ;;  %21275 = vmatprep.subr.bf16.mxu0 %v21274_v27  ;;  %v21290_v33 = vpack.c.bf16 %v14530_v29, %v14522_v56  ;;  %v21474_v17 = vpack.c.bf16 %v16802_v48, %v16794_v11  ;;  %v21476_v48 = vpack.c.bf16 %v16801_v61, %v16793_v42  ;;  %v14534_v56 = vld [vmem:[#allocation11 + $0x18f8] sm:$0xff]  ;;  %v16798_v11 = vld [vmem:[#allocation11 + $0x1ea8] sm:$0xff]  ;;  %v14908_v42 = vld [vmem:[#allocation11 + $0x19d0] sm:$0xff] }
 0x867   : > { %v9192_v13 = vrot.slane %v9178_v28, %v23880_v58  ;;  %v9369_v5 = vpop.f32.mrb[144].mxu0  ;;  %21457 = vmatpush1.bf16.msra.mxu1 %v21456_v59  ;;  %16639 = vmatprep.mubr.f32.mxu1 %v24418_v46  ;;  %v21472_v59 = vpack.c.bf16 %v16785_v10, %v16777_v8  ;;  %v16782_v8 = vld [vmem:[#allocation11 + $0x1e28] sm:$0xff]  ;;  %v14526_v10 = vld [vmem:[#allocation11 + $0x18b8] sm:$0xff] }
 0x868   : > { %v9371_v23 = vpop.f32.mrb[145].mxu0  ;;  %21459 = vmatprep.subr.bf16.mxu1 %v21458_v36  ;;  %v24454_v36 = vrot.slane %v9524_v60, %v23880_v58 }
 0x869   : > { %v9193_v27 = vcombine.low %v9185_v25, %v9192_v13  ;;  %v9525_v45 = vcombine.low %v9369_v5, %v9371_v23  ;;  %21277 = vmatpush1.bf16.msra.mxu0 %v21276_v7  ;;  %v24446_v57 = vpop.f32.mrb[124].mxu1  ;;  %v16790_v25 = vld [vmem:[#allocation11 + $0x1e68] sm:$0xff]  ;;  %v14509_v5 = vld [vmem:[#allocation11 + $0x1830] sm:$0xff]  ;;  %v16781_v23 = vld [vmem:[#allocation11 + $0x1e20] sm:$0xff] }
 0x86a   : > { %v24448_v28 = vpop.f32.mrb[125].mxu1  ;;  %21287 = vmatprep.subr.bf16.mxu0 %v21286_v37  ;;  %v14510_v37 = vld [vmem:[#allocation11 + $0x1838] sm:$0xff] }
 0x86b   : > { %v24457_v7 = vadd.f32 %v9193_v27, %v24407_v26  ;;  %v24460_v54 = vrot.slane %v9525_v45, %v23880_v58  ;;  %v11798_v2 = vcombine.low %v24446_v57, %v24448_v28  ;;  %21461 = vmatpush1.bf16.msra.mxu1 %v21460_v40  ;;  %v21292_v26 = vpack.c.bf16 %v14529_v18, %v14521_v55  ;;  %v16783_v57 = vld [vmem:[#allocation11 + $0x1e30] sm:$0xff] }
 0x86c   : > { %18193 = vmatmul.mubr.msk.f32.vlgmr.msra.gmra.mrb[198].mxu0 %vm5438_vm4, %v24146_v62  ;;  %21471 = vmatprep.subr.bf16.mxu1 %v21470_v35  ;;  %v21302_v13 = vpack.c.bf16 %v14518_v9, %v14510_v37  ;;  %v14517_v62 = vld [vmem:[#allocation11 + $0x1870] sm:$0xff]  ;;  %v21486_v18 = vpack.c.bf16 %v16790_v25, %v16782_v8  ;;  %v16789_v35 = vld [vmem:[#allocation11 + $0x1e60] sm:$0xff]  ;;  %v25031_v37 = vcombine.low %v24182_v50, %v24184_v32  ;;  %v14893_v8 = vld [vmem:[#allocation11 + $0x1958] sm:$0xff]  ;;  %v24486_v25 = vrot.slane %v24194_v52, 6 }
 0x86d   : > { %v9556_v60 = vcombine.low %v24454_v36, %v24460_v54  ;;  %21289 = vmatpush1.bf16.msra.mxu0 %v21288_v47  ;;  %14673 = vmatprep.mubr.f32.mxu0 %v24418_v46  ;;  %v21304_v47 = vpack.c.bf16 %v14517_v62, %v14509_v5  ;;  %v14525_v36 = vld [vmem:[#allocation11 + $0x18b0] sm:$0xff]  ;;  %v21488_v61 = vpack.c.bf16 %v16789_v35, %v16781_v23  ;;  %v16797_v5 = vld [vmem:[#allocation11 + $0x1ea0] sm:$0xff] }
 0x86e   : > { %18216 = vmatmul.mubr.msk.f32.vlgmr.msra.gmra.mrb[178].mxu1 %vm5438_vm4, %v24438_v12  ;;  %21291 = vmatprep.subr.bf16.mxu0 %v21290_v33  ;;  %v16806_v33 = vld [vmem:[#allocation11 + $0x1ee8] sm:$0xff]  ;;  %v14533_v54 = vld [vmem:[#allocation11 + $0x18f0] sm:$0xff]  ;;  %v9548_v9 = vrot.slane %v25031_v37, %v23880_v58  ;;  %v16805_v50 = vld [vmem:[#allocation11 + $0x1ee0] sm:$0xff] }
 0x86f   : > { %v9511_v40 = vpop.f32.mrb[146].mxu0  ;;  %21473 = vmatpush1.bf16.msra.mxu1 %v21472_v59  ;;  %16876 = vmatprep.mubr.f32.mxu1 %v24418_v46  ;;  %v21306_v59 = vpack.c.bf16 %v14534_v56, %v14526_v10  ;;  %v21308_v62 = vpack.c.bf16 %v14533_v54, %v14525_v36  ;;  %v14884_v56 = vld [vmem:[#allocation11 + $0x1910] sm:$0xff]  ;;  %v17156_v23 = vld [vmem:[#allocation11 + $0x1f00] sm:$0xff]  ;;  %v14909_v36 = vld [vmem:[#allocation11 + $0x19d8] sm:$0xff] }
 0x870   : > { %v9513_v29 = vpop.f32.mrb[147].mxu0  ;;  %21475 = vmatprep.subr.bf16.mxu1 %v21474_v17  ;;  %v16791_v28 = vld [vmem:[#allocation11 + $0x1e70] sm:$0xff] }
 0x871   : > { %v9527_v27 = vcombine.low %v9511_v40, %v9513_v29  ;;  %v24472_v45 = vpop.f32.mrb[126].mxu1  ;;  %21293 = vmatpush1.bf16.msra.mxu0 %v21292_v26  ;;  %v14885_v26 = vld [vmem:[#allocation11 + $0x1918] sm:$0xff]  ;;  %v17157_v40 = vld [vmem:[#allocation11 + $0x1f08] sm:$0xff]  ;;  %v14892_v29 = vld [vmem:[#allocation11 + $0x1950] sm:$0xff] }
 0x872   : > { %v24474_v55 = vpop.f32.mrb[127].mxu1  ;;  %21303 = vmatprep.subr.bf16.mxu0 %v21302_v13  ;;  %v21490_v13 = vpack.c.bf16 %v16806_v33, %v16798_v11  ;;  %v21318_v10 = vpack.c.bf16 %v14893_v8, %v14885_v26  ;;  %v17164_v11 = vld [vmem:[#allocation11 + $0x1f40] sm:$0xff]  ;;  %v14901_v33 = vld [vmem:[#allocation11 + $0x1998] sm:$0xff]  ;;  %v21320_v26 = vpack.c.bf16 %v14892_v29, %v14884_v56  ;;  %v17181_v8 = vld [vmem:[#allocation11 + $0x1fc8] sm:$0xff] }
 0x873   : > { %v9555_v17 = vrot.slane %v9527_v27, %v23880_v58  ;;  %21477 = vmatpush1.bf16.msra.mxu1 %v21476_v48  ;;  %v17165_v48 = vld [vmem:[#allocation11 + $0x1f48] sm:$0xff]  ;;  %v14897_v29 = vld [vmem:[#allocation11 + $0x1978] sm:$0xff] }
 0x874   : > { %18195 = vmatmul.mubr.msk.f32.vlgmr.msra.gmra.mrb[200].mxu0 %vm5438_vm4, %v24194_v52  ;;  %21487 = vmatprep.subr.bf16.mxu1 %v21486_v18  ;;  %v9564_v18 = vrot.slane %v9556_v60, %v23880_v58  ;;  %v21502_v37 = vpack.c.bf16 %v17165_v48, %v17157_v40  ;;  %v17173_v60 = vld [vmem:[#allocation11 + $0x1f88] sm:$0xff] }
 0x875   : > { %v9557_v32 = vcombine.low %v9548_v9, %v9555_v17  ;;  %21305 = vmatpush1.bf16.msra.mxu0 %v21304_v47  ;;  %14815 = vmatprep.mubr.f32.mxu0 %v24418_v46  ;;  %v21492_v47 = vpack.c.bf16 %v16805_v50, %v16797_v5  ;;  %v21322_v5 = vpack.c.bf16 %v14909_v36, %v14901_v33  ;;  %v14900_v50 = vld [vmem:[#allocation11 + $0x1990] sm:$0xff] }
 0x876   : > { %18218 = vmatmul.mubr.msk.f32.vlgmr.msra.gmra.mrb[180].mxu1 %vm5438_vm4, %v24486_v25  ;;  %21307 = vmatprep.subr.bf16.mxu0 %v21306_v59  ;;  %v14896_v33 = vld [vmem:[#allocation11 + $0x1970] sm:$0xff] }
 0x877   : > { %v9571_v35 = vrot.slane %v9557_v32, %v23880_v58  ;;  %v9748_v27 = vpop.f32.mrb[148].mxu0  ;;  %21489 = vmatpush1.bf16.msra.mxu1 %v21488_v61  ;;  %17018 = vmatprep.mubr.f32.mxu1 %v24418_v46  ;;  %v21504_v61 = vpack.c.bf16 %v17164_v11, %v17156_v23  ;;  %v21506_v23 = vpack.c.bf16 %v17181_v8, %v17173_v60  ;;  %v14888_v11 = vld [vmem:[#allocation11 + $0x1930] sm:$0xff]  ;;  %v17168_v60 = vld [vmem:[#allocation11 + $0x1f60] sm:$0xff] }
 0x878   : > { %v9750_v54 = vpop.f32.mrb[149].mxu0  ;;  %21491 = vmatprep.subr.bf16.mxu1 %v21490_v13  ;;  %v25032_v13 = vcombine.low %v24204_v6, %v24206_v22  ;;  %v17172_v6 = vld [vmem:[#allocation11 + $0x1f80] sm:$0xff] }
 0x879   : > { %v9572_v59 = vcombine.low %v9564_v18, %v9571_v35  ;;  %v9904_v9 = vcombine.low %v9748_v27, %v9750_v54  ;;  %v24494_v17 = vpop.f32.mrb[128].mxu1  ;;  %21309 = vmatpush1.bf16.msra.mxu0 %v21308_v62  ;;  %v17180_v22 = vld [vmem:[#allocation11 + $0x1fc0] sm:$0xff]  ;;  %v21324_v18 = vpack.c.bf16 %v14908_v42, %v14900_v50  ;;  %v17161_v35 = vld [vmem:[#allocation11 + $0x1f28] sm:$0xff] }
 0x87a   : > { %v24496_v32 = vpop.f32.mrb[129].mxu1  ;;  %21319 = vmatprep.subr.bf16.mxu0 %v21318_v10  ;;  %v24502_v40 = vrot.slane %v25032_v13, %v23880_v58  ;;  %v14889_v10 = vld [vmem:[#allocation11 + $0x1938] sm:$0xff]  ;;  %v17169_v27 = vld [vmem:[#allocation11 + $0x1f68] sm:$0xff]  ;;  %v21508_v54 = vpack.c.bf16 %v17180_v22, %v17172_v6 }
 0x87b   : > { %v24505_v48 = vadd.f32 %v9572_v59, %v24457_v7  ;;  %v24508_v62 = vrot.slane %v9904_v9, %v23880_v58  ;;  %v12177_v56 = vcombine.low %v24494_v17, %v24496_v32  ;;  %21493 = vmatpush1.bf16.msra.mxu1 %v21492_v47  ;;  %v21334_v47 = vpack.c.bf16 %v14897_v29, %v14889_v10  ;;  %v14913_v59 = vld [vmem:[#allocation11 + $0x19f8] sm:$0xff]  ;;  %v17177_v13 = vld [vmem:[#allocation11 + $0x1fa8] sm:$0xff]  ;;  %v14904_v10 = vld [vmem:[#allocation11 + $0x19b0] sm:$0xff] }
 0x87c   : > { %18197 = vmatmul.mubr.msk.f32.vlgmr.msra.gmra.mrb[202].mxu0 %vm5438_vm4, %v24194_v52  ;;  %21503 = vmatprep.subr.bf16.mxu1 %v21502_v37  ;;  %v14905_v37 = vld [vmem:[#allocation11 + $0x19b8] sm:$0xff]  ;;  %v21518_v42 = vpack.c.bf16 %v17169_v27, %v17161_v35  ;;  %v14912_v29 = vld [vmem:[#allocation11 + $0x19f0] sm:$0xff] }
 0x87d   : > { %v9935_v7 = vcombine.low %v24502_v40, %v24508_v62  ;;  %21321 = vmatpush1.bf16.msra.mxu0 %v21320_v26  ;;  %15052 = vmatprep.mubr.f32.mxu0 %v24418_v46  ;;  %v17160_v26 = vld [vmem:[#allocation11 + $0x1f20] sm:$0xff]  ;;  %v17185_v40 = vld [vmem:[#allocation11 + $0x1fe8] sm:$0xff]  ;;  %v15264_v27 = vld [vmem:[#allocation11 + $0x1a18] sm:$0xff] }
 0x87e   : > { %18220 = vmatmul.mubr.msk.f32.vlgmr.msra.gmra.mrb[182].mxu1 %vm5438_vm4, %v24486_v25  ;;  %21323 = vmatprep.subr.bf16.mxu0 %v21322_v5  ;;  %v21336_v5 = vpack.c.bf16 %v14896_v33, %v14888_v11  ;;  %v15272_v11 = vld [vmem:[#allocation11 + $0x1a58] sm:$0xff]  ;;  %v21522_v33 = vpack.c.bf16 %v17185_v40, %v17177_v13  ;;  %v17170_v17 = vld [vmem:[#allocation11 + $0x1f70] sm:$0xff] }
 0x87f   : > { %v9890_v36 = vpop.f32.mrb[150].mxu0  ;;  %21505 = vmatpush1.bf16.msra.mxu1 %v21504_v61  ;;  %17255 = vmatprep.mubr.f32.mxu1 %v24418_v46  ;;  %v21338_v61 = vpack.c.bf16 %v14913_v59, %v14905_v37  ;;  %v21340_v37 = vpack.c.bf16 %v14912_v29, %v14904_v10  ;;  %v15263_v59 = vld [vmem:[#allocation11 + $0x1a10] sm:$0xff] }
 0x880   : > { %v9892_v9 = vpop.f32.mrb[151].mxu0  ;;  %21507 = vmatprep.subr.bf16.mxu1 %v21506_v23  ;;  %v25033_v23 = vcombine.low %v24230_v38, %v24232_v34  ;;  %v17184_v38 = vld [vmem:[#allocation11 + $0x1fe0] sm:$0xff] }
 0x881   : > { %v9906_v8 = vcombine.low %v9890_v36, %v9892_v9  ;;  %v24520_v50 = vpop.f32.mrb[130].mxu1  ;;  %21325 = vmatpush1.bf16.msra.mxu0 %v21324_v18  ;;  %v21520_v18 = vpack.c.bf16 %v17168_v60, %v17160_v26  ;;  %v17176_v36 = vld [vmem:[#allocation11 + $0x1fa0] sm:$0xff]  ;;  %v15271_v9 = vld [vmem:[#allocation11 + $0x1a50] sm:$0xff]  ;;  %v9943_v26 = vrot.slane %v9935_v7, %v23880_v58 }
 0x882   : > { %v24522_v62 = vpop.f32.mrb[131].mxu1  ;;  %21335 = vmatprep.subr.bf16.mxu0 %v21334_v47  ;;  %v9927_v6 = vrot.slane %v25033_v23, %v23880_v58  ;;  %v24534_v47 = vrot.slane %v24194_v52, 7  ;;  %v21524_v60 = vpack.c.bf16 %v17184_v38, %v17176_v36  ;;  %v15268_v38 = vld [vmem:[#allocation11 + $0x1a38] sm:$0xff] }
 0x883   : > { %v9934_v22 = vrot.slane %v9906_v8, %v23880_v58  ;;  %v12179_v35 = vcombine.low %v24520_v50, %v24522_v62  ;;  %21509 = vmatpush1.bf16.msra.mxu1 %v21508_v54  ;;  %v21350_v54 = vpack.c.bf16 %v15272_v11, %v15264_v27  ;;  %v15280_v8 = vld [vmem:[#allocation11 + $0x1a98] sm:$0xff] }
 0x884   : > { %18199 = vmatmul.mubr.msk.f32.vlgmr.msra.gmra.mrb[204].mxu0 %vm5438_vm4, %v24244_v30  ;;  %21519 = vmatprep.subr.bf16.mxu1 %v21518_v42 }
 0x885   : > { %v9936_v34 = vcombine.low %v9927_v6, %v9934_v22  ;;  %21337 = vmatpush1.bf16.msra.mxu0 %v21336_v5  ;;  %15194 = vmatprep.mubr.f32.mxu0 %v24418_v46  ;;  %v15288_v5 = vld [vmem:[#allocation11 + $0x1ad8] sm:$0xff]  ;;  %v15279_v6 = vld [vmem:[#allocation11 + $0x1a90] sm:$0xff] }
 0x886   : > { %18222 = vmatmul.mubr.msk.f32.vlgmr.msra.gmra.mrb[184].mxu1 %vm5438_vm4, %v24534_v47  ;;  %21339 = vmatprep.subr.bf16.mxu0 %v21338_v61  ;;  %v21352_v61 = vpack.c.bf16 %v15271_v9, %v15263_v59  ;;  %v21354_v7 = vpack.c.bf16 %v15288_v5, %v15280_v8  ;;  %v15287_v22 = vld [vmem:[#allocation11 + $0x1ad0] sm:$0xff]  ;;  %v15284_v9 = vld [vmem:[#allocation11 + $0x1ab8] sm:$0xff] }
 0x887   : > { %v9950_v52 = vrot.slane %v9936_v34, %v23880_v58  ;;  %v10127_v42 = vpop.f32.mrb[152].mxu0  ;;  %21521 = vmatpush1.bf16.msra.mxu1 %v21520_v18  ;;  %17397 = vmatprep.mubr.f32.mxu1 %v24418_v46  ;;  %v25034_v18 = vcombine.low %v24252_v53, %v24254_v4  ;;  %v15276_v34 = vld [vmem:[#allocation11 + $0x1a78] sm:$0xff]  ;;  %v15267_v4 = vld [vmem:[#allocation11 + $0x1a30] sm:$0xff] }
 0x888   : > { %v10129_v13 = vpop.f32.mrb[153].mxu0  ;;  %21523 = vmatprep.subr.bf16.mxu1 %v21522_v33  ;;  %v21366_v53 = vpack.c.bf16 %v15276_v34, %v15268_v38  ;;  %v15642_v34 = vld [vmem:[#allocation11 + $0x1b10] sm:$0xff] }
 0x889   : > { %v9951_v40 = vcombine.low %v9943_v26, %v9950_v52  ;;  %v10283_v10 = vcombine.low %v10127_v42, %v10129_v13  ;;  %v24542_v29 = vpop.f32.mrb[132].mxu1  ;;  %21341 = vmatpush1.bf16.msra.mxu0 %v21340_v37  ;;  %v10292_v27 = vrot.slane %v25034_v18, %v23880_v58  ;;  %v15292_v26 = vld [vmem:[#allocation11 + $0x1af8] sm:$0xff]  ;;  %v15283_v13 = vld [vmem:[#allocation11 + $0x1ab0] sm:$0xff] }
 0x88a   : > { %v24544_v23 = vpop.f32.mrb[133].mxu1  ;;  %21351 = vmatprep.subr.bf16.mxu0 %v21350_v54  ;;  %v21356_v54 = vpack.c.bf16 %v15287_v22, %v15279_v6  ;;  %v21370_v5 = vpack.c.bf16 %v15292_v26, %v15284_v9  ;;  %v15643_v22 = vld [vmem:[#allocation11 + $0x1b18] sm:$0xff] }
 0x88b   : > { %v9953_v11 = vadd.f32 %v9951_v40, %v24505_v48  ;;  %v10299_v33 = vrot.slane %v10283_v10, %v23880_v58  ;;  %v12556_v36 = vcombine.low %v24542_v29, %v24544_v23  ;;  %21525 = vmatpush1.bf16.msra.mxu1 %v21524_v60  ;;  %v15275_v48 = vld [vmem:[#allocation11 + $0x1a70] sm:$0xff]  ;;  %v25035_v10 = vcombine.low %v24278_v49, %v24280_v24  ;;  %v15651_v18 = vld [vmem:[#allocation11 + $0x1b58] sm:$0xff] }
 0x88c   : > { %18201 = vmatmul.mubr.msk.f32.vlgmr.msra.gmra.mrb[206].mxu0 %vm5438_vm4, %v24244_v30  ;;  %v21368_v30 = vpack.c.bf16 %v15275_v48, %v15267_v4  ;;  %v15291_v40 = vld [vmem:[#allocation11 + $0x1af0] sm:$0xff]  ;;  %v21382_v38 = vpack.c.bf16 %v15651_v18, %v15643_v22  ;;  %v15659_v4 = vld [vmem:[#allocation11 + $0x1b98] sm:$0xff] }
 0x88d   : > { %v10314_v37 = vcombine.low %v10292_v27, %v10299_v33  ;;  %21353 = vmatpush1.bf16.msra.mxu0 %v21352_v61  ;;  %15431 = vmatprep.mubr.f32.mxu0 %v24418_v46  ;;  %v10306_v61 = vrot.slane %v25035_v10, %v23880_v58  ;;  %v21372_v33 = vpack.c.bf16 %v15291_v40, %v15283_v13  ;;  %v15650_v49 = vld [vmem:[#allocation11 + $0x1b50] sm:$0xff]  ;;  %v15667_v48 = vld [vmem:[#allocation11 + $0x1bd8] sm:$0xff] }
 0x88e   : > { %18224 = vmatmul.mubr.msk.f32.vlgmr.msra.gmra.mrb[186].mxu1 %vm5438_vm4, %v24534_v47  ;;  %21355 = vmatprep.subr.bf16.mxu0 %v21354_v7  ;;  %v15658_v13 = vld [vmem:[#allocation11 + $0x1b90] sm:$0xff]  ;;  %v15647_v18 = vld [vmem:[#allocation11 + $0x1b38] sm:$0xff] }
 0x88f   : > { %v10269_v59 = vpop.f32.mrb[154].mxu0  ;;  %v10322_v24 = vrot.slane %v10314_v37, %v23880_v58  ;;  %v15666_v40 = vld [vmem:[#allocation11 + $0x1bd0] sm:$0xff]  ;;  %v25036_v37 = vcombine.low %v24300_v51, %v24302_v0 }
 0x890   : > { %v10271_v52 = vpop.f32.mrb[155].mxu0  ;;  %v15646_v51 = vld [vmem:[#allocation11 + $0x1b30] sm:$0xff] }
 0x891   : > { %v10285_v42 = vcombine.low %v10269_v59, %v10271_v52  ;;  %v24559_v60 = vpop.f32.mrb[134].mxu1  ;;  %21357 = vmatpush1.bf16.msra.mxu0 %v21356_v54  ;;  %v10671_v10 = vrot.slane %v25036_v37, %v23880_v58  ;;  %v15654_v0 = vld [vmem:[#allocation11 + $0x1b70] sm:$0xff]  ;;  %v16022_v37 = vld [vmem:[#allocation11 + $0x1c18] sm:$0xff] }
 0x892   : > { %v24561_v8 = vpop.f32.mrb[135].mxu1  ;;  %21367 = vmatprep.subr.bf16.mxu0 %v21366_v53 }
 0x893   : > { %v10313_v7 = vrot.slane %v10285_v42, %v23880_v58  ;;  %v12558_v6 = vcombine.low %v24559_v60, %v24561_v8  ;;  %v21384_v42 = vpack.c.bf16 %v15650_v49, %v15642_v34  ;;  %v15663_v49 = vld [vmem:[#allocation11 + $0x1bb8] sm:$0xff] }
 0x894   : > { %18203 = vmatmul.mubr.msk.f32.vlgmr.msra.gmra.mrb[208].mxu0 %vm5438_vm4, %v24292_v3 }
 0x895   : > { %v10315_v27 = vcombine.low %v10306_v61, %v10313_v7  ;;  %21369 = vmatpush1.bf16.msra.mxu0 %v21368_v30  ;;  %15573 = vmatprep.mubr.f32.mxu0 %v24418_v46  ;;  %v12580_v29 = vrot.slane %v12558_v6, %v23880_v58 }
 0x896   : > { %21371 = vmatprep.subr.bf16.mxu0 %v21370_v5  ;;  %v21386_v5 = vpack.c.bf16 %v15667_v48, %v15659_v4  ;;  %v21400_v48 = vpack.c.bf16 %v15654_v0, %v15646_v51  ;;  %v16038_v0 = vld [vmem:[#allocation11 + $0x1c98] sm:$0xff] }
 0x897   : > { %v10329_v54 = vrot.slane %v10315_v27, %v23880_v58  ;;  %v10506_v53 = vpop.f32.mrb[156].mxu0  ;;  %v15655_v27 = vld [vmem:[#allocation11 + $0x1b78] sm:$0xff] }
 0x898   : > { %v10508_v59 = vpop.f32.mrb[157].mxu0  ;;  %v21398_v34 = vpack.c.bf16 %v15655_v27, %v15647_v18 }
 0x899   : > { %v10330_v9 = vcombine.low %v10322_v24, %v10329_v54  ;;  %v10662_v26 = vcombine.low %v10506_v53, %v10508_v59  ;;  %v24575_v52 = vpop.f32.mrb[136].mxu1  ;;  %21373 = vmatpush1.bf16.msra.mxu0 %v21372_v33  ;;  %v15671_v24 = vld [vmem:[#allocation11 + $0x1bf8] sm:$0xff] }
 0x89a   : > { %v24577_v30 = vpop.f32.mrb[137].mxu1  ;;  %21383 = vmatprep.subr.bf16.mxu0 %v21382_v38  ;;  %v21388_v38 = vpack.c.bf16 %v15666_v40, %v15658_v13 }
 0x89b   : > { %v10332_v61 = vadd.f32 %v10330_v9, %v9953_v11  ;;  %v10678_v7 = vrot.slane %v10662_v26, %v23880_v58  ;;  %v12935_v22 = vcombine.low %v24575_v52, %v24577_v30  ;;  %v15662_v9 = vld [vmem:[#allocation11 + $0x1bb0] sm:$0xff] }
 0x89c   : > { %18205 = vmatmul.mubr.msk.f32.vlgmr.msra.gmra.mrb[210].mxu0 %vm5438_vm4, %v24292_v3  ;;  %v21402_v3 = vpack.c.bf16 %v15671_v24, %v15663_v49  ;;  %v15670_v26 = vld [vmem:[#allocation11 + $0x1bf0] sm:$0xff] }
 0x89d   : > { %v10693_v33 = vcombine.low %v10671_v10, %v10678_v7  ;;  %21385 = vmatpush1.bf16.msra.mxu0 %v21384_v42  ;;  %15810 = vmatprep.mubr.f32.mxu0 %v24418_v46  ;;  %v25037_v42 = vcombine.low %v24326_v31, %v24328_v19  ;;  %v16030_v10 = vld [vmem:[#allocation11 + $0x1c58] sm:$0xff]  ;;  %v21404_v18 = vpack.c.bf16 %v15670_v26, %v15662_v9  ;;  %v16029_v31 = vld [vmem:[#allocation11 + $0x1c50] sm:$0xff] }
 0x89e   : > { %21387 = vmatprep.subr.bf16.mxu0 %v21386_v5  ;;  %v21414_v27 = vpack.c.bf16 %v16030_v10, %v16022_v37  ;;  %v16037_v26 = vld [vmem:[#allocation11 + $0x1c90] sm:$0xff]  ;;  %v16026_v10 = vld [vmem:[#allocation11 + $0x1c38] sm:$0xff]  ;;  %v12945_v60 = vrot.slane %v12935_v22, %v23880_v58 }
 0x89f   : > { %v10648_v11 = vpop.f32.mrb[158].mxu0  ;;  %v10685_v5 = vrot.slane %v25037_v42, %v23880_v58  ;;  %v10701_v19 = vrot.slane %v10693_v33, %v23880_v58  ;;  %v16045_v42 = vld [vmem:[#allocation11 + $0x1cd0] sm:$0xff]  ;;  %v11050_v33 = vrot.slane %v11040_v39, %v23880_v58 }
 0x8a0   : > { %v10650_v54 = vpop.f32.mrb[159].mxu0 }
 0x8a1   : > { %v10664_v53 = vcombine.low %v10648_v11, %v10650_v54  ;;  %v24589_v4 = vpop.f32.mrb[138].mxu1  ;;  %21389 = vmatpush1.bf16.msra.mxu0 %v21388_v38  ;;  %v16021_v38 = vld [vmem:[#allocation11 + $0x1c10] sm:$0xff]  ;;  %v16046_v11 = vld [vmem:[#allocation11 + $0x1cd8] sm:$0xff] }
 0x8a2   : > { %v24591_v59 = vpop.f32.mrb[139].mxu1  ;;  %21399 = vmatprep.subr.bf16.mxu0 %v21398_v34 }
 0x8a3   : > { %v10692_v13 = vrot.slane %v10664_v53, %v23880_v58  ;;  %v12937_v40 = vcombine.low %v24589_v4, %v24591_v59 }
 0x8a4   : > { %18207 = vmatmul.mubr.msk.f32.vlgmr.msra.gmra.mrb[212].mxu0 %vm5438_vm4, %v24340_v41 }
 0x8a5   : > { %v10694_v7 = vcombine.low %v10685_v5, %v10692_v13  ;;  %21401 = vmatpush1.bf16.msra.mxu0 %v21400_v48  ;;  %15952 = vmatprep.mubr.f32.mxu0 %v24418_v46  ;;  %v21416_v48 = vpack.c.bf16 %v16029_v31, %v16021_v38  ;;  %v16050_v31 = vld [vmem:[#allocation11 + $0x1cf8] sm:$0xff]  ;;  %v12959_v52 = vrot.slane %v12937_v40, %v23880_v58 }
 0x8a6   : > { %21403 = vmatprep.subr.bf16.mxu0 %v21402_v3  ;;  %v21418_v3 = vpack.c.bf16 %v16046_v11, %v16038_v0  ;;  %v21432_v0 = vpack.c.bf16 %v16033_v14, %v16025_v63  ;;  %v16417_v14 = vld [vmem:[#allocation11 + $0x1d98] sm:$0xff] }
 0x8a7   : > { %v10708_v34 = vrot.slane %v10694_v7, %v23880_v58  ;;  %v10885_v51 = vpop.f32.mrb[160].mxu0  ;;  %v16034_v7 = vld [vmem:[#allocation11 + $0x1c78] sm:$0xff] }
 0x8a8   : > { %v10887_v49 = vpop.f32.mrb[161].mxu0  ;;  %v21430_v38 = vpack.c.bf16 %v16034_v7, %v16026_v10 }
 0x8a9   : > { %v10709_v24 = vcombine.low %v10701_v19, %v10708_v34  ;;  %v11041_v54 = vcombine.low %v10885_v51, %v10887_v49  ;;  %v24605_v53 = vpop.f32.mrb[140].mxu1  ;;  %21405 = vmatpush1.bf16.msra.mxu0 %v21404_v18  ;;  %v16041_v49 = vld [vmem:[#allocation11 + $0x1cb0] sm:$0xff] }
 0x8aa   : > { %v24607_v9 = vpop.f32.mrb[141].mxu1  ;;  %21415 = vmatprep.subr.bf16.mxu0 %v21414_v27  ;;  %v21420_v27 = vpack.c.bf16 %v16045_v42, %v16037_v26  ;;  %v16401_v42 = vld [vmem:[#allocation11 + $0x1d18] sm:$0xff] }
 0x8ab   : > { %v10711_v5 = vadd.f32 %v10709_v24, %v10332_v61  ;;  %v11057_v13 = vrot.slane %v11041_v54, %v23880_v58  ;;  %v13314_v37 = vcombine.low %v24605_v53, %v24607_v9  ;;  %v16042_v61 = vld [vmem:[#allocation11 + $0x1cb8] sm:$0xff]  ;;  %v16049_v24 = vld [vmem:[#allocation11 + $0x1cf0] sm:$0xff]  ;;  %v25038_v54 = vcombine.low %v24374_v20, %v24376_v16 }
 0x8ac   : > { %18209 = vmatmul.mubr.msk.f32.vlgmr.msra.gmra.mrb[214].mxu0 %vm5438_vm4, %v24340_v41  ;;  %v21434_v41 = vpack.c.bf16 %v16050_v31, %v16042_v61  ;;  %v21436_v10 = vpack.c.bf16 %v16049_v24, %v16041_v49  ;;  %v16408_v20 = vld [vmem:[#allocation11 + $0x1d50] sm:$0xff] }
 0x8ad   : > { %v11072_v18 = vcombine.low %v11050_v33, %v11057_v13  ;;  %21417 = vmatpush1.bf16.msra.mxu0 %v21416_v48  ;;  %16189 = vmatprep.mubr.f32.mxu0 %v24418_v46  ;;  %v11064_v48 = vrot.slane %v25038_v54, %v23880_v58  ;;  %v16409_v33 = vld [vmem:[#allocation11 + $0x1d58] sm:$0xff]  ;;  %v16416_v24 = vld [vmem:[#allocation11 + $0x1d90] sm:$0xff]  ;;  %v13324_v4 = vrot.slane %v13314_v37, %v23880_v58 }
 0x8ae   : > { %21419 = vmatprep.subr.bf16.mxu0 %v21418_v3  ;;  %v21446_v7 = vpack.c.bf16 %v16409_v33, %v16401_v42  ;;  %v16424_v54 = vld [vmem:[#allocation11 + $0x1dd0] sm:$0xff] }
 0x8af   : > { %v11027_v39 = vpop.f32.mrb[162].mxu0  ;;  %v11080_v16 = vrot.slane %v11072_v18, %v23880_v58  ;;  %v25039_v18 = vcombine.low %v24396_v1, %v24398_v21  ;;  %v16404_v1 = vld [vmem:[#allocation11 + $0x1d30] sm:$0xff] }
 0x8b0   : > { %v11029_v19 = vpop.f32.mrb[163].mxu0  ;;  %v16412_v21 = vld [vmem:[#allocation11 + $0x1d70] sm:$0xff] }
 0x8b1   : > { %v11043_v34 = vcombine.low %v11027_v39, %v11029_v19  ;;  %v24619_v51 = vpop.f32.mrb[142].mxu1  ;;  %21421 = vmatpush1.bf16.msra.mxu0 %v21420_v27  ;;  %v16400_v27 = vld [vmem:[#allocation11 + $0x1d10] sm:$0xff]  ;;  %v16425_v39 = vld [vmem:[#allocation11 + $0x1dd8] sm:$0xff] }
 0x8b2   : > { %v24621_v11 = vpop.f32.mrb[143].mxu1  ;;  %21431 = vmatprep.subr.bf16.mxu0 %v21430_v38 }
 0x8b3   : > { %v11071_v3 = vrot.slane %v11043_v34, %v23880_v58  ;;  %v13316_v26 = vcombine.low %v24619_v51, %v24621_v11 }
 0x8b4   : > { %18211 = vmatmul.mubr.msk.f32.vlgmr.msra.gmra.mrb[216].mxu0 %vm5438_vm4, %v24388_v44 }
 0x8b5   : > { %v11073_v13 = vcombine.low %v11064_v48, %v11071_v3  ;;  %21433 = vmatpush1.bf16.msra.mxu0 %v21432_v0  ;;  %16331 = vmatprep.mubr.f32.mxu0 %v24418_v46  ;;  %v21448_v0 = vpack.c.bf16 %v16408_v20, %v16400_v27  ;;  %v11429_v48 = vrot.slane %v25039_v18, %v23880_v58 }
 0x8b6   : > { %21435 = vmatprep.subr.bf16.mxu0 %v21434_v41  ;;  %v21450_v41 = vpack.c.bf16 %v16425_v39, %v16417_v14  ;;  %v21452_v27 = vpack.c.bf16 %v16424_v54, %v16416_v24  ;;  %v13338_v53 = vrot.slane %v13316_v26, %v23880_v58 }
 0x8b7   : > { %v11087_v38 = vrot.slane %v11073_v13, %v23880_v58  ;;  %v11264_v63 = vpop.f32.mrb[164].mxu0  ;;  %v16405_v13 = vld [vmem:[#allocation11 + $0x1d38] sm:$0xff] }
 0x8b8   : > { %v11266_v61 = vpop.f32.mrb[165].mxu0 }
 0x8b9   : > { %v11088_v31 = vcombine.low %v11080_v16, %v11087_v38  ;;  %v11420_v19 = vcombine.low %v11264_v63, %v11266_v61  ;;  %v24635_v34 = vpop.f32.mrb[144].mxu1  ;;  %21437 = vmatpush1.bf16.msra.mxu0 %v21436_v10  ;;  %v16413_v10 = vld [vmem:[#allocation11 + $0x1d78] sm:$0xff]  ;;  %v21464_v61 = vpack.c.bf16 %v16412_v21, %v16404_v1 }
 0x8ba   : > { %v24637_v49 = vpop.f32.mrb[145].mxu1  ;;  %21447 = vmatprep.subr.bf16.mxu0 %v21446_v7  ;;  %v21462_v20 = vpack.c.bf16 %v16413_v10, %v16405_v13  ;;  %v16421_v16 = vld [vmem:[#allocation11 + $0x1db8] sm:$0xff] }
 0x8bb   : > { %v11090_v3 = vadd.f32 %v11088_v31, %v10711_v5  ;;  %v11436_v42 = vrot.slane %v11420_v19, %v23880_v58  ;;  %v13693_v33 = vcombine.low %v24635_v34, %v24637_v49  ;;  %v16429_v38 = vld [vmem:[#allocation11 + $0x1df8] sm:$0xff]  ;;  %v16420_v19 = vld [vmem:[#allocation11 + $0x1db0] sm:$0xff] }
 0x8bc   : > { %18213 = vmatmul.mubr.msk.f32.vlgmr.msra.gmra.mrb[218].mxu0 %vm5438_vm4, %v24388_v44  ;;  %v21466_v44 = vpack.c.bf16 %v16429_v38, %v16421_v16  ;;  %v16804_v16 = vld [vmem:[#allocation11 + $0x1ed8] sm:$0xff] }
 0x8bd   : > { %v11451_v7 = vcombine.low %v11429_v48, %v11436_v42  ;;  %21449 = vmatpush1.bf16.msra.mxu0 %v21448_v0  ;;  %16568 = vmatprep.mubr.f32.mxu0 %v24418_v46  ;;  %v16428_v0 = vld [vmem:[#allocation11 + $0x1df0] sm:$0xff]  ;;  %v16780_v48 = vld [vmem:[#allocation11 + $0x1e18] sm:$0xff]  ;;  %v13703_v51 = vrot.slane %v13693_v33, %v23880_v58 }
 0x8be   : > { %21451 = vmatprep.subr.bf16.mxu0 %v21450_v41  ;;  %v25040_v41 = vcombine.low %v24424_v15, %v24426_v43  ;;  %v16788_v42 = vld [vmem:[#allocation11 + $0x1e58] sm:$0xff]  ;;  %v21468_v10 = vpack.c.bf16 %v16428_v0, %v16420_v19  ;;  %v16787_v15 = vld [vmem:[#allocation11 + $0x1e50] sm:$0xff] }
 0x8bf   : > { %v11406_v5 = vpop.f32.mrb[166].mxu0  ;;  %v11459_v43 = vrot.slane %v11451_v7, %v23880_v58  ;;  %v16795_v0 = vld [vmem:[#allocation11 + $0x1e90] sm:$0xff]  ;;  %v11808_v7 = vrot.slane %v11798_v2, %v23880_v58 }
 0x8c0   : > { %v11408_v63 = vpop.f32.mrb[167].mxu0  ;;  %v11443_v24 = vrot.slane %v25040_v41, %v23880_v58 }
 0x8c1   : > { %v11422_v14 = vcombine.low %v11406_v5, %v11408_v63  ;;  %v24649_v39 = vpop.f32.mrb[146].mxu1  ;;  %21453 = vmatpush1.bf16.msra.mxu0 %v21452_v27  ;;  %v21478_v27 = vpack.c.bf16 %v16788_v42, %v16780_v48  ;;  %v16796_v5 = vld [vmem:[#allocation11 + $0x1e98] sm:$0xff] }
 0x8c2   : > { %v24651_v31 = vpop.f32.mrb[147].mxu1  ;;  %21463 = vmatprep.subr.bf16.mxu0 %v21462_v20  ;;  %v16779_v20 = vld [vmem:[#allocation11 + $0x1e10] sm:$0xff] }
 0x8c3   : > { %v11450_v54 = vrot.slane %v11422_v14, %v23880_v58  ;;  %v13695_v18 = vcombine.low %v24649_v39, %v24651_v31 }
 0x8c4   : > { %18215 = vmatmul.mubr.msk.f32.vlgmr.msra.gmra.mrb[220].mxu0 %vm5438_vm4, %v24438_v12 }
 0x8c5   : > { %v11452_v13 = vcombine.low %v11443_v24, %v11450_v54  ;;  %21465 = vmatpush1.bf16.msra.mxu0 %v21464_v61  ;;  %16710 = vmatprep.mubr.f32.mxu0 %v24418_v46  ;;  %v21480_v61 = vpack.c.bf16 %v16787_v15, %v16779_v20  ;;  %v16803_v24 = vld [vmem:[#allocation11 + $0x1ed0] sm:$0xff]  ;;  %v13717_v34 = vrot.slane %v13695_v18, %v23880_v58 }
 0x8c6   : > { %21467 = vmatprep.subr.bf16.mxu0 %v21466_v44  ;;  %v21482_v44 = vpack.c.bf16 %v16804_v16, %v16796_v5  ;;  %v21484_v20 = vpack.c.bf16 %v16803_v24, %v16795_v0  ;;  %v21496_v16 = vpack.c.bf16 %v16791_v28, %v16783_v57  ;;  %v17159_v24 = vld [vmem:[#allocation11 + $0x1f18] sm:$0xff] }
 0x8c7   : > { %v11466_v1 = vrot.slane %v11452_v13, %v23880_v58  ;;  %v11643_v21 = vpop.f32.mrb[168].mxu0  ;;  %v16784_v13 = vld [vmem:[#allocation11 + $0x1e38] sm:$0xff] }
 0x8c8   : > { %v11645_v38 = vpop.f32.mrb[169].mxu0 }
 0x8c9   : > { %v11467_v63 = vcombine.low %v11459_v43, %v11466_v1  ;;  %v11799_v14 = vcombine.low %v11643_v21, %v11645_v38  ;;  %v24665_v41 = vpop.f32.mrb[148].mxu1  ;;  %21469 = vmatpush1.bf16.msra.mxu0 %v21468_v10  ;;  %v16792_v10 = vld [vmem:[#allocation11 + $0x1e78] sm:$0xff] }
 0x8ca   : > { %v24667_v19 = vpop.f32.mrb[149].mxu1  ;;  %21479 = vmatprep.subr.bf16.mxu0 %v21478_v27  ;;  %v21494_v15 = vpack.c.bf16 %v16792_v10, %v16784_v13  ;;  %v16808_v43 = vld [vmem:[#allocation11 + $0x1ef8] sm:$0xff] }
 0x8cb   : > { %v11469_v54 = vadd.f32 %v11467_v63, %v11090_v3  ;;  %v11815_v48 = vrot.slane %v11799_v14, %v23880_v58  ;;  %v14072_v42 = vcombine.low %v24665_v41, %v24667_v19  ;;  %v16800_v3 = vld [vmem:[#allocation11 + $0x1eb8] sm:$0xff]  ;;  %v16799_v63 = vld [vmem:[#allocation11 + $0x1eb0] sm:$0xff] }
 0x8cc   : > { %18217 = vmatmul.mubr.msk.f32.vlgmr.msra.gmra.mrb[222].mxu0 %vm5438_vm4, %v24438_v12  ;;  %v21498_v12 = vpack.c.bf16 %v16808_v43, %v16800_v3  ;;  %v16807_v14 = vld [vmem:[#allocation11 + $0x1ef0] sm:$0xff]  ;;  %v21761_v10 = vld [vmem:[#allocation2] sm:$0xff] }
 0x8cd   : > { %v11830_v27 = vcombine.low %v11808_v7, %v11815_v48  ;;  %21481 = vmatpush1.bf16.msra.mxu0 %v21480_v61  ;;  %16947 = vmatprep.mubr.f32.mxu0 %v24418_v46  ;;  %v25041_v46 = vcombine.low %v24472_v45, %v24474_v55  ;;  %v17167_v7 = vld [vmem:[#allocation11 + $0x1f58] sm:$0xff]  ;;  %v21500_v13 = vpack.c.bf16 %v16807_v14, %v16799_v63  ;;  %v17166_v45 = vld [vmem:[#allocation11 + $0x1f50] sm:$0xff] }
 0x8ce   : > { %21483 = vmatprep.subr.bf16.mxu0 %v21482_v44  ;;  %v17183_v3 = vld [vmem:[#allocation11 + $0x1fd8] sm:$0xff]  ;;  %v17174_v14 = vld [vmem:[#allocation11 + $0x1f90] sm:$0xff]  ;;  %v14082_v39 = vrot.slane %v14072_v42, %v23880_v58 }
 0x8cf   : > { %v11785_v2 = vpop.f32.mrb[170].mxu0  ;;  %v11822_v61 = vrot.slane %v25041_v46, %v23880_v58  ;;  %v11838_v55 = vrot.slane %v11830_v27, %v23880_v58  ;;  %v12187_v27 = vrot.slane %v12177_v56, %v23880_v58  ;;  %v17179_v56 = vld [vmem:[#allocation11 + $0x1fb8] sm:$0xff] }
 0x8d0   : > { %v11787_v1 = vpop.f32.mrb[171].mxu0 }
 0x8d1   : > { %v11801_v21 = vcombine.low %v11785_v2, %v11787_v1  ;;  %v24679_v5 = vpop.f32.mrb[150].mxu1  ;;  %21485 = vmatpush1.bf16.msra.mxu0 %v21484_v20  ;;  %v21510_v20 = vpack.c.bf16 %v17167_v7, %v17159_v24  ;;  %v17175_v2 = vld [vmem:[#allocation11 + $0x1f98] sm:$0xff] }
 0x8d2   : > { %v24681_v38 = vpop.f32.mrb[151].mxu1  ;;  %21495 = vmatprep.subr.bf16.mxu0 %v21494_v15  ;;  %v17158_v15 = vld [vmem:[#allocation11 + $0x1f10] sm:$0xff] }
 0x8d3   : > { %v11829_v44 = vrot.slane %v11801_v21, %v23880_v58  ;;  %v14074_v0 = vcombine.low %v24679_v5, %v24681_v38 }
 0x8d4   : > { %18219 = vmatmul.mubr.msk.f32.vlgmr.msra.gmra.mrb[224].mxu0 %vm5438_vm4, %v24486_v25 }
 0x8d5   : > { %v11831_v48 = vcombine.low %v11822_v61, %v11829_v44  ;;  %21497 = vmatpush1.bf16.msra.mxu0 %v21496_v16  ;;  %17089 = vmatprep.mubr.f32.mxu0 %v21761_v10  ;;  %v21512_v16 = vpack.c.bf16 %v17166_v45, %v17158_v15  ;;  %v17182_v61 = vld [vmem:[#allocation11 + $0x1fd0] sm:$0xff]  ;;  %v14096_v41 = vrot.slane %v14074_v0, %v23880_v58 }
 0x8d6   : > { %21499 = vmatprep.subr.bf16.mxu0 %v21498_v12  ;;  %v21514_v12 = vpack.c.bf16 %v17183_v3, %v17175_v2  ;;  %v21516_v15 = vpack.c.bf16 %v17182_v61, %v17174_v14 }
 0x8d7   : > { %v11845_v57 = vrot.slane %v11831_v48, %v23880_v58  ;;  %v12022_v28 = vpop.f32.mrb[172].mxu0  ;;  %v17163_v48 = vld [vmem:[#allocation11 + $0x1f38] sm:$0xff] }
 0x8d8   : > { %v12024_v43 = vpop.f32.mrb[173].mxu0 }
 0x8d9   : > { %v11846_v1 = vcombine.low %v11838_v55, %v11845_v57  ;;  %v12178_v21 = vcombine.low %v12022_v28, %v12024_v43  ;;  %v24694_v46 = vpop.f32.mrb[152].mxu1  ;;  %21501 = vmatpush1.bf16.msra.mxu0 %v21500_v13  ;;  %v17171_v13 = vld [vmem:[#allocation11 + $0x1f78] sm:$0xff]  ;;  %v17162_v55 = vld [vmem:[#allocation11 + $0x1f30] sm:$0xff] }
 0x8da   : > { %v24696_v63 = vpop.f32.mrb[153].mxu1  ;;  %21511 = vmatprep.subr.bf16.mxu0 %v21510_v20  ;;  %v21526_v45 = vpack.c.bf16 %v17171_v13, %v17163_v48  ;;  %v21528_v3 = vpack.c.bf16 %v17170_v17, %v17162_v55  ;;  %v12566_v55 = vrot.slane %v12556_v36, %v23880_v58 }
 0x8db   : > { %v11848_v44 = vadd.f32 %v11846_v1, %v11469_v54  ;;  %v12194_v24 = vrot.slane %v12178_v21, %v23880_v58  ;;  %v14451_v7 = vcombine.low %v24694_v46, %v24696_v63  ;;  %v17187_v54 = vld [vmem:[#allocation11 + $0x1ff8] sm:$0xff]  ;;  %v17178_v1 = vld [vmem:[#allocation11 + $0x1fb0] sm:$0xff] }
 0x8dc   : > { %18221 = vmatmul.mubr.msk.f32.vlgmr.msra.gmra.mrb[226].mxu0 %vm5438_vm4, %v24486_v25  ;;  %v21530_v25 = vpack.c.bf16 %v17187_v54, %v17179_v56  ;;  %v17186_v21 = vld [vmem:[#allocation11 + $0x1ff0] sm:$0xff] }
 0x8dd   : > { %v12209_v20 = vcombine.low %v12187_v27, %v12194_v24  ;;  %21513 = vmatpush1.bf16.msra.mxu0 %v21512_v16  ;;  %17326 = vmatprep.mubr.f32.mxu0 %v21761_v10  ;;  %v12201_v16 = vrot.slane %v12179_v35, %v23880_v58  ;;  %v21532_v27 = vpack.c.bf16 %v17186_v21, %v17178_v1 }
 0x8de   : > { %21515 = vmatprep.subr.bf16.mxu0 %v21514_v12  ;;  %v14461_v5 = vrot.slane %v14451_v7, %v23880_v58 }
 0x8df   : > { %v12164_v32 = vpop.f32.mrb[174].mxu0  ;;  %v12217_v24 = vrot.slane %v12209_v20, %v23880_v58 }
 0x8e0   : > { %v12166_v57 = vpop.f32.mrb[175].mxu0 }
 0x8e1   : > { %v12180_v28 = vcombine.low %v12164_v32, %v12166_v57  ;;  %v24707_v2 = vpop.f32.mrb[154].mxu1  ;;  %21517 = vmatpush1.bf16.msra.mxu0 %v21516_v15 }
 0x8e2   : > { %v24709_v43 = vpop.f32.mrb[155].mxu1  ;;  %21527 = vmatprep.subr.bf16.mxu0 %v21526_v45 }
 0x8e3   : > { %v12208_v12 = vrot.slane %v12180_v28, %v23880_v58  ;;  %v14453_v14 = vcombine.low %v24707_v2, %v24709_v43 }
 0x8e4   : > { %18223 = vmatmul.mubr.msk.f32.vlgmr.msra.gmra.mrb[228].mxu0 %vm5438_vm4, %v24534_v47 }
 0x8e5   : > { %v12210_v61 = vcombine.low %v12201_v16, %v12208_v12  ;;  %21529 = vmatpush1.bf16.msra.mxu0 %v21528_v3  ;;  %17468 = vmatprep.mubr.f32.mxu0 %v21761_v10  ;;  %v14475_v46 = vrot.slane %v14453_v14, %v23880_v58 }
 0x8e6   : > { %21531 = vmatprep.subr.bf16.mxu0 %v21530_v25 }
 0x8e7   : > { %v12224_v48 = vrot.slane %v12210_v61, %v23880_v58  ;;  %v12401_v13 = vpop.f32.mrb[176].mxu0 }
 0x8e8   : > { %v12403_v50 = vpop.f32.mrb[177].mxu0 }
 0x8e9   : > { %v12225_v62 = vcombine.low %v12217_v24, %v12224_v48  ;;  %v12557_v35 = vcombine.low %v12401_v13, %v12403_v50  ;;  %v24722_v15 = vpop.f32.mrb[156].mxu1  ;;  %21533 = vmatpush1.bf16.msra.mxu0 %v21532_v27 }
 0x8ea   : > { %v24724_v45 = vpop.f32.mrb[157].mxu1 }
 0x8eb   : > { %v12227_v10 = vadd.f32 %v12225_v62, %v11848_v44  ;;  %v12573_v17 = vrot.slane %v12557_v35, %v23880_v58  ;;  %v14830_v20 = vcombine.low %v24722_v15, %v24724_v45 }
 0x8ec   : > { %18225 = vmatmul.mubr.msk.f32.vlgmr.msra.gmra.mrb[230].mxu0 %vm5438_vm4, %v24534_v47 }
 0x8ed   : > { %v12588_v32 = vcombine.low %v12566_v55, %v12573_v17  ;;  %v14840_v2 = vrot.slane %v14830_v20, %v23880_v58 }
 0x8ef   : > { %v12543_v56 = vpop.f32.mrb[178].mxu0  ;;  %v12596_v47 = vrot.slane %v12588_v32, %v23880_v58 }
 0x8f0   : > { %v12545_v54 = vpop.f32.mrb[179].mxu0 }
 0x8f1   : > { %v12559_v57 = vcombine.low %v12543_v56, %v12545_v54  ;;  %v24735_v28 = vpop.f32.mrb[158].mxu1 }
 0x8f2   : > { %v24737_v3 = vpop.f32.mrb[159].mxu1 }
 0x8f3   : > { %v12587_v23 = vrot.slane %v12559_v57, %v23880_v58  ;;  %v14832_v36 = vcombine.low %v24735_v28, %v24737_v3 }
 0x8f5   : > { %v12589_v44 = vcombine.low %v12580_v29, %v12587_v23  ;;  %v14854_v15 = vrot.slane %v14832_v36, %v23880_v58 }
 0x8f7   : > { %v12603_v25 = vrot.slane %v12589_v44, %v23880_v58  ;;  %v12780_v1 = vpop.f32.mrb[180].mxu0 }
 0x8f8   : > { %v12782_v21 = vpop.f32.mrb[181].mxu0 }
 0x8f9   : > { %v12604_v16 = vcombine.low %v12596_v47, %v12603_v25  ;;  %v12936_v12 = vcombine.low %v12780_v1, %v12782_v21  ;;  %v24748_v61 = vpop.f32.mrb[160].mxu1 }
 0x8fa   : > { %v24750_v27 = vpop.f32.mrb[161].mxu1 }
 0x8fb   : > { %v12606_v8 = vadd.f32 %v12604_v16, %v12227_v10  ;;  %v12952_v6 = vrot.slane %v12936_v12, %v23880_v58  ;;  %v15209_v24 = vcombine.low %v24748_v61, %v24750_v27 }
 0x8fd   : > { %v12967_v48 = vcombine.low %v12945_v60, %v12952_v6  ;;  %v15219_v28 = vrot.slane %v15209_v24, %v23880_v58 }
 0x8ff   : > { %v12922_v13 = vpop.f32.mrb[182].mxu0  ;;  %v12975_v17 = vrot.slane %v12967_v48, %v23880_v58 }
 0x900   : > { %v12924_v50 = vpop.f32.mrb[183].mxu0 }
 0x901   : > { %v12938_v62 = vcombine.low %v12922_v13, %v12924_v50  ;;  %v24759_v35 = vpop.f32.mrb[162].mxu1 }
 0x902   : > { %v24761_v55 = vpop.f32.mrb[163].mxu1 }
 0x903   : > { %v12966_v30 = vrot.slane %v12938_v62, %v23880_v58  ;;  %v15211_v22 = vcombine.low %v24759_v35, %v24761_v55 }
 0x905   : > { %v12968_v10 = vcombine.low %v12959_v52, %v12966_v30  ;;  %v15233_v61 = vrot.slane %v15211_v22, %v23880_v58 }
 0x907   : > { %v12982_v32 = vrot.slane %v12968_v10, %v23880_v58  ;;  %v13159_v56 = vpop.f32.mrb[184].mxu0 }
 0x908   : > { %v13161_v54 = vpop.f32.mrb[185].mxu0 }
 0x909   : > { %v12983_v57 = vcombine.low %v12975_v17, %v12982_v32  ;;  %v13315_v29 = vcombine.low %v13159_v56, %v13161_v54  ;;  %v24772_v23 = vpop.f32.mrb[164].mxu1 }
 0x90a   : > { %v24774_v44 = vpop.f32.mrb[165].mxu1 }
 0x90b   : > { %v12985_v59 = vadd.f32 %v12983_v57, %v12606_v8  ;;  %v13331_v40 = vrot.slane %v13315_v29, %v23880_v58  ;;  %v15588_v47 = vcombine.low %v24772_v23, %v24774_v44 }
 0x90d   : > { %v13346_v25 = vcombine.low %v13324_v4, %v13331_v40  ;;  %v15598_v35 = vrot.slane %v15588_v47, %v23880_v58 }
 0x90f   : > { %v13301_v1 = vpop.f32.mrb[186].mxu0  ;;  %v13354_v6 = vrot.slane %v13346_v25, %v23880_v58 }
 0x910   : > { %v13303_v21 = vpop.f32.mrb[187].mxu0 }
 0x911   : > { %v13317_v16 = vcombine.low %v13301_v1, %v13303_v21  ;;  %v24783_v12 = vpop.f32.mrb[166].mxu1 }
 0x912   : > { %v24785_v60 = vpop.f32.mrb[167].mxu1 }
 0x913   : > { %v13345_v9 = vrot.slane %v13317_v16, %v23880_v58  ;;  %v15590_v37 = vcombine.low %v24783_v12, %v24785_v60 }
 0x915   : > { %v13347_v8 = vcombine.low %v13338_v53, %v13345_v9 }
 0x917   : > { %v13361_v48 = vrot.slane %v13347_v8, %v23880_v58  ;;  %v13538_v13 = vpop.f32.mrb[188].mxu0 }
 0x918   : > { %v13540_v50 = vpop.f32.mrb[189].mxu0 }
 0x919   : > { %v13362_v62 = vcombine.low %v13354_v6, %v13361_v48  ;;  %v13694_v52 = vcombine.low %v13538_v13, %v13540_v50  ;;  %v24796_v30 = vpop.f32.mrb[168].mxu1 }
 0x91a   : > { %v24798_v10 = vpop.f32.mrb[169].mxu1 }
 0x91b   : > { %v13364_v11 = vadd.f32 %v13362_v62, %v12985_v59  ;;  %v13710_v26 = vrot.slane %v13694_v52, %v23880_v58  ;;  %v15967_v17 = vcombine.low %v24796_v30, %v24798_v10 }
 0x91d   : > { %v13725_v32 = vcombine.low %v13703_v51, %v13710_v26 }
 0x91f   : > { %v13680_v56 = vpop.f32.mrb[190].mxu0  ;;  %v13733_v40 = vrot.slane %v13725_v32, %v23880_v58 }
 0x920   : > { %v13682_v54 = vpop.f32.mrb[191].mxu0 }
 0x921   : > { %v13696_v57 = vcombine.low %v13680_v56, %v13682_v54  ;;  %v24807_v29 = vpop.f32.mrb[170].mxu1 }
 0x922   : > { %v24809_v4 = vpop.f32.mrb[171].mxu1 }
 0x923   : > { %v13724_v49 = vrot.slane %v13696_v57, %v23880_v58  ;;  %v15969_v33 = vcombine.low %v24807_v29, %v24809_v4 }
 0x925   : > { %v13726_v59 = vcombine.low %v13717_v34, %v13724_v49 }
 0x927   : > { %v13740_v25 = vrot.slane %v13726_v59, %v23880_v58  ;;  %v13917_v1 = vpop.f32.mrb[192].mxu0 }
 0x928   : > { %v13919_v21 = vpop.f32.mrb[193].mxu0 }
 0x929   : > { %v13741_v16 = vcombine.low %v13733_v40, %v13740_v25  ;;  %v14073_v53 = vcombine.low %v13917_v1, %v13919_v21  ;;  %v24820_v9 = vpop.f32.mrb[172].mxu1 }
 0x92a   : > { %v24822_v8 = vpop.f32.mrb[173].mxu1 }
 0x92b   : > { %v13743_v31 = vadd.f32 %v13741_v16, %v13364_v11  ;;  %v14089_v18 = vrot.slane %v14073_v53, %v23880_v58  ;;  %v16346_v6 = vcombine.low %v24820_v9, %v24822_v8 }
 0x92d   : > { %v14104_v48 = vcombine.low %v14082_v39, %v14089_v18 }
 0x92f   : > { %v14059_v13 = vpop.f32.mrb[194].mxu0  ;;  %v14112_v26 = vrot.slane %v14104_v48, %v23880_v58 }
 0x930   : > { %v14061_v50 = vpop.f32.mrb[195].mxu0 }
 0x931   : > { %v14075_v62 = vcombine.low %v14059_v13, %v14061_v50  ;;  %v24831_v52 = vpop.f32.mrb[174].mxu1 }
 0x932   : > { %v24833_v51 = vpop.f32.mrb[175].mxu1 }
 0x933   : > { %v14103_v19 = vrot.slane %v14075_v62, %v23880_v58  ;;  %v16348_v42 = vcombine.low %v24831_v52, %v24833_v51 }
 0x935   : > { %v14105_v11 = vcombine.low %v14096_v41, %v14103_v19 }
 0x937   : > { %v14119_v32 = vrot.slane %v14105_v11, %v23880_v58  ;;  %v14296_v56 = vpop.f32.mrb[196].mxu0 }
 0x938   : > { %v14298_v54 = vpop.f32.mrb[197].mxu0 }
 0x939   : > { %v14120_v57 = vcombine.low %v14112_v26, %v14119_v32  ;;  %v14452_v34 = vcombine.low %v14296_v56, %v14298_v54  ;;  %v24844_v49 = vpop.f32.mrb[176].mxu1 }
 0x93a   : > { %v24846_v59 = vpop.f32.mrb[177].mxu1 }
 0x93b   : > { %v14122_v38 = vadd.f32 %v14120_v57, %v13743_v31  ;;  %v14468_v0 = vrot.slane %v14452_v34, %v23880_v58  ;;  %v16725_v40 = vcombine.low %v24844_v49, %v24846_v59 }
 0x93d   : > { %v14483_v25 = vcombine.low %v14461_v5, %v14468_v0 }
 0x93f   : > { %v14438_v1 = vpop.f32.mrb[198].mxu0  ;;  %v14491_v18 = vrot.slane %v14483_v25, %v23880_v58 }
 0x940   : > { %v14440_v21 = vpop.f32.mrb[199].mxu0 }
 0x941   : > { %v14454_v16 = vcombine.low %v14438_v1, %v14440_v21  ;;  %v24855_v53 = vpop.f32.mrb[178].mxu1 }
 0x942   : > { %v24857_v39 = vpop.f32.mrb[179].mxu1 }
 0x943   : > { %v14482_v63 = vrot.slane %v14454_v16, %v23880_v58  ;;  %v16727_v7 = vcombine.low %v24855_v53, %v24857_v39 }
 0x945   : > { %v14484_v31 = vcombine.low %v14475_v46, %v14482_v63 }
 0x947   : > { %v14498_v48 = vrot.slane %v14484_v31, %v23880_v58  ;;  %v14675_v13 = vpop.f32.mrb[200].mxu0 }
 0x948   : > { %v14677_v50 = vpop.f32.mrb[201].mxu0 }
 0x949   : > { %v14499_v62 = vcombine.low %v14491_v18, %v14498_v48  ;;  %v14831_v41 = vcombine.low %v14675_v13, %v14677_v50  ;;  %v24868_v19 = vpop.f32.mrb[180].mxu1 }
 0x94a   : > { %v24870_v11 = vpop.f32.mrb[181].mxu1 }
 0x94b   : > { %v14501_v43 = vadd.f32 %v14499_v62, %v14122_v38  ;;  %v14847_v14 = vrot.slane %v14831_v41, %v23880_v58  ;;  %v17104_v26 = vcombine.low %v24868_v19, %v24870_v11 }
 0x94d   : > { %v14862_v32 = vcombine.low %v14840_v2, %v14847_v14 }
 0x94f   : > { %v14817_v56 = vpop.f32.mrb[202].mxu0  ;;  %v14870_v0 = vrot.slane %v14862_v32, %v23880_v58 }
 0x950   : > { %v14819_v54 = vpop.f32.mrb[203].mxu0 }
 0x951   : > { %v14833_v57 = vcombine.low %v14817_v56, %v14819_v54  ;;  %v24879_v34 = vpop.f32.mrb[182].mxu1 }
 0x952   : > { %v24881_v5 = vpop.f32.mrb[183].mxu1 }
 0x953   : > { %v14861_v45 = vrot.slane %v14833_v57, %v23880_v58  ;;  %v17106_v20 = vcombine.low %v24879_v34, %v24881_v5 }
 0x955   : > { %v14863_v38 = vcombine.low %v14854_v15, %v14861_v45 }
 0x957   : > { %v14877_v25 = vrot.slane %v14863_v38, %v23880_v58  ;;  %v15054_v1 = vpop.f32.mrb[204].mxu0 }
 0x958   : > { %v15056_v21 = vpop.f32.mrb[205].mxu0 }
 0x959   : > { %v14878_v16 = vcombine.low %v14870_v0, %v14877_v25  ;;  %v15210_v46 = vcombine.low %v15054_v1, %v15056_v21  ;;  %v24892_v63 = vpop.f32.mrb[184].mxu1  ;;  %v15612_v1 = vrot.slane %v15590_v37, %v23880_v58 }
 0x95a   : > { %v24894_v31 = vpop.f32.mrb[185].mxu1 }
 0x95b   : > { %v14880_v3 = vadd.f32 %v14878_v16, %v14501_v43  ;;  %v15226_v36 = vrot.slane %v15210_v46, %v23880_v58  ;;  %v17483_v18 = vcombine.low %v24892_v63, %v24894_v31 }
 0x95d   : > { %v15241_v48 = vcombine.low %v15219_v28, %v15226_v36  ;;  %v15977_v36 = vrot.slane %v15967_v17, %v23880_v58 }
 0x95f   : > { %v15196_v13 = vpop.f32.mrb[206].mxu0  ;;  %v15249_v14 = vrot.slane %v15241_v48, %v23880_v58 }
 0x960   : > { %v15198_v50 = vpop.f32.mrb[207].mxu0 }
 0x961   : > { %v15212_v62 = vcombine.low %v15196_v13, %v15198_v50  ;;  %v24903_v41 = vpop.f32.mrb[186].mxu1 }
 0x962   : > { %v24905_v2 = vpop.f32.mrb[187].mxu1 }
 0x963   : > { %v15240_v27 = vrot.slane %v15212_v62, %v23880_v58  ;;  %v17485_v24 = vcombine.low %v24903_v41, %v24905_v2  ;;  %v15991_v62 = vrot.slane %v15969_v33, %v23880_v58 }
 0x965   : > { %v15242_v43 = vcombine.low %v15233_v61, %v15240_v27 }
 0x967   : > { %v15256_v32 = vrot.slane %v15242_v43, %v23880_v58  ;;  %v15433_v56 = vpop.f32.mrb[208].mxu0 }
 0x968   : > { %v15435_v54 = vpop.f32.mrb[209].mxu0 }
 0x969   : > { %v15257_v57 = vcombine.low %v15249_v14, %v15256_v32  ;;  %v15589_v15 = vcombine.low %v15433_v56, %v15435_v54  ;;  %v16356_v56 = vrot.slane %v16346_v6, %v23880_v58 }
 0x96b   : > { %v15259_v55 = vadd.f32 %v15257_v57, %v14880_v3  ;;  %v15605_v22 = vrot.slane %v15589_v15, %v23880_v58 }
 0x96d   : > { %v15620_v45 = vcombine.low %v15598_v35, %v15605_v22  ;;  %v16370_v35 = vrot.slane %v16348_v42, %v23880_v58 }
 0x96f   : > { %v15575_v38 = vpop.f32.mrb[210].mxu0  ;;  %v15628_v46 = vrot.slane %v15620_v45, %v23880_v58 }
 0x970   : > { %v15577_v0 = vpop.f32.mrb[211].mxu0 }
 0x971   : > { %v15591_v25 = vcombine.low %v15575_v38, %v15577_v0 }
 0x973   : > { %v15619_v21 = vrot.slane %v15591_v25, %v23880_v58  ;;  %v16735_v25 = vrot.slane %v16725_v40, %v23880_v58 }
 0x975   : > { %v15621_v16 = vcombine.low %v15612_v1, %v15619_v21 }
 0x977   : > { %v15635_v23 = vrot.slane %v15621_v16, %v23880_v58  ;;  %v15812_v44 = vpop.f32.mrb[212].mxu0 }
 0x978   : > { %v15814_v47 = vpop.f32.mrb[213].mxu0 }
 0x979   : > { %v15636_v28 = vcombine.low %v15628_v46, %v15635_v23  ;;  %v15968_v3 = vcombine.low %v15812_v44, %v15814_v47  ;;  %v16749_v46 = vrot.slane %v16727_v7, %v23880_v58 }
 0x97b   : > { %v15638_v48 = vadd.f32 %v15636_v28, %v15259_v55  ;;  %v15984_v12 = vrot.slane %v15968_v3, %v23880_v58 }
 0x97d   : > { %v15999_v60 = vcombine.low %v15977_v36, %v15984_v12  ;;  %v17114_v36 = vrot.slane %v17104_v26, %v23880_v58 }
 0x97f   : > { %v15954_v37 = vpop.f32.mrb[214].mxu0  ;;  %v16007_v43 = vrot.slane %v15999_v60, %v23880_v58 }
 0x980   : > { %v15956_v13 = vpop.f32.mrb[215].mxu0 }
 0x981   : > { %v15970_v50 = vcombine.low %v15954_v37, %v15956_v13  ;;  %v17128_v37 = vrot.slane %v17106_v20, %v23880_v58 }
 0x983   : > { %v15998_v61 = vrot.slane %v15970_v50, %v23880_v58 }
 0x985   : > { %v16000_v27 = vcombine.low %v15991_v62, %v15998_v61 }
 0x987   : > { %v16014_v30 = vrot.slane %v16000_v27, %v23880_v58  ;;  %v16191_v10 = vpop.f32.mrb[216].mxu0 }
 0x988   : > { %v16193_v17 = vpop.f32.mrb[217].mxu0 }
 0x989   : > { %v16015_v14 = vcombine.low %v16007_v43, %v16014_v30  ;;  %v16347_v32 = vcombine.low %v16191_v10, %v16193_v17  ;;  %v17493_v43 = vrot.slane %v17483_v18, %v23880_v58 }
 0x98b   : > { %v16017_v54 = vadd.f32 %v16015_v14, %v15638_v48  ;;  %v16363_v29 = vrot.slane %v16347_v32, %v23880_v58  ;;  %v17507_v14 = vrot.slane %v17485_v24, %v23880_v58 }
 0x98d   : > { %v16378_v4 = vcombine.low %v16356_v56, %v16363_v29 }
 0x98f   : > { %v16333_v33 = vpop.f32.mrb[218].mxu0  ;;  %v16386_v45 = vrot.slane %v16378_v4, %v23880_v58 }
 0x990   : > { %v16335_v57 = vpop.f32.mrb[219].mxu0 }
 0x991   : > { %v16349_v15 = vcombine.low %v16333_v33, %v16335_v57 }
 0x993   : > { %v16377_v55 = vrot.slane %v16349_v15, %v23880_v58 }
 0x995   : > { %v16379_v22 = vcombine.low %v16370_v35, %v16377_v55 }
 0x997   : > { %v16393_v9 = vrot.slane %v16379_v22, %v23880_v58  ;;  %v16570_v8 = vpop.f32.mrb[220].mxu0 }
 0x998   : > { %v16572_v6 = vpop.f32.mrb[221].mxu0 }
 0x999   : > { %v16394_v38 = vcombine.low %v16386_v45, %v16393_v9  ;;  %v16726_v0 = vcombine.low %v16570_v8, %v16572_v6 }
 0x99b   : > { %v16396_v1 = vadd.f32 %v16394_v38, %v16017_v54  ;;  %v16742_v52 = vrot.slane %v16726_v0, %v23880_v58 }
 0x99d   : > { %v16757_v51 = vcombine.low %v16735_v25, %v16742_v52 }
 0x99f   : > { %v16712_v42 = vpop.f32.mrb[222].mxu0  ;;  %v16765_v47 = vrot.slane %v16757_v51, %v23880_v58 }
 0x9a0   : > { %v16714_v21 = vpop.f32.mrb[223].mxu0 }
 0x9a1   : > { %v16728_v16 = vcombine.low %v16712_v42, %v16714_v21 }
 0x9a3   : > { %v16756_v23 = vrot.slane %v16728_v16, %v23880_v58 }
 0x9a5   : > { %v16758_v44 = vcombine.low %v16749_v46, %v16756_v23 }
 0x9a7   : > { %v16772_v49 = vrot.slane %v16758_v44, %v23880_v58  ;;  %v16949_v59 = vpop.f32.mrb[224].mxu0 }
 0x9a8   : > { %v16951_v40 = vpop.f32.mrb[225].mxu0 }
 0x9a9   : > { %v16773_v28 = vcombine.low %v16765_v47, %v16772_v49  ;;  %v17105_v3 = vcombine.low %v16949_v59, %v16951_v40 }
 0x9ab   : > { %v16775_v48 = vadd.f32 %v16773_v28, %v16396_v1  ;;  %v17121_v53 = vrot.slane %v17105_v3, %v23880_v58 }
 0x9ad   : > { %v17136_v39 = vcombine.low %v17114_v36, %v17121_v53 }
 0x9af   : > { %v17091_v7 = vpop.f32.mrb[226].mxu0  ;;  %v17144_v62 = vrot.slane %v17136_v39, %v23880_v58 }
 0x9b0   : > { %v17093_v12 = vpop.f32.mrb[227].mxu0 }
 0x9b1   : > { %v17107_v60 = vcombine.low %v17091_v7, %v17093_v12 }
 0x9b3   : > { %v17135_v13 = vrot.slane %v17107_v60, %v23880_v58 }
 0x9b5   : > { %v17137_v50 = vcombine.low %v17128_v37, %v17135_v13 }
 0x9b7   : > { %v17151_v19 = vrot.slane %v17137_v50, %v23880_v58  ;;  %v17328_v11 = vpop.f32.mrb[228].mxu0 }
 0x9b8   : > { %v17330_v26 = vpop.f32.mrb[229].mxu0 }
 0x9b9   : > { %v17152_v61 = vcombine.low %v17144_v62, %v17151_v19  ;;  %v17484_v27 = vcombine.low %v17328_v11, %v17330_v26 }
 0x9bb   : > { %v17154_v30 = vadd.f32 %v17152_v61, %v16775_v48  ;;  %v17500_v34 = vrot.slane %v17484_v27, %v23880_v58 }
 0x9bd   : > { %v17515_v5 = vcombine.low %v17493_v43, %v17500_v34 }
 0x9bf   : > { %v17470_v20 = vpop.f32.mrb[230].mxu0  ;;  %v17523_v54 = vrot.slane %v17515_v5, %v23880_v58 }
 0x9c0   : > { %v17472_v10 = vpop.f32.mrb[231].mxu0 }
 0x9c1   : > { %v17486_v17 = vcombine.low %v17470_v20, %v17472_v10 }
 0x9c3   : > { %v17514_v32 = vrot.slane %v17486_v17, %v23880_v58 }
 0x9c5   : > { %v17516_v56 = vcombine.low %v17507_v14, %v17514_v32 }
 0x9c7   : > { %v17530_v63 = vrot.slane %v17516_v56, %v23880_v58 }
 0x9c9   : > { %v17531_v31 = vcombine.low %v17523_v54, %v17530_v63 }
 0x9cb   : > { %v17533_v18 = vadd.f32 %v17531_v31, %v17154_v30 }
 0x9cd   : > { %17534 = vst [vmem:[%s410_s26] sm:$0xff] %v17533_v18 }
 0x9ce PF: > { %s23_s30 = sadd.s32 1, %s21952_s30  }
 0x9cf   : > { %p20_p9 = scmp.ge.s32.totalorder %s23_s30, 4  }
 0x9d1   :  { %22 = sbr.rel (!%p20_p9) target bundleno = 4 (0x4), region = 172 }
 0x9d8   :  { %17554 = vsyncpa [#allocation5], 1 }
 0x9d9   :  { %17556 = vsyncpa [#allocation5 + $0x1], 1 }
 0x9da   :  { %17557 = vsyncpa [#allocation7], 1 }
 0x9db   :  { %17558 = vsyncpa [#allocation10], 1 }
 0x9dc   :  { %17559 = vsyncpa [#allocation13], 1 }

</bundles_post_ra>
